<compile_context>
chip_gen: v7x
topology: tpu7x:2x2x1
jax: 0.10.0
libtpu: 0.0.40
codegen_flags: <defaults>
</compile_context>

<pallas_src>
import functools
import numpy as np

import jax
import jax.numpy as jnp
from jax.experimental import pallas as pl
from jax.experimental.pallas import tpu as pltpu


# --------------------------------------------------------------------------
# Generation-aware tile sizing
# --------------------------------------------------------------------------
def _vmem_bytes():
    try:
        return int(pltpu.get_tpu_info().vmem_capacity_bytes)
    except Exception:
        return 128 << 20                      # v5e/v6e default


def _default_tiles():
    """(max GEMM row tile, attention q tile) sized for this generation's VMEM."""
    if _vmem_bytes() <= (64 << 20):           # v7x-class (64 MiB physical)
        return 1024, 256
    return 2048, 512                          # v5e / v6e (128 MiB)


def _pick_row_tile(m, max_tile):
    """Largest row tile: full extent if it fits, else a multiple-of-8 divisor of m."""
    if m <= max_tile:
        return m
    t = (max_tile // 8) * 8
    while t >= 8:
        if m % t == 0:
            return t
        t -= 8
    return m


# --------------------------------------------------------------------------
# Pallas kernel 1: contraction-dense GEMM for the depthwise-separable convs
# --------------------------------------------------------------------------
def _gemm_kernel(x_ref, w_ref, o_ref):
    o_ref[...] = jnp.dot(x_ref[...], w_ref[...],
                         preferred_element_type=jnp.float32).astype(o_ref.dtype)


def _im2col_3x3(x_nhwc):
    """(B,H,W,C) -> (B*H*W, 9*C) bf16; tap-major (ky*3+kx), then channel."""
    B, H, W, C = x_nhwc.shape
    xp = jnp.pad(x_nhwc, ((0, 0), (1, 1), (1, 1), (0, 0)))
    cols = [xp[:, ky:ky + H, kx:kx + W, :] for ky in range(3) for kx in range(3)]
    return jnp.concatenate(cols, axis=-1).reshape(B * H * W, 9 * C).astype(jnp.bfloat16)


def _fuse_dw_pw(w_dw, w_pw, col_perm=None):
    """Fold depthwise taps into the 1x1 weights: (9,Cin),(Cin,Cout) -> (9*Cin,Cout) bf16."""
    wf = (w_dw[:, :, None] * w_pw[None, :, :]).reshape(-1, w_pw.shape[1])
    if col_perm is not None:
        wf = wf[:, col_perm]                  # head-major output channel order
    return wf.astype(jnp.bfloat16)


def dsconv_gemm(xcol, wf, out_dtype, max_row_tile):
    """depthwise_separable_conv as ONE MXU GEMM (M=B*H*W, K=9*Cin, N=Cout), row-tiled."""
    M, K = xcol.shape
    Cout = wf.shape[1]
    tm = _pick_row_tile(M, max_row_tile)
    return pl.pallas_call(
        _gemm_kernel,
        out_shape=jax.ShapeDtypeStruct((M, Cout), out_dtype),
        grid=(M // tm,),
        in_specs=[pl.BlockSpec((tm, K), lambda i: (i, 0)),
                  pl.BlockSpec((K, Cout), lambda i: (0, 0))],   # weights stay resident
        out_specs=pl.BlockSpec((tm, Cout), lambda i: (i, 0)),
        compiler_params=pltpu.CompilerParams(dimension_semantics=("parallel",)),
    )(xcol, wf)


# --------------------------------------------------------------------------
# Pallas kernel 2: attention — head-major flat layout, lane-dense output
# --------------------------------------------------------------------------
def _attn_kernel(q_ref, k_ref, v_ref, bias_ref, out_ref, *, heads, dim_head, scale):
    # q/k/v are (rows, heads*dim_head) bf16 in HEAD-MAJOR channel order (the conv
    # weight columns were pre-permuted), so each head is a static lane slice.
    q = q_ref[...]                           # (tq,  heads*dh)
    k = k_ref[...]                           # (Nkv, heads*dh)
    v = v_ref[...]
    outs = []
    for h in range(heads):
        lo = h * dim_head
        q_h = q[:, lo:lo + dim_head]
        k_h = k[:, lo:lo + dim_head]
        s = jax.lax.dot_general(q_h, k_h, (((1,), (1,)), ((), ())),
                                preferred_element_type=jnp.float32)       # (tq, Nkv)
        s = (s + bias_ref[h].astype(jnp.float32)) * scale                 # scale in-kernel
        m = jnp.max(s, axis=-1, keepdims=True)
        p = jnp.exp(s - m)
        l = jnp.sum(p, axis=-1, keepdims=True)
        a = p * pl.reciprocal(l, approx=True)                             # EUP divide
        outs.append(jnp.dot(a.astype(v.dtype), v[:, lo:lo + dim_head],
                            preferred_element_type=jnp.float32))          # (tq, dh)
    # one lane-dense (tq, heads*dim_head) store, already in the order to_out expects
    out_ref[...] = jnp.concatenate(outs, axis=-1).astype(out_ref.dtype)


def attention(q2, k2, v2, bias, *, heads, dim_head, scale, q_tile):
    """q2:(B,Nq,inner) bf16, k2/v2:(B,Nkv,inner) bf16 (all head-major channels),
    bias:(heads,Nq,Nkv) bf16. Returns (B,Nq,inner) bf16, head-major channels."""
    # TODO(synk): the (Nq,Nkv) attention matrix is never consumed by the block, so
    # it is not materialized (second return value of the PyTorch module dropped).
    B, Nq, C = q2.shape
    Nkv = k2.shape[1]
    tq = _pick_row_tile(Nq, q_tile)
    n_t = Nq // tq
    kern = functools.partial(_attn_kernel, heads=heads, dim_head=dim_head, scale=scale)

    if n_t == 1:                              # common case: one q tile -> grid (B,)
        grid = (B,)
        q_spec = pl.BlockSpec((None, Nq, C), lambda b: (b, 0, 0))
        kv_spec = pl.BlockSpec((None, Nkv, C), lambda b: (b, 0, 0))
        b_spec = pl.BlockSpec((heads, Nq, Nkv), lambda b: (0, 0, 0))
        o_spec = pl.BlockSpec((None, Nq, C), lambda b: (b, 0, 0))
        dims = ("parallel",)
    else:                                     # batch innermost -> bias block reused
        grid = (n_t, B)
        q_spec = pl.BlockSpec((None, tq, C), lambda t, b: (b, t, 0))
        kv_spec = pl.BlockSpec((None, Nkv, C), lambda t, b: (b, 0, 0))
        b_spec = pl.BlockSpec((heads, tq, Nkv), lambda t, b: (0, t, 0))
        o_spec = pl.BlockSpec((None, tq, C), lambda t, b: (b, t, 0))
        dims = ("parallel", "parallel")

    return pl.pallas_call(
        kern,
        out_shape=jax.ShapeDtypeStruct((B, Nq, C), jnp.bfloat16),
        grid=grid,
        in_specs=[q_spec, kv_spec, kv_spec, b_spec],
        out_specs=o_spec,
        compiler_params=pltpu.CompilerParams(dimension_semantics=dims),
    )(q2, k2, v2, bias)


# --------------------------------------------------------------------------
# Pallas kernel 3: fused block epilogue
#   out = to_out(attn); out += residue; y = relu(bn2(out)); y = y @ mlp; y += out
# --------------------------------------------------------------------------
def _out_block_kernel(xcol_ref, wf_ref, res_ref, scale_ref, shift_ref, mlp_ref, o_ref):
    out = jnp.dot(xcol_ref[...], wf_ref[...], preferred_element_type=jnp.float32)
    out = out + res_ref[...]                               # + residue
    y = out * scale_ref[...] + shift_ref[...]              # BN2 (inference affine)
    y = jnp.maximum(y, 0.0)                                # ReLU
    y = jnp.dot(y.astype(jnp.bfloat16), mlp_ref[...],      # 1x1 mlp, bias=False
                preferred_element_type=jnp.float32)
    o_ref[...] = (y + out).astype(o_ref.dtype)             # + residue2


def out_proj_epilogue(xcol, wf_out, residue_2d, bn2_scale, bn2_shift, mlp_w, max_row_tile):
    M, K = xcol.shape
    Cout = wf_out.shape[1]
    tm = _pick_row_tile(M, max_row_tile)
    return pl.pallas_call(
        _out_block_kernel,
        out_shape=jax.ShapeDtypeStruct((M, Cout), jnp.float32),
        grid=(M // tm,),
        in_specs=[
            pl.BlockSpec((tm, K), lambda i: (i, 0)),
            pl.BlockSpec((K, Cout), lambda i: (0, 0)),
            pl.BlockSpec((tm, Cout), lambda i: (i, 0)),
            pl.BlockSpec((1, Cout), lambda i: (0, 0)),
            pl.BlockSpec((1, Cout), lambda i: (0, 0)),
            pl.BlockSpec((Cout, Cout), lambda i: (0, 0)),
        ],
        out_specs=pl.BlockSpec((tm, Cout), lambda i: (i, 0)),
        compiler_params=pltpu.CompilerParams(dimension_semantics=("parallel",)),
    )(xcol, wf_out, residue_2d, bn2_scale, bn2_shift, mlp_w)


# --------------------------------------------------------------------------
# Plain-JAX glue (matches the PyTorch module semantics)
# --------------------------------------------------------------------------
def head_major_perm(heads, dim_head):
    # PyTorch rearrange '(dim_head heads)' means old channel c = d*heads + h.
    # We want head-major c' = h*dim_head + d -> column perm applied to the 1x1 weights.
    return np.asarray([d * heads + h for h in range(heads) for d in range(dim_head)],
                      dtype=np.int32)


def make_rel_pos_index(h, w):
    """Same buffer as RelativePositionBias.relative_position_index."""
    coords = np.stack(np.meshgrid(np.arange(h), np.arange(w), indexing="ij"))
    coords_flat = coords.reshape(2, -1)
    rel = coords_flat[:, :, None] - coords_flat[:, None, :]
    rel = rel.transpose(1, 2, 0).copy()
    rel[:, :, 0] += h - 1
    rel[:, :, 1] += w - 1
    rel[:, :, 0] *= 2 * h - 1
    return jnp.asarray(rel.sum(-1), dtype=jnp.int32)            # (h*w, h*w)


def rel_pos_bias(table, index, h, w, heads, HH, WH):
    N = h * w
    bias = table[index.reshape(-1)].reshape(h, w, N, heads)
    bias = jnp.repeat(bias, HH // h, axis=0)                    # repeat_interleave dim 0
    bias = jnp.repeat(bias, WH // w, axis=1)                    # repeat_interleave dim 1
    bias = bias.reshape(HH * WH, N, heads).transpose(2, 0, 1)   # (heads, Nq, Nkv)
    return bias.astype(jnp.bfloat16)                            # bf16: halved DMA/VMEM


def bilinear_interp_ac(x, out_hw):
    """F.interpolate(mode='bilinear', align_corners=True) on NHWC tensors."""
    B, H, W, C = x.shape
    Ho, Wo = out_hw
    if H == Ho and W == Wo:
        return x
    ys = jnp.linspace(0.0, H - 1, Ho)
    xs = jnp.linspace(0.0, W - 1, Wo)
    y0 = jnp.floor(ys).astype(jnp.int32); y1 = jnp.minimum(y0 + 1, H - 1)
    x0 = jnp.floor(xs).astype(jnp.int32); x1 = jnp.minimum(x0 + 1, W - 1)
    wy = (ys - y0)[None, :, None, None]
    wx = (xs - x0)[None, None, :, None]
    xy0, xy1 = x[:, y0], x[:, y1]
    v00, v01 = xy0[:, :, x0], xy0[:, :, x1]
    v10, v11 = xy1[:, :, x0], xy1[:, :, x1]
    return (v00 * (1 - wy) * (1 - wx) + v01 * (1 - wy) * wx
            + v10 * wy * (1 - wx) + v11 * wy * wx)


def conv1x1(x_nhwc, w, b=None):
    y = jnp.einsum('bhwc,cd->bhwd', x_nhwc, w)
    return y if b is None else y + b


def batchnorm(x_nhwc, p, eps=1e-5):
    # TODO(synk): BatchNorm2d modeled in inference mode (running stats) only.
    inv = jax.lax.rsqrt(p["var"] + eps)
    return (x_nhwc - p["mean"]) * inv * p["gamma"] + p["beta"]


# --------------------------------------------------------------------------
# LinearAttentionDecoder (up to, but excluding, to_out — that is fused downstream)
# --------------------------------------------------------------------------
def linear_attention_decoder_core(q_nhwc, x_nhwc, params, *, heads, dim_head,
                                  reduce_size, max_row_tile, q_tile):
    inner = heads * dim_head
    scale = dim_head ** (-0.5)
    B, H, W, _ = x_nhwc.shape
    _, HH, WH, _ = q_nhwc.shape

    # to_kv / to_q: im2col + one fused GEMM each, bf16 out, head-major channels.
    kv = dsconv_gemm(_im2col_3x3(x_nhwc), params["kv_wf"], jnp.bfloat16, max_row_tile)
    kv = kv.reshape(B, H, W, 2 * inner)
    k_, v_ = kv[..., :inner], kv[..., inner:]                   # chunk(2) over channels
    qf = dsconv_gemm(_im2col_3x3(q_nhwc), params["q_wf"], jnp.bfloat16, max_row_tile)
    qf = qf.reshape(B, HH * WH, inner)

    if H != reduce_size:                                        # projection == 'interp'
        k_ = bilinear_interp_ac(k_, (reduce_size, reduce_size))
        v_ = bilinear_interp_ac(v_, (reduce_size, reduce_size))
    # TODO(synk): projection == 'maxpool' branch (adaptive_max_pool2d) not implemented.

    Nkv = reduce_size * reduce_size
    k2 = k_.reshape(B, Nkv, inner).astype(jnp.bfloat16)
    v2 = v_.reshape(B, Nkv, inner).astype(jnp.bfloat16)

    index = make_rel_pos_index(reduce_size, reduce_size)
    bias = rel_pos_bias(params["rel_table"], index, reduce_size, reduce_size,
                        heads, HH, WH)

    # attn_drop / proj_drop have p=0.0 -> identity
    return attention(qf, k2, v2, bias, heads=heads, dim_head=dim_head,
                     scale=scale, q_tile=q_tile)                # (B, HH*WH, inner) bf16


# --------------------------------------------------------------------------
# BasicTransDecoderBlock forward (NCHW in / NCHW out)
# --------------------------------------------------------------------------
def basic_trans_decoder_block(x1_nchw, x2_nchw, params, *, heads, reduce_size):
    B, in_ch, H1, W1 = x1_nchw.shape
    _, out_ch, H2, W2 = x2_nchw.shape
    dim_head = out_ch // heads
    inner = heads * dim_head
    max_row_tile, q_tile = _default_tiles()

    x1 = jnp.transpose(x1_nchw, (0, 2, 3, 1))    # NCHW -> NHWC
    x2 = jnp.transpose(x2_nchw, (0, 2, 3, 1))

    # residue = interpolate(conv_ch(x1), size=x2 spatial, bilinear, align_corners=True)
    residue = bilinear_interp_ac(conv1x1(x1, params["conv_ch_w"], params["conv_ch_b"]),
                                 (H2, W2))

    x1n = batchnorm(x1, params["bn_l"])
    x2n = batchnorm(x2, params["bn_h"])

    # self.attn(x2, x1): q = x2 (hi-res, out_ch), x = x1 (in_ch)
    attn_out = linear_attention_decoder_core(
        x2n, x1n, params["attn"], heads=heads, dim_head=dim_head,
        reduce_size=reduce_size, max_row_tile=max_row_tile, q_tile=q_tile)

    # to_out projection fused with the block epilogue (one Pallas kernel).
    xcol_out = _im2col_3x3(attn_out.reshape(B, H2, W2, inner))
    res2d = residue.reshape(B * H2 * W2, out_ch).astype(jnp.float32)
    bn2 = params["bn2"]
    bn2_scale = (bn2["gamma"] * jax.lax.rsqrt(bn2["var"] + 1e-5)).reshape(1, out_ch)
    bn2_shift = (bn2["beta"] - bn2["mean"] * bn2_scale[0]).reshape(1, out_ch)
    y = out_proj_epilogue(xcol_out, params["attn"]["out_wf"], res2d,
                          bn2_scale, bn2_shift, params["mlp_w"], max_row_tile)

    y = y.reshape(B, H2, W2, out_ch)
    return jnp.transpose(y, (0, 3, 1, 2))        # NHWC -> NCHW


# --------------------------------------------------------------------------
# Parameter init (raw PyTorch-like params -> fused / permuted kernel weights)
# --------------------------------------------------------------------------
def init_params(key, in_ch, out_ch, heads, reduce_size):
    dim_head = out_ch // heads
    inner = heads * dim_head
    ks = jax.random.split(key, 12)
    dw = lambda k, c: jax.random.normal(k, (9, c), jnp.float32) * 0.02
    pw = lambda k, ci, co: jax.random.normal(k, (ci, co), jnp.float32) * 0.02
    bn = lambda c: dict(gamma=jnp.ones((c,), jnp.float32),
                        beta=jnp.zeros((c,), jnp.float32),
                        mean=jnp.zeros((c,), jnp.float32),
                        var=jnp.ones((c,), jnp.float32))

    perm = head_major_perm(heads, dim_head)              # (dim_head,heads) -> head-major
    kv_perm = np.concatenate([perm, inner + perm])       # same perm inside k and v halves

    kv_dw, kv_pw = dw(ks[0], in_ch), pw(ks[1], in_ch, inner * 2)
    q_dw, q_pw = dw(ks[2], out_ch), pw(ks[3], out_ch, inner)
    out_dw, out_pw = dw(ks[4], inner), pw(ks[5], inner, out_ch)

    attn = {
        # fused depthwise⊗pointwise GEMM weights; q/kv columns permuted to head-major,
        # to_out dw-channels/pw-rows permuted so it consumes head-major input directly.
        "kv_wf": _fuse_dw_pw(kv_dw, kv_pw, col_perm=kv_perm),
        "q_wf": _fuse_dw_pw(q_dw, q_pw, col_perm=perm),
        "out_wf": _fuse_dw_pw(out_dw[:, perm], out_pw[perm, :]),
        "rel_table": jax.random.normal(
            ks[6], ((2 * reduce_size - 1) ** 2, heads), jnp.float32) * 0.02,
    }
    return {
        "conv_ch_w": pw(ks[7], in_ch, out_ch),
        "conv_ch_b": jax.random.normal(ks[8], (out_ch,), jnp.float32) * 0.02,
        "mlp_w": pw(ks[9], out_ch, out_ch).astype(jnp.bfloat16),
        "bn_l": bn(in_ch), "bn_h": bn(out_ch), "bn2": bn(out_ch),
        "attn": attn,
    }


if __name__ == "__main__":
    B = 2
    in_ch, out_ch = 16, 32
    heads = 4                       # dim_head = out_ch // heads = 8
    reduce_size = 4
    H1 = W1 = 8                     # x1: low-res, in_ch channels
    H2 = W2 = 16                    # x2: high-res, out_ch channels

    key = jax.random.PRNGKey(0)
    k1, k2, kp = jax.random.split(key, 3)
    x1 = jax.random.normal(k1, (B, in_ch, H1, W1), jnp.float32)
    x2 = jax.random.normal(k2, (B, out_ch, H2, W2), jnp.float32)
    params = init_params(kp, in_ch, out_ch, heads, reduce_size)

    fwd = jax.jit(functools.partial(basic_trans_decoder_block,
                                    heads=heads, reduce_size=reduce_size))
    out = jax.block_until_ready(fwd(x1, x2, params))

    assert out.shape == (B, out_ch, H2, W2)
    assert bool(jnp.all(jnp.isfinite(out)))
    print("KERNEL_OK")
</pallas_src>

<mosaic_0001>
module attributes {stable_mosaic.version = 11 : i64} {
  func.func @_gemm_kernel(%arg0: i32, %arg1: memref<128x144xbf16, #tpu.memory_space<vmem>>, %arg2: memref<144x64xbf16, #tpu.memory_space<vmem>>, %arg3: memref<128x64xbf16, #tpu.memory_space<vmem>>) attributes {dimension_semantics = [#tpu.dimension_semantics<parallel>], iteration_bounds = array<i64: 1>, scalar_prefetch = 0 : i64, scratch_operands = 0 : i64, tpu.core_type = #tpu.core_type<tc>, window_params = [{transform_indices = @transform_0, window_bounds = array<i64: 128, 144>}, {pipeline_mode = #tpu.pipeline_mode<synchronous>, transform_indices = @transform_1, window_bounds = array<i64: 144, 64>}, {transform_indices = @transform_2, window_bounds = array<i64: 128, 64>}]} {
    %c0 = arith.constant 0 : index
    %c0_0 = arith.constant 0 : index
    %0 = vector.load %arg1[%c0, %c0_0] : memref<128x144xbf16, #tpu.memory_space<vmem>>, vector<128x144xbf16>
    %c0_1 = arith.constant 0 : index
    %c0_2 = arith.constant 0 : index
    %1 = vector.load %arg2[%c0_1, %c0_2] : memref<144x64xbf16, #tpu.memory_space<vmem>>, vector<144x64xbf16>
    %cst = arith.constant dense<0.000000e+00> : vector<128x64xf32>
    %2 = tpu.matmul %0, %1, %cst {dimension_numbers = #tpu.dot_dimension_numbers<[1], [0], [0], [1], [0, 0, 1, 1], [], []>} : vector<128x144xbf16>, vector<144x64xbf16>, vector<128x64xf32> -> vector<128x64xf32>
    %3 = arith.truncf %2 : vector<128x64xf32> to vector<128x64xbf16>
    %c0_3 = arith.constant 0 : index
    %c0_4 = arith.constant 0 : index
    %4 = vector.load %arg3[%c0_3, %c0_4] : memref<128x64xbf16, #tpu.memory_space<vmem>>, vector<128x64xbf16>
    tpu.vector_store %arg3[%c0_3, %c0_4], %3 {strides = array<i32>} : memref<128x64xbf16, #tpu.memory_space<vmem>>, vector<128x64xbf16>,
    return
  }
  func.func @transform_0(%arg0: i32) -> (i32, i32) {
    %c0_i32 = arith.constant 0 : i32
    %c0_i32_0 = arith.constant 0 : i32
    return %arg0, %c0_i32 : i32, i32
  }
  func.func @transform_1(%arg0: i32) -> (i32, i32) {
    %c0_i32 = arith.constant 0 : i32
    %c0_i32_0 = arith.constant 0 : i32
    %c0_i32_1 = arith.constant 0 : i32
    return %c0_i32, %c0_i32_0 : i32, i32
  }
  func.func @transform_2(%arg0: i32) -> (i32, i32) {
    %c0_i32 = arith.constant 0 : i32
    %c0_i32_0 = arith.constant 0 : i32
    return %arg0, %c0_i32 : i32, i32
  }
}

module attributes {stable_mosaic.version = 11 : i64} {
  func.func @_gemm_kernel(%arg0: i32, %arg1: memref<512x288xbf16, #tpu.memory_space<vmem>>, %arg2: memref<288x32xbf16, #tpu.memory_space<vmem>>, %arg3: memref<512x32xbf16, #tpu.memory_space<vmem>>) attributes {dimension_semantics = [#tpu.dimension_semantics<parallel>], iteration_bounds = array<i64: 1>, scalar_prefetch = 0 : i64, scratch_operands = 0 : i64, tpu.core_type = #tpu.core_type<tc>, window_params = [{transform_indices = @transform_0, window_bounds = array<i64: 512, 288>}, {pipeline_mode = #tpu.pipeline_mode<synchronous>, transform_indices = @transform_1, window_bounds = array<i64: 288, 32>}, {transform_indices = @transform_2, window_bounds = array<i64: 512, 32>}]} {
    %c0 = arith.constant 0 : index
    %c0_0 = arith.constant 0 : index
    %0 = vector.load %arg1[%c0, %c0_0] : memref<512x288xbf16, #tpu.memory_space<vmem>>, vector<512x288xbf16>
    %c0_1 = arith.constant 0 : index
    %c0_2 = arith.constant 0 : index
    %1 = vector.load %arg2[%c0_1, %c0_2] : memref<288x32xbf16, #tpu.memory_space<vmem>>, vector<288x32xbf16>
    %cst = arith.constant dense<0.000000e+00> : vector<512x32xf32>
    %2 = tpu.matmul %0, %1, %cst {dimension_numbers = #tpu.dot_dimension_numbers<[1], [0], [0], [1], [0, 0, 1, 1], [], []>} : vector<512x288xbf16>, vector<288x32xbf16>, vector<512x32xf32> -> vector<512x32xf32>
    %3 = arith.truncf %2 : vector<512x32xf32> to vector<512x32xbf16>
    %c0_3 = arith.constant 0 : index
    %c0_4 = arith.constant 0 : index
    %4 = vector.load %arg3[%c0_3, %c0_4] : memref<512x32xbf16, #tpu.memory_space<vmem>>, vector<512x32xbf16>
    tpu.vector_store %arg3[%c0_3, %c0_4], %3 {strides = array<i32>} : memref<512x32xbf16, #tpu.memory_space<vmem>>, vector<512x32xbf16>,
    return
  }
  func.func @transform_0(%arg0: i32) -> (i32, i32) {
    %c0_i32 = arith.constant 0 : i32
    %c0_i32_0 = arith.constant 0 : i32
    return %arg0, %c0_i32 : i32, i32
  }
  func.func @transform_1(%arg0: i32) -> (i32, i32) {
    %c0_i32 = arith.constant 0 : i32
    %c0_i32_0 = arith.constant 0 : i32
    %c0_i32_1 = arith.constant 0 : i32
    return %c0_i32, %c0_i32_0 : i32, i32
  }
  func.func @transform_2(%arg0: i32) -> (i32, i32) {
    %c0_i32 = arith.constant 0 : i32
    %c0_i32_0 = arith.constant 0 : i32
    return %arg0, %c0_i32 : i32, i32
  }
}

module attributes {stable_mosaic.version = 11 : i64} {
  func.func @_attn_kernel(%arg0: i32, %arg1: memref<1x256x32xbf16, #tpu.memory_space<vmem>>, %arg2: memref<1x16x32xbf16, #tpu.memory_space<vmem>>, %arg3: memref<1x16x32xbf16, #tpu.memory_space<vmem>>, %arg4: memref<4x256x16xbf16, #tpu.memory_space<vmem>>, %arg5: memref<1x256x32xbf16, #tpu.memory_space<vmem>>) attributes {dimension_semantics = [#tpu.dimension_semantics<parallel>], iteration_bounds = array<i64: 2>, scalar_prefetch = 0 : i64, scratch_operands = 0 : i64, tpu.core_type = #tpu.core_type<tc>, window_params = [{transform_indices = @transform_0, window_bounds = array<i64: 1, 256, 32>}, {transform_indices = @transform_1, window_bounds = array<i64: 1, 16, 32>}, {transform_indices = @transform_2, window_bounds = array<i64: 1, 16, 32>}, {pipeline_mode = #tpu.pipeline_mode<synchronous>, transform_indices = @transform_3, window_bounds = array<i64: 4, 256, 16>}, {transform_indices = @transform_4, window_bounds = array<i64: 1, 256, 32>}]} {
    %c0 = arith.constant 0 : index
    %c0_0 = arith.constant 0 : index
    %c0_1 = arith.constant 0 : index
    %0 = vector.load %arg1[%c0, %c0_0, %c0_1] : memref<1x256x32xbf16, #tpu.memory_space<vmem>>, vector<1x256x32xbf16>
    %1 = vector.shape_cast %0 : vector<1x256x32xbf16> to vector<256x32xbf16>
    %c0_2 = arith.constant 0 : index
    %c0_3 = arith.constant 0 : index
    %c0_4 = arith.constant 0 : index
    %2 = vector.load %arg2[%c0_2, %c0_3, %c0_4] : memref<1x16x32xbf16, #tpu.memory_space<vmem>>, vector<1x16x32xbf16>
    %3 = vector.shape_cast %2 : vector<1x16x32xbf16> to vector<16x32xbf16>
    %c0_5 = arith.constant 0 : index
    %c0_6 = arith.constant 0 : index
    %c0_7 = arith.constant 0 : index
    %4 = vector.load %arg3[%c0_5, %c0_6, %c0_7] : memref<1x16x32xbf16, #tpu.memory_space<vmem>>, vector<1x16x32xbf16>
    %5 = vector.shape_cast %4 : vector<1x16x32xbf16> to vector<16x32xbf16>
    %6 = vector.extract_strided_slice %1 {offsets = [0, 0], sizes = [256, 8], strides = [1, 1]} : vector<256x32xbf16> to vector<256x8xbf16>
    %7 = vector.extract_strided_slice %3 {offsets = [0, 0], sizes = [16, 8], strides = [1, 1]} : vector<16x32xbf16> to vector<16x8xbf16>
    %cst = arith.constant dense<0.000000e+00> : vector<256x16xf32>
    %8 = tpu.matmul %6, %7, %cst {dimension_numbers = #tpu.dot_dimension_numbers<[1], [1], [0], [0], [0, 0, 1, 0], [], []>} : vector<256x8xbf16>, vector<16x8xbf16>, vector<256x16xf32> -> vector<256x16xf32>
    %c0_8 = arith.constant 0 : index
    %c0_9 = arith.constant 0 : index
    %c0_10 = arith.constant 0 : index
    %9 = vector.load %arg4[%c0_8, %c0_9, %c0_10] : memref<4x256x16xbf16, #tpu.memory_space<vmem>>, vector<1x256x16xbf16>
    %10 = vector.shape_cast %9 : vector<1x256x16xbf16> to vector<256x16xbf16>
    %11 = arith.extf %10 : vector<256x16xbf16> to vector<256x16xf32>
    %12 = arith.addf %8, %11 : vector<256x16xf32>
    %cst_11 = arith.constant 0.353553385 : f32
    %13 = vector.broadcast %cst_11 : f32 to vector<256x16xf32>
    %14 = arith.mulf %12, %13 : vector<256x16xf32>
    %cst_12 = arith.constant dense<0xFF800000> : vector<256xf32>
    %15 = vector.multi_reduction <maximumf>, %14, %cst_12 [1] : vector<256x16xf32> to vector<256xf32>
    %16 = vector.shape_cast %15 : vector<256xf32> to vector<256x1xf32>
    %17 = vector.broadcast %16 : vector<256x1xf32> to vector<256x16xf32>
    %18 = arith.subf %14, %17 : vector<256x16xf32>
    %19 = math.exp %18 : vector<256x16xf32>
    %cst_13 = arith.constant dense<0.000000e+00> : vector<256xf32>
    %20 = vector.multi_reduction <add>, %19, %cst_13 [1] : vector<256x16xf32> to vector<256xf32>
    %21 = vector.shape_cast %20 : vector<256xf32> to vector<256x1xf32>
    %22 = tpu.reciprocal %21 {approx = true} : vector<256x1xf32> -> vector<256x1xf32>
    %23 = vector.broadcast %22 : vector<256x1xf32> to vector<256x16xf32>
    %24 = arith.mulf %19, %23 : vector<256x16xf32>
    %25 = arith.truncf %24 : vector<256x16xf32> to vector<256x16xbf16>
    %26 = vector.extract_strided_slice %5 {offsets = [0, 0], sizes = [16, 8], strides = [1, 1]} : vector<16x32xbf16> to vector<16x8xbf16>
    %cst_14 = arith.constant dense<0.000000e+00> : vector<256x8xf32>
    %27 = tpu.matmul %25, %26, %cst_14 {dimension_numbers = #tpu.dot_dimension_numbers<[1], [0], [0], [1], [0, 0, 1, 1], [], []>} : vector<256x16xbf16>, vector<16x8xbf16>, vector<256x8xf32> -> vector<256x8xf32>
    %28 = vector.extract_strided_slice %1 {offsets = [0, 8], sizes = [256, 8], strides = [1, 1]} : vector<256x32xbf16> to vector<256x8xbf16>
    %29 = vector.extract_strided_slice %3 {offsets = [0, 8], sizes = [16, 8], strides = [1, 1]} : vector<16x32xbf16> to vector<16x8xbf16>
    %cst_15 = arith.constant dense<0.000000e+00> : vector<256x16xf32>
    %30 = tpu.matmul %28, %29, %cst_15 {dimension_numbers = #tpu.dot_dimension_numbers<[1], [1], [0], [0], [0, 0, 1, 0], [], []>} : vector<256x8xbf16>, vector<16x8xbf16>, vector<256x16xf32> -> vector<256x16xf32>
    %c1 = arith.constant 1 : index
    %c0_16 = arith.constant 0 : index
    %c0_17 = arith.constant 0 : index
    %31 = vector.load %arg4[%c1, %c0_16, %c0_17] : memref<4x256x16xbf16, #tpu.memory_space<vmem>>, vector<1x256x16xbf16>
    %32 = vector.shape_cast %31 : vector<1x256x16xbf16> to vector<256x16xbf16>
    %33 = arith.extf %32 : vector<256x16xbf16> to vector<256x16xf32>
    %34 = arith.addf %30, %33 : vector<256x16xf32>
    %cst_18 = arith.constant 0.353553385 : f32
    %35 = vector.broadcast %cst_18 : f32 to vector<256x16xf32>
    %36 = arith.mulf %34, %35 : vector<256x16xf32>
    %cst_19 = arith.constant dense<0xFF800000> : vector<256xf32>
    %37 = vector.multi_reduction <maximumf>, %36, %cst_19 [1] : vector<256x16xf32> to vector<256xf32>
    %38 = vector.shape_cast %37 : vector<256xf32> to vector<256x1xf32>
    %39 = vector.broadcast %38 : vector<256x1xf32> to vector<256x16xf32>
    %40 = arith.subf %36, %39 : vector<256x16xf32>
    %41 = math.exp %40 : vector<256x16xf32>
    %cst_20 = arith.constant dense<0.000000e+00> : vector<256xf32>
    %42 = vector.multi_reduction <add>, %41, %cst_20 [1] : vector<256x16xf32> to vector<256xf32>
    %43 = vector.shape_cast %42 : vector<256xf32> to vector<256x1xf32>
    %44 = tpu.reciprocal %43 {approx = true} : vector<256x1xf32> -> vector<256x1xf32>
    %45 = vector.broadcast %44 : vector<256x1xf32> to vector<256x16xf32>
    %46 = arith.mulf %41, %45 : vector<256x16xf32>
    %47 = arith.truncf %46 : vector<256x16xf32> to vector<256x16xbf16>
    %48 = vector.extract_strided_slice %5 {offsets = [0, 8], sizes = [16, 8], strides = [1, 1]} : vector<16x32xbf16> to vector<16x8xbf16>
    %cst_21 = arith.constant dense<0.000000e+00> : vector<256x8xf32>
    %49 = tpu.matmul %47, %48, %cst_21 {dimension_numbers = #tpu.dot_dimension_numbers<[1], [0], [0], [1], [0, 0, 1, 1], [], []>} : vector<256x16xbf16>, vector<16x8xbf16>, vector<256x8xf32> -> vector<256x8xf32>
    %50 = vector.extract_strided_slice %1 {offsets = [0, 16], sizes = [256, 8], strides = [1, 1]} : vector<256x32xbf16> to vector<256x8xbf16>
    %51 = vector.extract_strided_slice %3 {offsets = [0, 16], sizes = [16, 8], strides = [1, 1]} : vector<16x32xbf16> to vector<16x8xbf16>
    %cst_22 = arith.constant dense<0.000000e+00> : vector<256x16xf32>
    %52 = tpu.matmul %50, %51, %cst_22 {dimension_numbers = #tpu.dot_dimension_numbers<[1], [1], [0], [0], [0, 0, 1, 0], [], []>} : vector<256x8xbf16>, vector<16x8xbf16>, vector<256x16xf32> -> vector<256x16xf32>
    %c2 = arith.constant 2 : index
    %c0_23 = arith.constant 0 : index
    %c0_24 = arith.constant 0 : index
    %53 = vector.load %arg4[%c2, %c0_23, %c0_24] : memref<4x256x16xbf16, #tpu.memory_space<vmem>>, vector<1x256x16xbf16>
    %54 = vector.shape_cast %53 : vector<1x256x16xbf16> to vector<256x16xbf16>
    %55 = arith.extf %54 : vector<256x16xbf16> to vector<256x16xf32>
    %56 = arith.addf %52, %55 : vector<256x16xf32>
    %cst_25 = arith.constant 0.353553385 : f32
    %57 = vector.broadcast %cst_25 : f32 to vector<256x16xf32>
    %58 = arith.mulf %56, %57 : vector<256x16xf32>
    %cst_26 = arith.constant dense<0xFF800000> : vector<256xf32>
    %59 = vector.multi_reduction <maximumf>, %58, %cst_26 [1] : vector<256x16xf32> to vector<256xf32>
    %60 = vector.shape_cast %59 : vector<256xf32> to vector<256x1xf32>
    %61 = vector.broadcast %60 : vector<256x1xf32> to vector<256x16xf32>
    %62 = arith.subf %58, %61 : vector<256x16xf32>
    %63 = math.exp %62 : vector<256x16xf32>
    %cst_27 = arith.constant dense<0.000000e+00> : vector<256xf32>
    %64 = vector.multi_reduction <add>, %63, %cst_27 [1] : vector<256x16xf32> to vector<256xf32>
    %65 = vector.shape_cast %64 : vector<256xf32> to vector<256x1xf32>
    %66 = tpu.reciprocal %65 {approx = true} : vector<256x1xf32> -> vector<256x1xf32>
    %67 = vector.broadcast %66 : vector<256x1xf32> to vector<256x16xf32>
    %68 = arith.mulf %63, %67 : vector<256x16xf32>
    %69 = arith.truncf %68 : vector<256x16xf32> to vector<256x16xbf16>
    %70 = vector.extract_strided_slice %5 {offsets = [0, 16], sizes = [16, 8], strides = [1, 1]} : vector<16x32xbf16> to vector<16x8xbf16>
    %cst_28 = arith.constant dense<0.000000e+00> : vector<256x8xf32>
    %71 = tpu.matmul %69, %70, %cst_28 {dimension_numbers = #tpu.dot_dimension_numbers<[1], [0], [0], [1], [0, 0, 1, 1], [], []>} : vector<256x16xbf16>, vector<16x8xbf16>, vector<256x8xf32> -> vector<256x8xf32>
    %72 = vector.extract_strided_slice %1 {offsets = [0, 24], sizes = [256, 8], strides = [1, 1]} : vector<256x32xbf16> to vector<256x8xbf16>
    %73 = vector.extract_strided_slice %3 {offsets = [0, 24], sizes = [16, 8], strides = [1, 1]} : vector<16x32xbf16> to vector<16x8xbf16>
    %cst_29 = arith.constant dense<0.000000e+00> : vector<256x16xf32>
    %74 = tpu.matmul %72, %73, %cst_29 {dimension_numbers = #tpu.dot_dimension_numbers<[1], [1], [0], [0], [0, 0, 1, 0], [], []>} : vector<256x8xbf16>, vector<16x8xbf16>, vector<256x16xf32> -> vector<256x16xf32>
    %c3 = arith.constant 3 : index
    %c0_30 = arith.constant 0 : index
    %c0_31 = arith.constant 0 : index
    %75 = vector.load %arg4[%c3, %c0_30, %c0_31] : memref<4x256x16xbf16, #tpu.memory_space<vmem>>, vector<1x256x16xbf16>
    %76 = vector.shape_cast %75 : vector<1x256x16xbf16> to vector<256x16xbf16>
    %77 = arith.extf %76 : vector<256x16xbf16> to vector<256x16xf32>
    %78 = arith.addf %74, %77 : vector<256x16xf32>
    %cst_32 = arith.constant 0.353553385 : f32
    %79 = vector.broadcast %cst_32 : f32 to vector<256x16xf32>
    %80 = arith.mulf %78, %79 : vector<256x16xf32>
    %cst_33 = arith.constant dense<0xFF800000> : vector<256xf32>
    %81 = vector.multi_reduction <maximumf>, %80, %cst_33 [1] : vector<256x16xf32> to vector<256xf32>
    %82 = vector.shape_cast %81 : vector<256xf32> to vector<256x1xf32>
    %83 = vector.broadcast %82 : vector<256x1xf32> to vector<256x16xf32>
    %84 = arith.subf %80, %83 : vector<256x16xf32>
    %85 = math.exp %84 : vector<256x16xf32>
    %cst_34 = arith.constant dense<0.000000e+00> : vector<256xf32>
    %86 = vector.multi_reduction <add>, %85, %cst_34 [1] : vector<256x16xf32> to vector<256xf32>
    %87 = vector.shape_cast %86 : vector<256xf32> to vector<256x1xf32>
    %88 = tpu.reciprocal %87 {approx = true} : vector<256x1xf32> -> vector<256x1xf32>
    %89 = vector.broadcast %88 : vector<256x1xf32> to vector<256x16xf32>
    %90 = arith.mulf %85, %89 : vector<256x16xf32>
    %91 = arith.truncf %90 : vector<256x16xf32> to vector<256x16xbf16>
    %92 = vector.extract_strided_slice %5 {offsets = [0, 24], sizes = [16, 8], strides = [1, 1]} : vector<16x32xbf16> to vector<16x8xbf16>
    %cst_35 = arith.constant dense<0.000000e+00> : vector<256x8xf32>
    %93 = tpu.matmul %91, %92, %cst_35 {dimension_numbers = #tpu.dot_dimension_numbers<[1], [0], [0], [1], [0, 0, 1, 1], [], []>} : vector<256x16xbf16>, vector<16x8xbf16>, vector<256x8xf32> -> vector<256x8xf32>
    %94 = tpu.concatenate %27, %49, %71, %93 in 1 : vector<256x8xf32>, vector<256x8xf32>, vector<256x8xf32>, vector<256x8xf32> -> vector<256x32xf32>
    %95 = arith.truncf %94 : vector<256x32xf32> to vector<256x32xbf16>
    %c0_36 = arith.constant 0 : index
    %c0_37 = arith.constant 0 : index
    %c0_38 = arith.constant 0 : index
    %96 = vector.load %arg5[%c0_36, %c0_37, %c0_38] : memref<1x256x32xbf16, #tpu.memory_space<vmem>>, vector<1x256x32xbf16>
    %97 = vector.shape_cast %96 : vector<1x256x32xbf16> to vector<256x32xbf16>
    %98 = vector.shape_cast %95 : vector<256x32xbf16> to vector<1x256x32xbf16>
    tpu.vector_store %arg5[%c0_36, %c0_37, %c0_38], %98 {strides = array<i32>} : memref<1x256x32xbf16, #tpu.memory_space<vmem>>, vector<1x256x32xbf16>,
    return
  }
  func.func @transform_0(%arg0: i32) -> (i32, i32, i32) {
    %c0_i32 = arith.constant 0 : i32
    %c0_i32_0 = arith.constant 0 : i32
    %c0_i32_1 = arith.constant 0 : i32
    return %arg0, %c0_i32, %c0_i32_0 : i32, i32, i32
  }
  func.func @transform_1(%arg0: i32) -> (i32, i32, i32) {
    %c0_i32 = arith.constant 0 : i32
    %c0_i32_0 = arith.constant 0 : i32
    %c0_i32_1 = arith.constant 0 : i32
    return %arg0, %c0_i32, %c0_i32_0 : i32, i32, i32
  }
  func.func @transform_2(%arg0: i32) -> (i32, i32, i32) {
    %c0_i32 = arith.constant 0 : i32
    %c0_i32_0 = arith.constant 0 : i32
    %c0_i32_1 = arith.constant 0 : i32
    return %arg0, %c0_i32, %c0_i32_0 : i32, i32, i32
  }
  func.func @transform_3(%arg0: i32) -> (i32, i32, i32) {
    %c0_i32 = arith.constant 0 : i32
    %c0_i32_0 = arith.constant 0 : i32
    %c0_i32_1 = arith.constant 0 : i32
    %c0_i32_2 = arith.constant 0 : i32
    return %c0_i32, %c0_i32_0, %c0_i32_1 : i32, i32, i32
  }
  func.func @transform_4(%arg0: i32) -> (i32, i32, i32) {
    %c0_i32 = arith.constant 0 : i32
    %c0_i32_0 = arith.constant 0 : i32
    %c0_i32_1 = arith.constant 0 : i32
    return %arg0, %c0_i32, %c0_i32_0 : i32, i32, i32
  }
}

module attributes {stable_mosaic.version = 11 : i64} {
  func.func @_out_block_kernel(%arg0: i32, %arg1: memref<512x288xbf16, #tpu.memory_space<vmem>>, %arg2: memref<288x32xbf16, #tpu.memory_space<vmem>>, %arg3: memref<512x32xf32, #tpu.memory_space<vmem>>, %arg4: memref<1x32xf32, #tpu.memory_space<vmem>>, %arg5: memref<1x32xf32, #tpu.memory_space<vmem>>, %arg6: memref<32x32xbf16, #tpu.memory_space<vmem>>, %arg7: memref<512x32xf32, #tpu.memory_space<vmem>>) attributes {dimension_semantics = [#tpu.dimension_semantics<parallel>], iteration_bounds = array<i64: 1>, scalar_prefetch = 0 : i64, scratch_operands = 0 : i64, tpu.core_type = #tpu.core_type<tc>, window_params = [{transform_indices = @transform_0, window_bounds = array<i64: 512, 288>}, {pipeline_mode = #tpu.pipeline_mode<synchronous>, transform_indices = @transform_1, window_bounds = array<i64: 288, 32>}, {transform_indices = @transform_2, window_bounds = array<i64: 512, 32>}, {pipeline_mode = #tpu.pipeline_mode<synchronous>, transform_indices = @transform_3, window_bounds = array<i64: 1, 32>}, {pipeline_mode = #tpu.pipeline_mode<synchronous>, transform_indices = @transform_4, window_bounds = array<i64: 1, 32>}, {pipeline_mode = #tpu.pipeline_mode<synchronous>, transform_indices = @transform_5, window_bounds = array<i64: 32, 32>}, {transform_indices = @transform_6, window_bounds = array<i64: 512, 32>}]} {
    %c0 = arith.constant 0 : index
    %c0_0 = arith.constant 0 : index
    %0 = vector.load %arg1[%c0, %c0_0] : memref<512x288xbf16, #tpu.memory_space<vmem>>, vector<512x288xbf16>
    %c0_1 = arith.constant 0 : index
    %c0_2 = arith.constant 0 : index
    %1 = vector.load %arg2[%c0_1, %c0_2] : memref<288x32xbf16, #tpu.memory_space<vmem>>, vector<288x32xbf16>
    %cst = arith.constant dense<0.000000e+00> : vector<512x32xf32>
    %2 = tpu.matmul %0, %1, %cst {dimension_numbers = #tpu.dot_dimension_numbers<[1], [0], [0], [1], [0, 0, 1, 1], [], []>} : vector<512x288xbf16>, vector<288x32xbf16>, vector<512x32xf32> -> vector<512x32xf32>
    %c0_3 = arith.constant 0 : index
    %c0_4 = arith.constant 0 : index
    %3 = vector.load %arg3[%c0_3, %c0_4] : memref<512x32xf32, #tpu.memory_space<vmem>>, vector<512x32xf32>
    %4 = arith.addf %2, %3 : vector<512x32xf32>
    %c0_5 = arith.constant 0 : index
    %c0_6 = arith.constant 0 : index
    %5 = vector.load %arg4[%c0_5, %c0_6] : memref<1x32xf32, #tpu.memory_space<vmem>>, vector<1x32xf32>
    %6 = vector.broadcast %5 : vector<1x32xf32> to vector<512x32xf32>
    %7 = arith.mulf %4, %6 : vector<512x32xf32>
    %c0_7 = arith.constant 0 : index
    %c0_8 = arith.constant 0 : index
    %8 = vector.load %arg5[%c0_7, %c0_8] : memref<1x32xf32, #tpu.memory_space<vmem>>, vector<1x32xf32>
    %9 = vector.broadcast %8 : vector<1x32xf32> to vector<512x32xf32>
    %10 = arith.addf %7, %9 : vector<512x32xf32>
    %cst_9 = arith.constant 0.000000e+00 : f32
    %11 = vector.broadcast %cst_9 : f32 to vector<512x32xf32>
    %12 = arith.maximumf %10, %11 : vector<512x32xf32>
    %13 = arith.truncf %12 : vector<512x32xf32> to vector<512x32xbf16>
    %c0_10 = arith.constant 0 : index
    %c0_11 = arith.constant 0 : index
    %14 = vector.load %arg6[%c0_10, %c0_11] : memref<32x32xbf16, #tpu.memory_space<vmem>>, vector<32x32xbf16>
    %cst_12 = arith.constant dense<0.000000e+00> : vector<512x32xf32>
    %15 = tpu.matmul %13, %14, %cst_12 {dimension_numbers = #tpu.dot_dimension_numbers<[1], [0], [0], [1], [0, 0, 1, 1], [], []>} : vector<512x32xbf16>, vector<32x32xbf16>, vector<512x32xf32> -> vector<512x32xf32>
    %16 = arith.addf %15, %4 : vector<512x32xf32>
    %c0_13 = arith.constant 0 : index
    %c0_14 = arith.constant 0 : index
    %17 = vector.load %arg7[%c0_13, %c0_14] : memref<512x32xf32, #tpu.memory_space<vmem>>, vector<512x32xf32>
    tpu.vector_store %arg7[%c0_13, %c0_14], %16 {strides = array<i32>} : memref<512x32xf32, #tpu.memory_space<vmem>>, vector<512x32xf32>,
    return
  }
  func.func @transform_0(%arg0: i32) -> (i32, i32) {
    %c0_i32 = arith.constant 0 : i32
    %c0_i32_0 = arith.constant 0 : i32
    return %arg0, %c0_i32 : i32, i32
  }
  func.func @transform_1(%arg0: i32) -> (i32, i32) {
    %c0_i32 = arith.constant 0 : i32
    %c0_i32_0 = arith.constant 0 : i32
    %c0_i32_1 = arith.constant 0 : i32
    return %c0_i32, %c0_i32_0 : i32, i32
  }
  func.func @transform_2(%arg0: i32) -> (i32, i32) {
    %c0_i32 = arith.constant 0 : i32
    %c0_i32_0 = arith.constant 0 : i32
    return %arg0, %c0_i32 : i32, i32
  }
  func.func @transform_3(%arg0: i32) -> (i32, i32) {
    %c0_i32 = arith.constant 0 : i32
    %c0_i32_0 = arith.constant 0 : i32
    %c0_i32_1 = arith.constant 0 : i32
    return %c0_i32, %c0_i32_0 : i32, i32
  }
  func.func @transform_4(%arg0: i32) -> (i32, i32) {
    %c0_i32 = arith.constant 0 : i32
    %c0_i32_0 = arith.constant 0 : i32
    %c0_i32_1 = arith.constant 0 : i32
    return %c0_i32, %c0_i32_0 : i32, i32
  }
  func.func @transform_5(%arg0: i32) -> (i32, i32) {
    %c0_i32 = arith.constant 0 : i32
    %c0_i32_0 = arith.constant 0 : i32
    %c0_i32_1 = arith.constant 0 : i32
    return %c0_i32, %c0_i32_0 : i32, i32
  }
  func.func @transform_6(%arg0: i32) -> (i32, i32) {
    %c0_i32 = arith.constant 0 : i32
    %c0_i32_0 = arith.constant 0 : i32
    return %arg0, %c0_i32 : i32, i32
  }
}

</mosaic_0001>

<bundles_post_ra>
// kernel: basic_trans_decoder_block.4
= control target key start
LH: loop header
LB: loop body
LE: loop exit
PB: predicated region body
PF: predicated region fallthrough
CT: control target
= control target key end

     0   :  { %v496_v0 = vmov 0   ;;  %vm172_vm0 = vcmask 130048   ;;  %vm358_vm1 = vcmask 519168   ;;  %s659_s1 = inlined_call_operand.vmem [shape: bf16[144,64], index: 1, kind: input, shape index: {}]   ;;  %s660_s0 = inlined_call_operand.vmem [shape: bf16[128,144], index: 0, kind: input, shape index: {}]   ;;  %s661_s2 = inlined_call_operand.vmem [shape: bf16[128,64], index: 2, kind: output, shape index: {}]  }
   0x1   :  { %197 = vmatprep.subr.bf16.mxu0 %v496_v0  ;;  %444 = vmatprep.subr.bf16.mxu1 %v496_v0  ;;  %v463_v1 = vld [vmem:[%s659_s1] sm:$0xff]   ;;  %v464_v2 = vld [vmem:[%s659_s1 + $0x8] sm:$0xff]   ;;  %v465_v3 = vld [vmem:[%s659_s1 + $0x10] sm:$0xff]  }
   0x2   :  { %198 = vmatpush1.bf16.msra.mxu0 %v463_v1  ;;  %453 = vmatpush1.bf16.msra.mxu1 %v463_v1  ;;  %v466_v4 = vld [vmem:[%s659_s1 + $0x18] sm:$0xff]   ;;  %v474_v5 = vld [vmem:[%s660_s0 + $0x4] ss:$8 sps:$4 sm:$0xff]   ;;  %v469_v9 = vld [vmem:[%s659_s1 + $0x30] sm:$0xff]  }
   0x3   :  { %199 = vmatprep.subr.bf16.mxu0 %v496_v0  ;;  %445 = vmatprep.subr.bf16.mxu1 %v496_v0  ;;  %v477_v6 = vld [vmem:[%s660_s0 + $0x44] ss:$8 sps:$4 sm:$0xff]   ;;  %v470_v10 = vld [vmem:[%s659_s1 + $0x38] sm:$0xff]   ;;  %v472_v12 = vld [vmem:[%s660_s0] ss:$8 sps:$4 sm:$0xff]  }
   0x4   :  { %404 = vmatprep.mubr.msk.bf16.mxu0 %vm172_vm0, %v474_v5  ;;  %408 = vmatprep.mubr.msk.bf16.mxu1 %vm172_vm0, %v477_v6  ;;  %v467_v7 = vld [vmem:[%s659_s1 + $0x20] sm:$0xff]   ;;  %v468_v8 = vld [vmem:[%s659_s1 + $0x28] sm:$0xff]   ;;  %v478_v14 = vld [vmem:[%s660_s0 + $0x14] ss:$8 sps:$4 sm:$0xff]  }
   0x5   :  { %v471_v11 = vld [vmem:[%s659_s1 + $0x40] sm:$0xff]   ;;  %v480_v15 = vld [vmem:[%s660_s0 + $0x54] ss:$8 sps:$4 sm:$0xff]   ;;  %v482_v16 = vld [vmem:[%s660_s0 + $0x10] ss:$8 sps:$4 sm:$0xff]  }
   0x6   :  { %200 = vmatpush1.bf16.msra.mxu0 %v464_v2  ;;  %454 = vmatpush1.bf16.msra.mxu1 %v464_v2  ;;  %v475_v13 = vld [vmem:[%s660_s0 + $0x40] ss:$8 sps:$4 sm:$0xff]   ;;  %v483_v17 = vld [vmem:[%s660_s0 + $0x50] ss:$8 sps:$4 sm:$0xff]   ;;  %v484_v18 = vld [vmem:[%s660_s0 + $0x24] ss:$8 sps:$4 sm:$0xff]  }
   0x7   :  { %201 = vmatprep.subr.bf16.mxu0 %v496_v0  ;;  %446 = vmatprep.subr.bf16.mxu1 %v496_v0  ;;  %v486_v19 = vld [vmem:[%s660_s0 + $0x64] ss:$8 sps:$4 sm:$0xff]   ;;  %v488_v20 = vld [vmem:[%s660_s0 + $0x20] ss:$8 sps:$4 sm:$0xff]   ;;  %v490_v22 = vld [vmem:[%s660_s0 + $0x34] ss:$8 sps:$4 sm:$0xff]  }
   0x8   :  { %v489_v21 = vld [vmem:[%s660_s0 + $0x60] ss:$8 sps:$4 sm:$0xff]   ;;  %v492_v23 = vld [vmem:[%s660_s0 + $0x74] ss:$8 sps:$4 sm:$0xff]   ;;  %v494_v24 = vld [vmem:[%s660_s0 + $0x30] ss:$8 sps:$4 sm:$0xff]  }
   0x9   :  { %v495_v25 = vld [vmem:[%s660_s0 + $0x70] ss:$8 sps:$4 sm:$0xff]  }
   0xa   :  { %202 = vmatpush1.bf16.msra.mxu0 %v465_v3  ;;  %455 = vmatpush1.bf16.msra.mxu1 %v465_v3 }
   0xb   :  { %203 = vmatprep.subr.bf16.mxu0 %v496_v0  ;;  %447 = vmatprep.subr.bf16.mxu1 %v496_v0 }
   0xe   :  { %204 = vmatpush1.bf16.msra.mxu0 %v466_v4  ;;  %456 = vmatpush1.bf16.msra.mxu1 %v466_v4 }
   0xf   :  { %205 = vmatprep.subr.bf16.mxu0 %v496_v0  ;;  %448 = vmatprep.subr.bf16.mxu1 %v496_v0 }
  0x12   :  { %206 = vmatpush1.bf16.msra.mxu0 %v467_v7  ;;  %457 = vmatpush1.bf16.msra.mxu1 %v467_v7 }
  0x13   :  { %207 = vmatprep.subr.bf16.mxu0 %v496_v0  ;;  %449 = vmatprep.subr.bf16.mxu1 %v496_v0 }
  0x16   :  { %208 = vmatpush1.bf16.msra.mxu0 %v468_v8  ;;  %458 = vmatpush1.bf16.msra.mxu1 %v468_v8 }
  0x17   :  { %209 = vmatprep.subr.bf16.mxu0 %v496_v0  ;;  %450 = vmatprep.subr.bf16.mxu1 %v496_v0 }
  0x1a   :  { %210 = vmatpush1.bf16.msra.mxu0 %v469_v9  ;;  %459 = vmatpush1.bf16.msra.mxu1 %v469_v9 }
  0x1b   :  { %211 = vmatprep.subr.bf16.mxu0 %v496_v0  ;;  %451 = vmatprep.subr.bf16.mxu1 %v496_v0 }
  0x1e   :  { %212 = vmatpush1.bf16.msra.mxu0 %v470_v10  ;;  %460 = vmatpush1.bf16.msra.mxu1 %v470_v10 }
  0x1f   :  { %213 = vmatprep.subr.bf16.mxu0 %v496_v0  ;;  %452 = vmatprep.subr.bf16.mxu1 %v496_v0 }
  0x22   :  { %214 = vmatpush1.bf16.msra.mxu0 %v471_v11  ;;  %461 = vmatpush1.bf16.msra.mxu1 %v471_v11 }
  0x25   :  { %230 = vmatmul.mubr.bf16.vlgmr.msra.gmra.mrb[0].mxu0 %v472_v12  ;;  %262 = vmatmul.mubr.bf16.vlgmr.msra.gmra.mrb[0].mxu1 %v475_v13 }
  0x26   :  { %405 = vmatprep.mubr.msk.bf16.mxu0 %vm172_vm0, %v478_v14  ;;  %409 = vmatprep.mubr.msk.bf16.mxu1 %vm172_vm0, %v480_v15 }
  0x2d   :  { %238 = vmatmul.mubr.bf16.gmra.mrb[4].mxu0 %v482_v16  ;;  %270 = vmatmul.mubr.bf16.gmra.mrb[4].mxu1 %v483_v17 }
  0x2e   :  { %406 = vmatprep.mubr.msk.bf16.mxu0 %vm172_vm0, %v484_v18  ;;  %410 = vmatprep.mubr.msk.bf16.mxu1 %vm172_vm0, %v486_v19 }
  0x35   :  { %246 = vmatmul.mubr.bf16.gmra.mrb[8].mxu0 %v488_v20  ;;  %278 = vmatmul.mubr.bf16.gmra.mrb[8].mxu1 %v489_v21 }
  0x36   :  { %407 = vmatprep.mubr.msk.bf16.mxu0 %vm172_vm0, %v490_v22  ;;  %411 = vmatprep.mubr.msk.bf16.mxu1 %vm172_vm0, %v492_v23 }
  0x3d   :  { %254 = vmatmul.mubr.bf16.gmra.mrb[12].mxu0 %v494_v24  ;;  %286 = vmatmul.mubr.bf16.gmra.mrb[12].mxu1 %v495_v25 }
  0xf8   :  { %v231_v26 = vpop.f32.mrb[0].mxu0  ;;  %v263_v27 = vpop.f32.mrb[0].mxu1 }
  0xf9   :  { %v428_v28 = vpack.c.bf16 %v231_v26, %v231_v26  ;;  %v436_v29 = vpack.c.bf16 %v263_v27, %v263_v27  ;;  %v233_v30 = vpop.f32.mrb[1].mxu0  ;;  %v265_v31 = vpop.f32.mrb[1].mxu1 }
  0xfa   :  { %v234_v32 = vpop.f32.mrb[2].mxu0  ;;  %v266_v33 = vpop.f32.mrb[2].mxu1 }
  0xfb   :  { %359 = vst.msk [vmem:[%s661_s2] sm:$0xf] %vm358_vm1, %v428_v28  ;;  %367 = vst.msk [vmem:[%s661_s2 + $0x20] sm:$0xf] %vm358_vm1, %v436_v29  ;;  %v429_v34 = vpack.c.bf16 %v234_v32, %v234_v32  ;;  %v437_v35 = vpack.c.bf16 %v266_v33, %v266_v33  ;;  %v236_v36 = vpop.f32.mrb[3].mxu0  ;;  %v268_v37 = vpop.f32.mrb[3].mxu1 }
  0xfd   :  { %360 = vst.msk [vmem:[%s661_s2 + $0x4] sm:$0xf] %vm358_vm1, %v429_v34  ;;  %368 = vst.msk [vmem:[%s661_s2 + $0x24] sm:$0xf] %vm358_vm1, %v437_v35 }
 0x100   :  { %v239_v38 = vpop.f32.mrb[4].mxu0  ;;  %v271_v39 = vpop.f32.mrb[4].mxu1 }
 0x101   :  { %v430_v40 = vpack.c.bf16 %v239_v38, %v239_v38  ;;  %v438_v41 = vpack.c.bf16 %v271_v39, %v271_v39  ;;  %v241_v42 = vpop.f32.mrb[5].mxu0  ;;  %v273_v43 = vpop.f32.mrb[5].mxu1 }
 0x102   :  { %v242_v44 = vpop.f32.mrb[6].mxu0  ;;  %v274_v45 = vpop.f32.mrb[6].mxu1 }
 0x103   :  { %361 = vst.msk [vmem:[%s661_s2 + $0x8] sm:$0xf] %vm358_vm1, %v430_v40  ;;  %369 = vst.msk [vmem:[%s661_s2 + $0x28] sm:$0xf] %vm358_vm1, %v438_v41  ;;  %v431_v46 = vpack.c.bf16 %v242_v44, %v242_v44  ;;  %v439_v47 = vpack.c.bf16 %v274_v45, %v274_v45  ;;  %v244_v48 = vpop.f32.mrb[7].mxu0  ;;  %v276_v49 = vpop.f32.mrb[7].mxu1 }
 0x105   :  { %362 = vst.msk [vmem:[%s661_s2 + $0xc] sm:$0xf] %vm358_vm1, %v431_v46  ;;  %370 = vst.msk [vmem:[%s661_s2 + $0x2c] sm:$0xf] %vm358_vm1, %v439_v47 }
 0x108   :  { %v247_v50 = vpop.f32.mrb[8].mxu0  ;;  %v279_v51 = vpop.f32.mrb[8].mxu1 }
 0x109   :  { %v432_v52 = vpack.c.bf16 %v247_v50, %v247_v50  ;;  %v440_v53 = vpack.c.bf16 %v279_v51, %v279_v51  ;;  %v249_v54 = vpop.f32.mrb[9].mxu0  ;;  %v281_v55 = vpop.f32.mrb[9].mxu1 }
 0x10a   :  { %v250_v56 = vpop.f32.mrb[10].mxu0  ;;  %v282_v57 = vpop.f32.mrb[10].mxu1 }
 0x10b   :  { %363 = vst.msk [vmem:[%s661_s2 + $0x10] sm:$0xf] %vm358_vm1, %v432_v52  ;;  %371 = vst.msk [vmem:[%s661_s2 + $0x30] sm:$0xf] %vm358_vm1, %v440_v53  ;;  %v433_v58 = vpack.c.bf16 %v250_v56, %v250_v56  ;;  %v441_v59 = vpack.c.bf16 %v282_v57, %v282_v57  ;;  %v252_v60 = vpop.f32.mrb[11].mxu0  ;;  %v284_v61 = vpop.f32.mrb[11].mxu1 }
 0x10d   :  { %364 = vst.msk [vmem:[%s661_s2 + $0x14] sm:$0xf] %vm358_vm1, %v433_v58  ;;  %372 = vst.msk [vmem:[%s661_s2 + $0x34] sm:$0xf] %vm358_vm1, %v441_v59 }
 0x110   :  { %v255_v62 = vpop.f32.mrb[12].mxu0  ;;  %v287_v63 = vpop.f32.mrb[12].mxu1 }
 0x111   :  { %v434_v0 = vpack.c.bf16 %v255_v62, %v255_v62  ;;  %v442_v1 = vpack.c.bf16 %v287_v63, %v287_v63  ;;  %v257_v2 = vpop.f32.mrb[13].mxu0  ;;  %v289_v3 = vpop.f32.mrb[13].mxu1 }
 0x112   :  { %v258_v4 = vpop.f32.mrb[14].mxu0  ;;  %v290_v5 = vpop.f32.mrb[14].mxu1 }
 0x113   :  { %365 = vst.msk [vmem:[%s661_s2 + $0x18] sm:$0xf] %vm358_vm1, %v434_v0  ;;  %373 = vst.msk [vmem:[%s661_s2 + $0x38] sm:$0xf] %vm358_vm1, %v442_v1  ;;  %v435_v6 = vpack.c.bf16 %v258_v4, %v258_v4  ;;  %v443_v7 = vpack.c.bf16 %v290_v5, %v290_v5  ;;  %v260_v8 = vpop.f32.mrb[15].mxu0  ;;  %v292_v9 = vpop.f32.mrb[15].mxu1 }
 0x115   :  { %366 = vst.msk [vmem:[%s661_s2 + $0x1c] sm:$0xf] %vm358_vm1, %v435_v6  ;;  %374 = vst.msk [vmem:[%s661_s2 + $0x3c] sm:$0xf] %vm358_vm1, %v443_v7 }

// kernel: basic_trans_decoder_block.5
= control target key start
LH: loop header
LB: loop body
LE: loop exit
PB: predicated region body
PF: predicated region fallthrough
CT: control target
= control target key end

     0   :  { %v2319_v0 = vmov 0   ;;  %vm764_vm0 = vcmask 261120   ;;  %vm1695_vm1 = vcmask 257024   ;;  %s3117_s1 = inlined_call_operand.vmem [shape: bf16[288,32], index: 1, kind: input, shape index: {}]   ;;  %s3118_s0 = inlined_call_operand.vmem [shape: bf16[512,288], index: 0, kind: input, shape index: {}]   ;;  %s3119_s2 = inlined_call_operand.vmem [shape: bf16[512,32], index: 2, kind: output, shape index: {}]  }
   0x1   :  { %861 = vmatprep.subr.bf16.mxu0 %v2319_v0  ;;  %2140 = vmatprep.subr.bf16.mxu1 %v2319_v0  ;;  %v2173_v1 = vld [vmem:[%s3117_s1] sm:$0xff]   ;;  %v2174_v2 = vld [vmem:[%s3117_s1 + $0x8] sm:$0xff]   ;;  %v2175_v3 = vld [vmem:[%s3117_s1 + $0x10] sm:$0xff]  }
   0x2   :  { %862 = vmatpush1.bf16.msra.mxu0 %v2173_v1  ;;  %2156 = vmatpush1.bf16.msra.mxu1 %v2173_v1  ;;  %v2176_v4 = vld [vmem:[%s3117_s1 + $0x18] sm:$0xff]   ;;  %v2177_v5 = vld [vmem:[%s3117_s1 + $0x20] sm:$0xff]   ;;  %v2178_v7 = vld [vmem:[%s3117_s1 + $0x28] sm:$0xff]  }
   0x3   :  { %863 = vmatprep.subr.bf16.mxu0 %v2319_v0  ;;  %2141 = vmatprep.subr.bf16.mxu1 %v2319_v0  ;;  %v2191_v6 = vld [vmem:[%s3118_s0 + $0x4] ss:$12 sps:$4 sm:$0xff]   ;;  %v2180_v10 = vld [vmem:[%s3117_s1 + $0x38] sm:$0xff]   ;;  %v2182_v12 = vld [vmem:[%s3117_s1 + $0x48] sm:$0xff]  }
   0x4   :  { %v2194_v8 = vld [vmem:[%s3118_s0 + $0x244] ss:$12 sps:$4 sm:$0xff]   ;;  %893 = vmatprep.mubr.bf16.mxu0 %v2191_v6  ;;  %v2184_v14 = vld [vmem:[%s3117_s1 + $0x58] sm:$0xff]   ;;  %v2186_v16 = vld [vmem:[%s3117_s1 + $0x68] sm:$0xff]  }
   0x5   :  { %1085 = vmatprep.mubr.bf16.mxu1 %v2194_v8  ;;  %v2179_v9 = vld [vmem:[%s3117_s1 + $0x30] sm:$0xff]   ;;  %v2181_v11 = vld [vmem:[%s3117_s1 + $0x40] sm:$0xff]   ;;  %v2188_v18 = vld [vmem:[%s3117_s1 + $0x78] sm:$0xff]  }
   0x6   :  { %864 = vmatpush1.bf16.msra.mxu0 %v2174_v2  ;;  %2157 = vmatpush1.bf16.msra.mxu1 %v2174_v2  ;;  %v2183_v13 = vld [vmem:[%s3117_s1 + $0x50] sm:$0xff]   ;;  %v2185_v15 = vld [vmem:[%s3117_s1 + $0x60] sm:$0xff]   ;;  %v2196_v22 = vld [vmem:[%s3118_s0 + $0x1c] ss:$12 sps:$4 sm:$0xff]  }
   0x7   :  { %865 = vmatprep.subr.bf16.mxu0 %v2319_v0  ;;  %2142 = vmatprep.subr.bf16.mxu1 %v2319_v0  ;;  %v2187_v17 = vld [vmem:[%s3117_s1 + $0x70] sm:$0xff]   ;;  %v2195_v19 = vld [vmem:[%s3117_s1 + $0x80] sm:$0xff]   ;;  %v2198_v23 = vld [vmem:[%s3118_s0 + $0x25c] ss:$12 sps:$4 sm:$0xff]  }
   0x8   :  { %v2189_v20 = vld [vmem:[%s3118_s0] ss:$12 sps:$4 sm:$0xff]   ;;  %v2200_v25 = vld [vmem:[%s3118_s0 + $0x18] ss:$12 sps:$4 sm:$0xff]   ;;  %v2206_v29 = vld [vmem:[%s3118_s0 + $0x30] ss:$12 sps:$4 sm:$0xff]  }
   0x9   :  { %v2192_v21 = vld [vmem:[%s3118_s0 + $0x240] ss:$12 sps:$4 sm:$0xff]   ;;  %v2201_v26 = vld [vmem:[%s3118_s0 + $0x258] ss:$12 sps:$4 sm:$0xff]   ;;  %v2207_v30 = vld [vmem:[%s3118_s0 + $0x270] ss:$12 sps:$4 sm:$0xff]  }
   0xa   :  { %866 = vmatpush1.bf16.msra.mxu0 %v2175_v3  ;;  %2158 = vmatpush1.bf16.msra.mxu1 %v2175_v3  ;;  %v2220_v24 = vld [vmem:[%s3117_s1 + $0x88] sm:$0xff]   ;;  %v2202_v27 = vld [vmem:[%s3118_s0 + $0x34] ss:$12 sps:$4 sm:$0xff]   ;;  %v2214_v35 = vld [vmem:[%s3118_s0 + $0x64] ss:$12 sps:$4 sm:$0xff]  }
   0xb   :  { %867 = vmatprep.subr.bf16.mxu0 %v2319_v0  ;;  %2143 = vmatprep.subr.bf16.mxu1 %v2319_v0  ;;  %v2204_v28 = vld [vmem:[%s3118_s0 + $0x274] ss:$12 sps:$4 sm:$0xff]   ;;  %v2208_v31 = vld [vmem:[%s3118_s0 + $0x4c] ss:$12 sps:$4 sm:$0xff]   ;;  %v2216_v36 = vld [vmem:[%s3118_s0 + $0x2a4] ss:$12 sps:$4 sm:$0xff]  }
   0xc   :  { %v2210_v32 = vld [vmem:[%s3118_s0 + $0x28c] ss:$12 sps:$4 sm:$0xff]   ;;  %v2212_v33 = vld [vmem:[%s3118_s0 + $0x48] ss:$12 sps:$4 sm:$0xff]   ;;  %v2231_v45 = vld [vmem:[%s3118_s0 + $0x90] ss:$12 sps:$4 sm:$0xff]  }
   0xd   :  { %v2213_v34 = vld [vmem:[%s3118_s0 + $0x288] ss:$12 sps:$4 sm:$0xff]   ;;  %v2218_v37 = vld [vmem:[%s3118_s0 + $0x60] ss:$12 sps:$4 sm:$0xff]   ;;  %v2225_v41 = vld [vmem:[%s3118_s0 + $0x78] ss:$12 sps:$4 sm:$0xff]  }
   0xe   :  { %868 = vmatpush1.bf16.msra.mxu0 %v2176_v4  ;;  %2159 = vmatpush1.bf16.msra.mxu1 %v2176_v4  ;;  %v2219_v38 = vld [vmem:[%s3118_s0 + $0x2a0] ss:$12 sps:$4 sm:$0xff]   ;;  %v2221_v39 = vld [vmem:[%s3118_s0 + $0x7c] ss:$12 sps:$4 sm:$0xff]   ;;  %v2226_v42 = vld [vmem:[%s3118_s0 + $0x2b8] ss:$12 sps:$4 sm:$0xff]  }
   0xf   :  { %869 = vmatprep.subr.bf16.mxu0 %v2319_v0  ;;  %2144 = vmatprep.subr.bf16.mxu1 %v2319_v0  ;;  %v2223_v40 = vld [vmem:[%s3118_s0 + $0x2bc] ss:$12 sps:$4 sm:$0xff]   ;;  %v2227_v43 = vld [vmem:[%s3118_s0 + $0x94] ss:$12 sps:$4 sm:$0xff]   ;;  %v2233_v47 = vld [vmem:[%s3118_s0 + $0xac] ss:$12 sps:$4 sm:$0xff]  }
  0x10   :  { %v2229_v44 = vld [vmem:[%s3118_s0 + $0x2d4] ss:$12 sps:$4 sm:$0xff]   ;;  %v2232_v46 = vld [vmem:[%s3118_s0 + $0x2d0] ss:$12 sps:$4 sm:$0xff]   ;;  %v2235_v48 = vld [vmem:[%s3118_s0 + $0x2ec] ss:$12 sps:$4 sm:$0xff]  }
  0x11   :  { %v2237_v49 = vld [vmem:[%s3118_s0 + $0xa8] ss:$12 sps:$4 sm:$0xff]   ;;  %v2239_v51 = vld [vmem:[%s3118_s0 + $0xc4] ss:$12 sps:$4 sm:$0xff]   ;;  %v2242_v53 = vld [vmem:[%s3118_s0 + $0xc0] ss:$12 sps:$4 sm:$0xff]  }
  0x12   :  { %870 = vmatpush1.bf16.msra.mxu0 %v2177_v5  ;;  %2160 = vmatpush1.bf16.msra.mxu1 %v2177_v5  ;;  %v2238_v50 = vld [vmem:[%s3118_s0 + $0x2e8] ss:$12 sps:$4 sm:$0xff]   ;;  %v2243_v54 = vld [vmem:[%s3118_s0 + $0x20] ss:$12 sps:$4 sm:$0xff]   ;;  %v2246_v56 = vld [vmem:[%s3118_s0 + $0x38] ss:$12 sps:$4 sm:$0xff]  }
  0x13   :  { %871 = vmatprep.subr.bf16.mxu0 %v2319_v0  ;;  %2145 = vmatprep.subr.bf16.mxu1 %v2319_v0  ;;  %v2241_v52 = vld [vmem:[%s3118_s0 + $0x8] ss:$12 sps:$4 sm:$0xff]   ;;  %v2247_v57 = vld [vmem:[%s3118_s0 + $0xd8] ss:$12 sps:$4 sm:$0xff]   ;;  %v2248_v58 = vld [vmem:[%s3118_s0 + $0x50] ss:$12 sps:$4 sm:$0xff]  }
  0x14   :  { %v2244_v55 = vld [vmem:[%s3118_s0 + $0xdc] ss:$12 sps:$4 sm:$0xff]   ;;  %v2249_v59 = vld [vmem:[%s3118_s0 + $0xf4] ss:$12 sps:$4 sm:$0xff]   ;;  %v2254_v63 = vld [vmem:[%s3118_s0 + $0x10c] ss:$12 sps:$4 sm:$0xff]  }
  0x15   :  { %v2251_v60 = vld [vmem:[%s3118_s0 + $0x68] ss:$12 sps:$4 sm:$0xff]   ;;  %v2252_v61 = vld [vmem:[%s3118_s0 + $0xf0] ss:$12 sps:$4 sm:$0xff]   ;;  %v2253_v62 = vld [vmem:[%s3118_s0 + $0x80] ss:$12 sps:$4 sm:$0xff]  }
  0x16   :  { %872 = vmatpush1.bf16.msra.mxu0 %v2178_v7  ;;  %2161 = vmatpush1.bf16.msra.mxu1 %v2178_v7  ;;  %v2257_v1 = vld [vmem:[%s3118_s0 + $0x108] ss:$12 sps:$4 sm:$0xff]   ;;  %v2258_v2 = vld [vmem:[%s3118_s0 + $0xb0] ss:$12 sps:$4 sm:$0xff]   ;;  %v2262_v5 = vld [vmem:[%s3118_s0 + $0x120] ss:$12 sps:$4 sm:$0xff]  }
  0x17   :  { %873 = vmatprep.subr.bf16.mxu0 %v2319_v0  ;;  %2146 = vmatprep.subr.bf16.mxu1 %v2319_v0  ;;  %v2259_v3 = vld [vmem:[%s3118_s0 + $0x124] ss:$12 sps:$4 sm:$0xff]   ;;  %v2261_v4 = vld [vmem:[%s3118_s0 + $0xc8] ss:$12 sps:$4 sm:$0xff]   ;;  %v2263_v6 = vld [vmem:[%s3118_s0 + $0xe0] ss:$12 sps:$4 sm:$0xff]  }
  0x18   :  { %v2264_v7 = vld [vmem:[%s3118_s0 + $0x13c] ss:$12 sps:$4 sm:$0xff]   ;;  %v2266_v8 = vld [vmem:[%s3118_s0 + $0xf8] ss:$12 sps:$4 sm:$0xff]  }
  0x1a   :  { %874 = vmatpush1.bf16.msra.mxu0 %v2179_v9  ;;  %2162 = vmatpush1.bf16.msra.mxu1 %v2179_v9  ;;  %v2267_v9 = vld [vmem:[%s3118_s0 + $0x138] ss:$12 sps:$4 sm:$0xff]  }
  0x1b   :  { %875 = vmatprep.subr.bf16.mxu0 %v2319_v0  ;;  %2147 = vmatprep.subr.bf16.mxu1 %v2319_v0 }
  0x1e   :  { %876 = vmatpush1.bf16.msra.mxu0 %v2180_v10  ;;  %2163 = vmatpush1.bf16.msra.mxu1 %v2180_v10  ;;  %v2268_v10 = vld [vmem:[%s3118_s0 + $0x110] ss:$12 sps:$4 sm:$0xff]  }
  0x1f   :  { %877 = vmatprep.subr.bf16.mxu0 %v2319_v0  ;;  %2148 = vmatprep.subr.bf16.mxu1 %v2319_v0 }
  0x22   :  { %878 = vmatpush1.bf16.msra.mxu0 %v2181_v11  ;;  %2164 = vmatpush1.bf16.msra.mxu1 %v2181_v11  ;;  %v2269_v11 = vld [vmem:[%s3118_s0 + $0x154] ss:$12 sps:$4 sm:$0xff]  }
  0x23   :  { %879 = vmatprep.subr.bf16.mxu0 %v2319_v0  ;;  %2149 = vmatprep.subr.bf16.mxu1 %v2319_v0 }
  0x26   :  { %880 = vmatpush1.bf16.msra.mxu0 %v2182_v12  ;;  %2165 = vmatpush1.bf16.msra.mxu1 %v2182_v12  ;;  %v2271_v12 = vld [vmem:[%s3118_s0 + $0x128] ss:$12 sps:$4 sm:$0xff]  }
  0x27   :  { %881 = vmatprep.subr.bf16.mxu0 %v2319_v0  ;;  %2150 = vmatprep.subr.bf16.mxu1 %v2319_v0 }
  0x2a   :  { %882 = vmatpush1.bf16.msra.mxu0 %v2183_v13  ;;  %2166 = vmatpush1.bf16.msra.mxu1 %v2183_v13  ;;  %v2272_v13 = vld [vmem:[%s3118_s0 + $0x150] ss:$12 sps:$4 sm:$0xff]  }
  0x2b   :  { %883 = vmatprep.subr.bf16.mxu0 %v2319_v0  ;;  %2151 = vmatprep.subr.bf16.mxu1 %v2319_v0 }
  0x2e   :  { %884 = vmatpush1.bf16.msra.mxu0 %v2184_v14  ;;  %2167 = vmatpush1.bf16.msra.mxu1 %v2184_v14  ;;  %v2273_v14 = vld [vmem:[%s3118_s0 + $0x140] ss:$12 sps:$4 sm:$0xff]  }
  0x2f   :  { %885 = vmatprep.subr.bf16.mxu0 %v2319_v0  ;;  %2152 = vmatprep.subr.bf16.mxu1 %v2319_v0 }
  0x32   :  { %886 = vmatpush1.bf16.msra.mxu0 %v2185_v15  ;;  %2168 = vmatpush1.bf16.msra.mxu1 %v2185_v15  ;;  %v2274_v15 = vld [vmem:[%s3118_s0 + $0x16c] ss:$12 sps:$4 sm:$0xff]  }
  0x33   :  { %887 = vmatprep.subr.bf16.mxu0 %v2319_v0  ;;  %2153 = vmatprep.subr.bf16.mxu1 %v2319_v0 }
  0x36   :  { %888 = vmatpush1.bf16.msra.mxu0 %v2186_v16  ;;  %2169 = vmatpush1.bf16.msra.mxu1 %v2186_v16  ;;  %v2276_v16 = vld [vmem:[%s3118_s0 + $0x158] ss:$12 sps:$4 sm:$0xff]  }
  0x37   :  { %889 = vmatprep.subr.bf16.mxu0 %v2319_v0  ;;  %2154 = vmatprep.subr.bf16.mxu1 %v2319_v0 }
  0x3a   :  { %890 = vmatpush1.bf16.msra.mxu0 %v2187_v17  ;;  %2170 = vmatpush1.bf16.msra.mxu1 %v2187_v17  ;;  %v2277_v17 = vld [vmem:[%s3118_s0 + $0x168] ss:$12 sps:$4 sm:$0xff]  }
  0x3b   :  { %891 = vmatprep.subr.bf16.mxu0 %v2319_v0  ;;  %2155 = vmatprep.subr.bf16.mxu1 %v2319_v0  ;;  %v2256_v0 = vld [vmem:[%s3118_s0 + $0x98] ss:$12 sps:$4 sm:$0xff]  }
  0x3e   :  { %892 = vmatpush1.bf16.msra.mxu0 %v2188_v18  ;;  %2171 = vmatpush1.bf16.msra.mxu1 %v2188_v18  ;;  %v2278_v18 = vld [vmem:[%s3118_s0 + $0x170] ss:$12 sps:$4 sm:$0xff]  }
  0x3f   :  { %2072 = vmatprep.subr.bf16.mxu1 %v2195_v19 }
  0x41   :  { %894 = vmatmul.mubr.bf16.vlgmr.msra.gmra.mrb[0].mxu0 %v2189_v20  ;;  %1086 = vmatmul.mubr.bf16.vlgmr.msra.gmra.mrb[0].mxu1 %v2192_v21  ;;  %v2281_v20 = vld [vmem:[%s3118_s0 + $0x188] ss:$12 sps:$4 sm:$0xff]   ;;  %v2282_v21 = vld [vmem:[%s3118_s0 + $0x180] ss:$12 sps:$4 sm:$0xff]  }
  0x42   :  { %2073 = vmatpush3.bf16.msra.mxu1 %v2195_v19  ;;  %901 = vmatprep.mubr.bf16.mxu0 %v2196_v22  ;;  %v2279_v19 = vld [vmem:[%s3118_s0 + $0x184] ss:$12 sps:$4 sm:$0xff]   ;;  %v2283_v22 = vld [vmem:[%s3118_s0 + $0x1a0] ss:$12 sps:$4 sm:$0xff]  }
  0x43   :  { %1093 = vmatprep.mubr.bf16.mxu1 %v2198_v23  ;;  %2074 = vmatprep.subr.bf16.mxu1 %v2220_v24  ;;  %v2284_v23 = vld [vmem:[%s3118_s0 + $0x19c] ss:$12 sps:$4 sm:$0xff]  }
  0x46   :  { %2075 = vmatpush3.bf16.msra.mxu1 %v2220_v24  ;;  %v2286_v24 = vld [vmem:[%s3118_s0 + $0x1b8] ss:$12 sps:$4 sm:$0xff]  }
  0x49   :  { %902 = vmatmul.mubr.bf16.gmra.mrb[4].mxu0 %v2200_v25  ;;  %1094 = vmatmul.mubr.bf16.gmra.mrb[4].mxu1 %v2201_v26  ;;  %v2287_v25 = vld [vmem:[%s3118_s0 + $0x198] ss:$12 sps:$4 sm:$0xff]   ;;  %v2288_v26 = vld [vmem:[%s3118_s0 + $0x1d0] ss:$12 sps:$4 sm:$0xff]  }
  0x4a   :  { %909 = vmatprep.mubr.bf16.mxu0 %v2202_v27  ;;  %1101 = vmatprep.mubr.bf16.mxu1 %v2204_v28  ;;  %v2289_v27 = vld [vmem:[%s3118_s0 + $0x1b4] ss:$12 sps:$4 sm:$0xff]  }
  0x4b   :  { %v2291_v28 = vld [vmem:[%s3118_s0 + $0x1e8] ss:$12 sps:$4 sm:$0xff]  }
  0x51   :  { %910 = vmatmul.mubr.bf16.gmra.mrb[8].mxu0 %v2206_v29  ;;  %1102 = vmatmul.mubr.bf16.gmra.mrb[8].mxu1 %v2207_v30  ;;  %v2292_v29 = vld [vmem:[%s3118_s0 + $0x1b0] ss:$12 sps:$4 sm:$0xff]   ;;  %v2293_v30 = vld [vmem:[%s3118_s0 + $0x200] ss:$12 sps:$4 sm:$0xff]  }
  0x52   :  { %917 = vmatprep.mubr.bf16.mxu0 %v2208_v31  ;;  %1109 = vmatprep.mubr.bf16.mxu1 %v2210_v32  ;;  %v2294_v31 = vld [vmem:[%s3118_s0 + $0x1cc] ss:$12 sps:$4 sm:$0xff]  }
  0x53   :  { %v2296_v32 = vld [vmem:[%s3118_s0 + $0x218] ss:$12 sps:$4 sm:$0xff]  }
  0x59   :  { %918 = vmatmul.mubr.bf16.gmra.mrb[12].mxu0 %v2212_v33  ;;  %1110 = vmatmul.mubr.bf16.gmra.mrb[12].mxu1 %v2213_v34  ;;  %v2297_v33 = vld [vmem:[%s3118_s0 + $0x1c8] ss:$12 sps:$4 sm:$0xff]   ;;  %v2298_v34 = vld [vmem:[%s3118_s0 + $0x230] ss:$12 sps:$4 sm:$0xff]  }
  0x5a   :  { %925 = vmatprep.mubr.bf16.mxu0 %v2214_v35  ;;  %1117 = vmatprep.mubr.bf16.mxu1 %v2216_v36  ;;  %v2299_v35 = vld [vmem:[%s3118_s0 + $0x1e4] ss:$12 sps:$4 sm:$0xff]   ;;  %v2301_v36 = vld [vmem:[%s3118_s0 + $0x248] ss:$12 sps:$4 sm:$0xff]  }
  0x61   :  { %926 = vmatmul.mubr.bf16.gmra.mrb[16].mxu0 %v2218_v37  ;;  %1118 = vmatmul.mubr.bf16.gmra.mrb[16].mxu1 %v2219_v38  ;;  %v2302_v37 = vld [vmem:[%s3118_s0 + $0x1e0] ss:$12 sps:$4 sm:$0xff]  }
  0x62   :  { %933 = vmatprep.mubr.bf16.mxu0 %v2221_v39  ;;  %1125 = vmatprep.mubr.bf16.mxu1 %v2223_v40  ;;  %v2303_v38 = vld [vmem:[%s3118_s0 + $0x260] ss:$12 sps:$4 sm:$0xff]   ;;  %v2304_v39 = vld [vmem:[%s3118_s0 + $0x1fc] ss:$12 sps:$4 sm:$0xff]   ;;  %v2306_v40 = vld [vmem:[%s3118_s0 + $0x278] ss:$12 sps:$4 sm:$0xff]  }
  0x69   :  { %934 = vmatmul.mubr.bf16.gmra.mrb[20].mxu0 %v2225_v41  ;;  %1126 = vmatmul.mubr.bf16.gmra.mrb[20].mxu1 %v2226_v42  ;;  %v2307_v41 = vld [vmem:[%s3118_s0 + $0x1f8] ss:$12 sps:$4 sm:$0xff]   ;;  %v2308_v42 = vld [vmem:[%s3118_s0 + $0x290] ss:$12 sps:$4 sm:$0xff]  }
  0x6a   :  { %941 = vmatprep.mubr.bf16.mxu0 %v2227_v43  ;;  %1133 = vmatprep.mubr.bf16.mxu1 %v2229_v44  ;;  %v2309_v43 = vld [vmem:[%s3118_s0 + $0x214] ss:$12 sps:$4 sm:$0xff]  }
  0x6b   :  { %v2311_v44 = vld [vmem:[%s3118_s0 + $0x2a8] ss:$12 sps:$4 sm:$0xff]  }
  0x71   :  { %942 = vmatmul.mubr.bf16.gmra.mrb[24].mxu0 %v2231_v45  ;;  %1134 = vmatmul.mubr.bf16.gmra.mrb[24].mxu1 %v2232_v46  ;;  %v2312_v45 = vld [vmem:[%s3118_s0 + $0x210] ss:$12 sps:$4 sm:$0xff]   ;;  %v2313_v46 = vld [vmem:[%s3118_s0 + $0x2c0] ss:$12 sps:$4 sm:$0xff]  }
  0x72   :  { %949 = vmatprep.mubr.bf16.mxu0 %v2233_v47  ;;  %1141 = vmatprep.mubr.bf16.mxu1 %v2235_v48  ;;  %v2314_v47 = vld [vmem:[%s3118_s0 + $0x22c] ss:$12 sps:$4 sm:$0xff]  }
  0x73   :  { %v2316_v48 = vld [vmem:[%s3118_s0 + $0x2d8] ss:$12 sps:$4 sm:$0xff]  }
  0x79   :  { %950 = vmatmul.mubr.bf16.gmra.mrb[28].mxu0 %v2237_v49  ;;  %1142 = vmatmul.mubr.bf16.gmra.mrb[28].mxu1 %v2238_v50  ;;  %v2317_v49 = vld [vmem:[%s3118_s0 + $0x228] ss:$12 sps:$4 sm:$0xff]   ;;  %v2318_v50 = vld [vmem:[%s3118_s0 + $0x2f0] ss:$12 sps:$4 sm:$0xff]  }
  0x7a   :  { %957 = vmatprep.mubr.bf16.mxu0 %v2239_v51  ;;  %2076 = vmatprep.mubr.msk.bf16.mxu1 %vm764_vm0, %v2241_v52 }
  0x81   :  { %958 = vmatmul.mubr.bf16.gmra.mrb[32].mxu0 %v2242_v53  ;;  %2077 = vmatmul.mubr.msk.bf16.vlgmr.msra.gmra.mrb[32].mxu1 %vm764_vm0, %v2243_v54 }
  0x82   :  { %965 = vmatprep.mubr.bf16.mxu0 %v2244_v55  ;;  %2080 = vmatprep.mubr.msk.bf16.mxu1 %vm764_vm0, %v2246_v56 }
  0x89   :  { %966 = vmatmul.mubr.bf16.gmra.mrb[36].mxu0 %v2247_v57  ;;  %2081 = vmatmul.mubr.msk.bf16.gmra.mrb[36].mxu1 %vm764_vm0, %v2248_v58 }
  0x8a   :  { %973 = vmatprep.mubr.bf16.mxu0 %v2249_v59  ;;  %2084 = vmatprep.mubr.msk.bf16.mxu1 %vm764_vm0, %v2251_v60 }
  0x91   :  { %974 = vmatmul.mubr.bf16.gmra.mrb[40].mxu0 %v2252_v61  ;;  %2085 = vmatmul.mubr.msk.bf16.gmra.mrb[40].mxu1 %vm764_vm0, %v2253_v62 }
  0x92   :  { %981 = vmatprep.mubr.bf16.mxu0 %v2254_v63  ;;  %2088 = vmatprep.mubr.msk.bf16.mxu1 %vm764_vm0, %v2256_v0 }
  0x99   :  { %982 = vmatmul.mubr.bf16.gmra.mrb[44].mxu0 %v2257_v1  ;;  %2089 = vmatmul.mubr.msk.bf16.gmra.mrb[44].mxu1 %vm764_vm0, %v2258_v2 }
  0x9a   :  { %989 = vmatprep.mubr.bf16.mxu0 %v2259_v3  ;;  %2092 = vmatprep.mubr.msk.bf16.mxu1 %vm764_vm0, %v2261_v4 }
  0xa1   :  { %990 = vmatmul.mubr.bf16.gmra.mrb[48].mxu0 %v2262_v5  ;;  %2093 = vmatmul.mubr.msk.bf16.gmra.mrb[48].mxu1 %vm764_vm0, %v2263_v6 }
  0xa2   :  { %997 = vmatprep.mubr.bf16.mxu0 %v2264_v7  ;;  %2096 = vmatprep.mubr.msk.bf16.mxu1 %vm764_vm0, %v2266_v8 }
  0xa9   :  { %998 = vmatmul.mubr.bf16.gmra.mrb[52].mxu0 %v2267_v9  ;;  %2097 = vmatmul.mubr.msk.bf16.gmra.mrb[52].mxu1 %vm764_vm0, %v2268_v10 }
  0xaa   :  { %1005 = vmatprep.mubr.bf16.mxu0 %v2269_v11  ;;  %2100 = vmatprep.mubr.msk.bf16.mxu1 %vm764_vm0, %v2271_v12 }
  0xb1   :  { %1006 = vmatmul.mubr.bf16.gmra.mrb[56].mxu0 %v2272_v13  ;;  %2101 = vmatmul.mubr.msk.bf16.gmra.mrb[56].mxu1 %vm764_vm0, %v2273_v14 }
  0xb2   :  { %1013 = vmatprep.mubr.bf16.mxu0 %v2274_v15  ;;  %2104 = vmatprep.mubr.msk.bf16.mxu1 %vm764_vm0, %v2276_v16 }
  0xb9   :  { %1014 = vmatmul.mubr.bf16.gmra.mrb[60].mxu0 %v2277_v17  ;;  %2105 = vmatmul.mubr.msk.bf16.gmra.mrb[60].mxu1 %vm764_vm0, %v2278_v18 }
  0xba   :  { %1021 = vmatprep.mubr.bf16.mxu0 %v2279_v19  ;;  %2108 = vmatprep.mubr.msk.bf16.mxu1 %vm764_vm0, %v2281_v20 }
  0xc1   :  { %1022 = vmatmul.mubr.bf16.gmra.mrb[64].mxu0 %v2282_v21  ;;  %2109 = vmatmul.mubr.msk.bf16.gmra.mrb[64].mxu1 %vm764_vm0, %v2283_v22 }
  0xc2   :  { %1029 = vmatprep.mubr.bf16.mxu0 %v2284_v23  ;;  %2112 = vmatprep.mubr.msk.bf16.mxu1 %vm764_vm0, %v2286_v24 }
  0xc9   :  { %1030 = vmatmul.mubr.bf16.gmra.mrb[68].mxu0 %v2287_v25  ;;  %2113 = vmatmul.mubr.msk.bf16.gmra.mrb[68].mxu1 %vm764_vm0, %v2288_v26 }
  0xca   :  { %1037 = vmatprep.mubr.bf16.mxu0 %v2289_v27  ;;  %2116 = vmatprep.mubr.msk.bf16.mxu1 %vm764_vm0, %v2291_v28 }
  0xd1   :  { %1038 = vmatmul.mubr.bf16.gmra.mrb[72].mxu0 %v2292_v29  ;;  %2117 = vmatmul.mubr.msk.bf16.gmra.mrb[72].mxu1 %vm764_vm0, %v2293_v30 }
  0xd2   :  { %1045 = vmatprep.mubr.bf16.mxu0 %v2294_v31  ;;  %2120 = vmatprep.mubr.msk.bf16.mxu1 %vm764_vm0, %v2296_v32 }
  0xd9   :  { %1046 = vmatmul.mubr.bf16.gmra.mrb[76].mxu0 %v2297_v33  ;;  %2121 = vmatmul.mubr.msk.bf16.gmra.mrb[76].mxu1 %vm764_vm0, %v2298_v34 }
  0xda   :  { %1053 = vmatprep.mubr.bf16.mxu0 %v2299_v35  ;;  %2124 = vmatprep.mubr.msk.bf16.mxu1 %vm764_vm0, %v2301_v36 }
  0xe1   :  { %1054 = vmatmul.mubr.bf16.gmra.mrb[80].mxu0 %v2302_v37  ;;  %2125 = vmatmul.mubr.msk.bf16.gmra.mrb[80].mxu1 %vm764_vm0, %v2303_v38 }
  0xe2   :  { %1061 = vmatprep.mubr.bf16.mxu0 %v2304_v39  ;;  %2128 = vmatprep.mubr.msk.bf16.mxu1 %vm764_vm0, %v2306_v40 }
  0xe9   :  { %1062 = vmatmul.mubr.bf16.gmra.mrb[84].mxu0 %v2307_v41  ;;  %2129 = vmatmul.mubr.msk.bf16.gmra.mrb[84].mxu1 %vm764_vm0, %v2308_v42 }
  0xea   :  { %1069 = vmatprep.mubr.bf16.mxu0 %v2309_v43  ;;  %2132 = vmatprep.mubr.msk.bf16.mxu1 %vm764_vm0, %v2311_v44 }
  0xf1   :  { %1070 = vmatmul.mubr.bf16.gmra.mrb[88].mxu0 %v2312_v45  ;;  %2133 = vmatmul.mubr.msk.bf16.gmra.mrb[88].mxu1 %vm764_vm0, %v2313_v46 }
  0xf2   :  { %1077 = vmatprep.mubr.bf16.mxu0 %v2314_v47  ;;  %2136 = vmatprep.mubr.msk.bf16.mxu1 %vm764_vm0, %v2316_v48 }
  0xf9   :  { %1078 = vmatmul.mubr.bf16.gmra.mrb[92].mxu0 %v2317_v49  ;;  %2137 = vmatmul.mubr.msk.bf16.gmra.mrb[92].mxu1 %vm764_vm0, %v2318_v50 }
 0x114   :  { %v2741_v51 = vpop.f32.mrb[0].mxu0  ;;  %v2743_v52 = vpop.f32.mrb[0].mxu1 }
 0x115   :  { %v897_v53 = vpop.f32.mrb[1].mxu0  ;;  %v1089_v54 = vpop.f32.mrb[1].mxu1 }
 0x116   :  { %v2745_v55 = vpop.f32.mrb[2].mxu0  ;;  %v2747_v56 = vpop.f32.mrb[2].mxu1 }
 0x117   :  { %v900_v57 = vpop.f32.mrb[3].mxu0  ;;  %v1092_v58 = vpop.f32.mrb[3].mxu1 }
 0x11c   :  { %v903_v59 = vpop.f32.mrb[4].mxu0  ;;  %v2749_v60 = vpop.f32.mrb[4].mxu1 }
 0x11d   :  { %v905_v61 = vpop.f32.mrb[5].mxu0  ;;  %v1097_v62 = vpop.f32.mrb[5].mxu1 }
 0x11e   :  { %v2751_v63 = vpop.f32.mrb[6].mxu0  ;;  %v2753_v0 = vpop.f32.mrb[6].mxu1 }
 0x11f   :  { %v908_v1 = vpop.f32.mrb[7].mxu0  ;;  %v1100_v2 = vpop.f32.mrb[7].mxu1 }
 0x124   :  { %v2755_v3 = vpop.f32.mrb[8].mxu0  ;;  %v2757_v4 = vpop.f32.mrb[8].mxu1 }
 0x125   :  { %v913_v5 = vpop.f32.mrb[9].mxu0  ;;  %v1105_v6 = vpop.f32.mrb[9].mxu1 }
 0x126   :  { %v2759_v7 = vpop.f32.mrb[10].mxu0  ;;  %v2761_v8 = vpop.f32.mrb[10].mxu1 }
 0x127   :  { %v916_v9 = vpop.f32.mrb[11].mxu0  ;;  %v1108_v10 = vpop.f32.mrb[11].mxu1 }
 0x12c   :  { %v2763_v11 = vpop.f32.mrb[12].mxu0  ;;  %v2765_v12 = vpop.f32.mrb[12].mxu1 }
 0x12d   :  { %v921_v13 = vpop.f32.mrb[13].mxu0  ;;  %v1113_v14 = vpop.f32.mrb[13].mxu1 }
 0x12e   :  { %v2767_v15 = vpop.f32.mrb[14].mxu0  ;;  %v2769_v16 = vpop.f32.mrb[14].mxu1 }
 0x12f   :  { %v924_v17 = vpop.f32.mrb[15].mxu0  ;;  %v1116_v18 = vpop.f32.mrb[15].mxu1 }
 0x134   :  { %v2771_v19 = vpop.f32.mrb[16].mxu0  ;;  %v2773_v20 = vpop.f32.mrb[16].mxu1 }
 0x135   :  { %v929_v21 = vpop.f32.mrb[17].mxu0  ;;  %v1121_v22 = vpop.f32.mrb[17].mxu1 }
 0x136   :  { %v2775_v23 = vpop.f32.mrb[18].mxu0  ;;  %v2777_v24 = vpop.f32.mrb[18].mxu1 }
 0x137   :  { %v932_v25 = vpop.f32.mrb[19].mxu0  ;;  %v1124_v26 = vpop.f32.mrb[19].mxu1 }
 0x13c   :  { %v2779_v27 = vpop.f32.mrb[20].mxu0  ;;  %v2781_v28 = vpop.f32.mrb[20].mxu1 }
 0x13d   :  { %v937_v29 = vpop.f32.mrb[21].mxu0  ;;  %v1129_v30 = vpop.f32.mrb[21].mxu1 }
 0x13e   :  { %v2783_v31 = vpop.f32.mrb[22].mxu0  ;;  %v2785_v32 = vpop.f32.mrb[22].mxu1 }
 0x13f   :  { %v940_v33 = vpop.f32.mrb[23].mxu0  ;;  %v1132_v34 = vpop.f32.mrb[23].mxu1 }
 0x144   :  { %v2787_v35 = vpop.f32.mrb[24].mxu0  ;;  %v2789_v36 = vpop.f32.mrb[24].mxu1 }
 0x145   :  { %v945_v37 = vpop.f32.mrb[25].mxu0  ;;  %v1137_v38 = vpop.f32.mrb[25].mxu1 }
 0x146   :  { %v2791_v39 = vpop.f32.mrb[26].mxu0  ;;  %v2793_v40 = vpop.f32.mrb[26].mxu1 }
 0x147   :  { %v948_v41 = vpop.f32.mrb[27].mxu0  ;;  %v1140_v42 = vpop.f32.mrb[27].mxu1 }
 0x14c   :  { %v2795_v43 = vpop.f32.mrb[28].mxu0  ;;  %v2797_v44 = vpop.f32.mrb[28].mxu1 }
 0x14d   :  { %v953_v45 = vpop.f32.mrb[29].mxu0  ;;  %v1145_v46 = vpop.f32.mrb[29].mxu1 }
 0x14e   :  { %v2799_v47 = vpop.f32.mrb[30].mxu0  ;;  %v2801_v48 = vpop.f32.mrb[30].mxu1 }
 0x14f   :  { %v956_v49 = vpop.f32.mrb[31].mxu0  ;;  %v1148_v50 = vpop.f32.mrb[31].mxu1 }
 0x154   :  { %v2803_v53 = vpop.f32.mrb[32].mxu0  ;;  %v2078_v54 = vpop.f32.mrb[32].mxu1 }
 0x155   :  { %v1193_v57 = vadd.f32 %v2078_v54, %v903_v59  ;;  %v961_v58 = vpop.f32.mrb[33].mxu0  ;;  %v1184_v61 = vpop.f32.mrb[33].mxu1 }
 0x156   :  { %v1185_v62 = vadd.f32 %v1184_v61, %v2741_v51  ;;  %v2806_v1 = vpop.f32.mrb[34].mxu0  ;;  %v2079_v2 = vpop.f32.mrb[34].mxu1 }
 0x157   :  { %v1976_v5 = vpack.c.bf16 %v1193_v57, %v1193_v57  ;;  %v1196_v6 = vadd.f32 %v2079_v2, %v2751_v63  ;;  %v964_v9 = vpop.f32.mrb[35].mxu0  ;;  %v1187_v10 = vpop.f32.mrb[35].mxu1 }
 0x158   :  { %v1974_v13 = vpack.c.bf16 %v1185_v62, %v1185_v62  ;;  %v1188_v14 = vadd.f32 %v1187_v10, %v2745_v55 }
 0x159   :  { %1698 = vst.msk [vmem:[%s3119_s2 + $0x8] sm:$0xf] %vm1695_vm1, %v1976_v5  ;;  %v1977_v59 = vpack.c.bf16 %v1196_v6, %v1196_v6 }
 0x15a   :  { %1696 = vst.msk [vmem:[%s3119_s2] sm:$0xf] %vm1695_vm1, %v1974_v13  ;;  %v1975_v51 = vpack.c.bf16 %v1188_v14, %v1188_v14 }
 0x15b   :  { %1699 = vst.msk [vmem:[%s3119_s2 + $0xc] sm:$0xf] %vm1695_vm1, %v1977_v59 }
 0x15c   :  { %1697 = vst.msk [vmem:[%s3119_s2 + $0x4] sm:$0xf] %vm1695_vm1, %v1975_v51  ;;  %v967_v55 = vpop.f32.mrb[36].mxu0  ;;  %v2082_v63 = vpop.f32.mrb[36].mxu1 }
 0x15d   :  { %v1209_v17 = vadd.f32 %v2082_v63, %v2763_v11  ;;  %v969_v18 = vpop.f32.mrb[37].mxu0  ;;  %v1200_v21 = vpop.f32.mrb[37].mxu1 }
 0x15e   :  { %v1201_v22 = vadd.f32 %v1200_v21, %v2755_v3  ;;  %v2828_v25 = vpop.f32.mrb[38].mxu0  ;;  %v2083_v26 = vpop.f32.mrb[38].mxu1 }
 0x15f   :  { %v1980_v29 = vpack.c.bf16 %v1209_v17, %v1209_v17  ;;  %v1212_v30 = vadd.f32 %v2083_v26, %v2767_v15  ;;  %v972_v33 = vpop.f32.mrb[39].mxu0  ;;  %v1203_v34 = vpop.f32.mrb[39].mxu1 }
 0x160   :  { %v1978_v37 = vpack.c.bf16 %v1201_v22, %v1201_v22  ;;  %v1204_v38 = vadd.f32 %v1203_v34, %v2759_v7 }
 0x161   :  { %1702 = vst.msk [vmem:[%s3119_s2 + $0x18] sm:$0xf] %vm1695_vm1, %v1980_v29  ;;  %v1981_v11 = vpack.c.bf16 %v1212_v30, %v1212_v30 }
 0x162   :  { %1700 = vst.msk [vmem:[%s3119_s2 + $0x10] sm:$0xf] %vm1695_vm1, %v1978_v37  ;;  %v1979_v3 = vpack.c.bf16 %v1204_v38, %v1204_v38 }
 0x163   :  { %1703 = vst.msk [vmem:[%s3119_s2 + $0x1c] sm:$0xf] %vm1695_vm1, %v1981_v11 }
 0x164   :  { %1701 = vst.msk [vmem:[%s3119_s2 + $0x14] sm:$0xf] %vm1695_vm1, %v1979_v3  ;;  %v2848_v7 = vpop.f32.mrb[40].mxu0  ;;  %v2086_v15 = vpop.f32.mrb[40].mxu1 }
 0x165   :  { %v1225_v41 = vadd.f32 %v2086_v15, %v2779_v27  ;;  %v977_v42 = vpop.f32.mrb[41].mxu0  ;;  %v1216_v45 = vpop.f32.mrb[41].mxu1 }
 0x166   :  { %v1217_v46 = vadd.f32 %v1216_v45, %v2771_v19  ;;  %v2852_v49 = vpop.f32.mrb[42].mxu0  ;;  %v2087_v50 = vpop.f32.mrb[42].mxu1 }
 0x167   :  { %v1984_v54 = vpack.c.bf16 %v1225_v41, %v1225_v41  ;;  %v1228_v57 = vadd.f32 %v2087_v50, %v2783_v31  ;;  %v980_v58 = vpop.f32.mrb[43].mxu0  ;;  %v1219_v61 = vpop.f32.mrb[43].mxu1 }
 0x168   :  { %v1982_v62 = vpack.c.bf16 %v1217_v46, %v1217_v46  ;;  %v1220_v2 = vadd.f32 %v1219_v61, %v2775_v23 }
 0x169   :  { %1706 = vst.msk [vmem:[%s3119_s2 + $0x28] sm:$0xf] %vm1695_vm1, %v1984_v54  ;;  %v1985_v27 = vpack.c.bf16 %v1228_v57, %v1228_v57 }
 0x16a   :  { %1704 = vst.msk [vmem:[%s3119_s2 + $0x20] sm:$0xf] %vm1695_vm1, %v1982_v62  ;;  %v1983_v19 = vpack.c.bf16 %v1220_v2, %v1220_v2 }
 0x16b   :  { %1707 = vst.msk [vmem:[%s3119_s2 + $0x2c] sm:$0xf] %vm1695_vm1, %v1985_v27 }
 0x16c   :  { %1705 = vst.msk [vmem:[%s3119_s2 + $0x24] sm:$0xf] %vm1695_vm1, %v1983_v19  ;;  %v983_v23 = vpop.f32.mrb[44].mxu0  ;;  %v2090_v31 = vpop.f32.mrb[44].mxu1 }
 0x16d   :  { %v1241_v5 = vadd.f32 %v2090_v31, %v2795_v43  ;;  %v985_v6 = vpop.f32.mrb[45].mxu0  ;;  %v1232_v9 = vpop.f32.mrb[45].mxu1 }
 0x16e   :  { %v1233_v10 = vadd.f32 %v1232_v9, %v2787_v35  ;;  %v986_v13 = vpop.f32.mrb[46].mxu0  ;;  %v2091_v14 = vpop.f32.mrb[46].mxu1 }
 0x16f   :  { %v1988_v59 = vpack.c.bf16 %v1241_v5, %v1241_v5  ;;  %v1244_v51 = vadd.f32 %v2091_v14, %v2799_v47  ;;  %v988_v63 = vpop.f32.mrb[47].mxu0  ;;  %v1235_v17 = vpop.f32.mrb[47].mxu1 }
 0x170   :  { %v1986_v18 = vpack.c.bf16 %v1233_v10, %v1233_v10  ;;  %v1236_v21 = vadd.f32 %v1235_v17, %v2791_v39 }
 0x171   :  { %1710 = vst.msk [vmem:[%s3119_s2 + $0x38] sm:$0xf] %vm1695_vm1, %v1988_v59  ;;  %v1989_v43 = vpack.c.bf16 %v1244_v51, %v1244_v51 }
 0x172   :  { %1708 = vst.msk [vmem:[%s3119_s2 + $0x30] sm:$0xf] %vm1695_vm1, %v1986_v18  ;;  %v1987_v35 = vpack.c.bf16 %v1236_v21, %v1236_v21 }
 0x173   :  { %1711 = vst.msk [vmem:[%s3119_s2 + $0x3c] sm:$0xf] %vm1695_vm1, %v1989_v43 }
 0x174   :  { %1709 = vst.msk [vmem:[%s3119_s2 + $0x34] sm:$0xf] %vm1695_vm1, %v1987_v35  ;;  %v991_v39 = vpop.f32.mrb[48].mxu0  ;;  %v2094_v47 = vpop.f32.mrb[48].mxu1 }
 0x175   :  { %v1257_v22 = vadd.f32 %v2094_v47, %v967_v55  ;;  %v993_v26 = vpop.f32.mrb[49].mxu0  ;;  %v1248_v29 = vpop.f32.mrb[49].mxu1 }
 0x176   :  { %v1249_v30 = vadd.f32 %v1248_v29, %v2803_v53  ;;  %v994_v33 = vpop.f32.mrb[50].mxu0  ;;  %v2095_v34 = vpop.f32.mrb[50].mxu1 }
 0x177   :  { %v1992_v37 = vpack.c.bf16 %v1257_v22, %v1257_v22  ;;  %v1260_v38 = vadd.f32 %v2095_v34, %v2828_v25  ;;  %v996_v11 = vpop.f32.mrb[51].mxu0  ;;  %v1251_v3 = vpop.f32.mrb[51].mxu1 }
 0x178   :  { %v1990_v15 = vpack.c.bf16 %v1249_v30, %v1249_v30  ;;  %v1252_v41 = vadd.f32 %v1251_v3, %v2806_v1 }
 0x179   :  { %1714 = vst.msk [vmem:[%s3119_s2 + $0x48] sm:$0xf] %vm1695_vm1, %v1992_v37  ;;  %v1993_v55 = vpack.c.bf16 %v1260_v38, %v1260_v38 }
 0x17a   :  { %1712 = vst.msk [vmem:[%s3119_s2 + $0x40] sm:$0xf] %vm1695_vm1, %v1990_v15  ;;  %v1991_v53 = vpack.c.bf16 %v1252_v41, %v1252_v41 }
 0x17b   :  { %1715 = vst.msk [vmem:[%s3119_s2 + $0x4c] sm:$0xf] %vm1695_vm1, %v1993_v55 }
 0x17c   :  { %1713 = vst.msk [vmem:[%s3119_s2 + $0x44] sm:$0xf] %vm1695_vm1, %v1991_v53  ;;  %v999_v1 = vpop.f32.mrb[52].mxu0  ;;  %v2098_v25 = vpop.f32.mrb[52].mxu1 }
 0x17d   :  { %v1273_v42 = vadd.f32 %v2098_v25, %v983_v23  ;;  %v1001_v45 = vpop.f32.mrb[53].mxu0  ;;  %v1264_v46 = vpop.f32.mrb[53].mxu1 }
 0x17e   :  { %v1265_v50 = vadd.f32 %v1264_v46, %v2848_v7  ;;  %v1002_v54 = vpop.f32.mrb[54].mxu0  ;;  %v2099_v57 = vpop.f32.mrb[54].mxu1 }
 0x17f   :  { %v1996_v58 = vpack.c.bf16 %v1273_v42, %v1273_v42  ;;  %v1276_v61 = vadd.f32 %v2099_v57, %v986_v13  ;;  %v1004_v62 = vpop.f32.mrb[55].mxu0  ;;  %v1267_v2 = vpop.f32.mrb[55].mxu1 }
 0x180   :  { %v1994_v27 = vpack.c.bf16 %v1265_v50, %v1265_v50  ;;  %v1268_v19 = vadd.f32 %v1267_v2, %v2852_v49 }
 0x181   :  { %1718 = vst.msk [vmem:[%s3119_s2 + $0x58] sm:$0xf] %vm1695_vm1, %v1996_v58  ;;  %v1997_v31 = vpack.c.bf16 %v1276_v61, %v1276_v61 }
 0x182   :  { %1716 = vst.msk [vmem:[%s3119_s2 + $0x50] sm:$0xf] %vm1695_vm1, %v1994_v27  ;;  %v1995_v7 = vpack.c.bf16 %v1268_v19, %v1268_v19 }
 0x183   :  { %1719 = vst.msk [vmem:[%s3119_s2 + $0x5c] sm:$0xf] %vm1695_vm1, %v1997_v31 }
 0x184   :  { %1717 = vst.msk [vmem:[%s3119_s2 + $0x54] sm:$0xf] %vm1695_vm1, %v1995_v7  ;;  %v1007_v49 = vpop.f32.mrb[56].mxu0  ;;  %v2102_v23 = vpop.f32.mrb[56].mxu1 }
 0x185   :  { %v1289_v5 = vadd.f32 %v2102_v23, %v999_v1  ;;  %v1009_v6 = vpop.f32.mrb[57].mxu0  ;;  %v1280_v9 = vpop.f32.mrb[57].mxu1 }
 0x186   :  { %v1281_v10 = vadd.f32 %v1280_v9, %v991_v39  ;;  %v1010_v13 = vpop.f32.mrb[58].mxu0  ;;  %v2103_v14 = vpop.f32.mrb[58].mxu1 }
 0x187   :  { %v2000_v59 = vpack.c.bf16 %v1289_v5, %v1289_v5  ;;  %v1292_v51 = vadd.f32 %v2103_v14, %v1002_v54  ;;  %v1012_v63 = vpop.f32.mrb[59].mxu0  ;;  %v1283_v17 = vpop.f32.mrb[59].mxu1 }
 0x188   :  { %v1998_v18 = vpack.c.bf16 %v1281_v10, %v1281_v10  ;;  %v1284_v21 = vadd.f32 %v1283_v17, %v994_v33 }
 0x189   :  { %1722 = vst.msk [vmem:[%s3119_s2 + $0x68] sm:$0xf] %vm1695_vm1, %v2000_v59  ;;  %v2001_v43 = vpack.c.bf16 %v1292_v51, %v1292_v51 }
 0x18a   :  { %1720 = vst.msk [vmem:[%s3119_s2 + $0x60] sm:$0xf] %vm1695_vm1, %v1998_v18  ;;  %v1999_v35 = vpack.c.bf16 %v1284_v21, %v1284_v21 }
 0x18b   :  { %1723 = vst.msk [vmem:[%s3119_s2 + $0x6c] sm:$0xf] %vm1695_vm1, %v2001_v43 }
 0x18c   :  { %1721 = vst.msk [vmem:[%s3119_s2 + $0x64] sm:$0xf] %vm1695_vm1, %v1999_v35  ;;  %v1015_v39 = vpop.f32.mrb[60].mxu0  ;;  %v2106_v47 = vpop.f32.mrb[60].mxu1 }
 0x18d   :  { %v1305_v22 = vadd.f32 %v2106_v47, %v1015_v39  ;;  %v1017_v26 = vpop.f32.mrb[61].mxu0  ;;  %v1296_v29 = vpop.f32.mrb[61].mxu1 }
 0x18e   :  { %v1297_v30 = vadd.f32 %v1296_v29, %v1007_v49  ;;  %v1018_v33 = vpop.f32.mrb[62].mxu0  ;;  %v2107_v34 = vpop.f32.mrb[62].mxu1 }
 0x18f   :  { %v2004_v37 = vpack.c.bf16 %v1305_v22, %v1305_v22  ;;  %v1308_v38 = vadd.f32 %v2107_v34, %v1018_v33  ;;  %v1020_v11 = vpop.f32.mrb[63].mxu0  ;;  %v1299_v3 = vpop.f32.mrb[63].mxu1 }
 0x190   :  { %v2002_v15 = vpack.c.bf16 %v1297_v30, %v1297_v30  ;;  %v1300_v41 = vadd.f32 %v1299_v3, %v1010_v13 }
 0x191   :  { %1726 = vst.msk [vmem:[%s3119_s2 + $0x78] sm:$0xf] %vm1695_vm1, %v2004_v37  ;;  %v2005_v55 = vpack.c.bf16 %v1308_v38, %v1308_v38 }
 0x192   :  { %1724 = vst.msk [vmem:[%s3119_s2 + $0x70] sm:$0xf] %vm1695_vm1, %v2002_v15  ;;  %v2003_v53 = vpack.c.bf16 %v1300_v41, %v1300_v41 }
 0x193   :  { %1727 = vst.msk [vmem:[%s3119_s2 + $0x7c] sm:$0xf] %vm1695_vm1, %v2005_v55 }
 0x194   :  { %1725 = vst.msk [vmem:[%s3119_s2 + $0x74] sm:$0xf] %vm1695_vm1, %v2003_v53  ;;  %v1023_v1 = vpop.f32.mrb[64].mxu0  ;;  %v2110_v25 = vpop.f32.mrb[64].mxu1 }
 0x195   :  { %v1025_v42 = vpop.f32.mrb[65].mxu0  ;;  %v1312_v45 = vpop.f32.mrb[65].mxu1 }
 0x196   :  { %v1313_v46 = vadd.f32 %v1312_v45, %v1023_v1  ;;  %v1026_v50 = vpop.f32.mrb[66].mxu0  ;;  %v2111_v54 = vpop.f32.mrb[66].mxu1 }
 0x197   :  { %v1028_v57 = vpop.f32.mrb[67].mxu0  ;;  %v1315_v58 = vpop.f32.mrb[67].mxu1 }
 0x198   :  { %v2006_v61 = vpack.c.bf16 %v1313_v46, %v1313_v46  ;;  %v1316_v62 = vadd.f32 %v1315_v58, %v1026_v50 }
 0x19a   :  { %1728 = vst.msk [vmem:[%s3119_s2 + $0x80] sm:$0xf] %vm1695_vm1, %v2006_v61  ;;  %v2007_v2 = vpack.c.bf16 %v1316_v62, %v1316_v62 }
 0x19c   :  { %1729 = vst.msk [vmem:[%s3119_s2 + $0x84] sm:$0xf] %vm1695_vm1, %v2007_v2  ;;  %v1031_v27 = vpop.f32.mrb[68].mxu0  ;;  %v2114_v19 = vpop.f32.mrb[68].mxu1 }
 0x19d   :  { %v1321_v31 = vadd.f32 %v2110_v25, %v1031_v27  ;;  %v1033_v7 = vpop.f32.mrb[69].mxu0  ;;  %v1328_v49 = vpop.f32.mrb[69].mxu1 }
 0x19e   :  { %v1034_v23 = vpop.f32.mrb[70].mxu0  ;;  %v2115_v5 = vpop.f32.mrb[70].mxu1 }
 0x19f   :  { %v2008_v6 = vpack.c.bf16 %v1321_v31, %v1321_v31  ;;  %v1324_v9 = vadd.f32 %v2111_v54, %v1034_v23  ;;  %v1036_v10 = vpop.f32.mrb[71].mxu0  ;;  %v1331_v13 = vpop.f32.mrb[71].mxu1 }
 0x1a1   :  { %1730 = vst.msk [vmem:[%s3119_s2 + $0x88] sm:$0xf] %vm1695_vm1, %v2008_v6  ;;  %v2009_v14 = vpack.c.bf16 %v1324_v9, %v1324_v9 }
 0x1a3   :  { %1731 = vst.msk [vmem:[%s3119_s2 + $0x8c] sm:$0xf] %vm1695_vm1, %v2009_v14 }
 0x1a4   :  { %v1039_v59 = vpop.f32.mrb[72].mxu0  ;;  %v2118_v51 = vpop.f32.mrb[72].mxu1 }
 0x1a5   :  { %v1329_v63 = vadd.f32 %v1328_v49, %v1039_v59  ;;  %v1041_v17 = vpop.f32.mrb[73].mxu0  ;;  %v1344_v18 = vpop.f32.mrb[73].mxu1 }
 0x1a6   :  { %v1042_v21 = vpop.f32.mrb[74].mxu0  ;;  %v2119_v43 = vpop.f32.mrb[74].mxu1 }
 0x1a7   :  { %v2010_v35 = vpack.c.bf16 %v1329_v63, %v1329_v63  ;;  %v1332_v39 = vadd.f32 %v1331_v13, %v1042_v21  ;;  %v1044_v47 = vpop.f32.mrb[75].mxu0  ;;  %v1347_v22 = vpop.f32.mrb[75].mxu1 }
 0x1a9   :  { %1732 = vst.msk [vmem:[%s3119_s2 + $0x90] sm:$0xf] %vm1695_vm1, %v2010_v35  ;;  %v2011_v26 = vpack.c.bf16 %v1332_v39, %v1332_v39 }
 0x1ab   :  { %1733 = vst.msk [vmem:[%s3119_s2 + $0x94] sm:$0xf] %vm1695_vm1, %v2011_v26 }
 0x1ac   :  { %v1047_v29 = vpop.f32.mrb[76].mxu0  ;;  %v2985_v30 = vpop.f32.mrb[76].mxu1 }
 0x1ad   :  { %v1337_v33 = vadd.f32 %v2114_v19, %v1047_v29  ;;  %v1049_v34 = vpop.f32.mrb[77].mxu0  ;;  %v2987_v37 = vpop.f32.mrb[77].mxu1 }
 0x1ae   :  { %v1050_v38 = vpop.f32.mrb[78].mxu0  ;;  %v2989_v11 = vpop.f32.mrb[78].mxu1 }
 0x1af   :  { %v2012_v3 = vpack.c.bf16 %v1337_v33, %v1337_v33  ;;  %v1340_v15 = vadd.f32 %v2115_v5, %v1050_v38  ;;  %v1052_v41 = vpop.f32.mrb[79].mxu0  ;;  %v2991_v55 = vpop.f32.mrb[79].mxu1 }
 0x1b1   :  { %1734 = vst.msk [vmem:[%s3119_s2 + $0x98] sm:$0xf] %vm1695_vm1, %v2012_v3  ;;  %v2013_v53 = vpack.c.bf16 %v1340_v15, %v1340_v15 }
 0x1b3   :  { %1735 = vst.msk [vmem:[%s3119_s2 + $0x9c] sm:$0xf] %vm1695_vm1, %v2013_v53 }
 0x1b4   :  { %v1055_v1 = vpop.f32.mrb[80].mxu0  ;;  %v2126_v25 = vpop.f32.mrb[80].mxu1 }
 0x1b5   :  { %v1345_v42 = vadd.f32 %v1344_v18, %v1055_v1  ;;  %v1385_v45 = vadd.f32 %v2126_v25, %v2749_v60  ;;  %v1057_v46 = vpop.f32.mrb[81].mxu0  ;;  %v1376_v50 = vpop.f32.mrb[81].mxu1 }
 0x1b6   :  { %v1377_v54 = vadd.f32 %v1376_v50, %v2743_v52  ;;  %v1058_v57 = vpop.f32.mrb[82].mxu0  ;;  %v2127_v58 = vpop.f32.mrb[82].mxu1 }
 0x1b7   :  { %v2014_v61 = vpack.c.bf16 %v1345_v42, %v1345_v42  ;;  %v2024_v62 = vpack.c.bf16 %v1385_v45, %v1385_v45  ;;  %v1348_v2 = vadd.f32 %v1347_v22, %v1058_v57  ;;  %v1388_v27 = vadd.f32 %v2127_v58, %v2753_v0  ;;  %v1060_v19 = vpop.f32.mrb[83].mxu0  ;;  %v1379_v31 = vpop.f32.mrb[83].mxu1 }
 0x1b8   :  { %v2022_v7 = vpack.c.bf16 %v1377_v54, %v1377_v54  ;;  %v1380_v49 = vadd.f32 %v1379_v31, %v2747_v56 }
 0x1b9   :  { %1736 = vst.msk [vmem:[%s3119_s2 + $0xa0] sm:$0xf] %vm1695_vm1, %v2014_v61  ;;  %1746 = vst.msk [vmem:[%s3119_s2 + $0xc8] sm:$0xf] %vm1695_vm1, %v2024_v62  ;;  %v2015_v52 = vpack.c.bf16 %v1348_v2, %v1348_v2  ;;  %v2025_v60 = vpack.c.bf16 %v1388_v27, %v1388_v27 }
 0x1ba   :  { %1744 = vst.msk [vmem:[%s3119_s2 + $0xc0] sm:$0xf] %vm1695_vm1, %v2022_v7  ;;  %v2023_v0 = vpack.c.bf16 %v1380_v49, %v1380_v49 }
 0x1bb   :  { %1737 = vst.msk [vmem:[%s3119_s2 + $0xa4] sm:$0xf] %vm1695_vm1, %v2015_v52  ;;  %1747 = vst.msk [vmem:[%s3119_s2 + $0xcc] sm:$0xf] %vm1695_vm1, %v2025_v60 }
 0x1bc   :  { %1745 = vst.msk [vmem:[%s3119_s2 + $0xc4] sm:$0xf] %vm1695_vm1, %v2023_v0  ;;  %v1063_v56 = vpop.f32.mrb[84].mxu0  ;;  %v2130_v23 = vpop.f32.mrb[84].mxu1 }
 0x1bd   :  { %v1353_v5 = vadd.f32 %v2118_v51, %v1063_v56  ;;  %v1401_v6 = vadd.f32 %v2130_v23, %v2765_v12  ;;  %v1065_v9 = vpop.f32.mrb[85].mxu0  ;;  %v1392_v10 = vpop.f32.mrb[85].mxu1 }
 0x1be   :  { %v1393_v13 = vadd.f32 %v1392_v10, %v2757_v4  ;;  %v1066_v14 = vpop.f32.mrb[86].mxu0  ;;  %v2131_v59 = vpop.f32.mrb[86].mxu1 }
 0x1bf   :  { %v2016_v63 = vpack.c.bf16 %v1353_v5, %v1353_v5  ;;  %v2028_v17 = vpack.c.bf16 %v1401_v6, %v1401_v6  ;;  %v1356_v18 = vadd.f32 %v2119_v43, %v1066_v14  ;;  %v1404_v21 = vadd.f32 %v2131_v59, %v2769_v16  ;;  %v1068_v35 = vpop.f32.mrb[87].mxu0  ;;  %v1395_v39 = vpop.f32.mrb[87].mxu1 }
 0x1c0   :  { %v2026_v47 = vpack.c.bf16 %v1393_v13, %v1393_v13  ;;  %v1396_v22 = vadd.f32 %v1395_v39, %v2761_v8 }
 0x1c1   :  { %1738 = vst.msk [vmem:[%s3119_s2 + $0xa8] sm:$0xf] %vm1695_vm1, %v2016_v63  ;;  %1750 = vst.msk [vmem:[%s3119_s2 + $0xd8] sm:$0xf] %vm1695_vm1, %v2028_v17  ;;  %v2017_v4 = vpack.c.bf16 %v1356_v18, %v1356_v18  ;;  %v2029_v12 = vpack.c.bf16 %v1404_v21, %v1404_v21 }
 0x1c2   :  { %1748 = vst.msk [vmem:[%s3119_s2 + $0xd0] sm:$0xf] %vm1695_vm1, %v2026_v47  ;;  %v2027_v16 = vpack.c.bf16 %v1396_v22, %v1396_v22 }
 0x1c3   :  { %1739 = vst.msk [vmem:[%s3119_s2 + $0xac] sm:$0xf] %vm1695_vm1, %v2017_v4  ;;  %1751 = vst.msk [vmem:[%s3119_s2 + $0xdc] sm:$0xf] %vm1695_vm1, %v2029_v12 }
 0x1c4   :  { %1749 = vst.msk [vmem:[%s3119_s2 + $0xd4] sm:$0xf] %vm1695_vm1, %v2027_v16  ;;  %v1071_v8 = vpop.f32.mrb[88].mxu0  ;;  %v2134_v51 = vpop.f32.mrb[88].mxu1 }
 0x1c5   :  { %v1361_v43 = vadd.f32 %v2987_v37, %v1071_v8  ;;  %v1417_v26 = vadd.f32 %v2134_v51, %v2781_v28  ;;  %v1073_v29 = vpop.f32.mrb[89].mxu0  ;;  %v1408_v33 = vpop.f32.mrb[89].mxu1 }
 0x1c6   :  { %v1409_v34 = vadd.f32 %v1408_v33, %v2773_v20  ;;  %v1074_v38 = vpop.f32.mrb[90].mxu0  ;;  %v2135_v3 = vpop.f32.mrb[90].mxu1 }
 0x1c7   :  { %v2018_v15 = vpack.c.bf16 %v1361_v43, %v1361_v43  ;;  %v2032_v41 = vpack.c.bf16 %v1417_v26, %v1417_v26  ;;  %v1364_v53 = vadd.f32 %v2991_v55, %v1074_v38  ;;  %v1420_v1 = vadd.f32 %v2135_v3, %v2785_v32  ;;  %v1076_v25 = vpop.f32.mrb[91].mxu0  ;;  %v1411_v42 = vpop.f32.mrb[91].mxu1 }
 0x1c8   :  { %v2030_v45 = vpack.c.bf16 %v1409_v34, %v1409_v34  ;;  %v1412_v46 = vadd.f32 %v1411_v42, %v2777_v24 }
 0x1c9   :  { %1740 = vst.msk [vmem:[%s3119_s2 + $0xb0] sm:$0xf] %vm1695_vm1, %v2018_v15  ;;  %1754 = vst.msk [vmem:[%s3119_s2 + $0xe8] sm:$0xf] %vm1695_vm1, %v2032_v41  ;;  %v2019_v20 = vpack.c.bf16 %v1364_v53, %v1364_v53  ;;  %v2033_v28 = vpack.c.bf16 %v1420_v1, %v1420_v1 }
 0x1ca   :  { %1752 = vst.msk [vmem:[%s3119_s2 + $0xe0] sm:$0xf] %vm1695_vm1, %v2030_v45  ;;  %v2031_v32 = vpack.c.bf16 %v1412_v46, %v1412_v46 }
 0x1cb   :  { %1741 = vst.msk [vmem:[%s3119_s2 + $0xb4] sm:$0xf] %vm1695_vm1, %v2019_v20  ;;  %1755 = vst.msk [vmem:[%s3119_s2 + $0xec] sm:$0xf] %vm1695_vm1, %v2033_v28 }
 0x1cc   :  { %1753 = vst.msk [vmem:[%s3119_s2 + $0xe4] sm:$0xf] %vm1695_vm1, %v2031_v32  ;;  %v1079_v24 = vpop.f32.mrb[92].mxu0  ;;  %v2138_v37 = vpop.f32.mrb[92].mxu1 }
 0x1cd   :  { %v1369_v55 = vadd.f32 %v2985_v30, %v1079_v24  ;;  %v1433_v50 = vadd.f32 %v2138_v37, %v2797_v44  ;;  %v1081_v54 = vpop.f32.mrb[93].mxu0  ;;  %v1424_v57 = vpop.f32.mrb[93].mxu1 }
 0x1ce   :  { %v1425_v58 = vadd.f32 %v1424_v57, %v2789_v36  ;;  %v1082_v61 = vpop.f32.mrb[94].mxu0  ;;  %v2139_v62 = vpop.f32.mrb[94].mxu1 }
 0x1cf   :  { %v2020_v2 = vpack.c.bf16 %v1369_v55, %v1369_v55  ;;  %v2036_v27 = vpack.c.bf16 %v1433_v50, %v1433_v50  ;;  %v1372_v19 = vadd.f32 %v2989_v11, %v1082_v61  ;;  %v1436_v31 = vadd.f32 %v2139_v62, %v2801_v48  ;;  %v1084_v7 = vpop.f32.mrb[95].mxu0  ;;  %v1427_v49 = vpop.f32.mrb[95].mxu1 }
 0x1d0   :  { %v2034_v52 = vpack.c.bf16 %v1425_v58, %v1425_v58  ;;  %v1428_v60 = vadd.f32 %v1427_v49, %v2793_v40 }
 0x1d1   :  { %1742 = vst.msk [vmem:[%s3119_s2 + $0xb8] sm:$0xf] %vm1695_vm1, %v2020_v2  ;;  %1758 = vst.msk [vmem:[%s3119_s2 + $0xf8] sm:$0xf] %vm1695_vm1, %v2036_v27  ;;  %v2021_v36 = vpack.c.bf16 %v1372_v19, %v1372_v19  ;;  %v2037_v44 = vpack.c.bf16 %v1436_v31, %v1436_v31 }
 0x1d2   :  { %1756 = vst.msk [vmem:[%s3119_s2 + $0xf0] sm:$0xf] %vm1695_vm1, %v2034_v52  ;;  %v2035_v48 = vpack.c.bf16 %v1428_v60, %v1428_v60 }
 0x1d3   :  { %1743 = vst.msk [vmem:[%s3119_s2 + $0xbc] sm:$0xf] %vm1695_vm1, %v2021_v36  ;;  %1759 = vst.msk [vmem:[%s3119_s2 + $0xfc] sm:$0xf] %vm1695_vm1, %v2037_v44 }
 0x1d4   :  { %1757 = vst.msk [vmem:[%s3119_s2 + $0xf4] sm:$0xf] %vm1695_vm1, %v2035_v48 }

// kernel: basic_trans_decoder_block.6
= control target key start
LH: loop header
LB: loop body
LE: loop exit
PB: predicated region body
PF: predicated region fallthrough
CT: control target
= control target key end

     0   :  { %s6640_s15 = smov 0   ;;  %s9304_s0 = inlined_call_operand.vmem [shape: bf16[2,256,32], index: 0, kind: input, shape index: {}]   ;;  %s9305_s1 = inlined_call_operand.vmem [shape: bf16[2,16,32], index: 1, kind: input, shape index: {}]   ;;  %s9306_s2 = inlined_call_operand.vmem [shape: bf16[2,16,32], index: 2, kind: input, shape index: {}]   ;;  %s9307_s3 = inlined_call_operand.vmem [shape: bf16[4,256,16], index: 3, kind: input, shape index: {}]   ;;  %s9308_s4 = inlined_call_operand.vmem [shape: bf16[2,256,32], index: 4, kind: output, shape index: {}]  }
   0x1 LB: > { %s4743_s16 = sadd.s32 4294967295, %s6607_s15   ;;  %p4747_p0 = scmp.ge.s32.totalorder %s6607_s15, 1  ;;  %s6607_s15 = sphi %s6640_s15, %s14_s15  }
   0x2   : > { %p182_p1 = scmp.lt.s32.totalorder %s6607_s15, 3 }
   0x4   : > { %p183_p2 = pnand %p4747_p0, %p182_p1 }
   0x6   : > { %186 = sbr.rel (%p183_p2) target bundleno = 1804 (0x70c), region = 36 }
   0xd   : > { %p218_p3 = scmp.lt.s32.totalorder %s4743_s16, 1  ;;  %vm424_vm0 = vcmask 64512   ;;  %v5324_v18 = vld [vmem:[%s9307_s3 + $0x8] sm:$0xff]   ;;  %v5069_v19 = vld [vmem:[%s9307_s3] sm:$0xff]   ;;  %vm669_vm1 = vcmask 130048   ;;  %v5326_v29 = vld [vmem:[%s9307_s3 + $0x18] sm:$0xff]  }
   0xe   : > { %v5074_v20 = vunpack.c.l.bf16 %v5324_v18  ;;  %v5070_v21 = vunpack.c.l.bf16 %v5069_v19  ;;  %v5075_v22 = vunpack.c.h.bf16 %v5324_v18  ;;  %v5071_v24 = vunpack.c.h.bf16 %v5069_v19  ;;  %v5325_v33 = vld [vmem:[%s9307_s3 + $0x10] sm:$0xff]   ;;  %v5328_v51 = vld [vmem:[%s9307_s3 + $0x28] sm:$0xff]   ;;  %v5327_v54 = vld [vmem:[%s9307_s3 + $0x20] sm:$0xff]   ;;  %s6609_s11 = smov 120   ;;  %s6614_s6 = smov 24  }
   0xf   : > { %s9701_s16 = smov (!%p218_p3, %s4743_s16), 1  ;;  %v5082_v38 = vunpack.c.l.bf16 %v5326_v29  ;;  %v5078_v41 = vunpack.c.l.bf16 %v5325_v33  ;;  %v5083_v43 = vunpack.c.h.bf16 %v5326_v29  ;;  %v5079_v44 = vunpack.c.h.bf16 %v5325_v33 }
  0x10   : > { %s5032_s17 = sshll.u32 %s9701_s16, 7  ;;  %s5033_s18 = sshll.u32 %s9701_s16, 3  ;;  %v5090_v58 = vunpack.c.l.bf16 %v5328_v51  ;;  %v5086_v61 = vunpack.c.l.bf16 %v5327_v54  ;;  %v5091_v18 = vunpack.c.h.bf16 %v5328_v51  ;;  %v5087_v19 = vunpack.c.h.bf16 %v5327_v54  ;;  %v5332_v51 = vld [vmem:[%s9307_s3 + $0x48] sm:$0xff]  }
  0x11   : > { %s6657_s21 = scalar_lea.vmem %s9304_s0, %s5032_s17  ;;  %s6664_s24 = scalar_lea.vmem %s9305_s1, %s5033_s18  ;;  %vm4470_vm2 = vcmask 195584   ;;  %vm4631_vm3 = vcmask 257024  }
  0x12   : > { %v6667_v0 = vld [vmem:[%s6664_s24] sm:$0xff]   ;;  %v6679_v3 = vld [vmem:[%s6657_s21 + $0x8] sm:$0xff]   ;;  %v6682_v4 = vld [vmem:[%s6657_s21 + $0x10] sm:$0xff]   ;;  %s6936_s14 = scalar_lea.vmem %s9306_s2, %s5033_s18  ;;  %s6610_s18 = smov 112  }
  0x13   : > { %v6670_v1 = vld [vmem:[%s6657_s21] sm:$0xff]   ;;  %5795 = vmatprep.subr.msk.bf16.mxu0 %vm424_vm0, %v6667_v0  ;;  %v474_v2 = vsel %vm424_vm0, %v6667_v0, 0  ;;  %v6689_v5 = vld [vmem:[%s6657_s21 + $0x18] sm:$0xff]   ;;  %v6699_v7 = vld [vmem:[%s6657_s21 + $0x28] sm:$0xff]   ;;  %s9131_s9 = scalar_lea.vmem %s9308_s4, %s5032_s17 }
  0x14   : > { %5524 = vmatpush3.bf16.xpose.msra.mxu0 %v474_v2  ;;  %5525 = vmatprep.mubr.msk.bf16.mxu0 %vm424_vm0, %v6670_v1  ;;  %v6692_v6 = vld [vmem:[%s6657_s21 + $0x20] sm:$0xff]   ;;  %v6702_v8 = vld [vmem:[%s6657_s21 + $0x30] sm:$0xff]   ;;  %v6709_v9 = vld [vmem:[%s6657_s21 + $0x38] sm:$0xff]  }
  0x15   : > { %v6712_v10 = vld [vmem:[%s6657_s21 + $0x40] sm:$0xff]   ;;  %v6719_v11 = vld [vmem:[%s6657_s21 + $0x48] sm:$0xff]   ;;  %v6722_v12 = vld [vmem:[%s6657_s21 + $0x50] sm:$0xff]  }
  0x16   : > { %v6729_v13 = vld [vmem:[%s6657_s21 + $0x58] sm:$0xff]   ;;  %v6732_v14 = vld [vmem:[%s6657_s21 + $0x60] sm:$0xff]   ;;  %v6739_v15 = vld [vmem:[%s6657_s21 + $0x68] sm:$0xff]  }
  0x17   : > { %v6742_v16 = vld [vmem:[%s6657_s21 + $0x70] sm:$0xff]   ;;  %v6749_v17 = vld [vmem:[%s6657_s21 + $0x78] sm:$0xff]  }
  0x1b   : > { %5526 = vmatmul.mubr.msk.bf16.vlgmr.msra.gmra.mrb[0].mxu0 %vm424_vm0, %v6679_v3 }
  0x1c   : > { %5529 = vmatprep.mubr.msk.bf16.mxu0 %vm424_vm0, %v6682_v4 }
  0x23   : > { %5530 = vmatmul.mubr.msk.bf16.gmra.mrb[4].mxu0 %vm424_vm0, %v6689_v5 }
  0x24   : > { %5533 = vmatprep.mubr.msk.bf16.mxu0 %vm424_vm0, %v6692_v6 }
  0x2b   : > { %5534 = vmatmul.mubr.msk.bf16.gmra.mrb[8].mxu0 %vm424_vm0, %v6699_v7 }
  0x2c   : > { %5537 = vmatprep.mubr.msk.bf16.mxu0 %vm424_vm0, %v6702_v8 }
  0x33   : > { %5538 = vmatmul.mubr.msk.bf16.gmra.mrb[12].mxu0 %vm424_vm0, %v6709_v9 }
  0x34   : > { %5541 = vmatprep.mubr.msk.bf16.mxu0 %vm424_vm0, %v6712_v10 }
  0x3b   : > { %5542 = vmatmul.mubr.msk.bf16.gmra.mrb[16].mxu0 %vm424_vm0, %v6719_v11 }
  0x3c   : > { %5545 = vmatprep.mubr.msk.bf16.mxu0 %vm424_vm0, %v6722_v12 }
  0x43   : > { %5546 = vmatmul.mubr.msk.bf16.gmra.mrb[20].mxu0 %vm424_vm0, %v6729_v13 }
  0x44   : > { %5549 = vmatprep.mubr.msk.bf16.mxu0 %vm424_vm0, %v6732_v14 }
  0x4b   : > { %5550 = vmatmul.mubr.msk.bf16.gmra.mrb[24].mxu0 %vm424_vm0, %v6739_v15 }
  0x4c   : > { %5553 = vmatprep.mubr.msk.bf16.mxu0 %vm424_vm0, %v6742_v16 }
  0x53   : > { %5554 = vmatmul.mubr.msk.bf16.gmra.mrb[28].mxu0 %vm424_vm0, %v6749_v17 }
  0xee   : > { %v5527_v23 = vpop.f32.mrb[0].mxu0 }
  0xef   : > { %v519_v25 = vadd.f32 %v5527_v23, %v5074_v20  ;;  %v510_v26 = vpop.f32.mrb[1].mxu0 }
  0xf0   : > { %v511_v27 = vadd.f32 %v5070_v21, %v510_v26  ;;  %v5528_v28 = vpop.f32.mrb[2].mxu0 }
  0xf1   : > { %v6762_v30 = vmul.f32 0.35355338, %v519_v25  ;;  %v522_v31 = vadd.f32 %v5528_v28, %v5075_v22  ;;  %v513_v32 = vpop.f32.mrb[3].mxu0  ;;  %v5330_v25 = vld [vmem:[%s9307_s3 + $0x38] sm:$0xff]   ;;  %v5329_v28 = vld [vmem:[%s9307_s3 + $0x30] sm:$0xff]  }
  0xf2   : > { %v6767_v34 = vmul.f32 0.35355338, %v511_v27  ;;  %v514_v35 = vadd.f32 %v5071_v24, %v513_v32 }
  0xf3   : > { %v6769_v36 = vmul.f32 0.35355338, %v522_v31  ;;  %v676_v37 = vsel %vm669_vm1, %v6762_v30, -inf }
  0xf4   : > { %v6773_v39 = vmul.f32 0.35355338, %v514_v35  ;;  %677 = vmax.xlane.f32.xlu1 %v676_v37  ;;  %v670_v40 = vsel %vm669_vm1, %v6767_v34, -inf  ;;  %v5098_v35 = vunpack.c.l.bf16 %v5330_v25 }
  0xf5   : > { %671 = vmax.xlane.f32.xlu0 %v670_v40  ;;  %v679_v47 = vsel %vm669_vm1, %v6769_v36, -inf  ;;  %v5094_v40 = vunpack.c.l.bf16 %v5329_v28 }
  0xf6   : > { %v5531_v42 = vpop.f32.mrb[4].mxu0  ;;  %v673_v50 = vsel %vm669_vm1, %v6773_v39, -inf }
  0xf7   : > { %v535_v45 = vadd.f32 %v5531_v42, %v5082_v38  ;;  %v526_v46 = vpop.f32.mrb[5].mxu0 }
  0xf8   : > { %v527_v48 = vadd.f32 %v5078_v41, %v526_v46  ;;  %680 = vmax.xlane.f32.xlu1 %v679_v47  ;;  %v5532_v49 = vpop.f32.mrb[6].mxu0 }
  0xf9   : > { %v6784_v52 = vmul.f32 0.35355338, %v535_v45  ;;  %v529_v53 = vpop.f32.mrb[7].mxu0  ;;  %674 = vmax.xlane.f32.xlu0 %v673_v50  ;;  %v538_v55 = vadd.f32 %v5532_v49, %v5083_v43  ;;  %v5095_v45 = vunpack.c.h.bf16 %v5329_v28 }
  0xfa   : > { %v530_v56 = vadd.f32 %v5079_v44, %v529_v53  ;;  %v6791_v59 = vmul.f32 0.35355338, %v527_v48  ;;  %v5099_v44 = vunpack.c.h.bf16 %v5330_v25 }
  0xfb   : > { %v688_v57 = vsel %vm669_vm1, %v6784_v52, -inf  ;;  %v6795_v62 = vmul.f32 0.35355338, %v538_v55  ;;  %v5331_v55 = vld [vmem:[%s9307_s3 + $0x40] sm:$0xff]  }
  0xfc   : > { %v6793_v60 = vmul.f32 0.35355338, %v530_v56  ;;  %v682_v24 = vsel %vm669_vm1, %v6791_v59, -inf }
  0xfd   : > { %689 = vmax.xlane.f32.xlu0 %v688_v57  ;;  %v691_v32 = vsel %vm669_vm1, %v6795_v62, -inf }
  0xfe   : > { %v5535_v63 = vpop.f32.mrb[8].mxu0  ;;  %v685_v2 = vsel %vm669_vm1, %v6793_v60, -inf }
  0xff   : > { %v551_v20 = vadd.f32 %v5535_v63, %v5090_v58  ;;  %v542_v21 = vpop.f32.mrb[9].mxu0  ;;  %686 = vmax.xlane.f32.xlu1 %v685_v2  ;;  %v5106_v63 = vunpack.c.l.bf16 %v5332_v51 }
 0x100   : > { %v543_v22 = vadd.f32 %v5086_v61, %v542_v21  ;;  %v5536_v23 = vpop.f32.mrb[10].mxu0 }
 0x101   : > { %v6804_v26 = vmul.f32 0.35355338, %v551_v20  ;;  %v545_v27 = vpop.f32.mrb[11].mxu0  ;;  %683 = vmax.xlane.f32.xlu0 %v682_v24  ;;  %v554_v29 = vadd.f32 %v5536_v23, %v5091_v18  ;;  %v5107_v23 = vunpack.c.h.bf16 %v5332_v51  ;;  %v5103_v24 = vunpack.c.h.bf16 %v5331_v55 }
 0x102   : > { %v546_v31 = vadd.f32 %v5087_v19, %v545_v27  ;;  %v6813_v37 = vmul.f32 0.35355338, %v543_v22  ;;  %v5102_v19 = vunpack.c.l.bf16 %v5331_v55 }
 0x103   : > { %692 = vmax.xlane.f32.xlu1 %v691_v32  ;;  %v700_v33 = vsel %vm669_vm1, %v6804_v26, -inf  ;;  %v6817_v41 = vmul.f32 0.35355338, %v554_v29  ;;  %v5334_v32 = vld [vmem:[%s9307_s3 + $0x58] sm:$0xff]  }
 0x104   : > { %v6815_v38 = vmul.f32 0.35355338, %v546_v31  ;;  %v694_v50 = vsel %vm669_vm1, %v6813_v37, -inf  ;;  %v5115_v55 = vunpack.c.h.bf16 %v5334_v32 }
 0x105   : > { %701 = vmax.xlane.f32.xlu0 %v700_v33  ;;  %v703_v58 = vsel %vm669_vm1, %v6817_v41, -inf }
 0x106   : > { %v5539_v42 = vpop.f32.mrb[12].mxu0  ;;  %v697_v43 = vsel %vm669_vm1, %v6815_v38, -inf }
 0x107   : > { %v567_v46 = vadd.f32 %v5539_v42, %v5098_v35  ;;  %v558_v47 = vpop.f32.mrb[13].mxu0  ;;  %698 = vmax.xlane.f32.xlu1 %v697_v43 }
 0x108   : > { %v559_v48 = vadd.f32 %v5094_v40, %v558_v47  ;;  %v5540_v49 = vpop.f32.mrb[14].mxu0  ;;  %v5333_v40 = vld [vmem:[%s9307_s3 + $0x50] sm:$0xff]  }
 0x109   : > { %v6826_v53 = vmul.f32 0.35355338, %v567_v46  ;;  %v561_v54 = vpop.f32.mrb[15].mxu0  ;;  %695 = vmax.xlane.f32.xlu0 %v694_v50  ;;  %v570_v56 = vadd.f32 %v5540_v49, %v5099_v44  ;;  %v5114_v46 = vunpack.c.l.bf16 %v5334_v32  ;;  %v5110_v49 = vunpack.c.l.bf16 %v5333_v40 }
 0x10a   : > { %v562_v57 = vadd.f32 %v5095_v45, %v561_v54  ;;  %v6835_v2 = vmul.f32 0.35355338, %v559_v48 }
 0x10b   : > { %704 = vmax.xlane.f32.xlu1 %v703_v58  ;;  %v712_v61 = vsel %vm669_vm1, %v6826_v53, -inf  ;;  %v6839_v20 = vmul.f32 0.35355338, %v570_v56  ;;  %v5111_v56 = vunpack.c.h.bf16 %v5333_v40 }
 0x10c   : > { %v6837_v18 = vmul.f32 0.35355338, %v562_v57  ;;  %v706_v31 = vsel %vm669_vm1, %v6835_v2, -inf }
 0x10d   : > { %713 = vmax.xlane.f32.xlu0 %v712_v61  ;;  %v715_v44 = vsel %vm669_vm1, %v6839_v20, -inf }
 0x10e   : > { %v5543_v21 = vpop.f32.mrb[16].mxu0  ;;  %v709_v22 = vsel %vm669_vm1, %v6837_v18, -inf }
 0x10f   : > { %v583_v25 = vadd.f32 %v5543_v21, %v5106_v63  ;;  %v574_v27 = vpop.f32.mrb[17].mxu0  ;;  %710 = vmax.xlane.f32.xlu1 %v709_v22  ;;  %v5336_v21 = vld [vmem:[%s9307_s3 + $0x68] sm:$0xff]  }
 0x110   : > { %v575_v28 = vadd.f32 %v5102_v19, %v574_v27  ;;  %v5544_v29 = vpop.f32.mrb[18].mxu0 }
 0x111   : > { %v6848_v33 = vmul.f32 0.35355338, %v583_v25  ;;  %v577_v35 = vpop.f32.mrb[19].mxu0  ;;  %707 = vmax.xlane.f32.xlu0 %v706_v31  ;;  %v586_v42 = vadd.f32 %v5544_v29, %v5107_v23  ;;  %v5122_v31 = vunpack.c.l.bf16 %v5336_v21 }
 0x112   : > { %v578_v43 = vadd.f32 %v5103_v24, %v577_v35  ;;  %v6857_v47 = vmul.f32 0.35355338, %v575_v28  ;;  %v5335_v24 = vld [vmem:[%s9307_s3 + $0x60] sm:$0xff]  }
 0x113   : > { %716 = vmax.xlane.f32.xlu1 %v715_v44  ;;  %v724_v45 = vsel %vm669_vm1, %v6848_v33, -inf  ;;  %v6861_v50 = vmul.f32 0.35355338, %v586_v42  ;;  %v5118_v40 = vunpack.c.l.bf16 %v5335_v24 }
 0x114   : > { %v6859_v48 = vmul.f32 0.35355338, %v578_v43  ;;  %v718_v19 = vsel %vm669_vm1, %v6857_v47, -inf }
 0x115   : > { %725 = vmax.xlane.f32.xlu0 %v724_v45  ;;  %v727_v28 = vsel %vm669_vm1, %v6861_v50, -inf  ;;  %v5123_v45 = vunpack.c.h.bf16 %v5336_v21 }
 0x116   : > { %v5547_v51 = vpop.f32.mrb[20].mxu0  ;;  %v721_v54 = vsel %vm669_vm1, %v6859_v48, -inf }
 0x117   : > { %v599_v57 = vadd.f32 %v5547_v51, %v5114_v46  ;;  %v590_v58 = vpop.f32.mrb[21].mxu0  ;;  %722 = vmax.xlane.f32.xlu1 %v721_v54  ;;  %v5119_v46 = vunpack.c.h.bf16 %v5335_v24 }
 0x118   : > { %v591_v61 = vadd.f32 %v5110_v49, %v590_v58  ;;  %v5548_v63 = vpop.f32.mrb[22].mxu0 }
 0x119   : > { %v6870_v22 = vmul.f32 0.35355338, %v599_v57  ;;  %v593_v23 = vpop.f32.mrb[23].mxu0  ;;  %719 = vmax.xlane.f32.xlu0 %v718_v19  ;;  %v602_v25 = vadd.f32 %v5548_v63, %v5115_v55  ;;  %v5338_v57 = vld [vmem:[%s9307_s3 + $0x78] sm:$0xff]   ;;  %v5337_v63 = vld [vmem:[%s9307_s3 + $0x70] sm:$0xff]  }
 0x11a   : > { %v594_v27 = vadd.f32 %v5111_v56, %v593_v23  ;;  %v6879_v32 = vmul.f32 0.35355338, %v591_v61 }
 0x11b   : > { %728 = vmax.xlane.f32.xlu1 %v727_v28  ;;  %v736_v29 = vsel %vm669_vm1, %v6870_v22, -inf  ;;  %v6883_v42 = vmul.f32 0.35355338, %v602_v25  ;;  %v5130_v25 = vunpack.c.l.bf16 %v5338_v57 }
 0x11c   : > { %v6881_v35 = vmul.f32 0.35355338, %v594_v27  ;;  %v730_v56 = vsel %vm669_vm1, %v6879_v32, -inf }
 0x11d   : > { %737 = vmax.xlane.f32.xlu0 %v736_v29  ;;  %v739_v23 = vsel %vm669_vm1, %v6883_v42, -inf  ;;  %v5126_v29 = vunpack.c.l.bf16 %v5337_v63 }
 0x11e   : > { %v5551_v43 = vpop.f32.mrb[24].mxu0  ;;  %v733_v44 = vsel %vm669_vm1, %v6881_v35, -inf }
 0x11f   : > { %v615_v49 = vadd.f32 %v5551_v43, %v5122_v31  ;;  %v606_v51 = vpop.f32.mrb[25].mxu0  ;;  %734 = vmax.xlane.f32.xlu1 %v733_v44  ;;  %v5131_v44 = vunpack.c.h.bf16 %v5338_v57 }
 0x120   : > { %v607_v54 = vadd.f32 %v5118_v40, %v606_v51  ;;  %v5552_v55 = vpop.f32.mrb[26].mxu0 }
 0x121   : > { %v6892_v58 = vmul.f32 0.35355338, %v615_v49  ;;  %v609_v61 = vpop.f32.mrb[27].mxu0  ;;  %731 = vmax.xlane.f32.xlu0 %v730_v56  ;;  %v618_v19 = vadd.f32 %v5552_v55, %v5123_v45  ;;  %v5127_v45 = vunpack.c.h.bf16 %v5337_v63 }
 0x122   : > { %v610_v21 = vadd.f32 %v5119_v46, %v609_v61  ;;  %v6901_v27 = vmul.f32 0.35355338, %v607_v54 }
 0x123   : > { %740 = vmax.xlane.f32.xlu1 %v739_v23  ;;  %v748_v24 = vsel %vm669_vm1, %v6892_v58, -inf  ;;  %v6905_v31 = vmul.f32 0.35355338, %v618_v19 }
 0x124   : > { %v6903_v28 = vmul.f32 0.35355338, %v610_v21  ;;  %v742_v54 = vsel %vm669_vm1, %v6901_v27, -inf }
 0x125   : > { %749 = vmax.xlane.f32.xlu0 %v748_v24  ;;  %v751_v23 = vsel %vm669_vm1, %v6905_v31, -inf }
 0x126   : > { %v5555_v40 = vpop.f32.mrb[28].mxu0  ;;  %v745_v43 = vsel %vm669_vm1, %v6903_v28, -inf }
 0x127   : > { %v631_v46 = vadd.f32 %v5555_v40, %v5130_v25  ;;  %v622_v49 = vpop.f32.mrb[29].mxu0  ;;  %746 = vmax.xlane.f32.xlu1 %v745_v43 }
 0x128   : > { %v623_v51 = vadd.f32 %v5126_v29, %v622_v49  ;;  %v5556_v55 = vpop.f32.mrb[30].mxu0 }
 0x129   : > { %v6911_v56 = vmul.f32 0.35355338, %v631_v46  ;;  %v625_v61 = vpop.f32.mrb[31].mxu0  ;;  %743 = vmax.xlane.f32.xlu0 %v742_v54  ;;  %v634_v19 = vadd.f32 %v5556_v55, %v5131_v44  ;;  %v6939_v44 = vld [vmem:[%s6936_s14] sm:$0xff]  }
 0x12a   : > { %v626_v21 = vadd.f32 %v5127_v45, %v625_v61  ;;  %v6917_v63 = vmul.f32 0.35355338, %v623_v51  ;;  %5557 = vmatprep.subr.bf16.mxu1 %v6939_v44 }
 0x12b   : > { %752 = vmax.xlane.f32.xlu1 %v751_v23  ;;  %v760_v57 = vsel %vm669_vm1, %v6911_v56, -inf  ;;  %v6921_v25 = vmul.f32 0.35355338, %v634_v19  ;;  %5558 = vmatpush3.bf16.msra.mxu1 %v6939_v44 }
 0x12c   : > { %v6919_v24 = vmul.f32 0.35355338, %v626_v21  ;;  %v754_v40 = vsel %vm669_vm1, %v6917_v63, -inf }
 0x12d   : > { %761 = vmax.xlane.f32.xlu0 %v760_v57  ;;  %v763_v43 = vsel %vm669_vm1, %v6921_v25, -inf }
 0x12e   : > { %v757_v29 = vsel %vm669_vm1, %v6919_v24, -inf }
 0x12f   : > { %758 = vmax.xlane.f32.xlu1 %v757_v29 }
 0x131   : > { %755 = vmax.xlane.f32.xlu0 %v754_v40 }
 0x133   : > { %764 = vmax.xlane.f32.xlu1 %v763_v43 }
 0x147   : > { %1350 = vrot.lane.b32.xlu0 %v6667_v0, %s6609_s11 }
 0x181   : > { %v678_v45 = vpop.xlane.xlu1 %677 }
 0x182   : > { %v768_v46 = vsub.f32 %v6762_v30, %v678_v45  ;;  %v672_v49 = vpop.xlane.xlu0 %671 }
 0x183   : > { %v766_v51 = vsub.f32 %v6767_v34, %v672_v49 }
 0x184   : > { %v802_v0 = vmul.f32 1.442695, %v768_v46 }
 0x185   : > { %v798_v55 = vmul.f32 1.442695, %v766_v51  ;;  %v681_v54 = vpop.xlane.xlu1 %680 }
 0x186   : > { %6071 = vpow2.f32 %v802_v0  ;;  %v769_v61 = vsub.f32 %v6769_v36, %v681_v54  ;;  %v675_v19 = vpop.xlane.xlu0 %674 }
 0x187   : > { %v767_v21 = vsub.f32 %v6773_v39, %v675_v19  ;;  %6073 = vpow2.f32 %v798_v55 }
 0x188   : > { %v804_v23 = vmul.f32 1.442695, %v769_v61 }
 0x189   : > { %v800_v57 = vmul.f32 1.442695, %v767_v21 }
 0x18a   : > { %6075 = vpow2.f32 %v804_v23  ;;  %v690_v29 = vpop.xlane.xlu0 %689 }
 0x18b   : > { %v772_v40 = vsub.f32 %v6784_v52, %v690_v29  ;;  %6077 = vpow2.f32 %v800_v57 }
 0x18c   : > { %v687_v30 = vpop.xlane.xlu1 %686 }
 0x18d   : > { %v810_v43 = vmul.f32 1.442695, %v772_v40  ;;  %v771_v34 = vsub.f32 %v6793_v60, %v687_v30 }
 0x18e   : > { %v684_v45 = vpop.xlane.xlu0 %683 }
 0x18f   : > { %6079 = vpow2.f32 %v810_v43  ;;  %v770_v46 = vsub.f32 %v6791_v59, %v684_v45  ;;  %v808_v52 = vmul.f32 1.442695, %v771_v34 }
 0x190   : > { %v6950_v36 = vpop.eup %6071  ;;  %v693_v49 = vpop.xlane.xlu1 %692 }
 0x191   : > { %v806_v39 = vmul.f32 1.442695, %v770_v46  ;;  %v773_v51 = vsub.f32 %v6795_v62, %v693_v49  ;;  %v868_v0 = vsel %vm669_vm1, %v6950_v36, 0.0  ;;  %v6955_v55 = vpop.eup %6073 }
 0x192   : > { %869 = vadd.xlane.f32.xlu0 %v868_v0  ;;  %v702_v54 = vpop.xlane.xlu0 %701  ;;  %v862_v23 = vsel %vm669_vm1, %v6955_v55, 0.0 }
 0x193   : > { %6081 = vpow2.f32 %v806_v39  ;;  %v812_v60 = vmul.f32 1.442695, %v773_v51  ;;  %v776_v61 = vsub.f32 %v6804_v26, %v702_v54 }
 0x194   : > { %v6958_v19 = vpop.eup %6075  ;;  %v699_v59 = vpop.xlane.xlu1 %698 }
 0x195   : > { %6083 = vpow2.f32 %v812_v60  ;;  %v818_v21 = vmul.f32 1.442695, %v776_v61  ;;  %v871_v62 = vsel %vm669_vm1, %v6958_v19, 0.0  ;;  %v6964_v57 = vpop.eup %6077  ;;  %v775_v29 = vsub.f32 %v6815_v38, %v699_v59 }
 0x196   : > { %6085 = vpow2.f32 %v808_v52  ;;  %872 = vadd.xlane.f32.xlu1 %v871_v62  ;;  %863 = vadd.xlane.f32.xlu0 %v862_v23  ;;  %v696_v40 = vpop.xlane.xlu0 %695  ;;  %v865_v46 = vsel %vm669_vm1, %v6964_v57, 0.0 }
 0x197   : > { %6087 = vpow2.f32 %v818_v21  ;;  %v774_v26 = vsub.f32 %v6813_v37, %v696_v40  ;;  %v816_v49 = vmul.f32 1.442695, %v775_v29 }
 0x198   : > { %v705_v30 = vpop.xlane.xlu1 %704 }
 0x199   : > { %v6968_v43 = vpop.eup %6079  ;;  %v814_v34 = vmul.f32 1.442695, %v774_v26  ;;  %v777_v45 = vsub.f32 %v6817_v41, %v705_v30 }
 0x19a   : > { %866 = vadd.xlane.f32.xlu1 %v865_v46  ;;  %v714_v39 = vpop.xlane.xlu0 %713  ;;  %v880_v38 = vsel %vm669_vm1, %v6968_v43, 0.0 }
 0x19b   : > { %6089 = vpow2.f32 %v814_v34  ;;  %v820_v51 = vmul.f32 1.442695, %v777_v45  ;;  %v780_v0 = vsub.f32 %v6826_v53, %v714_v39  ;;  %881 = vadd.xlane.f32.xlu0 %v880_v38 }
 0x19c   : > { %v711_v37 = vpop.xlane.xlu1 %710 }
 0x19d   : > { %v6976_v52 = vpop.eup %6081  ;;  %6091 = vpow2.f32 %v820_v51  ;;  %v826_v54 = vmul.f32 1.442695, %v780_v0  ;;  %v779_v41 = vsub.f32 %v6837_v18, %v711_v37 }
 0x19e   : > { %6093 = vpow2.f32 %v816_v49  ;;  %v708_v60 = vpop.xlane.xlu0 %707  ;;  %v874_v61 = vsel %vm669_vm1, %v6976_v52, 0.0 }
 0x19f   : > { %v6981_v59 = vpop.eup %6083  ;;  %6095 = vpow2.f32 %v826_v54  ;;  %v778_v21 = vsub.f32 %v6835_v2, %v708_v60  ;;  %875 = vadd.xlane.f32.xlu0 %v874_v61  ;;  %v824_v26 = vmul.f32 1.442695, %v779_v41 }
 0x1a0   : > { %v6984_v53 = vpop.eup %6085  ;;  %v717_v62 = vpop.xlane.xlu1 %716  ;;  %v883_v23 = vsel %vm669_vm1, %v6981_v59, 0.0 }
 0x1a1   : > { %v6988_v29 = vpop.eup %6087  ;;  %v822_v40 = vmul.f32 1.442695, %v778_v21  ;;  %v781_v18 = vsub.f32 %v6839_v20, %v717_v62  ;;  %884 = vadd.xlane.f32.xlu1 %v883_v23  ;;  %v877_v49 = vsel %vm669_vm1, %v6984_v53, 0.0 }
 0x1a2   : > { %v726_v30 = vpop.xlane.xlu0 %725  ;;  %v892_v34 = vsel %vm669_vm1, %v6988_v29, 0.0 }
 0x1a3   : > { %6097 = vpow2.f32 %v822_v40  ;;  %v828_v2 = vmul.f32 1.442695, %v781_v18  ;;  %v784_v45 = vsub.f32 %v6848_v33, %v726_v30  ;;  %893 = vadd.xlane.f32.xlu0 %v892_v34 }
 0x1a4   : > { %v723_v46 = vpop.xlane.xlu1 %722 }
 0x1a5   : > { %v6996_v39 = vpop.eup %6089  ;;  %6099 = vpow2.f32 %v828_v2  ;;  %v834_v38 = vmul.f32 1.442695, %v784_v45  ;;  %878 = vadd.xlane.f32.xlu1 %v877_v49  ;;  %v783_v20 = vsub.f32 %v6859_v48, %v723_v46 }
 0x1a6   : > { %6101 = vpow2.f32 %v824_v26  ;;  %v720_v51 = vpop.xlane.xlu0 %719  ;;  %v886_v0 = vsel %vm669_vm1, %v6996_v39, 0.0 }
 0x1a7   : > { %v7001_v37 = vpop.eup %6091  ;;  %6103 = vpow2.f32 %v834_v38  ;;  %v782_v33 = vsub.f32 %v6857_v47, %v720_v51  ;;  %887 = vadd.xlane.f32.xlu0 %v886_v0  ;;  %v832_v62 = vmul.f32 1.442695, %v783_v20 }
 0x1a8   : > { %v7004_v54 = vpop.eup %6093  ;;  %v729_v41 = vpop.xlane.xlu1 %728  ;;  %v895_v60 = vsel %vm669_vm1, %v7001_v37, 0.0 }
 0x1a9   : > { %v7008_v61 = vpop.eup %6095  ;;  %v830_v21 = vmul.f32 1.442695, %v782_v33  ;;  %v785_v48 = vsub.f32 %v6861_v50, %v729_v41  ;;  %896 = vadd.xlane.f32.xlu1 %v895_v60  ;;  %v889_v30 = vsel %vm669_vm1, %v7004_v54, 0.0 }
 0x1aa   : > { %v738_v23 = vpop.xlane.xlu0 %737  ;;  %v904_v40 = vsel %vm669_vm1, %v7008_v61, 0.0 }
 0x1ab   : > { %6105 = vpow2.f32 %v830_v21  ;;  %v836_v47 = vmul.f32 1.442695, %v785_v48  ;;  %v788_v18 = vsub.f32 %v6870_v22, %v738_v23  ;;  %905 = vadd.xlane.f32.xlu0 %v904_v40 }
 0x1ac   : > { %v735_v26 = vpop.xlane.xlu1 %734 }
 0x1ad   : > { %v7016_v34 = vpop.eup %6097  ;;  %6107 = vpow2.f32 %v836_v47  ;;  %v842_v2 = vmul.f32 1.442695, %v788_v18  ;;  %890 = vadd.xlane.f32.xlu1 %v889_v30  ;;  %v787_v50 = vsub.f32 %v6881_v35, %v735_v26 }
 0x1ae   : > { %6109 = vpow2.f32 %v832_v62  ;;  %v732_v45 = vpop.xlane.xlu0 %731  ;;  %v898_v46 = vsel %vm669_vm1, %v7016_v34, 0.0 }
 0x1af   : > { %v7021_v49 = vpop.eup %6099  ;;  %6111 = vpow2.f32 %v842_v2  ;;  %v786_v22 = vsub.f32 %v6879_v32, %v732_v45  ;;  %899 = vadd.xlane.f32.xlu0 %v898_v46  ;;  %v840_v41 = vmul.f32 1.442695, %v787_v50 }
 0x1b0   : > { %v7024_v38 = vpop.eup %6101  ;;  %v741_v20 = vpop.xlane.xlu1 %740  ;;  %v907_v51 = vsel %vm669_vm1, %v7021_v49, 0.0 }
 0x1b1   : > { %v7028_v0 = vpop.eup %6103  ;;  %v838_v33 = vmul.f32 1.442695, %v786_v22  ;;  %v789_v35 = vsub.f32 %v6883_v42, %v741_v20  ;;  %908 = vadd.xlane.f32.xlu1 %v907_v51  ;;  %v901_v23 = vsel %vm669_vm1, %v7024_v38, 0.0 }
 0x1b2   : > { %v750_v60 = vpop.xlane.xlu0 %749  ;;  %v916_v21 = vsel %vm669_vm1, %v7028_v0, 0.0 }
 0x1b3   : > { %6113 = vpow2.f32 %v838_v33  ;;  %v844_v32 = vmul.f32 1.442695, %v789_v35  ;;  %v792_v48 = vsub.f32 %v6892_v58, %v750_v60  ;;  %917 = vadd.xlane.f32.xlu0 %v916_v21 }
 0x1b4   : > { %v747_v62 = vpop.xlane.xlu1 %746 }
 0x1b5   : > { %v7036_v40 = vpop.eup %6105  ;;  %6115 = vpow2.f32 %v844_v32  ;;  %v850_v47 = vmul.f32 1.442695, %v792_v48  ;;  %902 = vadd.xlane.f32.xlu1 %v901_v23  ;;  %v791_v42 = vsub.f32 %v6903_v28, %v747_v62 }
 0x1b6   : > { %6117 = vpow2.f32 %v840_v41  ;;  %v744_v18 = vpop.xlane.xlu0 %743  ;;  %v910_v26 = vsel %vm669_vm1, %v7036_v40, 0.0 }
 0x1b7   : > { %v7041_v30 = vpop.eup %6107  ;;  %6119 = vpow2.f32 %v850_v47  ;;  %v790_v58 = vsub.f32 %v6901_v27, %v744_v18  ;;  %911 = vadd.xlane.f32.xlu0 %v910_v26  ;;  %v848_v20 = vmul.f32 1.442695, %v791_v42 }
 0x1b8   : > { %v7044_v2 = vpop.eup %6109  ;;  %v753_v50 = vpop.xlane.xlu1 %752  ;;  %v919_v45 = vsel %vm669_vm1, %v7041_v30, 0.0 }
 0x1b9   : > { %v7048_v46 = vpop.eup %6111  ;;  %v846_v22 = vmul.f32 1.442695, %v790_v58  ;;  %v793_v28 = vsub.f32 %v6905_v31, %v753_v50  ;;  %920 = vadd.xlane.f32.xlu1 %v919_v45  ;;  %v913_v60 = vsel %vm669_vm1, %v7044_v2, 0.0 }
 0x1ba   : > { %v762_v51 = vpop.xlane.xlu0 %761  ;;  %v928_v33 = vsel %vm669_vm1, %v7048_v46, 0.0 }
 0x1bb   : > { %6121 = vpow2.f32 %v846_v22  ;;  %v852_v27 = vmul.f32 1.442695, %v793_v28  ;;  %v796_v35 = vsub.f32 %v6911_v56, %v762_v51  ;;  %929 = vadd.xlane.f32.xlu0 %v928_v33 }
 0x1bc   : > { %v759_v41 = vpop.xlane.xlu1 %758 }
 0x1bd   : > { %v7056_v21 = vpop.eup %6113  ;;  %6123 = vpow2.f32 %v852_v27  ;;  %v858_v32 = vmul.f32 1.442695, %v796_v35  ;;  %914 = vadd.xlane.f32.xlu1 %v913_v60  ;;  %v795_v56 = vsub.f32 %v6919_v24, %v759_v41 }
 0x1be   : > { %6125 = vpow2.f32 %v848_v20  ;;  %v756_v31 = vpop.xlane.xlu0 %755  ;;  %v922_v48 = vsel %vm669_vm1, %v7056_v21, 0.0 }
 0x1bf   : > { %v7060_v62 = vpop.eup %6115  ;;  %6127 = vpow2.f32 %v858_v32  ;;  %v794_v23 = vsub.f32 %v6917_v63, %v756_v31  ;;  %923 = vadd.xlane.f32.xlu0 %v922_v48  ;;  %v856_v24 = vmul.f32 1.442695, %v795_v56 }
 0x1c0   : > { %v7064_v47 = vpop.eup %6117  ;;  %v765_v42 = vpop.xlane.xlu1 %764  ;;  %v931_v18 = vsel %vm669_vm1, %v7060_v62, 0.0 }
 0x1c1   : > { %v7068_v26 = vpop.eup %6119  ;;  %v854_v58 = vmul.f32 1.442695, %v794_v23  ;;  %v797_v50 = vsub.f32 %v6921_v25, %v765_v42  ;;  %932 = vadd.xlane.f32.xlu1 %v931_v18  ;;  %v925_v28 = vsel %vm669_vm1, %v7064_v47, 0.0  ;;  %v6585_v18 = vld [vmem:[%s6657_s21 + $0x8] sm:$0xff]  }
 0x1c2   : > { %v940_v45 = vsel %vm669_vm1, %v7068_v26, 0.0  ;;  %v7073_v22 = vpop.permute.xlu0 %1350 }
 0x1c3   : > { %6129 = vpow2.f32 %v854_v58  ;;  %v860_v63 = vmul.f32 1.442695, %v797_v50  ;;  %941 = vadd.xlane.f32.xlu0 %v940_v45  ;;  %5796 = vmatprep.subr.msk.bf16.mxu1 %vm424_vm0, %v7073_v22  ;;  %v6588_v58 = vld [vmem:[%s6657_s21 + $0x38] sm:$0xff]  }
 0x1c5   : > { %v7079_v20 = vpop.eup %6121  ;;  %6131 = vpow2.f32 %v860_v63  ;;  %926 = vadd.xlane.f32.xlu1 %v925_v28 }
 0x1c6   : > { %v934_v25 = vsel %vm669_vm1, %v7079_v20, 0.0  ;;  %6133 = vpow2.f32 %v856_v24  ;;  %v6589_v24 = vld [vmem:[%s6657_s21 + $0x10] sm:$0xff]  }
 0x1c7   : > { %v7083_v51 = vpop.eup %6123  ;;  %935 = vadd.xlane.f32.xlu0 %v934_v25 }
 0x1c8   : > { %v7085_v33 = vpop.eup %6125  ;;  %v943_v27 = vsel %vm669_vm1, %v7083_v51, 0.0 }
 0x1c9   : > { %v7089_v35 = vpop.eup %6127  ;;  %944 = vadd.xlane.f32.xlu1 %v943_v27  ;;  %v937_v60 = vsel %vm669_vm1, %v7085_v33, 0.0 }
 0x1ca   : > { %v952_v41 = vsel %vm669_vm1, %v7089_v35, 0.0 }
 0x1cb   : > { %953 = vadd.xlane.f32.xlu0 %v952_v41 }
 0x1cd   : > { %v7095_v32 = vpop.eup %6129  ;;  %938 = vadd.xlane.f32.xlu1 %v937_v60  ;;  %v6590_v60 = vld [vmem:[%s6657_s21 + $0x48] sm:$0xff]  }
 0x1ce   : > { %v946_v31 = vsel %vm669_vm1, %v7095_v32, 0.0 }
 0x1cf   : > { %v7099_v48 = vpop.eup %6131  ;;  %947 = vadd.xlane.f32.xlu0 %v946_v31 }
 0x1d0   : > { %v955_v56 = vsel %vm669_vm1, %v7099_v48, 0.0  ;;  %v7103_v23 = vpop.eup %6133 }
 0x1d1   : > { %956 = vadd.xlane.f32.xlu1 %v955_v56  ;;  %v949_v42 = vsel %vm669_vm1, %v7103_v23, 0.0 }
 0x1d5   : > { %950 = vadd.xlane.f32.xlu1 %v949_v42 }
 0x1e5   : > { %1324 = vrot.lane.b32.xlu0 %v6689_v5, %s6609_s11 }
 0x1e6   : > { %1318 = vrot.lane.b32.xlu1 %v6670_v1, %s6609_s11  ;;  %v6583_v1 = vld [vmem:[%s6657_s21] sm:$0xff]  }
 0x1e9   : > { %1328 = vrot.lane.b32.xlu0 %v6699_v7, %s6609_s11 }
 0x1ea   : > { %1320 = vrot.lane.b32.xlu1 %v6679_v3, %s6609_s11  ;;  %v6584_v3 = vld [vmem:[%s6664_s24] sm:$0xff]   ;;  %s6611_s24 = smov 104  }
 0x1ed   : > { %1332 = vrot.lane.b32.xlu0 %v6709_v9, %s6609_s11 }
 0x1ee   : > { %1322 = vrot.lane.b32.xlu1 %v6682_v4, %s6609_s11 }
 0x1f1   : > { %1336 = vrot.lane.b32.xlu0 %v6719_v11, %s6609_s11 }
 0x1f2   : > { %1326 = vrot.lane.b32.xlu1 %v6692_v6, %s6609_s11 }
 0x1f5   : > { %1340 = vrot.lane.b32.xlu0 %v6729_v13, %s6609_s11 }
 0x1f6   : > { %1330 = vrot.lane.b32.xlu1 %v6702_v8, %s6609_s11 }
 0x1f9   : > { %1344 = vrot.lane.b32.xlu0 %v6739_v15, %s6609_s11 }
 0x1fa   : > { %1334 = vrot.lane.b32.xlu1 %v6712_v10, %s6609_s11 }
 0x1fd   : > { %1348 = vrot.lane.b32.xlu0 %v6749_v17, %s6609_s11 }
 0x1fe   : > { %1338 = vrot.lane.b32.xlu1 %v6722_v12, %s6609_s11 }
 0x201   : > { %2241 = vrot.lane.b32.xlu0 %v6583_v1, %s6610_s18 }
 0x202   : > { %1342 = vrot.lane.b32.xlu1 %v6732_v14, %s6609_s11 }
 0x205   : > { %2245 = vrot.lane.b32.xlu0 %v6682_v4, %s6610_s18 }
 0x206   : > { %1346 = vrot.lane.b32.xlu1 %v6742_v16, %s6609_s11 }
 0x209   : > { %2249 = vrot.lane.b32.xlu0 %v6692_v6, %s6610_s18 }
 0x20a   : > { %2273 = vrot.lane.b32.xlu1 %v6584_v3, %s6610_s18 }
 0x20d   : > { %2253 = vrot.lane.b32.xlu0 %v6702_v8, %s6610_s18 }
 0x20e   : > { %2243 = vrot.lane.b32.xlu1 %v6585_v18, %s6610_s18 }
 0x211   : > { %2257 = vrot.lane.b32.xlu0 %v6712_v10, %s6610_s18 }
 0x212   : > { %2247 = vrot.lane.b32.xlu1 %v6689_v5, %s6610_s18 }
 0x215   : > { %2261 = vrot.lane.b32.xlu0 %v6722_v12, %s6610_s18 }
 0x216   : > { %2251 = vrot.lane.b32.xlu1 %v6699_v7, %s6610_s18 }
 0x219   : > { %2265 = vrot.lane.b32.xlu0 %v6732_v14, %s6610_s18 }
 0x21a   : > { %2255 = vrot.lane.b32.xlu1 %v6709_v9, %s6610_s18  ;;  %v6586_v9 = vld [vmem:[%s6657_s21 + $0x18] sm:$0xff]  }
 0x21d   : > { %2269 = vrot.lane.b32.xlu0 %v6742_v16, %s6610_s18 }
 0x21e   : > { %2259 = vrot.lane.b32.xlu1 %v6719_v11, %s6610_s18  ;;  %v6587_v11 = vld [vmem:[%s6657_s21 + $0x28] sm:$0xff]  }
 0x21f   : > { %v870_v4 = vpop.xlane.xlu0 %869 }
 0x221   : > { %3196 = vrot.lane.b32.xlu0 %v6584_v3, %s6611_s24  ;;  %v6593_v3 = vld [vmem:[%s6657_s21 + $0x30] sm:$0xff]  }
 0x222   : > { %2263 = vrot.lane.b32.xlu1 %v6729_v13, %s6610_s18 }
 0x223   : > { %v873_v5 = vpop.xlane.xlu1 %872  ;;  %v864_v6 = vpop.xlane.xlu0 %863 }
 0x224   : > { %6135 = vrcp.f32 %v873_v5 }
 0x225   : > { %3166 = vrot.lane.b32.xlu0 %v6585_v18, %s6611_s24  ;;  %6137 = vrcp.f32 %v864_v6 }
 0x226   : > { %2267 = vrot.lane.b32.xlu1 %v6739_v15, %s6610_s18  ;;  %6139 = vrcp.f32 %v870_v4 }
 0x227   : > { %v867_v7 = vpop.xlane.xlu1 %866 }
 0x228   : > { %6141 = vrcp.f32 %v867_v7  ;;  %v882_v8 = vpop.xlane.xlu0 %881  ;;  %v6594_v7 = vld [vmem:[%s6657_s21 + $0x68] sm:$0xff]  }
 0x229   : > { %3170 = vrot.lane.b32.xlu0 %v6586_v9, %s6611_s24 }
 0x22a   : > { %2271 = vrot.lane.b32.xlu1 %v6749_v17, %s6610_s18 }
 0x22c   : > { %v876_v10 = vpop.xlane.xlu0 %875 }
 0x22d   : > { %3174 = vrot.lane.b32.xlu0 %v6587_v11, %s6611_s24  ;;  %v6595_v11 = vld [vmem:[%s6657_s21 + $0x40] sm:$0xff]  }
 0x22e   : > { %v885_v12 = vpop.xlane.xlu1 %884  ;;  %3164 = vrot.lane.b32.xlu1 %v6583_v1, %s6611_s24  ;;  %v6136_v13 = vpop.eup %6135 }
 0x22f   : > { %v6138_v14 = vpop.eup %6137  ;;  %6143 = vrcp.f32 %v885_v12  ;;  %v993_v45 = vmul.f32 %v6136_v13, %v6958_v19  ;;  %v6591_v19 = vld [vmem:[%s6657_s21 + $0x20] sm:$0xff]  }
 0x230   : > { %v894_v15 = vpop.xlane.xlu0 %893  ;;  %v6140_v16 = vpop.eup %6139  ;;  %6145 = vrcp.f32 %v876_v10  ;;  %v990_v63 = vmul.f32 %v6138_v14, %v6955_v55  ;;  %v1401_v55 = vsel %vm424_vm0, %v7073_v22, 0 }
 0x231   : > { %3178 = vrot.lane.b32.xlu0 %v6588_v58, %s6611_s24  ;;  %6147 = vrcp.f32 %v882_v8  ;;  %v992_v27 = vmul.f32 %v6140_v16, %v6950_v36  ;;  %v6592_v36 = vld [vmem:[%s6657_s21 + $0x58] sm:$0xff]  }
 0x232   : > { %v6142_v50 = vpop.eup %6141  ;;  %v879_v17 = vpop.xlane.xlu1 %878  ;;  %3168 = vrot.lane.b32.xlu1 %v6589_v24, %s6611_s24 }
 0x233   : > { %6149 = vrcp.f32 %v879_v17  ;;  %v991_v28 = vmul.f32 %v6142_v50, %v6964_v57  ;;  %v1023_v56 = vpack.c.bf16 %v993_v45, %v992_v27 }
 0x234   : > { %v888_v25 = vpop.xlane.xlu0 %887 }
 0x235   : > { %v1022_v41 = vpack.c.bf16 %v991_v28, %v990_v63  ;;  %3182 = vrot.lane.b32.xlu0 %v6590_v60, %s6611_s24 }
 0x236   : > { %v897_v31 = vpop.xlane.xlu1 %896  ;;  %3172 = vrot.lane.b32.xlu1 %v6591_v19, %s6611_s24 }
 0x237   : > { %5559 = vmatprep.mubr.msk.bf16.mxu1 %vm669_vm1, %v1022_v41  ;;  %6151 = vrcp.f32 %v897_v31 }
 0x238   : > { %5560 = vmatmul.mubr.msk.bf16.vlgmr.msra.gmra.mrb[0].mxu1 %vm669_vm1, %v1023_v56  ;;  %v906_v57 = vpop.xlane.xlu0 %905  ;;  %6153 = vrcp.f32 %v888_v25  ;;  %v6598_v25 = vld [vmem:[%s6657_s21 + $0x60] sm:$0xff]  }
 0x239   : > { %5592 = vmatpush3.bf16.xpose.msra.mxu1 %v1401_v55  ;;  %3186 = vrot.lane.b32.xlu0 %v6592_v36, %s6611_s24  ;;  %v6144_v42 = vpop.eup %6143  ;;  %6155 = vrcp.f32 %v894_v15 }
 0x23a   : > { %v891_v1 = vpop.xlane.xlu1 %890  ;;  %3176 = vrot.lane.b32.xlu1 %v6593_v3, %s6611_s24  ;;  %v6146_v18 = vpop.eup %6145  ;;  %v997_v6 = vmul.f32 %v6144_v42, %v6981_v59  ;;  %v6596_v59 = vld [vmem:[%s6657_s21 + $0x78] sm:$0xff]  }
 0x23b   : > { %6157 = vrcp.f32 %v891_v1  ;;  %v6148_v4 = vpop.eup %6147  ;;  %v994_v9 = vmul.f32 %v6146_v18, %v6976_v52 }
 0x23c   : > { %v900_v5 = vpop.xlane.xlu0 %899  ;;  %v996_v12 = vmul.f32 %v6148_v4, %v6968_v43 }
 0x23d   : > { %v6150_v22 = vpop.eup %6149  ;;  %3190 = vrot.lane.b32.xlu0 %v6594_v7, %s6611_s24 }
 0x23e   : > { %v909_v8 = vpop.xlane.xlu1 %908  ;;  %v995_v10 = vmul.f32 %v6150_v22, %v6984_v53  ;;  %3180 = vrot.lane.b32.xlu1 %v6595_v11, %s6611_s24  ;;  %v1025_v15 = vpack.c.bf16 %v997_v6, %v996_v12  ;;  %v6597_v53 = vld [vmem:[%s6657_s21 + $0x50] sm:$0xff]  }
 0x23f   : > { %6159 = vrcp.f32 %v909_v8 }
 0x240   : > { %v918_v13 = vpop.xlane.xlu0 %917  ;;  %v1024_v14 = vpack.c.bf16 %v995_v10, %v994_v9  ;;  %6161 = vrcp.f32 %v900_v5 }
 0x241   : > { %3194 = vrot.lane.b32.xlu0 %v6596_v59, %s6611_s24  ;;  %v6152_v16 = vpop.eup %6151  ;;  %6163 = vrcp.f32 %v906_v57 }
 0x242   : > { %v903_v52 = vpop.xlane.xlu1 %902  ;;  %5563 = vmatprep.mubr.msk.bf16.mxu1 %vm669_vm1, %v1024_v14  ;;  %3184 = vrot.lane.b32.xlu1 %v6597_v53, %s6611_s24  ;;  %v6154_v58 = vpop.eup %6153  ;;  %v1001_v45 = vmul.f32 %v6152_v16, %v7001_v37  ;;  %v6599_v37 = vld [vmem:[%s6657_s21 + $0x70] sm:$0xff]  }
 0x243   : > { %6165 = vrcp.f32 %v903_v52  ;;  %5564 = vmatmul.mubr.msk.bf16.gmra.mrb[4].mxu1 %vm669_vm1, %v1025_v15  ;;  %v6156_v43 = vpop.eup %6155  ;;  %v998_v63 = vmul.f32 %v6154_v58, %v6996_v39 }
 0x244   : > { %v912_v50 = vpop.xlane.xlu0 %911  ;;  %v1000_v27 = vmul.f32 %v6156_v43, %v6988_v29 }
 0x245   : > { %v6158_v17 = vpop.eup %6157 }
 0x246   : > { %v921_v24 = vpop.xlane.xlu1 %920  ;;  %v999_v28 = vmul.f32 %v6158_v17, %v7004_v54  ;;  %3188 = vrot.lane.b32.xlu1 %v6598_v25, %s6611_s24  ;;  %v1027_v31 = vpack.c.bf16 %v1001_v45, %v1000_v27 }
 0x247   : > { %6167 = vrcp.f32 %v921_v24 }
 0x248   : > { %v930_v41 = vpop.xlane.xlu0 %929  ;;  %v1026_v60 = vpack.c.bf16 %v999_v28, %v998_v63  ;;  %6169 = vrcp.f32 %v912_v50 }
 0x249   : > { %v6160_v56 = vpop.eup %6159  ;;  %6171 = vrcp.f32 %v918_v13 }
 0x24a   : > { %v915_v19 = vpop.xlane.xlu1 %914  ;;  %5567 = vmatprep.mubr.msk.bf16.mxu1 %vm669_vm1, %v1026_v60  ;;  %3192 = vrot.lane.b32.xlu1 %v6599_v37, %s6611_s24  ;;  %v6162_v39 = vpop.eup %6161  ;;  %v1005_v57 = vmul.f32 %v6160_v56, %v7021_v49 }
 0x24b   : > { %6173 = vrcp.f32 %v915_v19  ;;  %5568 = vmatmul.mubr.msk.bf16.gmra.mrb[8].mxu1 %vm669_vm1, %v1027_v31  ;;  %v6164_v54 = vpop.eup %6163  ;;  %v1002_v42 = vmul.f32 %v6162_v39, %v7016_v34 }
 0x24c   : > { %v924_v55 = vpop.xlane.xlu0 %923  ;;  %v1004_v3 = vmul.f32 %v6164_v54, %v7008_v61 }
 0x24d   : > { %v6166_v29 = vpop.eup %6165 }
 0x24e   : > { %v933_v36 = vpop.xlane.xlu1 %932  ;;  %v1003_v1 = vmul.f32 %v6166_v29, %v7024_v38  ;;  %1964 = vrot.lane.b32.xlu1 %v6939_v44, %s6609_s11  ;;  %v1029_v5 = vpack.c.bf16 %v1005_v57, %v1004_v3 }
 0x24f   : > { %6175 = vrcp.f32 %v933_v36 }
 0x250   : > { %v942_v18 = vpop.xlane.xlu0 %941  ;;  %v1028_v4 = vpack.c.bf16 %v1003_v1, %v1002_v42  ;;  %6177 = vrcp.f32 %v924_v55 }
 0x251   : > { %v6168_v22 = vpop.eup %6167  ;;  %6179 = vrcp.f32 %v930_v41 }
 0x252   : > { %v927_v6 = vpop.xlane.xlu1 %926  ;;  %5571 = vmatprep.mubr.msk.bf16.mxu1 %vm669_vm1, %v1028_v4  ;;  %2887 = vrot.lane.b32.xlu1 %v6939_v44, %s6610_s18  ;;  %v6170_v34 = vpop.eup %6169  ;;  %v1009_v7 = vmul.f32 %v6168_v22, %v7041_v30 }
 0x253   : > { %6181 = vrcp.f32 %v927_v6  ;;  %5572 = vmatmul.mubr.msk.bf16.gmra.mrb[12].mxu1 %vm669_vm1, %v1029_v5  ;;  %v6172_v49 = vpop.eup %6171  ;;  %v1006_v9 = vmul.f32 %v6170_v34, %v7036_v40 }
 0x254   : > { %v936_v38 = vpop.xlane.xlu0 %935  ;;  %v1008_v11 = vmul.f32 %v6172_v49, %v7028_v0 }
 0x255   : > { %v6174_v61 = vpop.eup %6173 }
 0x256   : > { %v945_v8 = vpop.xlane.xlu1 %944  ;;  %v1007_v10 = vmul.f32 %v6174_v61, %v7044_v2  ;;  %v1031_v44 = vpack.c.bf16 %v1009_v7, %v1008_v11 }
 0x257   : > { %6183 = vrcp.f32 %v945_v8 }
 0x258   : > { %v954_v12 = vpop.xlane.xlu0 %953  ;;  %v1030_v13 = vpack.c.bf16 %v1007_v10, %v1006_v9  ;;  %6185 = vrcp.f32 %v936_v38 }
 0x259   : > { %v6176_v14 = vpop.eup %6175  ;;  %6187 = vrcp.f32 %v942_v18 }
 0x25a   : > { %v939_v15 = vpop.xlane.xlu1 %938  ;;  %5575 = vmatprep.mubr.msk.bf16.mxu1 %vm669_vm1, %v1030_v13  ;;  %v6178_v59 = vpop.eup %6177  ;;  %v1013_v2 = vmul.f32 %v6176_v14, %v7060_v62 }
 0x25b   : > { %6189 = vrcp.f32 %v939_v15  ;;  %5576 = vmatmul.mubr.msk.bf16.gmra.mrb[16].mxu1 %vm669_vm1, %v1031_v44  ;;  %v6180_v30 = vpop.eup %6179  ;;  %v1010_v52 = vmul.f32 %v6178_v59, %v7056_v21 }
 0x25c   : > { %v948_v40 = vpop.xlane.xlu0 %947  ;;  %v1012_v58 = vmul.f32 %v6180_v30, %v7048_v46 }
 0x25d   : > { %v6182_v16 = vpop.eup %6181 }
 0x25e   : > { %v957_v0 = vpop.xlane.xlu1 %956  ;;  %v1011_v53 = vmul.f32 %v6182_v16, %v7064_v47  ;;  %v1033_v17 = vpack.c.bf16 %v1013_v2, %v1012_v58 }
 0x25f   : > { %6191 = vrcp.f32 %v957_v0 }
 0x260   : > { %v1032_v43 = vpack.c.bf16 %v1011_v53, %v1010_v52  ;;  %v1325_v50 = vpop.permute.xlu0 %1324  ;;  %6193 = vrcp.f32 %v948_v40 }
 0x261   : > { %v6184_v45 = vpop.eup %6183  ;;  %6195 = vrcp.f32 %v954_v12 }
 0x262   : > { %v951_v24 = vpop.xlane.xlu1 %950  ;;  %5579 = vmatprep.mubr.msk.bf16.mxu1 %vm669_vm1, %v1032_v43  ;;  %v6186_v63 = vpop.eup %6185  ;;  %v1017_v47 = vmul.f32 %v6184_v45, %v7083_v51 }
 0x263   : > { %6197 = vrcp.f32 %v951_v24  ;;  %5580 = vmatmul.mubr.msk.bf16.gmra.mrb[20].mxu1 %vm669_vm1, %v1033_v17  ;;  %v6188_v62 = vpop.eup %6187  ;;  %v1014_v25 = vmul.f32 %v6186_v63, %v7079_v20 }
 0x264   : > { %v1329_v21 = vpop.permute.xlu0 %1328  ;;  %v1016_v41 = vmul.f32 %v6188_v62, %v7068_v26 }
 0x265   : > { %v6190_v28 = vpop.eup %6189 }
 0x266   : > { %v1319_v46 = vpop.permute.xlu1 %1318  ;;  %v1015_v27 = vmul.f32 %v6190_v28, %v7085_v33  ;;  %v1035_v56 = vpack.c.bf16 %v1017_v47, %v1016_v41 }
 0x268   : > { %v1034_v60 = vpack.c.bf16 %v1015_v27, %v1014_v25  ;;  %v1333_v31 = vpop.permute.xlu0 %1332 }
 0x269   : > { %v6192_v19 = vpop.eup %6191 }
 0x26a   : > { %v1321_v37 = vpop.permute.xlu1 %1320  ;;  %5583 = vmatprep.mubr.msk.bf16.mxu1 %vm669_vm1, %v1034_v60  ;;  %v6194_v39 = vpop.eup %6193  ;;  %v1021_v29 = vmul.f32 %v6192_v19, %v7099_v48 }
 0x26b   : > { %5584 = vmatmul.mubr.msk.bf16.gmra.mrb[24].mxu1 %vm669_vm1, %v1035_v56  ;;  %v6196_v54 = vpop.eup %6195  ;;  %v1018_v33 = vmul.f32 %v6194_v39, %v7095_v32 }
 0x26c   : > { %v1337_v55 = vpop.permute.xlu0 %1336  ;;  %v1020_v57 = vmul.f32 %v6196_v54, %v7089_v35 }
 0x26d   : > { %v6198_v51 = vpop.eup %6197 }
 0x26e   : > { %v1323_v20 = vpop.permute.xlu1 %1322  ;;  %v1019_v26 = vmul.f32 %v6198_v51, %v7103_v23  ;;  %v1037_v1 = vpack.c.bf16 %v1021_v29, %v1020_v57 }
 0x270   : > { %v1036_v36 = vpack.c.bf16 %v1019_v26, %v1018_v33  ;;  %v1341_v42 = vpop.permute.xlu0 %1340 }
 0x272   : > { %v1327_v3 = vpop.permute.xlu1 %1326  ;;  %5587 = vmatprep.mubr.msk.bf16.mxu1 %vm669_vm1, %v1036_v36 }
 0x273   : > { %5588 = vmatmul.mubr.msk.bf16.gmra.mrb[28].mxu1 %vm669_vm1, %v1037_v1 }
 0x274   : > { %5593 = vmatprep.mubr.msk.bf16.mxu1 %vm424_vm0, %v1319_v46  ;;  %v1345_v18 = vpop.permute.xlu0 %1344 }
 0x276   : > { %v1331_v4 = vpop.permute.xlu1 %1330 }
 0x278   : > { %v1349_v48 = vpop.permute.xlu0 %1348 }
 0x27a   : > { %v1335_v5 = vpop.permute.xlu1 %1334 }
 0x27b   : > { %5594 = vmatmul.mubr.msk.bf16.vlgmr.msra.gmra.mrb[32].mxu1 %vm424_vm0, %v1321_v37 }
 0x27c   : > { %5597 = vmatprep.mubr.msk.bf16.mxu1 %vm424_vm0, %v1323_v20  ;;  %v2242_v32 = vpop.permute.xlu0 %2241 }
 0x27e   : > { %v1339_v35 = vpop.permute.xlu1 %1338 }
 0x280   : > { %v2246_v23 = vpop.permute.xlu0 %2245 }
 0x282   : > { %v1343_v22 = vpop.permute.xlu1 %1342 }
 0x283   : > { %5598 = vmatmul.mubr.msk.bf16.gmra.mrb[36].mxu1 %vm424_vm0, %v1325_v50 }
 0x284   : > { %5601 = vmatprep.mubr.msk.bf16.mxu1 %vm424_vm0, %v1327_v3  ;;  %v2250_v6 = vpop.permute.xlu0 %2249 }
 0x286   : > { %v1347_v34 = vpop.permute.xlu1 %1346 }
 0x288   : > { %v2254_v49 = vpop.permute.xlu0 %2253 }
 0x28a   : > { %v2274_v38 = vpop.permute.xlu1 %2273 }
 0x28b   : > { %5602 = vmatmul.mubr.msk.bf16.gmra.mrb[40].mxu1 %vm424_vm0, %v1329_v21  ;;  %5797 = vmatprep.subr.msk.bf16.mxu1 %vm424_vm0, %v2274_v38  ;;  %v2324_v61 = vsel %vm424_vm0, %v2274_v38, 0 }
 0x28c   : > { %5605 = vmatprep.mubr.msk.bf16.mxu1 %vm424_vm0, %v1331_v4  ;;  %5660 = vmatpush3.bf16.xpose.msra.mxu1 %v2324_v61  ;;  %v2258_v7 = vpop.permute.xlu0 %2257  ;;  %v5339_v61 = vld [vmem:[%s9307_s3 + $0x80] sm:$0xff]  }
 0x28e   : > { %v2244_v12 = vpop.permute.xlu1 %2243 }
 0x290   : > { %v2262_v8 = vpop.permute.xlu0 %2261 }
 0x292   : > { %v2248_v44 = vpop.permute.xlu1 %2247 }
 0x293   : > { %5606 = vmatmul.mubr.msk.bf16.gmra.mrb[44].mxu1 %vm424_vm0, %v1333_v31 }
 0x294   : > { %5609 = vmatprep.mubr.msk.bf16.mxu1 %vm424_vm0, %v1335_v5  ;;  %v2266_v9 = vpop.permute.xlu0 %2265 }
 0x296   : > { %v2252_v14 = vpop.permute.xlu1 %2251 }
 0x298   : > { %v2270_v10 = vpop.permute.xlu0 %2269 }
 0x29a   : > { %v2256_v15 = vpop.permute.xlu1 %2255 }
 0x29b   : > { %5610 = vmatmul.mubr.msk.bf16.gmra.mrb[48].mxu1 %vm424_vm0, %v1337_v55 }
 0x29c   : > { %5613 = vmatprep.mubr.msk.bf16.mxu1 %vm424_vm0, %v1339_v35  ;;  %v3197_v11 = vpop.permute.xlu0 %3196 }
 0x29d   : > { %5798 = vmatprep.subr.msk.bf16.mxu1 %vm424_vm0, %v3197_v11  ;;  %v3247_v13 = vsel %vm424_vm0, %v3197_v11, 0  ;;  %v5135_v11 = vunpack.c.h.bf16 %v5339_v61 }
 0x29e   : > { %v2260_v59 = vpop.permute.xlu1 %2259 }
 0x2a0   : > { %v3167_v0 = vpop.permute.xlu0 %3166 }
 0x2a2   : > { %v2264_v30 = vpop.permute.xlu1 %2263 }
 0x2a3   : > { %5614 = vmatmul.mubr.msk.bf16.gmra.mrb[52].mxu1 %vm424_vm0, %v1341_v42 }
 0x2a4   : > { %5617 = vmatprep.mubr.msk.bf16.mxu1 %vm424_vm0, %v1343_v22  ;;  %v3171_v53 = vpop.permute.xlu0 %3170 }
 0x2a6   : > { %v2268_v40 = vpop.permute.xlu1 %2267 }
 0x2a8   : > { %v3175_v43 = vpop.permute.xlu0 %3174 }
 0x2aa   : > { %v2272_v16 = vpop.permute.xlu1 %2271 }
 0x2ab   : > { %5618 = vmatmul.mubr.msk.bf16.gmra.mrb[56].mxu1 %vm424_vm0, %v1345_v18 }
 0x2ac   : > { %5621 = vmatprep.mubr.msk.bf16.mxu1 %vm424_vm0, %v1347_v34  ;;  %v3179_v62 = vpop.permute.xlu0 %3178 }
 0x2ae   : > { %v3165_v2 = vpop.permute.xlu1 %3164 }
 0x2b0   : > { %v3183_v25 = vpop.permute.xlu0 %3182 }
 0x2b2   : > { %v3169_v52 = vpop.permute.xlu1 %3168 }
 0x2b3   : > { %5622 = vmatmul.mubr.msk.bf16.gmra.mrb[60].mxu1 %vm424_vm0, %v1349_v48 }
 0x2b4   : > { %5661 = vmatprep.mubr.msk.bf16.mxu1 %vm424_vm0, %v2242_v32  ;;  %v3187_v19 = vpop.permute.xlu0 %3186 }
 0x2b6   : > { %v3173_v58 = vpop.permute.xlu1 %3172 }
 0x2b8   : > { %v3191_v29 = vpop.permute.xlu0 %3190 }
 0x2ba   : > { %v3177_v50 = vpop.permute.xlu1 %3176 }
 0x2bb   : > { %5662 = vmatmul.mubr.msk.bf16.vlgmr.msra.gmra.mrb[64].mxu1 %vm424_vm0, %v2244_v12 }
 0x2bc   : > { %5665 = vmatprep.mubr.msk.bf16.mxu1 %vm424_vm0, %v2246_v23  ;;  %5728 = vmatpush3.bf16.xpose.msra.mxu1 %v3247_v13  ;;  %v3195_v42 = vpop.permute.xlu0 %3194 }
 0x2be   : > { %v3181_v21 = vpop.permute.xlu1 %3180 }
 0x2c2   : > { %v3185_v41 = vpop.permute.xlu1 %3184 }
 0x2c3   : > { %5666 = vmatmul.mubr.msk.bf16.gmra.mrb[68].mxu1 %vm424_vm0, %v2248_v44 }
 0x2c4   : > { %5669 = vmatprep.mubr.msk.bf16.mxu1 %vm424_vm0, %v2250_v6 }
 0x2c6   : > { %v3189_v39 = vpop.permute.xlu1 %3188 }
 0x2ca   : > { %v3193_v33 = vpop.permute.xlu1 %3192 }
 0x2cb   : > { %5670 = vmatmul.mubr.msk.bf16.gmra.mrb[72].mxu1 %vm424_vm0, %v2252_v14 }
 0x2cc   : > { %5673 = vmatprep.mubr.msk.bf16.mxu1 %vm424_vm0, %v2254_v49  ;;  %v5340_v49 = vld [vmem:[%s9307_s3 + $0x88] sm:$0xff]  }
 0x2d3   : > { %5674 = vmatmul.mubr.msk.bf16.gmra.mrb[76].mxu1 %vm424_vm0, %v2256_v15  ;;  %v5342_v15 = vld [vmem:[%s9307_s3 + $0x98] sm:$0xff]  }
 0x2d4   : > { %5677 = vmatprep.mubr.msk.bf16.mxu1 %vm424_vm0, %v2258_v7  ;;  %v5138_v7 = vunpack.c.l.bf16 %v5340_v49 }
 0x2db   : > { %5678 = vmatmul.mubr.msk.bf16.gmra.mrb[80].mxu1 %vm424_vm0, %v2260_v59 }
 0x2dc   : > { %5681 = vmatprep.mubr.msk.bf16.mxu1 %vm424_vm0, %v2262_v8  ;;  %v5134_v8 = vunpack.c.l.bf16 %v5339_v61 }
 0x2e3   : > { %5682 = vmatmul.mubr.msk.bf16.gmra.mrb[84].mxu1 %vm424_vm0, %v2264_v30 }
 0x2e4   : > { %5685 = vmatprep.mubr.msk.bf16.mxu1 %vm424_vm0, %v2266_v9  ;;  %v5139_v9 = vunpack.c.h.bf16 %v5340_v49 }
 0x2eb   : > { %5686 = vmatmul.mubr.msk.bf16.gmra.mrb[88].mxu1 %vm424_vm0, %v2268_v40 }
 0x2ec   : > { %5689 = vmatprep.mubr.msk.bf16.mxu1 %vm424_vm0, %v2270_v10 }
 0x2f3   : > { %5690 = vmatmul.mubr.msk.bf16.gmra.mrb[92].mxu1 %vm424_vm0, %v2272_v16  ;;  %v5341_v16 = vld [vmem:[%s9307_s3 + $0x90] sm:$0xff]  }
 0x2f4   : > { %5729 = vmatprep.mubr.msk.bf16.mxu1 %vm424_vm0, %v3165_v2 }
 0x2fb   : > { %5730 = vmatmul.mubr.msk.bf16.vlgmr.msra.gmra.mrb[96].mxu1 %vm424_vm0, %v3167_v0 }
 0x2fc   : > { %5733 = vmatprep.mubr.msk.bf16.mxu1 %vm424_vm0, %v3169_v52  ;;  %v1965_v52 = vpop.permute.xlu1 %1964 }
 0x2fd   : > { %5625 = vmatprep.subr.bf16.mxu0 %v1965_v52 }
 0x2fe   : > { %5626 = vmatpush3.bf16.msra.mxu0 %v1965_v52 }
 0x303   : > { %5734 = vmatmul.mubr.msk.bf16.gmra.mrb[100].mxu1 %vm424_vm0, %v3171_v53 }
 0x304   : > { %5737 = vmatprep.mubr.msk.bf16.mxu1 %vm424_vm0, %v3173_v58 }
 0x30b   : > { %v7299_v17 = vpop.f32.mrb[0].mxu1  ;;  %5738 = vmatmul.mubr.msk.bf16.gmra.mrb[104].mxu1 %vm424_vm0, %v3175_v43  ;;  %v5146_v43 = vunpack.c.l.bf16 %v5342_v15 }
 0x30c   : > { %9418 = vst [vmem:[#allocation2_spill] sm:$0xff] %v7299_v17  ;;  %v7302_v45 = vpop.f32.mrb[1].mxu1  ;;  %5741 = vmatprep.mubr.msk.bf16.mxu1 %vm424_vm0, %v3177_v50 }
 0x30d   : > { %9419 = vst [vmem:[#allocation3_spill] sm:$0xff] %v7302_v45  ;;  %v7305_v24 = vpop.f32.mrb[2].mxu1 }
 0x30e   : > { %9420 = vst [vmem:[#allocation4_spill] sm:$0xff] %v7305_v24  ;;  %v7307_v63 = vpop.f32.mrb[3].mxu1 }
 0x30f   : > { %9421 = vst [vmem:[#allocation5_spill] sm:$0xff] %v7307_v63 }
 0x313   : > { %5742 = vmatmul.mubr.msk.bf16.gmra.mrb[108].mxu1 %vm424_vm0, %v3179_v62  ;;  %v5142_v62 = vunpack.c.l.bf16 %v5341_v16 }
 0x314   : > { %5745 = vmatprep.mubr.msk.bf16.mxu1 %vm424_vm0, %v3181_v21  ;;  %v5147_v21 = vunpack.c.h.bf16 %v5342_v15 }
 0x316   : > { %v7311_v28 = vpop.f32.mrb[4].mxu1 }
 0x317   : > { %9422 = vst [vmem:[#allocation6_spill] sm:$0xff] %v7311_v28  ;;  %v7313_v47 = vpop.f32.mrb[5].mxu1 }
 0x318   : > { %9423 = vst [vmem:[#allocation7_spill] sm:$0xff] %v7313_v47  ;;  %v7315_v46 = vpop.f32.mrb[6].mxu1 }
 0x319   : > { %9424 = vst [vmem:[#allocation8_spill] sm:$0xff] %v7315_v46  ;;  %v7317_v27 = vpop.f32.mrb[7].mxu1 }
 0x31a   : > { %9425 = vst [vmem:[#allocation9_spill] sm:$0xff] %v7317_v27 }
 0x31b   : > { %5746 = vmatmul.mubr.msk.bf16.gmra.mrb[112].mxu1 %vm424_vm0, %v3183_v25 }
 0x31c   : > { %5749 = vmatprep.mubr.msk.bf16.mxu1 %vm424_vm0, %v3185_v41 }
 0x31e   : > { %v7321_v60 = vpop.f32.mrb[8].mxu1 }
 0x31f   : > { %9426 = vst [vmem:[#allocation10_spill] sm:$0xff] %v7321_v60  ;;  %v7323_v31 = vpop.f32.mrb[9].mxu1 }
 0x320   : > { %9427 = vst [vmem:[#allocation11_spill] sm:$0xff] %v7323_v31  ;;  %v7325_v56 = vpop.f32.mrb[10].mxu1 }
 0x321   : > { %9428 = vst [vmem:[#allocation12_spill] sm:$0xff] %v7325_v56  ;;  %v7327_v37 = vpop.f32.mrb[11].mxu1 }
 0x322   : > { %9429 = vst [vmem:[#allocation13_spill] sm:$0xff] %v7327_v37 }
 0x323   : > { %5750 = vmatmul.mubr.msk.bf16.gmra.mrb[116].mxu1 %vm424_vm0, %v3187_v19 }
 0x324   : > { %5753 = vmatprep.mubr.msk.bf16.mxu1 %vm424_vm0, %v3189_v39 }
 0x326   : > { %v7331_v54 = vpop.f32.mrb[12].mxu1 }
 0x327   : > { %9430 = vst [vmem:[#allocation14_spill] sm:$0xff] %v7331_v54  ;;  %v7333_v55 = vpop.f32.mrb[13].mxu1 }
 0x328   : > { %9431 = vst [vmem:[#allocation15_spill] sm:$0xff] %v7333_v55  ;;  %v7335_v51 = vpop.f32.mrb[14].mxu1  ;;  %v5357_v55 = vld [vmem:[%s9307_s3 + $0x110] sm:$0xff]  }
 0x329   : > { %9432 = vst [vmem:[#allocation16_spill] sm:$0xff] %v7335_v51  ;;  %v7337_v20 = vpop.f32.mrb[15].mxu1 }
 0x32a   : > { %9433 = vst [vmem:[#allocation17_spill] sm:$0xff] %v7337_v20 }
 0x32b   : > { %5754 = vmatmul.mubr.msk.bf16.gmra.mrb[120].mxu1 %vm424_vm0, %v3191_v29 }
 0x32c   : > { %5757 = vmatprep.mubr.msk.bf16.mxu1 %vm424_vm0, %v3193_v33  ;;  %v5143_v33 = vunpack.c.h.bf16 %v5341_v16 }
 0x32e   : > { %v7341_v26 = vpop.f32.mrb[16].mxu1 }
 0x32f   : > { %9434 = vst [vmem:[#allocation18_spill] sm:$0xff] %v7341_v26  ;;  %v7343_v57 = vpop.f32.mrb[17].mxu1 }
 0x330   : > { %9435 = vst [vmem:[#allocation19_spill] sm:$0xff] %v7343_v57  ;;  %v7345_v36 = vpop.f32.mrb[18].mxu1 }
 0x331   : > { %9436 = vst [vmem:[#allocation20_spill] sm:$0xff] %v7345_v36  ;;  %v7347_v1 = vpop.f32.mrb[19].mxu1 }
 0x332   : > { %9437 = vst [vmem:[#allocation21_spill] sm:$0xff] %v7347_v1 }
 0x333   : > { %5758 = vmatmul.mubr.msk.bf16.gmra.mrb[124].mxu1 %vm424_vm0, %v3195_v42  ;;  %v5344_v42 = vld [vmem:[%s9307_s3 + $0xa8] sm:$0xff]  }
 0x334   : > { %v5155_v16 = vunpack.c.h.bf16 %v5344_v42 }
 0x336   : > { %v7350_v3 = vpop.f32.mrb[20].mxu1 }
 0x337   : > { %9438 = vst [vmem:[#allocation22_spill] sm:$0xff] %v7350_v3  ;;  %v7352_v18 = vpop.f32.mrb[21].mxu1 }
 0x338   : > { %9439 = vst [vmem:[#allocation23_spill] sm:$0xff] %v7352_v18  ;;  %v7354_v4 = vpop.f32.mrb[22].mxu1 }
 0x339   : > { %9440 = vst [vmem:[#allocation24_spill] sm:$0xff] %v7354_v4  ;;  %v7356_v48 = vpop.f32.mrb[23].mxu1 }
 0x33a   : > { %9441 = vst [vmem:[#allocation25_spill] sm:$0xff] %v7356_v48  ;;  %v5356_v48 = vld [vmem:[%s9307_s3 + $0x108] sm:$0xff]  }
 0x33b   : > { %v5202_v3 = vunpack.c.l.bf16 %v5356_v48 }
 0x33e   : > { %v7358_v5 = vpop.f32.mrb[24].mxu1 }
 0x33f   : > { %9442 = vst [vmem:[#allocation26_spill] sm:$0xff] %v7358_v5  ;;  %v7360_v32 = vpop.f32.mrb[25].mxu1 }
 0x340   : > { %9443 = vst [vmem:[#allocation27_spill] sm:$0xff] %v7360_v32  ;;  %v7362_v35 = vpop.f32.mrb[26].mxu1 }
 0x341   : > { %9444 = vst [vmem:[#allocation28_spill] sm:$0xff] %v7362_v35  ;;  %v7364_v23 = vpop.f32.mrb[27].mxu1 }
 0x342   : > { %9445 = vst [vmem:[#allocation29_spill] sm:$0xff] %v7364_v23 }
 0x346   : > { %v7366_v22 = vpop.f32.mrb[28].mxu1 }
 0x347   : > { %9446 = vst [vmem:[#allocation30_spill] sm:$0xff] %v7366_v22  ;;  %v7368_v6 = vpop.f32.mrb[29].mxu1 }
 0x348   : > { %9447 = vst [vmem:[#allocation31_spill] sm:$0xff] %v7368_v6  ;;  %v7370_v34 = vpop.f32.mrb[30].mxu1 }
 0x349   : > { %9448 = vst [vmem:[#allocation32_spill] sm:$0xff] %v7370_v34  ;;  %v7375_v38 = vpop.f32.mrb[31].mxu1 }
 0x34a   : > { %9449 = vst [vmem:[#allocation33_spill] sm:$0xff] %v7375_v38  ;;  %v5352_v38 = vld [vmem:[%s9307_s3 + $0xe8] sm:$0xff]  }
 0x34e   : > { %v5595_v10 = vpop.f32.mrb[32].mxu1 }
 0x34f   : > { %v1446_v12 = vadd.f32 %v5595_v10, %v5138_v7  ;;  %v1437_v13 = vpop.f32.mrb[33].mxu1  ;;  %v5343_v10 = vld [vmem:[%s9307_s3 + $0xa0] sm:$0xff]  }
 0x350   : > { %v1438_v44 = vadd.f32 %v5134_v8, %v1437_v13  ;;  %v5596_v14 = vpop.f32.mrb[34].mxu1  ;;  %v5154_v13 = vunpack.c.l.bf16 %v5344_v42  ;;  %v5151_v52 = vunpack.c.h.bf16 %v5343_v10 }
 0x351   : > { %v7383_v59 = vmul.f32 0.35355338, %v1446_v12  ;;  %v1449_v30 = vadd.f32 %v5596_v14, %v5139_v9  ;;  %v1440_v40 = vpop.f32.mrb[35].mxu1 }
 0x352   : > { %v7388_v2 = vmul.f32 0.35355338, %v1438_v44  ;;  %v1441_v0 = vadd.f32 %v5135_v11, %v1440_v40  ;;  %v7408_v11 = vpop.permute.xlu1 %2887  ;;  %v5150_v40 = vunpack.c.l.bf16 %v5343_v10 }
 0x353   : > { %v7390_v53 = vmul.f32 0.35355338, %v1449_v30  ;;  %v1602_v58 = vsel %vm669_vm1, %v7383_v59, -inf  ;;  %9450 = vst [vmem:[#allocation34_spill] sm:$0xff] %v7408_v11  ;;  %5693 = vmatprep.subr.bf16.mxu0 %v7408_v11 }
 0x354   : > { %1603 = vmax.xlane.f32.xlu0 %v1602_v58  ;;  %v1596_v50 = vsel %vm669_vm1, %v7388_v2, -inf  ;;  %v7396_v25 = vmul.f32 0.35355338, %v1441_v0 }
 0x355   : > { %1597 = vmax.xlane.f32.xlu1 %v1596_v50  ;;  %v1605_v39 = vsel %vm669_vm1, %v7390_v53, -inf }
 0x356   : > { %v5599_v41 = vpop.f32.mrb[36].mxu1  ;;  %v1599_v12 = vsel %vm669_vm1, %v7396_v25, -inf }
 0x357   : > { %v1462_v19 = vadd.f32 %v5599_v41, %v5146_v43  ;;  %v1453_v29 = vpop.f32.mrb[37].mxu1  ;;  %v5346_v41 = vld [vmem:[%s9307_s3 + $0xb8] sm:$0xff]  }
 0x358   : > { %1606 = vmax.xlane.f32.xlu0 %v1605_v39  ;;  %v1454_v49 = vadd.f32 %v5142_v62, %v1453_v29  ;;  %v5600_v61 = vpop.f32.mrb[38].mxu1 }
 0x359   : > { %v7403_v7 = vmul.f32 0.35355338, %v1462_v19  ;;  %v1465_v8 = vadd.f32 %v5600_v61, %v5147_v21  ;;  %v1456_v9 = vpop.f32.mrb[39].mxu1 }
 0x35a   : > { %v7413_v44 = vmul.f32 0.35355338, %v1454_v49  ;;  %v1457_v30 = vadd.f32 %v5143_v33, %v1456_v9  ;;  %v5345_v49 = vld [vmem:[%s9307_s3 + $0xb0] sm:$0xff]  }
 0x35b   : > { %v7415_v14 = vmul.f32 0.35355338, %v1465_v8  ;;  %v1614_v15 = vsel %vm669_vm1, %v7403_v7, -inf  ;;  %v5162_v8 = vunpack.c.l.bf16 %v5346_v41 }
 0x35c   : > { %1600 = vmax.xlane.f32.xlu0 %v1599_v12  ;;  %1615 = vmax.xlane.f32.xlu1 %v1614_v15  ;;  %v7419_v58 = vmul.f32 0.35355338, %v1457_v30  ;;  %v1608_v62 = vsel %vm669_vm1, %v7413_v44, -inf  ;;  %v5158_v15 = vunpack.c.l.bf16 %v5345_v49  ;;  %v5163_v30 = vunpack.c.h.bf16 %v5346_v41 }
 0x35d   : > { %v1617_v50 = vsel %vm669_vm1, %v7415_v14, -inf }
 0x35e   : > { %v5603_v0 = vpop.f32.mrb[40].mxu1  ;;  %v1611_v12 = vsel %vm669_vm1, %v7419_v58, -inf }
 0x35f   : > { %v1478_v43 = vadd.f32 %v5603_v0, %v5154_v13  ;;  %v1469_v21 = vpop.f32.mrb[41].mxu1 }
 0x360   : > { %1618 = vmax.xlane.f32.xlu0 %v1617_v50  ;;  %1609 = vmax.xlane.f32.xlu1 %v1608_v62  ;;  %v1470_v19 = vadd.f32 %v5150_v40, %v1469_v21  ;;  %v5604_v39 = vpop.f32.mrb[42].mxu1  ;;  %v5159_v62 = vunpack.c.h.bf16 %v5345_v49  ;;  %v5348_v21 = vld [vmem:[%s9307_s3 + $0xc8] sm:$0xff]  }
 0x361   : > { %v7428_v29 = vmul.f32 0.35355338, %v1478_v43  ;;  %v1481_v33 = vadd.f32 %v5604_v39, %v5155_v16  ;;  %v1472_v42 = vpop.f32.mrb[43].mxu1  ;;  %v5170_v49 = vunpack.c.l.bf16 %v5348_v21 }
 0x362   : > { %v1473_v61 = vadd.f32 %v5151_v52, %v1472_v42  ;;  %v7433_v9 = vmul.f32 0.35355338, %v1470_v19 }
 0x363   : > { %v7435_v10 = vmul.f32 0.35355338, %v1481_v33  ;;  %v1626_v13 = vsel %vm669_vm1, %v7428_v29, -inf }
 0x364   : > { %1612 = vmax.xlane.f32.xlu0 %v1611_v12  ;;  %1627 = vmax.xlane.f32.xlu1 %v1626_v13  ;;  %v7441_v40 = vmul.f32 0.35355338, %v1473_v61  ;;  %v1620_v43 = vsel %vm669_vm1, %v7433_v9, -inf  ;;  %v5347_v61 = vld [vmem:[%s9307_s3 + $0xc0] sm:$0xff]  }
 0x365   : > { %v1629_v52 = vsel %vm669_vm1, %v7435_v10, -inf }
 0x366   : > { %v5607_v16 = vpop.f32.mrb[44].mxu1 }
 0x367   : > { %v1494_v0 = vadd.f32 %v5607_v16, %v5162_v8  ;;  %v1485_v50 = vpop.f32.mrb[45].mxu1  ;;  %v1623_v8 = vsel %vm669_vm1, %v7441_v40, -inf }
 0x368   : > { %1630 = vmax.xlane.f32.xlu0 %v1629_v52  ;;  %1621 = vmax.xlane.f32.xlu1 %v1620_v43  ;;  %v1486_v19 = vadd.f32 %v5158_v15, %v1485_v50  ;;  %v5608_v41 = vpop.f32.mrb[46].mxu1  ;;  %v5167_v43 = vunpack.c.h.bf16 %v5347_v61 }
 0x369   : > { %v7450_v39 = vmul.f32 0.35355338, %v1494_v0  ;;  %v1497_v33 = vadd.f32 %v5608_v41, %v5163_v30  ;;  %v1488_v42 = vpop.f32.mrb[47].mxu1  ;;  %v5166_v30 = vunpack.c.l.bf16 %v5347_v61  ;;  %v5171_v0 = vunpack.c.h.bf16 %v5348_v21 }
 0x36a   : > { %v7457_v12 = vmul.f32 0.35355338, %v1486_v19  ;;  %v1489_v16 = vadd.f32 %v5159_v62, %v1488_v42  ;;  %v5350_v62 = vld [vmem:[%s9307_s3 + $0xd8] sm:$0xff]  }
 0x36b   : > { %v7459_v13 = vmul.f32 0.35355338, %v1497_v33  ;;  %v1638_v15 = vsel %vm669_vm1, %v7450_v39, -inf }
 0x36c   : > { %1624 = vmax.xlane.f32.xlu0 %v1623_v8  ;;  %1639 = vmax.xlane.f32.xlu1 %v1638_v15  ;;  %v7463_v50 = vmul.f32 0.35355338, %v1489_v16  ;;  %v1632_v19 = vsel %vm669_vm1, %v7457_v12, -inf }
 0x36d   : > { %v1641_v17 = vsel %vm669_vm1, %v7459_v13, -inf }
 0x36e   : > { %v5611_v52 = vpop.f32.mrb[48].mxu1 }
 0x36f   : > { %v1510_v41 = vadd.f32 %v5611_v52, %v5170_v49  ;;  %v1501_v33 = vpop.f32.mrb[49].mxu1  ;;  %v5349_v49 = vld [vmem:[%s9307_s3 + $0xd0] sm:$0xff]   ;;  %v5178_v52 = vunpack.c.l.bf16 %v5350_v62 }
 0x370   : > { %1642 = vmax.xlane.f32.xlu0 %v1641_v17  ;;  %1633 = vmax.xlane.f32.xlu1 %v1632_v19  ;;  %v1502_v42 = vadd.f32 %v5166_v30, %v1501_v33  ;;  %v5612_v21 = vpop.f32.mrb[50].mxu1  ;;  %v1635_v17 = vsel %vm669_vm1, %v7463_v50, -inf }
 0x371   : > { %v7472_v8 = vmul.f32 0.35355338, %v1510_v41  ;;  %v1513_v61 = vadd.f32 %v5612_v21, %v5171_v0  ;;  %v1504_v15 = vpop.f32.mrb[51].mxu1  ;;  %v5174_v0 = vunpack.c.l.bf16 %v5349_v49  ;;  %v5179_v41 = vunpack.c.h.bf16 %v5350_v62 }
 0x372   : > { %v1505_v16 = vadd.f32 %v5167_v43, %v1504_v15  ;;  %v7477_v24 = vmul.f32 0.35355338, %v1502_v42  ;;  %v5175_v15 = vunpack.c.h.bf16 %v5349_v49  ;;  %v5186_v49 = vunpack.c.l.bf16 %v5352_v38 }
 0x373   : > { %v7479_v6 = vmul.f32 0.35355338, %v1513_v61  ;;  %v1650_v30 = vsel %vm669_vm1, %v7472_v8, -inf }
 0x374   : > { %1636 = vmax.xlane.f32.xlu0 %v1635_v17  ;;  %1651 = vmax.xlane.f32.xlu1 %v1650_v30  ;;  %v7485_v19 = vmul.f32 0.35355338, %v1505_v16  ;;  %v1644_v42 = vsel %vm669_vm1, %v7477_v24, -inf }
 0x375   : > { %v1653_v43 = vsel %vm669_vm1, %v7479_v6, -inf }
 0x376   : > { %v5615_v33 = vpop.f32.mrb[52].mxu1  ;;  %v1647_v22 = vsel %vm669_vm1, %v7485_v19, -inf }
 0x377   : > { %v1526_v21 = vadd.f32 %v5615_v33, %v5178_v52  ;;  %v1517_v61 = vpop.f32.mrb[53].mxu1  ;;  %v5351_v33 = vld [vmem:[%s9307_s3 + $0xe0] sm:$0xff]  }
 0x378   : > { %1654 = vmax.xlane.f32.xlu0 %v1653_v43  ;;  %1645 = vmax.xlane.f32.xlu1 %v1644_v42  ;;  %v1518_v17 = vadd.f32 %v5174_v0, %v1517_v61  ;;  %v5616_v62 = vpop.f32.mrb[54].mxu1  ;;  %v5183_v61 = vunpack.c.h.bf16 %v5351_v33 }
 0x379   : > { %v7494_v16 = vmul.f32 0.35355338, %v1526_v21  ;;  %v1529_v30 = vadd.f32 %v5616_v62, %v5179_v41  ;;  %v1520_v52 = vpop.f32.mrb[55].mxu1  ;;  %v5182_v41 = vunpack.c.l.bf16 %v5351_v33  ;;  %v5187_v21 = vunpack.c.h.bf16 %v5352_v38 }
 0x37a   : > { %v7501_v34 = vmul.f32 0.35355338, %v1518_v17  ;;  %v1521_v43 = vadd.f32 %v5175_v15, %v1520_v52  ;;  %v5354_v15 = vld [vmem:[%s9307_s3 + $0xf8] sm:$0xff]  }
 0x37b   : > { %v7503_v32 = vmul.f32 0.35355338, %v1529_v30  ;;  %v1662_v0 = vsel %vm669_vm1, %v7494_v16, -inf }
 0x37c   : > { %1648 = vmax.xlane.f32.xlu0 %v1647_v22  ;;  %1663 = vmax.xlane.f32.xlu1 %v1662_v0  ;;  %v7507_v62 = vmul.f32 0.35355338, %v1521_v43  ;;  %v1656_v30 = vsel %vm669_vm1, %v7501_v34, -inf }
 0x37d   : > { %v1665_v17 = vsel %vm669_vm1, %v7503_v32, -inf }
 0x37e   : > { %v5619_v42 = vpop.f32.mrb[56].mxu1  ;;  %9451 = vst [vmem:[#allocation35_spill] sm:$0xff] %v7507_v62 }
 0x37f   : > { %v1542_v23 = vadd.f32 %v5619_v42, %v5186_v49  ;;  %v1533_v5 = vpop.f32.mrb[57].mxu1  ;;  %v5353_v49 = vld [vmem:[%s9307_s3 + $0xf0] sm:$0xff]   ;;  %v5194_v42 = vunpack.c.l.bf16 %v5354_v15 }
 0x380   : > { %v1534_v22 = vadd.f32 %v5182_v41, %v1533_v5  ;;  %1666 = vmax.xlane.f32.xlu0 %v1665_v17  ;;  %1657 = vmax.xlane.f32.xlu1 %v1656_v30  ;;  %v5620_v38 = vpop.f32.mrb[58].mxu1  ;;  %v1659_v5 = vsel %vm669_vm1, %v7507_v62, -inf }
 0x381   : > { %v7516_v52 = vmul.f32 0.35355338, %v1542_v23  ;;  %v1545_v33 = vadd.f32 %v5620_v38, %v5187_v21  ;;  %v1536_v43 = vpop.f32.mrb[59].mxu1  ;;  %v5190_v23 = vunpack.c.l.bf16 %v5353_v49  ;;  %v5195_v21 = vunpack.c.h.bf16 %v5354_v15 }
 0x382   : > { %v1537_v0 = vadd.f32 %v5183_v61, %v1536_v43  ;;  %v7521_v35 = vmul.f32 0.35355338, %v1534_v22  ;;  %v5191_v43 = vunpack.c.h.bf16 %v5353_v49 }
 0x383   : > { %v7523_v18 = vmul.f32 0.35355338, %v1545_v33  ;;  %v1674_v41 = vsel %vm669_vm1, %v7516_v52, -inf }
 0x384   : > { %1660 = vmax.xlane.f32.xlu0 %v1659_v5  ;;  %1675 = vmax.xlane.f32.xlu1 %v1674_v41  ;;  %v7529_v17 = vmul.f32 0.35355338, %v1537_v0  ;;  %v1668_v33 = vsel %vm669_vm1, %v7521_v35, -inf }
 0x385   : > { %9452 = vst [vmem:[#allocation36_spill] sm:$0xff] %v7523_v18  ;;  %v1677_v22 = vsel %vm669_vm1, %v7523_v18, -inf }
 0x386   : > { %9453 = vst [vmem:[#allocation37_spill] sm:$0xff] %v7529_v17  ;;  %v5623_v30 = vpop.f32.mrb[60].mxu1 }
 0x387   : > { %v1558_v38 = vadd.f32 %v5623_v30, %v5194_v42  ;;  %v1549_v61 = vpop.f32.mrb[61].mxu1  ;;  %v1671_v30 = vsel %vm669_vm1, %v7529_v17, -inf }
 0x388   : > { %v1550_v5 = vadd.f32 %v5190_v23, %v1549_v61  ;;  %1678 = vmax.xlane.f32.xlu0 %v1677_v22  ;;  %1669 = vmax.xlane.f32.xlu1 %v1668_v33  ;;  %v5624_v15 = vpop.f32.mrb[62].mxu1  ;;  %v5355_v23 = vld [vmem:[%s9307_s3 + $0x100] sm:$0xff]  }
 0x389   : > { %v7538_v0 = vmul.f32 0.35355338, %v1558_v38  ;;  %v1561_v41 = vadd.f32 %v5624_v15, %v5195_v21  ;;  %v1552_v42 = vpop.f32.mrb[63].mxu1  ;;  %v5203_v21 = vunpack.c.h.bf16 %v5356_v48  ;;  %v5198_v61 = vunpack.c.l.bf16 %v5355_v23 }
 0x38a   : > { %v7542_v4 = vmul.f32 0.35355338, %v1550_v5  ;;  %v1553_v49 = vadd.f32 %v5191_v43, %v1552_v42  ;;  %v5199_v22 = vunpack.c.h.bf16 %v5355_v23  ;;  %v5358_v42 = vld [vmem:[%s9307_s3 + $0x118] sm:$0xff]  }
 0x38b   : > { %v7544_v57 = vmul.f32 0.35355338, %v1561_v41  ;;  %v1686_v1 = vsel %vm669_vm1, %v7538_v0, -inf }
 0x38c   : > { %1672 = vmax.xlane.f32.xlu0 %v1671_v30  ;;  %1687 = vmax.xlane.f32.xlu1 %v1686_v1  ;;  %v7551_v33 = vmul.f32 0.35355338, %v1553_v49  ;;  %v1680_v41 = vsel %vm669_vm1, %v7542_v4, -inf  ;;  %v5210_v49 = vunpack.c.l.bf16 %v5358_v42 }
 0x38d   : > { %9454 = vst [vmem:[#allocation38_spill] sm:$0xff] %v7544_v57  ;;  %v1689_v43 = vsel %vm669_vm1, %v7544_v57, -inf }
 0x38e   : > { %v5663_v38 = vpop.f32.mrb[64].mxu1  ;;  %9455 = vst [vmem:[#allocation39_spill] sm:$0xff] %v7551_v33  ;;  %v1683_v36 = vsel %vm669_vm1, %v7551_v33, -inf }
 0x38f   : > { %v2369_v5 = vadd.f32 %v5663_v38, %v5202_v3  ;;  %v2360_v15 = vpop.f32.mrb[65].mxu1 }
 0x390   : > { %1690 = vmax.xlane.f32.xlu0 %v1689_v43  ;;  %1681 = vmax.xlane.f32.xlu1 %v1680_v41  ;;  %v5664_v1 = vpop.f32.mrb[66].mxu1  ;;  %v2361_v3 = vadd.f32 %v5198_v61, %v2360_v15  ;;  %v5207_v41 = vunpack.c.h.bf16 %v5357_v55 }
 0x391   : > { %v2372_v48 = vadd.f32 %v5664_v1, %v5203_v21  ;;  %v2363_v30 = vpop.f32.mrb[67].mxu1  ;;  %v7560_v26 = vmul.f32 0.35355338, %v2369_v5  ;;  %v5206_v1 = vunpack.c.l.bf16 %v5357_v55 }
 0x392   : > { %v2364_v23 = vadd.f32 %v5199_v22, %v2363_v30  ;;  %v5211_v22 = vunpack.c.h.bf16 %v5358_v42  ;;  %v7573_v61 = vmul.f32 0.35355338, %v2361_v3 }
 0x393   : > { %v7562_v38 = vmul.f32 0.35355338, %v2372_v48  ;;  %v2525_v30 = vsel %vm669_vm1, %v7560_v26, -inf }
 0x394   : > { %1684 = vmax.xlane.f32.xlu0 %v1683_v36  ;;  %v7569_v43 = vmul.f32 0.35355338, %v2364_v23  ;;  %v5360_v36 = vld [vmem:[%s9307_s3 + $0x128] sm:$0xff]   ;;  %v2519_v51 = vsel %vm669_vm1, %v7573_v61, -inf }
 0x395   : > { %9456 = vst [vmem:[#allocation40_spill] sm:$0xff] %v7562_v38  ;;  %v2528_v21 = vsel %vm669_vm1, %v7562_v38, -inf  ;;  %v5218_v54 = vunpack.c.l.bf16 %v5360_v36 }
 0x396   : > { %9457 = vst [vmem:[#allocation41_spill] sm:$0xff] %v7569_v43  ;;  %2529 = vmax.xlane.f32.xlu1 %v2528_v21  ;;  %v5667_v5 = vpop.f32.mrb[68].mxu1  ;;  %v2522_v42 = vsel %vm669_vm1, %v7569_v43, -inf }
 0x397   : > { %v2385_v15 = vadd.f32 %v5667_v5, %v5210_v49  ;;  %v2376_v48 = vpop.f32.mrb[69].mxu1 }
 0x398   : > { %2526 = vmax.xlane.f32.xlu0 %v2525_v30  ;;  %v5668_v23 = vpop.f32.mrb[70].mxu1  ;;  %v2377_v55 = vadd.f32 %v5206_v1, %v2376_v48  ;;  %v5359_v30 = vld [vmem:[%s9307_s3 + $0x120] sm:$0xff]  }
 0x399   : > { %v2388_v20 = vadd.f32 %v5668_v23, %v5211_v22  ;;  %v2379_v21 = vpop.f32.mrb[71].mxu1  ;;  %v7582_v49 = vmul.f32 0.35355338, %v2385_v15  ;;  %v5214_v48 = vunpack.c.l.bf16 %v5359_v30 }
 0x39a   : > { %2523 = vmax.xlane.f32.xlu1 %v2522_v42  ;;  %v2380_v3 = vadd.f32 %v5207_v41, %v2379_v21  ;;  %v5219_v41 = vunpack.c.h.bf16 %v5360_v36  ;;  %v5215_v42 = vunpack.c.h.bf16 %v5359_v30  ;;  %v7595_v1 = vmul.f32 0.35355338, %v2377_v55 }
 0x39b   : > { %v7584_v5 = vmul.f32 0.35355338, %v2388_v20  ;;  %v2537_v31 = vsel %vm669_vm1, %v7582_v49, -inf }
 0x39c   : > { %2520 = vmax.xlane.f32.xlu0 %v2519_v51  ;;  %v7591_v22 = vmul.f32 0.35355338, %v2380_v3  ;;  %v5362_v51 = vld [vmem:[%s9307_s3 + $0x138] sm:$0xff]  }
 0x39d   : > { %9458 = vst [vmem:[#allocation42_spill] sm:$0xff] %v7584_v5  ;;  %v2540_v23 = vsel %vm669_vm1, %v7584_v5, -inf  ;;  %v5226_v60 = vunpack.c.l.bf16 %v5362_v51 }
 0x39e   : > { %9459 = vst [vmem:[#allocation43_spill] sm:$0xff] %v7591_v22  ;;  %2541 = vmax.xlane.f32.xlu1 %v2540_v23  ;;  %v5671_v15 = vpop.f32.mrb[72].mxu1  ;;  %v2534_v36 = vsel %vm669_vm1, %v7591_v22, -inf }
 0x39f   : > { %v2401_v20 = vadd.f32 %v5671_v15, %v5218_v54  ;;  %v2392_v21 = vpop.f32.mrb[73].mxu1  ;;  %v5361_v54 = vld [vmem:[%s9307_s3 + $0x130] sm:$0xff]  }
 0x3a0   : > { %2538 = vmax.xlane.f32.xlu0 %v2537_v31  ;;  %v5672_v3 = vpop.f32.mrb[74].mxu1  ;;  %v2393_v15 = vadd.f32 %v5214_v48, %v2392_v21  ;;  %v2531_v31 = vsel %vm669_vm1, %v7595_v1, -inf  ;;  %v5223_v21 = vunpack.c.h.bf16 %v5361_v54 }
 0x3a1   : > { %v2404_v37 = vadd.f32 %v5672_v3, %v5219_v41  ;;  %v2395_v23 = vpop.f32.mrb[75].mxu1  ;;  %v7607_v30 = vmul.f32 0.35355338, %v2401_v20 }
 0x3a2   : > { %2535 = vmax.xlane.f32.xlu1 %v2534_v36  ;;  %v2396_v55 = vadd.f32 %v5215_v42, %v2395_v23  ;;  %v5222_v42 = vunpack.c.l.bf16 %v5361_v54  ;;  %v5227_v36 = vunpack.c.h.bf16 %v5362_v51  ;;  %v7617_v47 = vmul.f32 0.35355338, %v2393_v15 }
 0x3a3   : > { %v7609_v56 = vmul.f32 0.35355338, %v2404_v37  ;;  %v2549_v20 = vsel %vm669_vm1, %v7607_v30, -inf }
 0x3a4   : > { %2532 = vmax.xlane.f32.xlu0 %v2531_v31  ;;  %v7613_v41 = vmul.f32 0.35355338, %v2396_v55  ;;  %v5364_v55 = vld [vmem:[%s9307_s3 + $0x148] sm:$0xff]  }
 0x3a5   : > { %9460 = vst [vmem:[#allocation44_spill] sm:$0xff] %v7609_v56  ;;  %v2552_v3 = vsel %vm669_vm1, %v7609_v56, -inf  ;;  %v5234_v46 = vunpack.c.l.bf16 %v5364_v55 }
 0x3a6   : > { %9461 = vst [vmem:[#allocation45_spill] sm:$0xff] %v7613_v41  ;;  %2553 = vmax.xlane.f32.xlu1 %v2552_v3  ;;  %v5675_v23 = vpop.f32.mrb[76].mxu1  ;;  %v2546_v51 = vsel %vm669_vm1, %v7613_v41, -inf  ;;  %v5366_v41 = vld [vmem:[%s9307_s3 + $0x158] sm:$0xff]  }
 0x3a7   : > { %v2417_v37 = vadd.f32 %v5675_v23, %v5226_v60  ;;  %v2408_v48 = vpop.f32.mrb[77].mxu1  ;;  %v5363_v60 = vld [vmem:[%s9307_s3 + $0x140] sm:$0xff]   ;;  %v2543_v23 = vsel %vm669_vm1, %v7617_v47, -inf }
 0x3a8   : > { %2550 = vmax.xlane.f32.xlu0 %v2549_v20  ;;  %v5676_v31 = vpop.f32.mrb[78].mxu1  ;;  %v2409_v28 = vadd.f32 %v5222_v42, %v2408_v48  ;;  %v5235_v48 = vunpack.c.h.bf16 %v5364_v55  ;;  %v5231_v11 = vunpack.c.h.bf16 %v5363_v60 }
 0x3a9   : > { %v7624_v27 = vmul.f32 0.35355338, %v2417_v37  ;;  %v2420_v15 = vadd.f32 %v5676_v31, %v5227_v36  ;;  %v2411_v3 = vpop.f32.mrb[79].mxu1  ;;  %v5230_v36 = vunpack.c.l.bf16 %v5363_v60 }
 0x3aa   : > { %2547 = vmax.xlane.f32.xlu1 %v2546_v51  ;;  %v2412_v42 = vadd.f32 %v5223_v21, %v2411_v3  ;;  %v7637_v37 = vmul.f32 0.35355338, %v2409_v28 }
 0x3ab   : > { %v7631_v54 = vmul.f32 0.35355338, %v2420_v15  ;;  %v2561_v20 = vsel %vm669_vm1, %v7624_v27, -inf }
 0x3ac   : > { %2544 = vmax.xlane.f32.xlu0 %v2543_v23  ;;  %v7639_v51 = vmul.f32 0.35355338, %v2412_v42  ;;  %v2555_v55 = vsel %vm669_vm1, %v7637_v37, -inf  ;;  %v5242_v42 = vunpack.c.l.bf16 %v5366_v41 }
 0x3ad   : > { %9462 = vst [vmem:[#allocation46_spill] sm:$0xff] %v7631_v54  ;;  %v2564_v15 = vsel %vm669_vm1, %v7631_v54, -inf }
 0x3ae   : > { %2562 = vmax.xlane.f32.xlu1 %v2561_v20  ;;  %v5679_v31 = vpop.f32.mrb[80].mxu1  ;;  %9463 = vst [vmem:[#allocation47_spill] sm:$0xff] %v7639_v51 }
 0x3af   : > { %v2433_v45 = vadd.f32 %v5679_v31, %v5234_v46  ;;  %v2424_v63 = vpop.f32.mrb[81].mxu1  ;;  %v5365_v46 = vld [vmem:[%s9307_s3 + $0x150] sm:$0xff]   ;;  %v2558_v31 = vsel %vm669_vm1, %v7639_v51, -inf  ;;  %v5368_v51 = vld [vmem:[%s9307_s3 + $0x168] sm:$0xff]  }
 0x3b0   : > { %2565 = vmax.xlane.f32.xlu0 %v2564_v15  ;;  %v5680_v21 = vpop.f32.mrb[82].mxu1  ;;  %v2425_v3 = vadd.f32 %v5230_v36, %v2424_v63  ;;  %v5243_v15 = vunpack.c.h.bf16 %v5366_v41  ;;  %v5239_v22 = vunpack.c.h.bf16 %v5365_v46 }
 0x3b1   : > { %v7646_v28 = vmul.f32 0.35355338, %v2433_v45  ;;  %v2436_v23 = vadd.f32 %v5680_v21, %v5235_v48  ;;  %v2427_v20 = vpop.f32.mrb[83].mxu1  ;;  %v5238_v48 = vunpack.c.l.bf16 %v5365_v46 }
 0x3b2   : > { %2556 = vmax.xlane.f32.xlu1 %v2555_v55  ;;  %v2428_v63 = vadd.f32 %v5231_v11, %v2427_v20  ;;  %v7659_v36 = vmul.f32 0.35355338, %v2425_v3 }
 0x3b3   : > { %9464 = vst [vmem:[#allocation48_spill] sm:$0xff] %v7646_v28  ;;  %v7653_v60 = vmul.f32 0.35355338, %v2436_v23  ;;  %v2573_v45 = vsel %vm669_vm1, %v7646_v28, -inf }
 0x3b4   : > { %2559 = vmax.xlane.f32.xlu0 %v2558_v31  ;;  %9466 = vst [vmem:[#allocation50_spill] sm:$0xff] %v7659_v36  ;;  %v7661_v55 = vmul.f32 0.35355338, %v2428_v63  ;;  %v2567_v41 = vsel %vm669_vm1, %v7659_v36, -inf  ;;  %v5250_v63 = vunpack.c.l.bf16 %v5368_v51 }
 0x3b5   : > { %9465 = vst [vmem:[#allocation49_spill] sm:$0xff] %v7653_v60  ;;  %v2576_v23 = vsel %vm669_vm1, %v7653_v60, -inf }
 0x3b6   : > { %2574 = vmax.xlane.f32.xlu1 %v2573_v45  ;;  %v5683_v21 = vpop.f32.mrb[84].mxu1  ;;  %9467 = vst [vmem:[#allocation51_spill] sm:$0xff] %v7661_v55 }
 0x3b7   : > { %v2449_v54 = vadd.f32 %v5683_v21, %v5242_v42  ;;  %v2440_v56 = vpop.f32.mrb[85].mxu1  ;;  %v5367_v42 = vld [vmem:[%s9307_s3 + $0x160] sm:$0xff]   ;;  %v2570_v21 = vsel %vm669_vm1, %v7661_v55, -inf }
 0x3b8   : > { %2577 = vmax.xlane.f32.xlu0 %v2576_v23  ;;  %v5684_v11 = vpop.f32.mrb[86].mxu1  ;;  %v2441_v20 = vadd.f32 %v5238_v48, %v2440_v56  ;;  %v5251_v23 = vunpack.c.h.bf16 %v5368_v51  ;;  %v5247_v5 = vunpack.c.h.bf16 %v5367_v42 }
 0x3b9   : > { %v7668_v3 = vmul.f32 0.35355338, %v2449_v54  ;;  %v2452_v31 = vadd.f32 %v5684_v11, %v5243_v15  ;;  %v2443_v45 = vpop.f32.mrb[87].mxu1  ;;  %v5246_v15 = vunpack.c.l.bf16 %v5367_v42 }
 0x3ba   : > { %2568 = vmax.xlane.f32.xlu1 %v2567_v41  ;;  %v2444_v56 = vadd.f32 %v5239_v22, %v2443_v45  ;;  %v7681_v48 = vmul.f32 0.35355338, %v2441_v20 }
 0x3bb   : > { %9468 = vst [vmem:[#allocation52_spill] sm:$0xff] %v7668_v3  ;;  %v7675_v46 = vmul.f32 0.35355338, %v2452_v31  ;;  %v2585_v54 = vsel %vm669_vm1, %v7668_v3, -inf  ;;  %v5370_v3 = vld [vmem:[%s9307_s3 + $0x178] sm:$0xff]  }
 0x3bc   : > { %2571 = vmax.xlane.f32.xlu0 %v2570_v21  ;;  %9470 = vst [vmem:[#allocation54_spill] sm:$0xff] %v7681_v48  ;;  %v7683_v41 = vmul.f32 0.35355338, %v2444_v56  ;;  %v2579_v51 = vsel %vm669_vm1, %v7681_v48, -inf  ;;  %v5258_v56 = vunpack.c.l.bf16 %v5370_v3  ;;  %v5371_v48 = vld [vmem:[%s9307_s3 + $0x180] sm:$0xff]  }
 0x3bd   : > { %9469 = vst [vmem:[#allocation53_spill] sm:$0xff] %v7675_v46  ;;  %v2588_v31 = vsel %vm669_vm1, %v7675_v46, -inf }
 0x3be   : > { %2586 = vmax.xlane.f32.xlu1 %v2585_v54  ;;  %v5687_v11 = vpop.f32.mrb[88].mxu1  ;;  %9471 = vst [vmem:[#allocation55_spill] sm:$0xff] %v7683_v41 }
 0x3bf   : > { %v2465_v60 = vadd.f32 %v5687_v11, %v5250_v63  ;;  %v2456_v36 = vpop.f32.mrb[89].mxu1  ;;  %v2582_v63 = vsel %vm669_vm1, %v7683_v41, -inf }
 0x3c0   : > { %2589 = vmax.xlane.f32.xlu0 %v2588_v31  ;;  %v5688_v22 = vpop.f32.mrb[90].mxu1  ;;  %v2457_v45 = vadd.f32 %v5246_v15, %v2456_v36 }
 0x3c1   : > { %v7690_v20 = vmul.f32 0.35355338, %v2465_v60  ;;  %v2468_v21 = vadd.f32 %v5688_v22, %v5251_v23  ;;  %v2459_v54 = vpop.f32.mrb[91].mxu1  ;;  %v5369_v60 = vld [vmem:[%s9307_s3 + $0x170] sm:$0xff]  }
 0x3c2   : > { %2580 = vmax.xlane.f32.xlu1 %v2579_v51  ;;  %v2460_v11 = vadd.f32 %v5247_v5, %v2459_v54  ;;  %v7703_v36 = vmul.f32 0.35355338, %v2457_v45  ;;  %v5254_v51 = vunpack.c.l.bf16 %v5369_v60  ;;  %v5372_v5 = vld [vmem:[%s9307_s3 + $0x188] sm:$0xff]   ;;  %v5255_v55 = vunpack.c.h.bf16 %v5369_v60 }
 0x3c3   : > { %9472 = vst [vmem:[#allocation56_spill] sm:$0xff] %v7690_v20  ;;  %v7694_v46 = vmul.f32 0.35355338, %v2468_v21  ;;  %v2597_v42 = vsel %vm669_vm1, %v7690_v20, -inf  ;;  %v5267_v33 = vunpack.c.h.bf16 %v5372_v5 }
 0x3c4   : > { %2583 = vmax.xlane.f32.xlu0 %v2582_v63  ;;  %9474 = vst [vmem:[#allocation58_spill] sm:$0xff] %v7703_v36  ;;  %v7705_v23 = vmul.f32 0.35355338, %v2460_v11  ;;  %v2591_v45 = vsel %vm669_vm1, %v7703_v36, -inf }
 0x3c5   : > { %9473 = vst [vmem:[#allocation57_spill] sm:$0xff] %v7694_v46  ;;  %v2600_v31 = vsel %vm669_vm1, %v7694_v46, -inf }
 0x3c6   : > { %2598 = vmax.xlane.f32.xlu1 %v2597_v42  ;;  %v5691_v15 = vpop.f32.mrb[92].mxu1  ;;  %9475 = vst [vmem:[#allocation59_spill] sm:$0xff] %v7705_v23  ;;  %v2594_v11 = vsel %vm669_vm1, %v7705_v23, -inf  ;;  %v5262_v23 = vunpack.c.l.bf16 %v5371_v48 }
 0x3c7   : > { %v2481_v22 = vadd.f32 %v5691_v15, %v5258_v56  ;;  %v2472_v21 = vpop.f32.mrb[93].mxu1  ;;  %v5259_v56 = vunpack.c.h.bf16 %v5370_v3  ;;  %v5266_v15 = vunpack.c.l.bf16 %v5372_v5  ;;  %v7728_v3 = vld [vmem:[%s9307_s3 + $0x198] sm:$0xff]   ;;  %v5263_v5 = vunpack.c.h.bf16 %v5371_v48 }
 0x3c8   : > { %2601 = vmax.xlane.f32.xlu0 %v2600_v31  ;;  %v5692_v41 = vpop.f32.mrb[94].mxu1  ;;  %v2473_v42 = vadd.f32 %v5254_v51, %v2472_v21 }
 0x3c9   : > { %v7714_v54 = vmul.f32 0.35355338, %v2481_v22  ;;  %v2475_v63 = vpop.f32.mrb[95].mxu1  ;;  %v2484_v22 = vadd.f32 %v5692_v41, %v5259_v56  ;;  %v5274_v41 = vunpack.c.l.bf16 %v7728_v3 }
 0x3ca   : > { %2592 = vmax.xlane.f32.xlu1 %v2591_v45  ;;  %v7723_v36 = vmul.f32 0.35355338, %v2473_v42  ;;  %v7735_v42 = vld [vmem:[%s9307_s3 + $0x190] sm:$0xff]   ;;  %v2476_v60 = vadd.f32 %v5255_v55, %v2475_v63 }
 0x3cb   : > { %9476 = vst [vmem:[#allocation60_spill] sm:$0xff] %v7714_v54  ;;  %v2609_v31 = vsel %vm669_vm1, %v7714_v54, -inf }
 0x3cc   : > { %2595 = vmax.xlane.f32.xlu0 %v2594_v11  ;;  %9477 = vst [vmem:[#allocation61_spill] sm:$0xff] %v7723_v36  ;;  %v2603_v56 = vsel %vm669_vm1, %v7723_v36, -inf  ;;  %v7745_v54 = vmul.f32 0.35355338, %v2476_v60 }
 0x3ce   : > { %v5731_v46 = vpop.f32.mrb[96].mxu1  ;;  %9480 = vst [vmem:[#allocation64_spill] sm:$0xff] %v7745_v54 }
 0x3cf   : > { %v3292_v45 = vadd.f32 %v5731_v46, %v5266_v15  ;;  %v3283_v51 = vpop.f32.mrb[97].mxu1  ;;  %v7738_v46 = vmul.f32 0.35355338, %v2484_v22 }
 0x3d0   : > { %2610 = vmax.xlane.f32.xlu0 %v2609_v31  ;;  %v5732_v21 = vpop.f32.mrb[98].mxu1  ;;  %v5270_v31 = vunpack.c.l.bf16 %v7735_v42 }
 0x3d1   : > { %v7730_v11 = vmul.f32 0.35355338, %v3292_v45  ;;  %v3286_v43 = vpop.f32.mrb[99].mxu1  ;;  %9479 = vst [vmem:[#allocation63_spill] sm:$0xff] %v7738_v46  ;;  %v3284_v45 = vadd.f32 %v5262_v23, %v3283_v51  ;;  %v2612_v22 = vsel %vm669_vm1, %v7738_v46, -inf  ;;  %v3295_v60 = vadd.f32 %v5732_v21, %v5267_v33 }
 0x3d3   : > { %9478 = vst [vmem:[#allocation62_spill] sm:$0xff] %v7730_v11  ;;  %v3448_v15 = vsel %vm669_vm1, %v7730_v11, -inf  ;;  %v7775_v21 = vmul.f32 0.35355338, %v3295_v60  ;;  %v5271_v11 = vunpack.c.h.bf16 %v7735_v42 }
 0x3d4   : > { %2604 = vmax.xlane.f32.xlu0 %v2603_v56  ;;  %3449 = vmax.xlane.f32.xlu1 %v3448_v15  ;;  %v7752_v56 = vld [vmem:[%s9307_s3 + $0x1a8] sm:$0xff]   ;;  %v7754_v15 = vmul.f32 0.35355338, %v3284_v45 }
 0x3d5   : > { %v5282_v45 = vunpack.c.l.bf16 %v7752_v56  ;;  %9484 = vst [vmem:[#allocation68_spill] sm:$0xff] %v7775_v21 }
 0x3d6   : > { %v5735_v38 = vpop.f32.mrb[100].mxu1  ;;  %9481 = vst [vmem:[#allocation65_spill] sm:$0xff] %v7754_v15 }
 0x3d7   : > { %v3308_v57 = vadd.f32 %v5735_v38, %v5274_v41  ;;  %v3299_v55 = vpop.f32.mrb[101].mxu1  ;;  %v7761_v38 = vld [vmem:[%s9307_s3 + $0x1a0] sm:$0xff]  }
 0x3d8   : > { %2613 = vmax.xlane.f32.xlu0 %v2612_v22  ;;  %v3300_v63 = vadd.f32 %v5270_v31, %v3299_v55  ;;  %v5736_v36 = vpop.f32.mrb[102].mxu1  ;;  %v2606_v31 = vsel %vm669_vm1, %v7745_v54, -inf  ;;  %v3442_v55 = vsel %vm669_vm1, %v7754_v15, -inf  ;;  %v5275_v54 = vunpack.c.h.bf16 %v7728_v3  ;;  %v7789_v3 = vld [vmem:[%s9307_s3 + $0x1b0] sm:$0xff]  }
 0x3d9   : > { %v7756_v23 = vmul.f32 0.35355338, %v3308_v57  ;;  %v3302_v51 = vpop.f32.mrb[103].mxu1  ;;  %v5278_v57 = vunpack.c.l.bf16 %v7761_v38 }
 0x3da   : > { %v7763_v41 = vmul.f32 0.35355338, %v3300_v63  ;;  %v3287_v63 = vadd.f32 %v5263_v5, %v3286_v43 }
 0x3db   : > { %9482 = vst [vmem:[#allocation66_spill] sm:$0xff] %v7756_v23  ;;  %v3460_v22 = vsel %vm669_vm1, %v7756_v23, -inf }
 0x3dc   : > { %9483 = vst [vmem:[#allocation67_spill] sm:$0xff] %v7763_v41  ;;  %2607 = vmax.xlane.f32.xlu0 %v2606_v31  ;;  %3461 = vmax.xlane.f32.xlu1 %v3460_v22  ;;  %v3454_v48 = vsel %vm669_vm1, %v7763_v41, -inf  ;;  %v7781_v31 = vld [vmem:[%s9307_s3 + $0x1b8] sm:$0xff]   ;;  %v7791_v60 = vmul.f32 0.35355338, %v3287_v63  ;;  %v5286_v63 = vunpack.c.l.bf16 %v7789_v3 }
 0x3de   : > { %v5739_v33 = vpop.f32.mrb[104].mxu1  ;;  %9486 = vst [vmem:[#allocation70_spill] sm:$0xff] %v7791_v60 }
 0x3df   : > { %v3324_v46 = vadd.f32 %v5739_v33, %v5282_v45  ;;  %v3315_v23 = vpop.f32.mrb[105].mxu1 }
 0x3e0   : > { %3443 = vmax.xlane.f32.xlu0 %v3442_v55  ;;  %3455 = vmax.xlane.f32.xlu1 %v3454_v48  ;;  %v3316_v22 = vadd.f32 %v5278_v57, %v3315_v23  ;;  %v5740_v15 = vpop.f32.mrb[106].mxu1  ;;  %v5290_v23 = vunpack.c.l.bf16 %v7781_v31  ;;  %v3311_v57 = vadd.f32 %v5736_v36, %v5275_v54  ;;  %v5283_v36 = vunpack.c.h.bf16 %v7752_v56 }
 0x3e1   : > { %v7784_v41 = vmul.f32 0.35355338, %v3324_v46  ;;  %v1604_v43 = vpop.xlane.xlu0 %1603  ;;  %v3318_v5 = vpop.f32.mrb[107].mxu1  ;;  %v3451_v46 = vsel %vm669_vm1, %v7775_v21, -inf  ;;  %v5279_v56 = vunpack.c.h.bf16 %v7761_v38 }
 0x3e2   : > { %v1694_v45 = vsub.f32 %v7383_v59, %v1604_v43  ;;  %v1598_v33 = vpop.xlane.xlu1 %1597  ;;  %v7794_v55 = vmul.f32 0.35355338, %v3316_v22  ;;  %v7806_v54 = vmul.f32 0.35355338, %v3311_v57 }
 0x3e3   : > { %9485 = vst [vmem:[#allocation69_spill] sm:$0xff] %v7784_v41  ;;  %v1692_v42 = vsub.f32 %v7388_v2, %v1598_v33  ;;  %v3472_v48 = vsel %vm669_vm1, %v7784_v41, -inf  ;;  %v3303_v33 = vadd.f32 %v5271_v11, %v3302_v51  ;;  %v7818_v11 = vld [vmem:[%s9307_s3 + $0x1c8] sm:$0xff]  }
 0x3e4   : > { %9487 = vst [vmem:[#allocation71_spill] sm:$0xff] %v7794_v55  ;;  %v1728_v17 = vmul.f32 1.442695, %v1694_v45  ;;  %3452 = vmax.xlane.f32.xlu0 %v3451_v46  ;;  %3473 = vmax.xlane.f32.xlu1 %v3472_v48  ;;  %v3466_v22 = vsel %vm669_vm1, %v7794_v55, -inf  ;;  %9488 = vst [vmem:[#allocation72_spill] sm:$0xff] %v7806_v54  ;;  %v3445_v45 = vsel %vm669_vm1, %v7791_v60, -inf }
 0x3e5   : > { %v1607_v59 = vpop.xlane.xlu0 %1606  ;;  %v1724_v43 = vmul.f32 1.442695, %v1692_v42  ;;  %v7820_v51 = vmul.f32 0.35355338, %v3303_v33  ;;  %v5298_v33 = vunpack.c.l.bf16 %v7818_v11 }
 0x3e6   : > { %6199 = vpow2.f32 %v1728_v17  ;;  %v5743_v2 = vpop.f32.mrb[108].mxu1  ;;  %v1695_v38 = vsub.f32 %v7390_v53, %v1607_v59  ;;  %v5291_v59 = vunpack.c.h.bf16 %v7781_v31 }
 0x3e7   : > { %v3340_v21 = vadd.f32 %v5743_v2, %v5290_v23  ;;  %v3331_v46 = vpop.f32.mrb[109].mxu1  ;;  %6201 = vpow2.f32 %v1724_v43  ;;  %9491 = vst [vmem:[#allocation75_spill] sm:$0xff] %v7820_v51  ;;  %v3327_v23 = vadd.f32 %v5740_v15, %v5283_v36  ;;  %v3457_v53 = vsel %vm669_vm1, %v7820_v51, -inf }
 0x3e8   : > { %3446 = vmax.xlane.f32.xlu0 %v3445_v45  ;;  %3467 = vmax.xlane.f32.xlu1 %v3466_v22  ;;  %v3332_v48 = vadd.f32 %v5286_v63, %v3331_v46  ;;  %v5744_v41 = vpop.f32.mrb[110].mxu1  ;;  %v7836_v45 = vld [vmem:[%s9307_s3 + $0x1c0] sm:$0xff]  }
 0x3e9   : > { %v7810_v20 = vmul.f32 0.35355338, %v3340_v21  ;;  %v1616_v55 = vpop.xlane.xlu1 %1615  ;;  %v1601_v17 = vpop.xlane.xlu0 %1600  ;;  %v3463_v21 = vsel %vm669_vm1, %v7806_v54, -inf  ;;  %v7838_v46 = vmul.f32 0.35355338, %v3327_v23 }
 0x3ea   : > { %v7813_v42 = vmul.f32 0.35355338, %v3332_v48  ;;  %v3334_v57 = vpop.f32.mrb[111].mxu1  ;;  %v1698_v15 = vsub.f32 %v7403_v7, %v1616_v55  ;;  %v3319_v48 = vadd.f32 %v5279_v56, %v3318_v5  ;;  %v1730_v55 = vmul.f32 1.442695, %v1695_v38 }
 0x3eb   : > { %9489 = vst [vmem:[#allocation73_spill] sm:$0xff] %v7810_v20  ;;  %v3484_v63 = vsel %vm669_vm1, %v7810_v20, -inf  ;;  %9492 = vst [vmem:[#allocation76_spill] sm:$0xff] %v7838_v46  ;;  %v1693_v54 = vsub.f32 %v7396_v25, %v1601_v17  ;;  %v5294_v56 = vunpack.c.l.bf16 %v7836_v45  ;;  %v3475_v38 = vsel %vm669_vm1, %v7838_v46, -inf }
 0x3ec   : > { %9490 = vst [vmem:[#allocation74_spill] sm:$0xff] %v7813_v42  ;;  %3464 = vmax.xlane.f32.xlu0 %v3463_v21  ;;  %3485 = vmax.xlane.f32.xlu1 %v3484_v63  ;;  %v3478_v2 = vsel %vm669_vm1, %v7813_v42, -inf  ;;  %v1736_v51 = vmul.f32 1.442695, %v1698_v15  ;;  %v5287_v42 = vunpack.c.h.bf16 %v7789_v3  ;;  %v3343_v25 = vadd.f32 %v5744_v41, %v5291_v59 }
 0x3ed   : > { %v1610_v22 = vpop.xlane.xlu1 %1609  ;;  %v7827_v43 = vpop.xlane.xlu0 %1618  ;;  %6203 = vpow2.f32 %v1730_v55 }
 0x3ee   : > { %v5747_v36 = vpop.f32.mrb[112].mxu1  ;;  %v1696_v31 = vsub.f32 %v7413_v44, %v1610_v22  ;;  %6205 = vpow2.f32 %v1736_v51  ;;  %v7871_v41 = vmul.f32 0.35355338, %v3343_v25  ;;  %v3335_v59 = vadd.f32 %v5287_v42, %v3334_v57  ;;  %v7890_v57 = vld [vmem:[%s9307_s3 + $0x1d8] sm:$0xff]  }
 0x3ef   : > { %v3347_v21 = vpop.f32.mrb[113].mxu1  ;;  %v3356_v5 = vadd.f32 %v5747_v36, %v5298_v33  ;;  %v1726_v33 = vmul.f32 1.442695, %v1693_v54  ;;  %v1699_v25 = vsub.f32 %v7415_v14, %v7827_v43 }
 0x3f0   : > { %v7843_v63 = vpop.eup %6199  ;;  %3458 = vmax.xlane.f32.xlu0 %v3457_v53  ;;  %3479 = vmax.xlane.f32.xlu1 %v3478_v2  ;;  %v7845_v7 = vpop.f32.mrb[114].mxu1  ;;  %v7857_v2 = vmul.f32 0.35355338, %v3319_v48  ;;  %v3348_v15 = vadd.f32 %v5294_v56, %v3347_v21  ;;  %v1732_v36 = vmul.f32 1.442695, %v1696_v31  ;;  %9497 = vst [vmem:[#allocation81_spill] sm:$0xff] %v7871_v41 }
 0x3f1   : > { %9493 = vst [vmem:[#allocation77_spill] sm:$0xff] %v7843_v63  ;;  %v7848_v60 = vpop.xlane.xlu1 %1627  ;;  %v7850_v23 = vpop.xlane.xlu0 %1612  ;;  %v1794_v17 = vsel %vm669_vm1, %v7843_v63, 0.0  ;;  %v7869_v22 = vmul.f32 0.35355338, %v3356_v5  ;;  %6207 = vpow2.f32 %v1726_v33  ;;  %v7894_v56 = vmul.f32 0.35355338, %v3335_v59 }
 0x3f2   : > { %v7855_v20 = vpop.f32.mrb[115].mxu1  ;;  %9494 = vst [vmem:[#allocation78_spill] sm:$0xff] %v7857_v2  ;;  %v7863_v53 = vpop.eup %6201  ;;  %v3469_v46 = vsel %vm669_vm1, %v7857_v2, -inf  ;;  %v7883_v21 = vmul.f32 0.35355338, %v3348_v15  ;;  %6209 = vpow2.f32 %v1732_v36  ;;  %v3487_v31 = vsel %vm669_vm1, %v7871_v41, -inf }
 0x3f3   : > { %9495 = vst [vmem:[#allocation79_spill] sm:$0xff] %v7863_v53  ;;  %9496 = vst [vmem:[#allocation80_spill] sm:$0xff] %v7869_v22  ;;  %v1788_v55 = vsel %vm669_vm1, %v7863_v53, 0.0  ;;  %v3496_v42 = vsel %vm669_vm1, %v7869_v22, -inf  ;;  %v5306_v36 = vunpack.c.l.bf16 %v7890_v57  ;;  %v1702_v59 = vsub.f32 %v7428_v29, %v7848_v60 }
 0x3f4   : > { %3476 = vmax.xlane.f32.xlu0 %v3475_v38  ;;  %1795 = vadd.xlane.f32.xlu1 %v1794_v17  ;;  %9498 = vst [vmem:[#allocation82_spill] sm:$0xff] %v7883_v21  ;;  %9499 = vst [vmem:[#allocation83_spill] sm:$0xff] %v7894_v56  ;;  %v3490_v15 = vsel %vm669_vm1, %v7883_v21, -inf  ;;  %v3481_v43 = vsel %vm669_vm1, %v7894_v56, -inf  ;;  %v1738_v60 = vmul.f32 1.442695, %v1699_v25  ;;  %v1697_v41 = vsub.f32 %v7419_v58, %v7850_v23 }
 0x3f5   : > { %v7865_v44 = vpop.xlane.xlu1 %1621  ;;  %v7867_v3 = vpop.xlane.xlu0 %1630 }
 0x3f6   : > { %v5751_v48 = vpop.f32.mrb[116].mxu1  ;;  %v1700_v18 = vsub.f32 %v7433_v9, %v7865_v44  ;;  %6211 = vpow2.f32 %v1738_v60  ;;  %v1734_v9 = vmul.f32 1.442695, %v1697_v41 }
 0x3f7   : > { %v3363_v54 = vpop.f32.mrb[117].mxu1  ;;  %v7916_v14 = vpop.eup %6203  ;;  %v3372_v53 = vadd.f32 %v5751_v48, %v5306_v36  ;;  %v5295_v48 = vunpack.c.h.bf16 %v7836_v45 }
 0x3f8   : > { %3470 = vmax.xlane.f32.xlu0 %v3469_v46  ;;  %1789 = vadd.xlane.f32.xlu1 %v1788_v55  ;;  %v7877_v38 = vpop.f32.mrb[118].mxu1  ;;  %v7912_v55 = vld [vmem:[%s9307_s3 + $0x1d0] sm:$0xff]   ;;  %9500 = vst [vmem:[#allocation84_spill] sm:$0xff] %v7916_v14  ;;  %v7923_v22 = vpop.eup %6205  ;;  %v1797_v23 = vsel %vm669_vm1, %v7916_v14, 0.0 }
 0x3f9   : > { %v7879_v5 = vpop.xlane.xlu1 %1639  ;;  %v7881_v51 = vpop.xlane.xlu0 %1624  ;;  %9501 = vst [vmem:[#allocation85_spill] sm:$0xff] %v7923_v22  ;;  %v5302_v56 = vunpack.c.l.bf16 %v7912_v55  ;;  %v1806_v58 = vsel %vm669_vm1, %v7923_v22, 0.0  ;;  %v3351_v45 = vadd.f32 %v5295_v48, %v7855_v20 }
 0x3fa   : > { %v7892_v46 = vpop.f32.mrb[119].mxu1 }
 0x3fc   : > { %3488 = vmax.xlane.f32.xlu0 %v3487_v31  ;;  %3497 = vmax.xlane.f32.xlu1 %v3496_v42  ;;  %v5299_v31 = vunpack.c.h.bf16 %v7818_v11  ;;  %v1744_v11 = vmul.f32 1.442695, %v1702_v59 }
 0x3fd   : > { %v7900_v17 = vpop.xlane.xlu1 %1633  ;;  %v7902_v33 = vpop.xlane.xlu0 %1642 }
 0x3fe   : > { %v7914_v42 = vpop.f32.mrb[120].mxu1  ;;  %v3359_v25 = vadd.f32 %v7845_v7, %v5299_v31  ;;  %v3364_v7 = vadd.f32 %v5302_v56, %v3363_v54  ;;  %6213 = vpow2.f32 %v1744_v11  ;;  %v1740_v31 = vmul.f32 1.442695, %v1700_v18  ;;  %v7978_v11 = vld [vmem:[%s9307_s3 + $0x1e8] sm:$0xff]  }
 0x3ff   : > { %v7921_v21 = vpop.f32.mrb[121].mxu1  ;;  %6215 = vpow2.f32 %v1734_v9  ;;  %v1703_v9 = vsub.f32 %v7435_v10, %v7867_v3  ;;  %v5307_v3 = vunpack.c.h.bf16 %v7890_v57 }
 0x400   : > { %3482 = vmax.xlane.f32.xlu0 %v3481_v43  ;;  %3491 = vmax.xlane.f32.xlu1 %v3490_v15  ;;  %v7925_v29 = vpop.f32.mrb[122].mxu1  ;;  %v7938_v15 = vpop.eup %6207  ;;  %v7952_v43 = vmul.f32 0.35355338, %v3372_v53  ;;  %v7956_v14 = vmul.f32 0.35355338, %v3359_v25  ;;  %6217 = vpow2.f32 %v1740_v31 }
 0x401   : > { %v7929_v2 = vpop.xlane.xlu1 %1651  ;;  %v7931_v63 = vpop.xlane.xlu0 %1636  ;;  %9502 = vst [vmem:[#allocation86_spill] sm:$0xff] %v7938_v15  ;;  %v1791_v41 = vsel %vm669_vm1, %v7938_v15, 0.0  ;;  %v7971_v56 = vmul.f32 0.35355338, %v3364_v7 }
 0x402   : > { %v7936_v62 = vpop.f32.mrb[123].mxu1  ;;  %v7946_v36 = vpop.eup %6209  ;;  %9504 = vst [vmem:[#allocation88_spill] sm:$0xff] %v7952_v43  ;;  %9505 = vst [vmem:[#allocation89_spill] sm:$0xff] %v7956_v14  ;;  %v3508_v20 = vsel %vm669_vm1, %v7952_v43, -inf  ;;  %v3499_v48 = vsel %vm669_vm1, %v7956_v14, -inf }
 0x403   : > { %9503 = vst [vmem:[#allocation87_spill] sm:$0xff] %v7946_v36  ;;  %9506 = vst [vmem:[#allocation90_spill] sm:$0xff] %v7971_v56  ;;  %v1746_v14 = vmul.f32 1.442695, %v1703_v9 }
 0x404   : > { %1807 = vadd.xlane.f32.xlu1 %v1806_v58  ;;  %1798 = vadd.xlane.f32.xlu0 %v1797_v23  ;;  %v1800_v58 = vsel %vm669_vm1, %v7946_v36, 0.0  ;;  %v7982_v23 = vmul.f32 0.35355338, %v3351_v45  ;;  %v1706_v45 = vsub.f32 %v7450_v39, %v7879_v5  ;;  %v1701_v39 = vsub.f32 %v7441_v40, %v7881_v51 }
 0x405   : > { %v7948_v44 = vpop.xlane.xlu1 %1645  ;;  %v7950_v59 = vpop.xlane.xlu0 %1654  ;;  %v5303_v51 = vunpack.c.h.bf16 %v7912_v55  ;;  %6219 = vpow2.f32 %v1746_v14 }
 0x406   : > { %v7954_v22 = vpop.f32.mrb[124].mxu1  ;;  %9507 = vst [vmem:[#allocation91_spill] sm:$0xff] %v7982_v23  ;;  %v3493_v10 = vsel %vm669_vm1, %v7982_v23, -inf  ;;  %v1752_v28 = vmul.f32 1.442695, %v1706_v45  ;;  %v1704_v23 = vsub.f32 %v7457_v12, %v7900_v17 }
 0x407   : > { %v7963_v60 = vpop.f32.mrb[125].mxu1  ;;  %v3367_v55 = vadd.f32 %v5303_v51, %v7892_v46 }
 0x408   : > { %1801 = vadd.xlane.f32.xlu1 %v1800_v58  ;;  %1792 = vadd.xlane.f32.xlu0 %v1791_v41  ;;  %v7965_v53 = vpop.f32.mrb[126].mxu1  ;;  %v3502_v58 = vsel %vm669_vm1, %v7971_v56, -inf  ;;  %v5314_v41 = vunpack.c.l.bf16 %v7978_v11  ;;  %6221 = vpow2.f32 %v1752_v28  ;;  %v1748_v45 = vmul.f32 1.442695, %v1704_v23 }
 0x409   : > { %v7967_v18 = vpop.xlane.xlu1 %1663  ;;  %v7969_v54 = vpop.xlane.xlu0 %1648 }
 0x40a   : > { %v7980_v25 = vpop.f32.mrb[127].mxu1  ;;  %v3388_v36 = vadd.f32 %v7914_v42, %v5314_v41  ;;  %v1742_v42 = vmul.f32 1.442695, %v1701_v39 }
 0x40c   : > { %3509 = vmax.xlane.f32.xlu1 %v3508_v20  ;;  %3500 = vmax.xlane.f32.xlu0 %v3499_v48  ;;  %v8000_v20 = vld [vmem:[%s9307_s3 + $0x1e0] sm:$0xff]   ;;  %v8002_v48 = vpop.eup %6211  ;;  %v8029_v17 = vmul.f32 0.35355338, %v3388_v36  ;;  %6223 = vpow2.f32 %v1742_v42 }
 0x40d   : > { %v7988_v7 = vpop.xlane.xlu1 %1657  ;;  %v7990_v31 = vpop.xlane.xlu0 %1666  ;;  %v5310_v15 = vunpack.c.l.bf16 %v8000_v20  ;;  %v1809_v40 = vsel %vm669_vm1, %v8002_v48, 0.0  ;;  %6225 = vpow2.f32 %v1748_v45  ;;  %v5315_v45 = vunpack.c.h.bf16 %v7978_v11 }
 0x40e   : > { %v8007_v43 = vpop.eup %6213 }
 0x40f   : > { %9508 = vst [vmem:[#allocation92_spill] sm:$0xff] %v8007_v43  ;;  %v8017_v57 = vpop.eup %6215  ;;  %v1818_v9 = vsel %vm669_vm1, %v8007_v43, 0.0 }
 0x410   : > { %3503 = vmax.xlane.f32.xlu1 %v3502_v58  ;;  %3494 = vmax.xlane.f32.xlu0 %v3493_v10  ;;  %v3375_v58 = vadd.f32 %v7877_v38, %v5307_v3  ;;  %v8025_v10 = vpop.eup %6217  ;;  %v3380_v38 = vadd.f32 %v5310_v15, %v7921_v21  ;;  %v1710_v3 = vsub.f32 %v7472_v8, %v7929_v2  ;;  %v1803_v39 = vsel %vm669_vm1, %v8017_v57, 0.0 }
 0x411   : > { %v1676_v5 = vpop.xlane.xlu1 %1675  ;;  %v8011_v56 = vpop.xlane.xlu0 %1660  ;;  %v1812_v14 = vsel %vm669_vm1, %v8025_v10, 0.0  ;;  %v3520_v8 = vsel %vm669_vm1, %v8029_v17, -inf  ;;  %v8048_v15 = vmul.f32 0.35355338, %v3367_v55 }
 0x412   : > { %v8034_v43 = vmul.f32 0.35355338, %v3375_v58  ;;  %v8043_v28 = vmul.f32 0.35355338, %v3380_v38  ;;  %v1760_v2 = vmul.f32 1.442695, %v1710_v3  ;;  %v1718_v46 = vsub.f32 %v7516_v52, %v1676_v5  ;;  %v8059_v52 = vpop.eup %6219 }
 0x413   : > { %v1707_v58 = vsub.f32 %v7459_v13, %v7902_v33  ;;  %v3505_v38 = vsel %vm669_vm1, %v8048_v15, -inf  ;;  %v8064_v3 = vpop.eup %6221  ;;  %v1821_v11 = vsel %vm669_vm1, %v8059_v52, 0.0 }
 0x414   : > { %1819 = vadd.xlane.f32.xlu1 %v1818_v9  ;;  %1810 = vadd.xlane.f32.xlu0 %v1809_v40  ;;  %v3511_v23 = vsel %vm669_vm1, %v8034_v43, -inf  ;;  %v3514_v40 = vsel %vm669_vm1, %v8043_v28, -inf  ;;  %6227 = vpow2.f32 %v1760_v2  ;;  %v1776_v51 = vmul.f32 1.442695, %v1718_v46 }
 0x415   : > { %v1670_v41 = vpop.xlane.xlu1 %1669  ;;  %v8027_v12 = vpop.xlane.xlu0 %1678  ;;  %v1754_v13 = vmul.f32 1.442695, %v1707_v58  ;;  %v5311_v2 = vunpack.c.h.bf16 %v8000_v20 }
 0x416   : > { %v1716_v42 = vsub.f32 %v7521_v35, %v1670_v41  ;;  %6229 = vpow2.f32 %v1776_v51  ;;  %v8069_v35 = vpop.eup %6223 }
 0x417   : > { %v8079_v46 = vpop.eup %6225  ;;  %6231 = vpow2.f32 %v1754_v13 }
 0x418   : > { %1813 = vadd.xlane.f32.xlu1 %v1812_v14  ;;  %1804 = vadd.xlane.f32.xlu0 %v1803_v39  ;;  %v1772_v55 = vmul.f32 1.442695, %v1716_v42  ;;  %v1830_v39 = vsel %vm669_vm1, %v8064_v3, 0.0  ;;  %v1824_v51 = vsel %vm669_vm1, %v8079_v46, 0.0 }
 0x419   : > { %v1688_v36 = vpop.xlane.xlu1 %1687  ;;  %v8041_v21 = vpop.xlane.xlu0 %1672 }
 0x41a   : > { %v1722_v14 = vsub.f32 %v7538_v0, %v1688_v36  ;;  %v1705_v0 = vsub.f32 %v7463_v50, %v7931_v63  ;;  %6233 = vpow2.f32 %v1772_v55  ;;  %v1815_v50 = vsel %vm669_vm1, %v8069_v35, 0.0 }
 0x41b   : > { %v3383_v63 = vadd.f32 %v5311_v2, %v7936_v62 }
 0x41c   : > { %3521 = vmax.xlane.f32.xlu1 %v3520_v8  ;;  %3512 = vmax.xlane.f32.xlu0 %v3511_v23  ;;  %v3391_v8 = vadd.f32 %v7925_v29, %v5315_v45  ;;  %v1784_v23 = vmul.f32 1.442695, %v1722_v14 }
 0x41d   : > { %v8054_v9 = vpop.xlane.xlu0 %1690  ;;  %v1682_v5 = vpop.xlane.xlu1 %1681  ;;  %v8102_v55 = vmul.f32 0.35355338, %v3383_v63 }
 0x41e   : > { %v1720_v58 = vsub.f32 %v7542_v4, %v1682_v5  ;;  %v8089_v29 = vmul.f32 0.35355338, %v3391_v8  ;;  %v8098_v42 = vpop.eup %6227  ;;  %v1750_v4 = vmul.f32 1.442695, %v1705_v0  ;;  %6235 = vpow2.f32 %v1784_v23 }
 0x41f   : > { %9509 = vst [vmem:[#allocation93_spill] sm:$0xff] %v8102_v55 }
 0x420   : > { %3515 = vmax.xlane.f32.xlu1 %v3514_v40  ;;  %3506 = vmax.xlane.f32.xlu0 %v3505_v38  ;;  %v8087_v40 = vld [vmem:[%s9307_s3 + $0x1f8] sm:$0xff]   ;;  %v1780_v45 = vmul.f32 1.442695, %v1720_v58  ;;  %v3523_v62 = vsel %vm669_vm1, %v8089_v29, -inf  ;;  %6237 = vpow2.f32 %v1750_v4 }
 0x421   : > { %v8066_v33 = vpop.xlane.xlu0 %1684  ;;  %v5322_v38 = vunpack.c.l.bf16 %v8087_v40 }
 0x422   : > { %6239 = vpow2.f32 %v1780_v45 }
 0x423   : > { %v8071_v41 = vpop.xlane.xlu1 %2529  ;;  %v3404_v2 = vadd.f32 %v7954_v22, %v5322_v38  ;;  %v5385_v22 = vld [vmem:[%s9307_s3 + $0x1f0] sm:$0xff]  }
 0x424   : > { %1831 = vadd.xlane.f32.xlu1 %v1830_v39  ;;  %1822 = vadd.xlane.f32.xlu0 %v1821_v11  ;;  %v1842_v39 = vsel %vm669_vm1, %v8098_v42, 0.0  ;;  %v8110_v11 = vpop.eup %6229 }
 0x425   : > { %v2527_v36 = vpop.xlane.xlu0 %2526  ;;  %9510 = vst [vmem:[#allocation94_spill] sm:$0xff] %v8110_v11  ;;  %v1866_v58 = vsel %vm669_vm1, %v8110_v11, 0.0 }
 0x426   : > { %v2617_v13 = vsub.f32 %v7560_v26, %v2527_v36  ;;  %v8114_v36 = vpop.eup %6231 }
 0x427   : > { %v8091_v20 = vpop.xlane.xlu1 %2523 }
 0x428   : > { %1825 = vadd.xlane.f32.xlu1 %v1824_v51  ;;  %1816 = vadd.xlane.f32.xlu0 %v1815_v50  ;;  %v2651_v26 = vmul.f32 1.442695, %v2617_v13  ;;  %v3517_v51 = vsel %vm669_vm1, %v8102_v55, -inf  ;;  %v8122_v50 = vpop.eup %6233  ;;  %v1833_v13 = vsel %vm669_vm1, %v8114_v36, 0.0 }
 0x429   : > { %v2521_v5 = vpop.xlane.xlu0 %2520  ;;  %9511 = vst [vmem:[#allocation95_spill] sm:$0xff] %v8122_v50  ;;  %v1860_v45 = vsel %vm669_vm1, %v8122_v50, 0.0  ;;  %v5319_v50 = vunpack.c.h.bf16 %v5385_v22 }
 0x42a   : > { %v2615_v0 = vsub.f32 %v7573_v61, %v2521_v5  ;;  %v8127_v61 = vmul.f32 0.35355338, %v3404_v2  ;;  %6241 = vpow2.f32 %v2651_v26  ;;  %v1708_v2 = vsub.f32 %v7477_v24, %v7948_v44 }
 0x42b   : > { %v8104_v14 = vpop.xlane.xlu1 %2541 }
 0x42c   : > { %1843 = vadd.xlane.f32.xlu1 %v1842_v39  ;;  %3524 = vmax.xlane.f32.xlu0 %v3523_v62  ;;  %v2647_v4 = vmul.f32 1.442695, %v2615_v0  ;;  %v5318_v39 = vunpack.c.l.bf16 %v5385_v22  ;;  %v8136_v62 = vpop.eup %6235  ;;  %v1756_v44 = vmul.f32 1.442695, %v1708_v2 }
 0x42d   : > { %v2539_v8 = vpop.xlane.xlu0 %2538  ;;  %9512 = vst [vmem:[#allocation96_spill] sm:$0xff] %v8136_v62  ;;  %v1878_v11 = vsel %vm669_vm1, %v8136_v62, 0.0 }
 0x42e   : > { %v2621_v5 = vsub.f32 %v7582_v49, %v2539_v8  ;;  %v3532_v49 = vsel %vm669_vm1, %v8127_v61, -inf  ;;  %6243 = vpow2.f32 %v2647_v4  ;;  %v1711_v4 = vsub.f32 %v7479_v6, %v7950_v59 }
 0x42f   : > { %v8116_v23 = vpop.xlane.xlu1 %2535 }
 0x430   : > { %1867 = vadd.xlane.f32.xlu1 %v1866_v58  ;;  %3518 = vmax.xlane.f32.xlu0 %v3517_v51  ;;  %v2659_v8 = vmul.f32 1.442695, %v2621_v5  ;;  %v8143_v58 = vpop.eup %6237  ;;  %v1762_v6 = vmul.f32 1.442695, %v1711_v4 }
 0x431   : > { %v2533_v63 = vpop.xlane.xlu0 %2532  ;;  %v8151_v24 = vpop.eup %6239 }
 0x432   : > { %v2619_v0 = vsub.f32 %v7595_v1, %v2533_v63  ;;  %9513 = vst [vmem:[#allocation97_spill] sm:$0xff] %v8151_v24  ;;  %6245 = vpow2.f32 %v2659_v8 }
 0x433   : > { %v8130_v38 = vpop.xlane.xlu1 %2553  ;;  %6247 = vpow2.f32 %v1756_v44 }
 0x434   : > { %1861 = vadd.xlane.f32.xlu1 %v1860_v45  ;;  %1834 = vadd.xlane.f32.xlu0 %v1833_v13  ;;  %v3396_v45 = vadd.f32 %v5318_v39, %v7963_v60  ;;  %v5323_v13 = vunpack.c.h.bf16 %v8087_v40  ;;  %v2655_v63 = vmul.f32 1.442695, %v2619_v0  ;;  %v1872_v60 = vsel %vm669_vm1, %v8151_v24, 0.0  ;;  %v8163_v39 = vpop.eup %6241  ;;  %v9549_v24 = vld [vmem:[#allocation67_spill] sm:$0xff] }
 0x435   : > { %v2551_v26 = vpop.xlane.xlu0 %2550  ;;  %v1827_v40 = vsel %vm669_vm1, %v8143_v58, 0.0  ;;  %9514 = vst [vmem:[#allocation98_spill] sm:$0xff] %v8163_v39  ;;  %v2717_v8 = vsel %vm669_vm1, %v8163_v39, 0.0  ;;  %v3399_v0 = vadd.f32 %v5319_v50, %v7980_v25 }
 0x436   : > { %v2625_v5 = vsub.f32 %v7607_v30, %v2551_v26  ;;  %v8156_v55 = vmul.f32 0.35355338, %v3396_v45  ;;  %v1709_v30 = vsub.f32 %v7485_v19, %v7969_v54  ;;  %6249 = vpow2.f32 %v2655_v63 }
 0x437   : > { %v8145_v51 = vpop.xlane.xlu1 %2547  ;;  %6251 = vpow2.f32 %v1762_v6  ;;  %v1714_v19 = vsub.f32 %v7494_v16, %v7967_v18  ;;  %v8184_v4 = vmul.f32 0.35355338, %v3399_v0  ;;  %v1712_v18 = vsub.f32 %v7501_v34, %v7988_v7 }
 0x438   : > { %1879 = vadd.xlane.f32.xlu1 %v1878_v11  ;;  %3533 = vmax.xlane.f32.xlu0 %v3532_v49  ;;  %v3407_v11 = vadd.f32 %v7965_v53, %v5323_v13  ;;  %v2667_v22 = vmul.f32 1.442695, %v2625_v5  ;;  %v3526_v53 = vsel %vm669_vm1, %v8156_v55, -inf  ;;  %v8177_v45 = vpop.eup %6243  ;;  %v1715_v7 = vsub.f32 %v7503_v32, %v7990_v31 }
 0x439   : > { %v2545_v1 = vpop.xlane.xlu0 %2544  ;;  %9516 = vst [vmem:[#allocation100_spill] sm:$0xff] %v8177_v45  ;;  %9517 = vst [vmem:[#allocation101_spill] sm:$0xff] %v8184_v4  ;;  %v2711_v50 = vsel %vm669_vm1, %v8177_v45, 0.0  ;;  %v1768_v16 = vmul.f32 1.442695, %v1714_v19 }
 0x43a   : > { %v2623_v2 = vsub.f32 %v7617_v47, %v2545_v1  ;;  %v8170_v26 = vmul.f32 0.35355338, %v3407_v11  ;;  %v1758_v47 = vmul.f32 1.442695, %v1709_v30  ;;  %6253 = vpow2.f32 %v2667_v22 }
 0x43b   : > { %v2563_v62 = vpop.xlane.xlu1 %2562  ;;  %v3529_v11 = vsel %vm669_vm1, %v8184_v4, -inf  ;;  %v1764_v34 = vmul.f32 1.442695, %v1712_v18  ;;  %v1770_v32 = vmul.f32 1.442695, %v1715_v7 }
 0x43c   : > { %1873 = vadd.xlane.f32.xlu1 %v1872_v60  ;;  %1828 = vadd.xlane.f32.xlu0 %v1827_v40  ;;  %9515 = vst [vmem:[#allocation99_spill] sm:$0xff] %v8170_v26  ;;  %v2663_v13 = vmul.f32 1.442695, %v2623_v2  ;;  %v2629_v44 = vsub.f32 %v7624_v27, %v2563_v62  ;;  %v3535_v25 = vsel %vm669_vm1, %v8170_v26, -inf  ;;  %v8190_v63 = vpop.eup %6245  ;;  %6255 = vpow2.f32 %v1758_v47  ;;  %v9520_v2 = vld [vmem:[#allocation48_spill] sm:$0xff]  ;;  %v9586_v26 = vld [vmem:[#allocation79_spill] sm:$0xff] }
 0x43d   : > { %v8167_v59 = vpop.xlane.xlu0 %2565  ;;  %9518 = vst [vmem:[#allocation102_spill] sm:$0xff] %v8190_v63  ;;  %v8197_v60 = vpop.eup %6247  ;;  %v2729_v6 = vsel %vm669_vm1, %v8190_v63, 0.0  ;;  %v9537_v63 = vld [vmem:[#allocation61_spill] sm:$0xff] }
 0x43e   : > { %6257 = vpow2.f32 %v2663_v13  ;;  %v2675_v27 = vmul.f32 1.442695, %v2629_v44  ;;  %v1836_v0 = vsel %vm669_vm1, %v8197_v60, 0.0  ;;  %v9522_v13 = vld [vmem:[#allocation35_spill] sm:$0xff] }
 0x43f   : > { %v2557_v49 = vpop.xlane.xlu1 %2556  ;;  %6259 = vpow2.f32 %v1768_v16  ;;  %v1713_v44 = vsub.f32 %v9522_v13, %v8011_v56  ;;  %v9528_v13 = vld [vmem:[#allocation37_spill] sm:$0xff] }
 0x440   : > { %3527 = vmax.xlane.f32.xlu0 %v3526_v53  ;;  %2718 = vadd.xlane.f32.xlu1 %v2717_v8  ;;  %v2627_v62 = vsub.f32 %v7637_v37, %v2557_v49  ;;  %v8205_v30 = vpop.eup %6249  ;;  %6261 = vpow2.f32 %v2675_v27 }
 0x441   : > { %v8181_v54 = vpop.xlane.xlu0 %2559  ;;  %9519 = vst [vmem:[#allocation103_spill] sm:$0xff] %v8205_v30  ;;  %v8212_v53 = vpop.eup %6251  ;;  %v2723_v19 = vsel %vm669_vm1, %v8205_v30, 0.0  ;;  %6263 = vpow2.f32 %v1764_v34  ;;  %v1766_v56 = vmul.f32 1.442695, %v1713_v44  ;;  %v1717_v44 = vsub.f32 %v9528_v13, %v8041_v21 }
 0x442   : > { %v2671_v22 = vmul.f32 1.442695, %v2627_v62  ;;  %v1845_v16 = vsel %vm669_vm1, %v8212_v53, 0.0 }
 0x443   : > { %v2575_v1 = vpop.xlane.xlu1 %2574  ;;  %v1774_v21 = vmul.f32 1.442695, %v1717_v44  ;;  %v9533_v44 = vld [vmem:[#allocation60_spill] sm:$0xff] }
 0x444   : > { %3536 = vmax.xlane.f32.xlu0 %v3535_v25  ;;  %2712 = vadd.xlane.f32.xlu1 %v2711_v50  ;;  %v2633_v49 = vsub.f32 %v9520_v2, %v2575_v1  ;;  %v8220_v47 = vpop.eup %6253  ;;  %6265 = vpow2.f32 %v2671_v22 }
 0x445   : > { %v8194_v5 = vpop.xlane.xlu0 %2577  ;;  %9521 = vst [vmem:[#allocation48_spill] sm:$0xff] %v8220_v47  ;;  %v2741_v18 = vsel %vm669_vm1, %v8220_v47, 0.0  ;;  %6267 = vpow2.f32 %v1770_v32 }
 0x446   : > { %v2683_v1 = vmul.f32 1.442695, %v2633_v49  ;;  %v8226_v25 = vpop.eup %6255 }
 0x447   : > { %v8199_v40 = vpop.xlane.xlu1 %2568  ;;  %v1839_v22 = vsel %vm669_vm1, %v8226_v25, 0.0 }
 0x448   : > { %3530 = vmax.xlane.f32.xlu0 %v3529_v11  ;;  %2730 = vadd.xlane.f32.xlu1 %v2729_v6  ;;  %v8234_v27 = vpop.eup %6257  ;;  %v9524_v11 = vld [vmem:[#allocation36_spill] sm:$0xff]  ;;  %6269 = vpow2.f32 %v2683_v1 }
 0x449   : > { %v8209_v37 = vpop.xlane.xlu0 %2571  ;;  %9523 = vst [vmem:[#allocation35_spill] sm:$0xff] %v8234_v27  ;;  %v1719_v6 = vsub.f32 %v9524_v11, %v8027_v12  ;;  %v8240_v34 = vpop.eup %6259  ;;  %v2735_v2 = vsel %vm669_vm1, %v8234_v27, 0.0  ;;  %6271 = vpow2.f32 %v1766_v56  ;;  %v9530_v56 = vld [vmem:[#allocation38_spill] sm:$0xff] }
 0x44a   : > { %9525 = vst [vmem:[#allocation36_spill] sm:$0xff] %v8240_v34  ;;  %v8246_v49 = vpop.eup %6261 }
 0x44b   : > { %v8214_v8 = vpop.xlane.xlu1 %2586  ;;  %9526 = vst [vmem:[#allocation104_spill] sm:$0xff] %v8246_v49  ;;  %v1778_v12 = vmul.f32 1.442695, %v1719_v6  ;;  %v2753_v11 = vsel %vm669_vm1, %v8246_v49, 0.0  ;;  %v1723_v6 = vsub.f32 %v9530_v56, %v8054_v9 }
 0x44c   : > { %1837 = vadd.xlane.f32.xlu0 %v1836_v0  ;;  %2724 = vadd.xlane.f32.xlu1 %v2723_v19  ;;  %v9527_v0 = vld [vmem:[#allocation56_spill] sm:$0xff] }
 0x44d   : > { %v8222_v31 = vpop.xlane.xlu0 %2589  ;;  %v1786_v13 = vmul.f32 1.442695, %v1723_v6 }
 0x44f   : > { %v8228_v50 = vpop.xlane.xlu1 %2580 }
 0x450   : > { %1846 = vadd.xlane.f32.xlu0 %v1845_v16  ;;  %2742 = vadd.xlane.f32.xlu1 %v2741_v18  ;;  %v8253_v16 = vpop.eup %6263  ;;  %v1854_v18 = vsel %vm669_vm1, %v8240_v34, 0.0 }
 0x451   : > { %v8236_v62 = vpop.xlane.xlu0 %2583  ;;  %v8259_v47 = vpop.eup %6265 }
 0x452   : > { %9529 = vst [vmem:[#allocation56_spill] sm:$0xff] %v8259_v47 }
 0x453   : > { %v2599_v7 = vpop.xlane.xlu1 %2598 }
 0x454   : > { %v2641_v19 = vsub.f32 %v9527_v0, %v2599_v7  ;;  %1840 = vadd.xlane.f32.xlu0 %v1839_v22  ;;  %2736 = vadd.xlane.f32.xlu1 %v2735_v2  ;;  %v8265_v22 = vpop.eup %6267  ;;  %v1848_v2 = vsel %vm669_vm1, %v8253_v16, 0.0  ;;  %v2747_v0 = vsel %vm669_vm1, %v8259_v47, 0.0 }
 0x455   : > { %v8249_v32 = vpop.xlane.xlu0 %2601  ;;  %v1857_v56 = vsel %vm669_vm1, %v8265_v22, 0.0 }
 0x456   : > { %v2699_v1 = vmul.f32 1.442695, %v2641_v19  ;;  %v8271_v19 = vpop.eup %6269 }
 0x457   : > { %9531 = vst [vmem:[#allocation37_spill] sm:$0xff] %v8271_v19  ;;  %v2765_v49 = vsel %vm669_vm1, %v8271_v19, 0.0  ;;  %v8282_v47 = vpop.eup %6271 }
 0x458   : > { %6273 = vpow2.f32 %v2699_v1  ;;  %1855 = vadd.xlane.f32.xlu0 %v1854_v18  ;;  %2754 = vadd.xlane.f32.xlu1 %v2753_v11  ;;  %v9532_v1 = vld [vmem:[#allocation39_spill] sm:$0xff]  ;;  %v8275_v18 = vpop.xlane.xlu1 %2592  ;;  %v1851_v19 = vsel %vm669_vm1, %v8282_v47, 0.0 }
 0x459   : > { %v8263_v7 = vpop.xlane.xlu0 %2595  ;;  %6275 = vpow2.f32 %v1778_v12  ;;  %v1721_v9 = vsub.f32 %v9532_v1, %v8066_v33 }
 0x45a   : > { %6277 = vpow2.f32 %v1774_v21  ;;  %v9535_v21 = vld [vmem:[#allocation40_spill] sm:$0xff] }
 0x45b   : > { %6279 = vpow2.f32 %v1786_v13  ;;  %v1782_v6 = vmul.f32 1.442695, %v1721_v9 }
 0x45c   : > { %1849 = vadd.xlane.f32.xlu0 %v1848_v2  ;;  %2748 = vadd.xlane.f32.xlu1 %v2747_v0 }
 0x45d   : > { %v2611_v12 = vpop.xlane.xlu0 %2610 }
 0x45e   : > { %v2645_v11 = vsub.f32 %v9533_v44, %v2611_v12  ;;  %v2618_v12 = vsub.f32 %v9535_v21, %v8071_v41  ;;  %v9536_v44 = vld [vmem:[#allocation62_spill] sm:$0xff] }
 0x460   : > { %v2707_v2 = vmul.f32 1.442695, %v2645_v11  ;;  %1858 = vadd.xlane.f32.xlu0 %v1857_v56  ;;  %2766 = vadd.xlane.f32.xlu1 %v2765_v49  ;;  %v2653_v41 = vmul.f32 1.442695, %v2618_v12 }
 0x461   : > { %v3450_v33 = vpop.xlane.xlu1 %3449  ;;  %v2605_v0 = vpop.xlane.xlu0 %2604 }
 0x462   : > { %v8284_v1 = vpop.eup %6273  ;;  %6281 = vpow2.f32 %v2707_v2  ;;  %v3540_v27 = vsub.f32 %v9536_v44, %v3450_v33  ;;  %v2643_v30 = vsub.f32 %v9537_v63, %v2605_v0  ;;  %v9539_v2 = vld [vmem:[#allocation41_spill] sm:$0xff] }
 0x463   : > { %9534 = vst [vmem:[#allocation38_spill] sm:$0xff] %v8284_v1  ;;  %v2789_v49 = vsel %vm669_vm1, %v8284_v1, 0.0  ;;  %v8294_v13 = vpop.eup %6275  ;;  %6283 = vpow2.f32 %v1782_v6  ;;  %v2616_v33 = vsub.f32 %v9539_v2, %v8091_v20 }
 0x464   : > { %9538 = vst [vmem:[#allocation39_spill] sm:$0xff] %v8294_v13  ;;  %v2703_v9 = vmul.f32 1.442695, %v2643_v30  ;;  %1852 = vadd.xlane.f32.xlu0 %v1851_v19  ;;  %2790 = vadd.xlane.f32.xlu1 %v2789_v49  ;;  %v3574_v11 = vmul.f32 1.442695, %v3540_v27  ;;  %v1869_v63 = vsel %vm669_vm1, %v8294_v13, 0.0  ;;  %v8302_v0 = vpop.eup %6277 }
 0x465   : > { %v8296_v56 = vpop.xlane.xlu0 %2613  ;;  %9540 = vst [vmem:[#allocation60_spill] sm:$0xff] %v8302_v0  ;;  %v2649_v27 = vmul.f32 1.442695, %v2616_v33  ;;  %v9541_v19 = vld [vmem:[#allocation42_spill] sm:$0xff]  ;;  %v8308_v12 = vpop.eup %6279  ;;  %v1863_v20 = vsel %vm669_vm1, %v8302_v0, 0.0  ;;  %v9545_v33 = vld [vmem:[#allocation43_spill] sm:$0xff] }
 0x466   : > { %6285 = vpow2.f32 %v2703_v9  ;;  %v2622_v6 = vsub.f32 %v9541_v19, %v8104_v14  ;;  %9542 = vst [vmem:[#allocation40_spill] sm:$0xff] %v8308_v12  ;;  %v9544_v49 = vld [vmem:[#allocation66_spill] sm:$0xff]  ;;  %v2620_v14 = vsub.f32 %v9545_v33, %v8116_v23  ;;  %v9546_v19 = vld [vmem:[#allocation65_spill] sm:$0xff]  ;;  %v1881_v39 = vsel %vm669_vm1, %v8308_v12, 0.0 }
 0x467   : > { %6287 = vpow2.f32 %v3574_v11  ;;  %v9587_v0 = vld [vmem:[#allocation86_spill] sm:$0xff] }
 0x468   : > { %1870 = vadd.xlane.f32.xlu0 %v1869_v63  ;;  %6289 = vpow2.f32 %v2653_v41  ;;  %v2661_v41 = vmul.f32 1.442695, %v2622_v6  ;;  %v2657_v23 = vmul.f32 1.442695, %v2620_v14 }
 0x469   : > { %v3462_v21 = vpop.xlane.xlu1 %3461  ;;  %v8304_v30 = vpop.xlane.xlu0 %2607  ;;  %6291 = vpow2.f32 %v2649_v27 }
 0x46a   : > { %v3544_v9 = vsub.f32 %v9544_v49, %v3462_v21  ;;  %6293 = vpow2.f32 %v2661_v41 }
 0x46c   : > { %v8312_v44 = vpop.eup %6281  ;;  %1864 = vadd.xlane.f32.xlu0 %v1863_v20  ;;  %v3582_v49 = vmul.f32 1.442695, %v3544_v9  ;;  %v9553_v9 = vld [vmem:[#allocation69_spill] sm:$0xff] }
 0x46d   : > { %9543 = vst [vmem:[#allocation62_spill] sm:$0xff] %v8312_v44  ;;  %v3456_v2 = vpop.xlane.xlu1 %3455  ;;  %v3444_v11 = vpop.xlane.xlu0 %3443  ;;  %v2801_v63 = vsel %vm669_vm1, %v8312_v44, 0.0 }
 0x46e   : > { %v3538_v1 = vsub.f32 %v9546_v19, %v3444_v11  ;;  %2802 = vadd.xlane.f32.xlu1 %v2801_v63  ;;  %v8322_v45 = vpop.eup %6283  ;;  %v3542_v44 = vsub.f32 %v9549_v24, %v3456_v2  ;;  %v9550_v11 = vld [vmem:[#allocation44_spill] sm:$0xff] }
 0x46f   : > { %9547 = vst [vmem:[#allocation61_spill] sm:$0xff] %v8322_v45  ;;  %v2626_v63 = vsub.f32 %v9550_v11, %v8130_v38  ;;  %v9554_v11 = vld [vmem:[#allocation45_spill] sm:$0xff] }
 0x470   : > { %v3570_v20 = vmul.f32 1.442695, %v3538_v1  ;;  %1882 = vadd.xlane.f32.xlu0 %v1881_v39  ;;  %v8324_v21 = vpop.eup %6285  ;;  %v1875_v39 = vsel %vm669_vm1, %v8322_v45, 0.0  ;;  %v3578_v24 = vmul.f32 1.442695, %v3542_v44 }
 0x471   : > { %9548 = vst [vmem:[#allocation41_spill] sm:$0xff] %v8324_v21  ;;  %v3474_v27 = vpop.xlane.xlu1 %3473  ;;  %v8327_v6 = vpop.xlane.xlu0 %3452  ;;  %v2795_v33 = vsel %vm669_vm1, %v8324_v21, 0.0  ;;  %v2669_v38 = vmul.f32 1.442695, %v2626_v63  ;;  %v2624_v21 = vsub.f32 %v9554_v11, %v8145_v51  ;;  %v9557_v51 = vld [vmem:[#allocation46_spill] sm:$0xff] }
 0x472   : > { %v8333_v19 = vpop.eup %6287  ;;  %6295 = vpow2.f32 %v3570_v20  ;;  %2796 = vadd.xlane.f32.xlu1 %v2795_v33  ;;  %v3548_v2 = vsub.f32 %v9553_v9, %v3474_v27  ;;  %v2630_v11 = vsub.f32 %v9557_v51, %v8167_v59 }
 0x473   : > { %9551 = vst [vmem:[#allocation42_spill] sm:$0xff] %v8333_v19  ;;  %v8337_v1 = vpop.eup %6289  ;;  %6297 = vpow2.f32 %v3582_v49  ;;  %v3640_v20 = vsel %vm669_vm1, %v8333_v19, 0.0  ;;  %v9556_v49 = vld [vmem:[#allocation71_spill] sm:$0xff]  ;;  %v2665_v63 = vmul.f32 1.442695, %v2624_v21 }
 0x474   : > { %9552 = vst [vmem:[#allocation66_spill] sm:$0xff] %v8337_v1  ;;  %1876 = vadd.xlane.f32.xlu0 %v1875_v39  ;;  %6299 = vpow2.f32 %v2657_v23  ;;  %v2720_v33 = vsel %vm669_vm1, %v8337_v1, 0.0  ;;  %v8348_v39 = vpop.eup %6291  ;;  %v3590_v44 = vmul.f32 1.442695, %v3548_v2  ;;  %v9560_v2 = vld [vmem:[#allocation73_spill] sm:$0xff] }
 0x475   : > { %v3468_v41 = vpop.xlane.xlu1 %3467  ;;  %v8340_v14 = vpop.xlane.xlu0 %3446  ;;  %9555 = vst [vmem:[#allocation43_spill] sm:$0xff] %v8348_v39  ;;  %6301 = vpow2.f32 %v3578_v24  ;;  %v2677_v21 = vmul.f32 1.442695, %v2630_v11 }
 0x476   : > { %3641 = vadd.xlane.f32.xlu1 %v3640_v20  ;;  %v3546_v27 = vsub.f32 %v9556_v49, %v3468_v41  ;;  %6303 = vpow2.f32 %v2669_v38  ;;  %v2714_v20 = vsel %vm669_vm1, %v8348_v39, 0.0  ;;  %v8357_v19 = vpop.eup %6293  ;;  %v9561_v38 = vld [vmem:[#allocation47_spill] sm:$0xff] }
 0x477   : > { %9558 = vst [vmem:[#allocation65_spill] sm:$0xff] %v8357_v19  ;;  %6305 = vpow2.f32 %v3590_v44  ;;  %v2628_v59 = vsub.f32 %v9561_v38, %v8181_v54  ;;  %v2732_v44 = vsel %vm669_vm1, %v8357_v19, 0.0  ;;  %v9565_v38 = vld [vmem:[#allocation50_spill] sm:$0xff] }
 0x478   : > { %2721 = vadd.xlane.f32.xlu0 %v2720_v33  ;;  %v3586_v24 = vmul.f32 1.442695, %v3546_v27  ;;  %6307 = vpow2.f32 %v2665_v63 }
 0x479   : > { %v3486_v9 = vpop.xlane.xlu1 %3485  ;;  %v8351_v23 = vpop.xlane.xlu0 %3464  ;;  %v2673_v54 = vmul.f32 1.442695, %v2628_v59 }
 0x47a   : > { %v3552_v41 = vsub.f32 %v9560_v2, %v3486_v9  ;;  %6309 = vpow2.f32 %v3586_v24 }
 0x47b   : > { %6311 = vpow2.f32 %v2677_v21 }
 0x47c   : > { %2715 = vadd.xlane.f32.xlu0 %v2714_v20  ;;  %v8359_v1 = vpop.eup %6295  ;;  %v3598_v9 = vmul.f32 1.442695, %v3552_v41  ;;  %v9564_v20 = vld [vmem:[#allocation74_spill] sm:$0xff] }
 0x47d   : > { %9559 = vst [vmem:[#allocation67_spill] sm:$0xff] %v8359_v1  ;;  %v3480_v33 = vpop.xlane.xlu1 %3479  ;;  %v8362_v49 = vpop.xlane.xlu0 %3458  ;;  %v3634_v51 = vsel %vm669_vm1, %v8359_v1, 0.0  ;;  %v2631_v1 = vsub.f32 %v9565_v38, %v8199_v40  ;;  %v9568_v40 = vld [vmem:[#allocation49_spill] sm:$0xff] }
 0x47e   : > { %v8368_v39 = vpop.eup %6297  ;;  %3635 = vadd.xlane.f32.xlu1 %v3634_v51  ;;  %v3550_v63 = vsub.f32 %v9564_v20, %v3480_v33  ;;  %6313 = vpow2.f32 %v3598_v9  ;;  %v2634_v59 = vsub.f32 %v9568_v40, %v8194_v5  ;;  %v9571_v5 = vld [vmem:[#allocation51_spill] sm:$0xff] }
 0x47f   : > { %9562 = vst [vmem:[#allocation44_spill] sm:$0xff] %v8368_v39  ;;  %v8372_v27 = vpop.eup %6299  ;;  %v3652_v51 = vsel %vm669_vm1, %v8368_v39, 0.0  ;;  %6315 = vpow2.f32 %v2673_v54  ;;  %v2679_v20 = vmul.f32 1.442695, %v2631_v1  ;;  %v2632_v1 = vsub.f32 %v9571_v5, %v8209_v37 }
 0x480   : > { %9563 = vst [vmem:[#allocation69_spill] sm:$0xff] %v8372_v27  ;;  %2733 = vadd.xlane.f32.xlu0 %v2732_v44  ;;  %v8381_v12 = vpop.eup %6301  ;;  %v2726_v24 = vsel %vm669_vm1, %v8372_v27, 0.0  ;;  %v3594_v33 = vmul.f32 1.442695, %v3550_v63  ;;  %v2685_v54 = vmul.f32 1.442695, %v2634_v59 }
 0x481   : > { %v1796_v11 = vpop.xlane.xlu1 %1795  ;;  %v8375_v2 = vpop.xlane.xlu0 %3476  ;;  %9566 = vst [vmem:[#allocation45_spill] sm:$0xff] %v8381_v12  ;;  %v3646_v38 = vsel %vm669_vm1, %v8381_v12, 0.0  ;;  %v9573_v12 = vld [vmem:[#allocation52_spill] sm:$0xff]  ;;  %v2681_v37 = vmul.f32 1.442695, %v2632_v1 }
 0x482   : > { %3653 = vadd.xlane.f32.xlu1 %v3652_v51  ;;  %v8385_v41 = vpop.eup %6303  ;;  %6317 = vpow2.f32 %v3594_v33 }
 0x483   : > { %9567 = vst [vmem:[#allocation71_spill] sm:$0xff] %v8385_v41  ;;  %v8393_v51 = vpop.eup %6305  ;;  %v2744_v39 = vsel %vm669_vm1, %v8385_v41, 0.0  ;;  %6319 = vpow2.f32 %v2679_v20  ;;  %v2637_v41 = vsub.f32 %v9573_v12, %v8214_v8 }
 0x484   : > { %2727 = vadd.xlane.f32.xlu0 %v2726_v24  ;;  %9569 = vst [vmem:[#allocation46_spill] sm:$0xff] %v8393_v51  ;;  %v8397_v24 = vpop.eup %6307  ;;  %v3664_v40 = vsel %vm669_vm1, %v8393_v51, 0.0  ;;  %6321 = vpow2.f32 %v2685_v54 }
 0x485   : > { %v1790_v44 = vpop.xlane.xlu1 %1789  ;;  %v8387_v21 = vpop.xlane.xlu0 %3470  ;;  %9570 = vst [vmem:[#allocation73_spill] sm:$0xff] %v8397_v24  ;;  %v2691_v19 = vmul.f32 1.442695, %v2637_v41  ;;  %6323 = vpow2.f32 %v2681_v37 }
 0x486   : > { %3647 = vadd.xlane.f32.xlu1 %v3646_v38  ;;  %v8407_v38 = vpop.eup %6309 }
 0x487   : > { %9572 = vst [vmem:[#allocation47_spill] sm:$0xff] %v8407_v38  ;;  %v8413_v33 = vpop.eup %6311  ;;  %v3658_v5 = vsel %vm669_vm1, %v8407_v38, 0.0  ;;  %6325 = vpow2.f32 %v2691_v19  ;;  %v9578_v38 = vld [vmem:[#allocation54_spill] sm:$0xff]  ;;  %v9580_v19 = vld [vmem:[#allocation53_spill] sm:$0xff] }
 0x488   : > { %2745 = vadd.xlane.f32.xlu0 %v2744_v39  ;;  %v2738_v39 = vsel %vm669_vm1, %v8397_v24, 0.0  ;;  %9574 = vst [vmem:[#allocation74_spill] sm:$0xff] %v8413_v33  ;;  %v8421_v51 = vpop.eup %6313  ;;  %v2756_v8 = vsel %vm669_vm1, %v8413_v33, 0.0  ;;  %v2635_v24 = vsub.f32 %v9578_v38, %v8228_v50  ;;  %6327 = vrcp.f32 %v1790_v44 }
 0x489   : > { %v8399_v9 = vpop.xlane.xlu1 %3497  ;;  %v8401_v63 = vpop.xlane.xlu0 %3488  ;;  %9575 = vst [vmem:[#allocation50_spill] sm:$0xff] %v8421_v51  ;;  %v3676_v54 = vsel %vm669_vm1, %v8421_v51, 0.0  ;;  %v2638_v33 = vsub.f32 %v9580_v19, %v8222_v31  ;;  %v9583_v31 = vld [vmem:[#allocation58_spill] sm:$0xff] }
 0x48a   : > { %3665 = vadd.xlane.f32.xlu1 %v3664_v40  ;;  %v8425_v12 = vpop.eup %6315  ;;  %v2687_v27 = vmul.f32 1.442695, %v2635_v24  ;;  %v2639_v24 = vsub.f32 %v9583_v31, %v8275_v18  ;;  %v9585_v31 = vld [vmem:[#allocation84_spill] sm:$0xff] }
 0x48b   : > { %9576 = vst [vmem:[#allocation49_spill] sm:$0xff] %v8425_v12  ;;  %v2750_v41 = vsel %vm669_vm1, %v8425_v12, 0.0 }
 0x48c   : > { %2739 = vadd.xlane.f32.xlu0 %v2738_v39  ;;  %v8429_v1 = vpop.eup %6317 }
 0x48d   : > { %v8415_v59 = vpop.xlane.xlu1 %3491  ;;  %v8417_v20 = vpop.xlane.xlu0 %3482  ;;  %9577 = vst [vmem:[#allocation51_spill] sm:$0xff] %v8429_v1  ;;  %v3670_v51 = vsel %vm669_vm1, %v8429_v1, 0.0 }
 0x48e   : > { %3659 = vadd.xlane.f32.xlu1 %v3658_v5  ;;  %v8435_v5 = vpop.eup %6319 }
 0x48f   : > { %9579 = vst [vmem:[#allocation52_spill] sm:$0xff] %v8435_v5  ;;  %v2759_v50 = vsel %vm669_vm1, %v8435_v5, 0.0  ;;  %v8443_v38 = vpop.eup %6321 }
 0x490   : > { %2757 = vadd.xlane.f32.xlu0 %v2756_v8  ;;  %9581 = vst [vmem:[#allocation54_spill] sm:$0xff] %v8443_v38 }
 0x491   : > { %v1808_v40 = vpop.xlane.xlu1 %1807  ;;  %v1799_v39 = vpop.xlane.xlu0 %1798 }
 0x492   : > { %3677 = vadd.xlane.f32.xlu1 %v3676_v54  ;;  %6329 = vrcp.f32 %v1799_v39 }
 0x493   : > { %6331 = vrcp.f32 %v1796_v11  ;;  %v9582_v11 = vld [vmem:[#allocation55_spill] sm:$0xff] }
 0x494   : > { %2751 = vadd.xlane.f32.xlu0 %v2750_v41  ;;  %v2636_v54 = vsub.f32 %v9582_v11, %v8236_v62  ;;  %v2693_v41 = vmul.f32 1.442695, %v2638_v33 }
 0x495   : > { %v1802_v8 = vpop.xlane.xlu1 %1801  ;;  %v1793_v37 = vpop.xlane.xlu0 %1792 }
 0x496   : > { %6333 = vrcp.f32 %v1793_v37  ;;  %3671 = vadd.xlane.f32.xlu1 %v3670_v51  ;;  %v2768_v51 = vsel %vm669_vm1, %v8443_v38, 0.0  ;;  %v8455_v37 = vpop.eup %6323  ;;  %v2689_v12 = vmul.f32 1.442695, %v2636_v54  ;;  %v9588_v54 = vld [vmem:[#allocation57_spill] sm:$0xff] }
 0x497   : > { %6335 = vpow2.f32 %v2687_v27  ;;  %v8457_v19 = vpop.eup %6325  ;;  %v2695_v27 = vmul.f32 1.442695, %v2639_v24  ;;  %v2762_v18 = vsel %vm669_vm1, %v8455_v37, 0.0  ;;  %v9589_v24 = vld [vmem:[#allocation77_spill] sm:$0xff] }
 0x498   : > { %2760 = vadd.xlane.f32.xlu0 %v2759_v50  ;;  %9584 = vst [vmem:[#allocation53_spill] sm:$0xff] %v8457_v19  ;;  %v6328_v5 = vpop.eup %6327  ;;  %6337 = vpow2.f32 %v2693_v41  ;;  %v2642_v41 = vsub.f32 %v9588_v54, %v8249_v32 }
 0x499   : > { %v8445_v44 = vpop.xlane.xlu1 %3509  ;;  %v8447_v39 = vpop.xlane.xlu0 %3500  ;;  %6339 = vpow2.f32 %v2689_v12  ;;  %v1916_v13 = vmul.f32 %v6328_v5, %v9586_v26 }
 0x49a   : > { %6341 = vpow2.f32 %v2695_v27  ;;  %v2701_v32 = vmul.f32 1.442695, %v2642_v41 }
 0x49b   : > { %6343 = vrcp.f32 %v1802_v8  ;;  %v6600_v8 = vld [vmem:[%s6936_s14] sm:$0xff]   ;;  %s6612_s14 = smov 8  }
 0x49c   : > { %2769 = vadd.xlane.f32.xlu0 %v2768_v51  ;;  %v6330_v62 = vpop.eup %6329 }
 0x49d   : > { %v8459_v50 = vpop.xlane.xlu1 %3503  ;;  %v8461_v1 = vpop.xlane.xlu0 %3494  ;;  %v1919_v38 = vmul.f32 %v6330_v62, %v9585_v31 }
 0x49e   : > { %v6332_v33 = vpop.eup %6331 }
 0x49f   : > { %v1918_v34 = vmul.f32 %v6332_v33, %v9589_v24  ;;  %v9592_v33 = vld [vmem:[#allocation34_spill] sm:$0xff] }
 0x4a0   : > { %2763 = vadd.xlane.f32.xlu0 %v2762_v18  ;;  %v6334_v11 = vpop.eup %6333  ;;  %v2777_v18 = vsel %vm669_vm1, %v8457_v19, 0.0 }
 0x4a1   : > { %v8466_v51 = vpop.xlane.xlu1 %1819  ;;  %v1811_v45 = vpop.xlane.xlu0 %1810  ;;  %v1917_v4 = vmul.f32 %v6334_v11, %v9587_v0  ;;  %v1949_v12 = vpack.c.bf16 %v1919_v38, %v1918_v34  ;;  %v9591_v0 = vld [vmem:[#allocation59_spill] sm:$0xff]  ;;  %v9595_v11 = vld [vmem:[#allocation64_spill] sm:$0xff] }
 0x4a2   : > { %v8475_v31 = vpop.eup %6335  ;;  %6345 = vrcp.f32 %v1811_v45  ;;  %v2640_v27 = vsub.f32 %v9591_v0, %v8263_v7  ;;  %v9594_v7 = vld [vmem:[#allocation63_spill] sm:$0xff]  ;;  %v2644_v54 = vsub.f32 %v9595_v11, %v8304_v30 }
 0x4a3   : > { %v1948_v62 = vpack.c.bf16 %v1917_v4, %v1916_v13  ;;  %9590 = vst [vmem:[#allocation55_spill] sm:$0xff] %v8475_v31  ;;  %6347 = vrcp.f32 %v1808_v40  ;;  %v2771_v45 = vsel %vm669_vm1, %v8475_v31, 0.0  ;;  %v8486_v4 = vpop.eup %6337  ;;  %v2646_v40 = vsub.f32 %v9594_v7, %v8296_v56  ;;  %v9597_v11 = vld [vmem:[#allocation87_spill] sm:$0xff] }
 0x4a4   : > { %2778 = vadd.xlane.f32.xlu0 %v2777_v18  ;;  %9593 = vst [vmem:[#allocation58_spill] sm:$0xff] %v8486_v4  ;;  %v2697_v38 = vmul.f32 1.442695, %v2640_v27  ;;  %v8496_v41 = vpop.eup %6339  ;;  %v2780_v24 = vsel %vm669_vm1, %v8486_v4, 0.0 }
 0x4a5   : > { %v1814_v26 = vpop.xlane.xlu1 %1813  ;;  %v1805_v5 = vpop.xlane.xlu0 %1804  ;;  %5627 = vmatprep.mubr.msk.bf16.mxu0 %vm669_vm1, %v1948_v62  ;;  %9596 = vst [vmem:[#allocation84_spill] sm:$0xff] %v8496_v41  ;;  %v2709_v0 = vmul.f32 1.442695, %v2646_v40  ;;  %v2774_v30 = vsel %vm669_vm1, %v8496_v41, 0.0  ;;  %v9598_v40 = vld [vmem:[#allocation68_spill] sm:$0xff] }
 0x4a6   : > { %6349 = vrcp.f32 %v1805_v5  ;;  %5628 = vmatmul.mubr.msk.bf16.vlgmr.msra.gmra.mrb[32].mxu0 %vm669_vm1, %v1949_v12  ;;  %v8500_v18 = vpop.eup %6341 }
 0x4a7   : > { %5694 = vmatpush3.bf16.msra.mxu0 %v9592_v33  ;;  %3810 = vrot.lane.b32.xlu1 %v6600_v8, %s6611_s24  ;;  %6351 = vpow2.f32 %v2701_v32  ;;  %v6344_v5 = vpop.eup %6343  ;;  %v2705_v32 = vmul.f32 1.442695, %v2644_v54  ;;  %v9599_v54 = vld [vmem:[#allocation85_spill] sm:$0xff]  ;;  %s6613_s24 = smov 16  }
 0x4a8   : > { %2772 = vadd.xlane.f32.xlu0 %v2771_v45  ;;  %6353 = vpow2.f32 %v2697_v38  ;;  %v3541_v38 = vsub.f32 %v9598_v40, %v8327_v6 }
 0x4a9   : > { %v8488_v34 = vpop.xlane.xlu1 %3521  ;;  %v8490_v13 = vpop.xlane.xlu0 %3512  ;;  %6355 = vpow2.f32 %v2709_v0 }
 0x4aa   : > { %6357 = vpow2.f32 %v2705_v32  ;;  %v3576_v6 = vmul.f32 1.442695, %v3541_v38 }
 0x4ab   : > { %6359 = vrcp.f32 %v1814_v26  ;;  %v9601_v26 = vld [vmem:[#allocation70_spill] sm:$0xff] }
 0x4ac   : > { %2781 = vadd.xlane.f32.xlu0 %v2780_v24  ;;  %v6346_v56 = vpop.eup %6345  ;;  %v1920_v24 = vmul.f32 %v6344_v5, %v9597_v11  ;;  %v3539_v32 = vsub.f32 %v9601_v26, %v8340_v14 }
 0x4ad   : > { %v8502_v62 = vpop.xlane.xlu1 %3515  ;;  %v8504_v12 = vpop.xlane.xlu0 %3506  ;;  %v1923_v7 = vmul.f32 %v6346_v56, %v8002_v48 }
 0x4ae   : > { %v6348_v27 = vpop.eup %6347 }
 0x4af   : > { %v1922_v31 = vmul.f32 %v6348_v27, %v9599_v54  ;;  %v9605_v54 = vld [vmem:[#allocation75_spill] sm:$0xff] }
 0x4b0   : > { %v6350_v33 = vpop.eup %6349  ;;  %2775 = vadd.xlane.f32.xlu0 %v2774_v30  ;;  %v2783_v30 = vsel %vm669_vm1, %v8500_v18, 0.0 }
 0x4b1   : > { %v8508_v8 = vpop.xlane.xlu1 %1831  ;;  %v1823_v45 = vpop.xlane.xlu0 %1822  ;;  %v1921_v19 = vmul.f32 %v6350_v33, %v8017_v57  ;;  %v1951_v5 = vpack.c.bf16 %v1923_v7, %v1922_v31  ;;  %v9600_v57 = vld [vmem:[#allocation90_spill] sm:$0xff]  ;;  %v9603_v33 = vld [vmem:[#allocation72_spill] sm:$0xff] }
 0x4b2   : > { %v8518_v4 = vpop.eup %6351  ;;  %6361 = vrcp.f32 %v1823_v45  ;;  %v3558_v56 = vsub.f32 %v9600_v57, %v8459_v50  ;;  %v3545_v45 = vsub.f32 %v9603_v33, %v8351_v23 }
 0x4b3   : > { %v1950_v41 = vpack.c.bf16 %v1921_v19, %v1920_v24  ;;  %6363 = vrcp.f32 %v8466_v51  ;;  %v2792_v19 = vsel %vm669_vm1, %v8518_v4, 0.0  ;;  %v8529_v27 = vpop.eup %6353 }
 0x4b4   : > { %2784 = vadd.xlane.f32.xlu0 %v2783_v30  ;;  %9602 = vst [vmem:[#allocation79_spill] sm:$0xff] %v8529_v27  ;;  %v3610_v51 = vmul.f32 1.442695, %v3558_v56  ;;  %v8537_v14 = vpop.eup %6355  ;;  %v2786_v7 = vsel %vm669_vm1, %v8529_v27, 0.0  ;;  %v3543_v30 = vsub.f32 %v9605_v54, %v8362_v49  ;;  %v3584_v23 = vmul.f32 1.442695, %v3545_v45 }
 0x4b5   : > { %v1826_v48 = vpop.xlane.xlu1 %1825  ;;  %v1817_v0 = vpop.xlane.xlu0 %1816  ;;  %5631 = vmatprep.mubr.msk.bf16.mxu0 %vm669_vm1, %v1950_v41  ;;  %v3572_v41 = vmul.f32 1.442695, %v3539_v32  ;;  %9604 = vst [vmem:[#allocation86_spill] sm:$0xff] %v8537_v14  ;;  %v9607_v45 = vld [vmem:[#allocation92_spill] sm:$0xff] }
 0x4b6   : > { %6365 = vrcp.f32 %v1817_v0  ;;  %5632 = vmatmul.mubr.msk.bf16.gmra.mrb[36].mxu0 %vm669_vm1, %v1951_v5  ;;  %v8541_v11 = vpop.eup %6357  ;;  %v9606_v5 = vld [vmem:[#allocation76_spill] sm:$0xff] }
 0x4b7   : > { %6367 = vpow2.f32 %v3576_v6  ;;  %v6360_v38 = vpop.eup %6359  ;;  %v3549_v57 = vsub.f32 %v9606_v5, %v8375_v2  ;;  %v2804_v6 = vsel %vm669_vm1, %v8537_v14, 0.0  ;;  %v2798_v54 = vsel %vm669_vm1, %v8541_v11, 0.0 }
 0x4b8   : > { %2793 = vadd.xlane.f32.xlu0 %v2792_v19  ;;  %6369 = vpow2.f32 %v3610_v51  ;;  %v1924_v49 = vmul.f32 %v6360_v38, %v8025_v10 }
 0x4b9   : > { %v8531_v31 = vpop.xlane.xlu1 %1843  ;;  %v8533_v50 = vpop.xlane.xlu0 %3524  ;;  %6371 = vpow2.f32 %v3572_v41  ;;  %v3592_v41 = vmul.f32 1.442695, %v3549_v57 }
 0x4ba   : > { %6373 = vpow2.f32 %v3584_v23 }
 0x4bc   : > { %2787 = vadd.xlane.f32.xlu0 %v2786_v7  ;;  %v6362_v0 = vpop.eup %6361  ;;  %v3580_v7 = vmul.f32 1.442695, %v3543_v30 }
 0x4bd   : > { %v8543_v24 = vpop.xlane.xlu1 %1867  ;;  %v8545_v40 = vpop.xlane.xlu0 %3518  ;;  %v1927_v33 = vmul.f32 %v6362_v0, %v8059_v52 }
 0x4be   : > { %v6364_v56 = vpop.eup %6363  ;;  %6375 = vpow2.f32 %v3580_v7 }
 0x4bf   : > { %v1926_v2 = vmul.f32 %v6364_v56, %v9607_v45  ;;  %6377 = vpow2.f32 %v3592_v41 }
 0x4c0   : > { %v6366_v26 = vpop.eup %6365  ;;  %2805 = vadd.xlane.f32.xlu0 %v2804_v6  ;;  %6379 = vrcp.f32 %v1826_v48 }
 0x4c1   : > { %v8553_v32 = vpop.xlane.xlu1 %1861  ;;  %v1835_v19 = vpop.xlane.xlu0 %1834  ;;  %v1925_v51 = vmul.f32 %v6366_v26, %v8069_v35  ;;  %v1953_v52 = vpack.c.bf16 %v1927_v33, %v1926_v2  ;;  %v9608_v35 = vld [vmem:[#allocation78_spill] sm:$0xff] }
 0x4c2   : > { %v8561_v14 = vpop.eup %6367  ;;  %v3547_v38 = vsub.f32 %v9608_v35, %v8387_v21  ;;  %6381 = vrcp.f32 %v1835_v19  ;;  %v9610_v21 = vld [vmem:[#allocation81_spill] sm:$0xff] }
 0x4c3   : > { %v1952_v5 = vpack.c.bf16 %v1925_v51, %v1924_v49  ;;  %v8570_v30 = vpop.eup %6369  ;;  %v3643_v23 = vsel %vm669_vm1, %v8561_v14, 0.0  ;;  %v3553_v26 = vsub.f32 %v9610_v21, %v8401_v63  ;;  %v9611_v63 = vld [vmem:[#allocation83_spill] sm:$0xff] }
 0x4c4   : > { %2799 = vadd.xlane.f32.xlu0 %v2798_v54  ;;  %9609 = vst [vmem:[#allocation57_spill] sm:$0xff] %v8570_v30  ;;  %v8574_v57 = vpop.eup %6371  ;;  %v3694_v48 = vsel %vm669_vm1, %v8570_v30, 0.0 }
 0x4c5   : > { %v8563_v6 = vpop.xlane.xlu1 %1879  ;;  %v3534_v27 = vpop.xlane.xlu0 %3533  ;;  %5635 = vmatprep.mubr.msk.bf16.mxu0 %vm669_vm1, %v1952_v5  ;;  %v3637_v33 = vsel %vm669_vm1, %v8574_v57, 0.0  ;;  %v3600_v51 = vmul.f32 1.442695, %v3553_v26 }
 0x4c6   : > { %v3568_v10 = vsub.f32 %v8127_v61, %v3534_v27  ;;  %5636 = vmatmul.mubr.msk.bf16.gmra.mrb[40].mxu0 %vm669_vm1, %v1953_v52  ;;  %v3588_v27 = vmul.f32 1.442695, %v3547_v38  ;;  %v8585_v19 = vpop.eup %6373 }
 0x4c7   : > { %v3655_v45 = vsel %vm669_vm1, %v8585_v19, 0.0 }
 0x4c8   : > { %v3630_v0 = vmul.f32 1.442695, %v3568_v10  ;;  %3644 = vadd.xlane.f32.xlu0 %v3643_v23  ;;  %v8593_v41 = vpop.eup %6375  ;;  %v9612_v10 = vld [vmem:[#allocation80_spill] sm:$0xff] }
 0x4c9   : > { %v8576_v56 = vpop.xlane.xlu1 %1873  ;;  %v1829_v61 = vpop.xlane.xlu0 %1828  ;;  %v3556_v35 = vsub.f32 %v9612_v10, %v8399_v9  ;;  %v3649_v23 = vsel %vm669_vm1, %v8593_v41, 0.0  ;;  %v9614_v9 = vld [vmem:[#allocation82_spill] sm:$0xff] }
 0x4ca   : > { %6383 = vpow2.f32 %v3630_v0  ;;  %v8597_v2 = vpop.eup %6377 }
 0x4cb   : > { %6385 = vrcp.f32 %v8508_v8  ;;  %3695 = vadd.xlane.f32.xlu1 %v3694_v48  ;;  %v3551_v8 = vsub.f32 %v9611_v63, %v8417_v20  ;;  %v6380_v52 = vpop.eup %6379  ;;  %v3667_v30 = vsel %vm669_vm1, %v8597_v2, 0.0 }
 0x4cc   : > { %6387 = vrcp.f32 %v1829_v61  ;;  %3638 = vadd.xlane.f32.xlu0 %v3637_v33  ;;  %v6382_v38 = vpop.eup %6381  ;;  %v3606_v33 = vmul.f32 1.442695, %v3556_v35  ;;  %v1928_v10 = vmul.f32 %v6380_v52, %v8079_v46  ;;  %v9616_v52 = vld [vmem:[#allocation91_spill] sm:$0xff] }
 0x4cd   : > { %v8587_v7 = vpop.xlane.xlu1 %2718  ;;  %v8589_v49 = vpop.xlane.xlu0 %3527  ;;  %6389 = vpow2.f32 %v3588_v27  ;;  %v3596_v0 = vmul.f32 1.442695, %v3551_v8  ;;  %v1931_v63 = vmul.f32 %v6382_v38, %v8114_v36  ;;  %v9615_v8 = vld [vmem:[#allocation89_spill] sm:$0xff] }
 0x4ce   : > { %6391 = vpow2.f32 %v3600_v51  ;;  %v3554_v51 = vsub.f32 %v9614_v9, %v8415_v59 }
 0x4cf   : > { %6393 = vpow2.f32 %v3596_v0 }
 0x4d0   : > { %3656 = vadd.xlane.f32.xlu0 %v3655_v45  ;;  %v3557_v45 = vsub.f32 %v9615_v8, %v8447_v39  ;;  %v3602_v38 = vmul.f32 1.442695, %v3554_v51  ;;  %6395 = vpow2.f32 %v3606_v33  ;;  %v9617_v51 = vld [vmem:[#allocation88_spill] sm:$0xff] }
 0x4d1   : > { %v8599_v54 = vpop.xlane.xlu1 %2712  ;;  %v8601_v5 = vpop.xlane.xlu0 %3536 }
 0x4d2   : > { %v3608_v39 = vmul.f32 1.442695, %v3557_v45  ;;  %6397 = vpow2.f32 %v3602_v38 }
 0x4d4   : > { %v8605_v20 = vpop.eup %6383  ;;  %3650 = vadd.xlane.f32.xlu0 %v3649_v23  ;;  %6399 = vpow2.f32 %v3608_v39 }
 0x4d5   : > { %9613 = vst [vmem:[#allocation77_spill] sm:$0xff] %v8605_v20  ;;  %v6386_v61 = vpop.eup %6385  ;;  %v8609_v27 = vpop.xlane.xlu1 %2730  ;;  %v3724_v26 = vsel %vm669_vm1, %v8605_v20, 0.0 }
 0x4d6   : > { %v8611_v21 = vpop.xlane.xlu0 %3530  ;;  %v6388_v48 = vpop.eup %6387  ;;  %3725 = vadd.xlane.f32.xlu1 %v3724_v26  ;;  %v1930_v20 = vmul.f32 %v6386_v61, %v8064_v3 }
 0x4d7   : > { %v1929_v23 = vmul.f32 %v6388_v48, %v8143_v58  ;;  %v8625_v35 = vpop.eup %6389 }
 0x4d8   : > { %3668 = vadd.xlane.f32.xlu0 %v3667_v30  ;;  %v1955_v0 = vpack.c.bf16 %v1931_v63, %v1930_v20  ;;  %v3661_v46 = vsel %vm669_vm1, %v8625_v35, 0.0  ;;  %v8633_v58 = vpop.eup %6391  ;;  %v3555_v20 = vsub.f32 %v9616_v52, %v8461_v1  ;;  %v3560_v63 = vsub.f32 %v9617_v51, %v8445_v44 }
 0x4d9   : > { %v8627_v59 = vpop.xlane.xlu1 %2724  ;;  %v1954_v26 = vpack.c.bf16 %v1929_v23, %v1928_v10  ;;  %v3679_v61 = vsel %vm669_vm1, %v8633_v58, 0.0  ;;  %v8641_v48 = vpop.eup %6393  ;;  %v3561_v23 = vsub.f32 %v8034_v43, %v8490_v13  ;;  %v3564_v51 = vsub.f32 %v8029_v17, %v8488_v34 }
 0x4da   : > { %v1838_v36 = vpop.xlane.xlu0 %1837  ;;  %v3604_v8 = vmul.f32 1.442695, %v3555_v20  ;;  %v3673_v1 = vsel %vm669_vm1, %v8641_v48, 0.0  ;;  %v8650_v45 = vpop.eup %6395 }
 0x4db   : > { %5639 = vmatprep.mubr.msk.bf16.mxu0 %vm669_vm1, %v1954_v26  ;;  %v3688_v38 = vsel %vm669_vm1, %v8650_v45, 0.0  ;;  %v3622_v17 = vmul.f32 1.442695, %v3564_v51 }
 0x4dc   : > { %5640 = vmatmul.mubr.msk.bf16.gmra.mrb[44].mxu0 %vm669_vm1, %v1955_v0  ;;  %3662 = vadd.xlane.f32.xlu0 %v3661_v46  ;;  %v8658_v44 = vpop.eup %6397 }
 0x4dd   : > { %v8635_v3 = vpop.xlane.xlu1 %2742 }
 0x4de   : > { %v1847_v30 = vpop.xlane.xlu0 %1846  ;;  %v8662_v0 = vpop.eup %6399 }
 0x4df   : > { %6401 = vrcp.f32 %v1847_v30  ;;  %v3616_v30 = vmul.f32 1.442695, %v3561_v23  ;;  %v3691_v23 = vsel %vm669_vm1, %v8662_v0, 0.0 }
 0x4e0   : > { %6403 = vrcp.f32 %v1838_v36  ;;  %3680 = vadd.xlane.f32.xlu0 %v3679_v61  ;;  %v3614_v36 = vmul.f32 1.442695, %v3560_v63 }
 0x4e1   : > { %v8643_v33 = vpop.xlane.xlu1 %2736  ;;  %6405 = vrcp.f32 %v8531_v31  ;;  %v3559_v31 = vsub.f32 %v8048_v15, %v8504_v12  ;;  %v3682_v15 = vsel %vm669_vm1, %v8658_v44, 0.0 }
 0x4e2   : > { %v1841_v9 = vpop.xlane.xlu0 %1840 }
 0x4e3   : > { %6407 = vrcp.f32 %v1841_v9  ;;  %v3612_v43 = vmul.f32 1.442695, %v3559_v31 }
 0x4e4   : > { %3674 = vadd.xlane.f32.xlu0 %v3673_v1  ;;  %6409 = vpow2.f32 %v3604_v8 }
 0x4e5   : > { %v8654_v26 = vpop.xlane.xlu1 %2754  ;;  %6411 = vpow2.f32 %v3614_v36 }
 0x4e6   : > { %v1856_v10 = vpop.xlane.xlu0 %1855  ;;  %6413 = vpow2.f32 %v3616_v30 }
 0x4e7   : > { %6415 = vpow2.f32 %v3612_v43 }
 0x4e8   : > { %3689 = vadd.xlane.f32.xlu0 %v3688_v38 }
 0x4e9   : > { %v6402_v46 = vpop.eup %6401  ;;  %v8664_v20 = vpop.xlane.xlu1 %2748 }
 0x4ea   : > { %v1850_v39 = vpop.xlane.xlu0 %1849  ;;  %v6404_v52 = vpop.eup %6403  ;;  %v1935_v9 = vmul.f32 %v6402_v46, %v8212_v53 }
 0x4eb   : > { %v6406_v13 = vpop.eup %6405  ;;  %v1932_v63 = vmul.f32 %v6404_v52, %v8197_v60 }
 0x4ec   : > { %3683 = vadd.xlane.f32.xlu0 %v3682_v15  ;;  %v1934_v1 = vmul.f32 %v6406_v13, %v8098_v42  ;;  %v3562_v42 = vsub.f32 %v8043_v28, %v8502_v62 }
 0x4ed   : > { %v6408_v12 = vpop.eup %6407  ;;  %v8678_v34 = vpop.xlane.xlu1 %2766 }
 0x4ee   : > { %v1859_v61 = vpop.xlane.xlu0 %1858  ;;  %v1933_v8 = vmul.f32 %v6408_v12, %v8226_v25  ;;  %v8676_v31 = vpop.eup %6409  ;;  %v1957_v38 = vpack.c.bf16 %v1935_v9, %v1934_v1  ;;  %v3618_v46 = vmul.f32 1.442695, %v3562_v42 }
 0x4ef   : > { %6417 = vrcp.f32 %v1859_v61  ;;  %v3685_v60 = vsel %vm669_vm1, %v8676_v31, 0.0  ;;  %v8686_v25 = vpop.eup %6411 }
 0x4f0   : > { %v1956_v36 = vpack.c.bf16 %v1933_v8, %v1932_v63  ;;  %6419 = vrcp.f32 %v1850_v39  ;;  %3692 = vadd.xlane.f32.xlu0 %v3691_v23  ;;  %v8691_v30 = vpop.eup %6413  ;;  %v3700_v62 = vsel %vm669_vm1, %v8686_v25, 0.0  ;;  %v3566_v8 = vsub.f32 %v8156_v55, %v8589_v49 }
 0x4f1   : > { %6421 = vrcp.f32 %v1856_v10  ;;  %v3565_v10 = vsub.f32 %v8089_v29, %v8533_v50  ;;  %v8693_v28 = vpop.xlane.xlu1 %2790  ;;  %v8697_v52 = vpop.eup %6415  ;;  %v9618_v50 = vld [vmem:[#allocation93_spill] sm:$0xff]  ;;  %v3703_v9 = vsel %vm669_vm1, %v8691_v30, 0.0 }
 0x4f2   : > { %v1853_v53 = vpop.xlane.xlu0 %1852  ;;  %5643 = vmatprep.mubr.msk.bf16.mxu0 %vm669_vm1, %v1956_v36  ;;  %v9619_v36 = vld [vmem:[#allocation36_spill] sm:$0xff] }
 0x4f3   : > { %6423 = vrcp.f32 %v1853_v53  ;;  %5644 = vmatmul.mubr.msk.bf16.gmra.mrb[48].mxu0 %vm669_vm1, %v1957_v38  ;;  %v3624_v15 = vmul.f32 1.442695, %v3565_v10 }
 0x4f4   : > { %3686 = vadd.xlane.f32.xlu0 %v3685_v60  ;;  %6425 = vpow2.f32 %v3622_v17  ;;  %v3697_v17 = vsel %vm669_vm1, %v8697_v52, 0.0 }
 0x4f5   : > { %6427 = vrcp.f32 %v8553_v32  ;;  %v3563_v32 = vsub.f32 %v9618_v50, %v8545_v40 }
 0x4f6   : > { %v1871_v39 = vpop.xlane.xlu0 %1870 }
 0x4f7   : > { %6429 = vrcp.f32 %v1871_v39  ;;  %v3620_v40 = vmul.f32 1.442695, %v3563_v32  ;;  %v9620_v39 = vld [vmem:[#allocation101_spill] sm:$0xff]  ;;  %v9623_v32 = vld [vmem:[#allocation39_spill] sm:$0xff] }
 0x4f8   : > { %6431 = vrcp.f32 %v8543_v24  ;;  %3701 = vadd.xlane.f32.xlu0 %v3700_v62  ;;  %v3567_v10 = vsub.f32 %v9620_v39, %v8611_v21  ;;  %v9627_v39 = vld [vmem:[#allocation61_spill] sm:$0xff] }
 0x4f9   : > { %v6418_v13 = vpop.eup %6417 }
 0x4fa   : > { %v1865_v43 = vpop.xlane.xlu0 %1864  ;;  %v6420_v29 = vpop.eup %6419  ;;  %v1939_v24 = vmul.f32 %v6418_v13, %v8265_v22  ;;  %v9621_v13 = vld [vmem:[#allocation95_spill] sm:$0xff] }
 0x4fb   : > { %6433 = vrcp.f32 %v1865_v43  ;;  %v6422_v12 = vpop.eup %6421  ;;  %v8702_v61 = vpop.xlane.xlu1 %2802  ;;  %v1936_v1 = vmul.f32 %v6420_v29, %v8253_v16  ;;  %v9622_v29 = vld [vmem:[#allocation60_spill] sm:$0xff] }
 0x4fc   : > { %6435 = vpow2.f32 %v3618_v46  ;;  %3704 = vadd.xlane.f32.xlu0 %v3703_v9  ;;  %v1938_v53 = vmul.f32 %v6422_v12, %v9619_v36  ;;  %v9624_v9 = vld [vmem:[#allocation99_spill] sm:$0xff] }
 0x4fd   : > { %v6424_v51 = vpop.eup %6423  ;;  %6437 = vpow2.f32 %v3624_v15  ;;  %v3569_v21 = vsub.f32 %v9624_v9, %v8601_v5 }
 0x4fe   : > { %v1883_v63 = vpop.xlane.xlu0 %1882  ;;  %v1937_v23 = vmul.f32 %v6424_v51, %v8282_v47  ;;  %6439 = vrcp.f32 %v8576_v56  ;;  %v8713_v38 = vpop.eup %6425  ;;  %v1959_v16 = vpack.c.bf16 %v1939_v24, %v1938_v53  ;;  %v3626_v47 = vmul.f32 1.442695, %v3566_v8  ;;  %v9625_v24 = vld [vmem:[#allocation94_spill] sm:$0xff] }
 0x4ff   : > { %6441 = vrcp.f32 %v1883_v63  ;;  %v6428_v42 = vpop.eup %6427  ;;  %v8718_v60 = vpop.xlane.xlu1 %2796  ;;  %v3628_v51 = vmul.f32 1.442695, %v3567_v10 }
 0x500   : > { %v1958_v22 = vpack.c.bf16 %v1937_v23, %v1936_v1  ;;  %6443 = vrcp.f32 %v8563_v6  ;;  %3698 = vadd.xlane.f32.xlu0 %v3697_v17  ;;  %v3712_v6 = vsel %vm669_vm1, %v8713_v38, 0.0  ;;  %v1940_v15 = vmul.f32 %v6428_v42, %v9621_v13  ;;  %v9629_v13 = vld [vmem:[#allocation96_spill] sm:$0xff] }
 0x501   : > { %v6430_v49 = vpop.eup %6429  ;;  %v3632_v17 = vmul.f32 1.442695, %v3569_v21 }
 0x502   : > { %v1877_v55 = vpop.xlane.xlu0 %1876  ;;  %5647 = vmatprep.mubr.msk.bf16.mxu0 %vm669_vm1, %v1958_v22  ;;  %v6432_v56 = vpop.eup %6431  ;;  %v1943_v12 = vmul.f32 %v6430_v49, %v9623_v32 }
 0x503   : > { %6445 = vrcp.f32 %v1877_v55  ;;  %5648 = vmatmul.mubr.msk.bf16.gmra.mrb[52].mxu0 %vm669_vm1, %v1959_v16  ;;  %v1942_v8 = vmul.f32 %v6432_v56, %v9625_v24  ;;  %v8737_v23 = vpop.xlane.xlu1 %3641 }
 0x504   : > { %6447 = vpow2.f32 %v3620_v40  ;;  %3713 = vadd.xlane.f32.xlu0 %v3712_v6 }
 0x505   : > { %v6434_v46 = vpop.eup %6433  ;;  %6449 = vpow2.f32 %v3626_v47  ;;  %v9626_v47 = vld [vmem:[#allocation97_spill] sm:$0xff] }
 0x506   : > { %v8726_v62 = vpop.eup %6435  ;;  %v2722_v43 = vpop.xlane.xlu0 %2721  ;;  %v1941_v50 = vmul.f32 %v6434_v46, %v9622_v29  ;;  %6451 = vrcp.f32 %v8599_v54  ;;  %v1961_v54 = vpack.c.bf16 %v1943_v12, %v1942_v8  ;;  %v9628_v46 = vld [vmem:[#allocation40_spill] sm:$0xff] }
 0x507   : > { %v8735_v1 = vpop.eup %6437  ;;  %6453 = vrcp.f32 %v2722_v43  ;;  %v3706_v40 = vsel %vm669_vm1, %v8726_v62, 0.0 }
 0x508   : > { %v1960_v63 = vpack.c.bf16 %v1941_v50, %v1940_v15  ;;  %v6440_v36 = vpop.eup %6439  ;;  %6455 = vrcp.f32 %v8587_v7  ;;  %3707 = vadd.xlane.f32.xlu0 %v3706_v40  ;;  %v3715_v16 = vsel %vm669_vm1, %v8735_v1, 0.0 }
 0x509   : > { %v6442_v53 = vpop.eup %6441  ;;  %v1944_v56 = vmul.f32 %v6440_v36, %v9626_v47  ;;  %v9630_v36 = vld [vmem:[#allocation66_spill] sm:$0xff] }
 0x50a   : > { %5651 = vmatprep.mubr.msk.bf16.mxu0 %vm669_vm1, %v1960_v63  ;;  %v2716_v5 = vpop.xlane.xlu0 %2715  ;;  %v6444_v22 = vpop.eup %6443  ;;  %v1947_v6 = vmul.f32 %v6442_v53, %v9628_v46 }
 0x50b   : > { %6457 = vrcp.f32 %v2716_v5  ;;  %5652 = vmatmul.mubr.msk.bf16.gmra.mrb[56].mxu0 %vm669_vm1, %v1961_v54  ;;  %v8744_v55 = vpop.xlane.xlu1 %3635  ;;  %v1946_v15 = vmul.f32 %v6444_v22, %v9629_v13  ;;  %v9631_v54 = vld [vmem:[#allocation100_spill] sm:$0xff] }
 0x50c   : > { %6459 = vpow2.f32 %v3628_v51  ;;  %3716 = vadd.xlane.f32.xlu0 %v3715_v16 }
 0x50d   : > { %v6446_v42 = vpop.eup %6445  ;;  %6461 = vpow2.f32 %v3632_v17  ;;  %v1963_v21 = vpack.c.bf16 %v1947_v6, %v1946_v15  ;;  %v9632_v17 = vld [vmem:[#allocation43_spill] sm:$0xff] }
 0x50e   : > { %v8748_v49 = vpop.eup %6447  ;;  %v2734_v7 = vpop.xlane.xlu0 %2733  ;;  %v1945_v10 = vmul.f32 %v6446_v42, %v9627_v39  ;;  %6463 = vrcp.f32 %v8627_v59  ;;  %v9633_v42 = vld [vmem:[#allocation98_spill] sm:$0xff] }
 0x50f   : > { %v8755_v29 = vpop.eup %6449  ;;  %6465 = vrcp.f32 %v2734_v7  ;;  %v8757_v50 = vpop.xlane.xlu1 %3653  ;;  %v3709_v32 = vsel %vm669_vm1, %v8748_v49, 0.0 }
 0x510   : > { %v1962_v43 = vpack.c.bf16 %v1945_v10, %v1944_v56  ;;  %v6452_v12 = vpop.eup %6451  ;;  %6467 = vrcp.f32 %v8609_v27  ;;  %3710 = vadd.xlane.f32.xlu0 %v3709_v32  ;;  %v3718_v8 = vsel %vm669_vm1, %v8755_v29, 0.0 }
 0x511   : > { %v6454_v59 = vpop.eup %6453  ;;  %v2839_v53 = vmul.f32 %v6452_v12, %v9631_v54 }
 0x512   : > { %5655 = vmatprep.mubr.msk.bf16.mxu0 %vm669_vm1, %v1962_v43  ;;  %v2728_v9 = vpop.xlane.xlu0 %2727  ;;  %v6456_v51 = vpop.eup %6455  ;;  %v2842_v27 = vmul.f32 %v6454_v59, %v9630_v36  ;;  %v9637_v36 = vld [vmem:[#allocation102_spill] sm:$0xff] }
 0x513   : > { %6469 = vrcp.f32 %v2728_v9  ;;  %5656 = vmatmul.mubr.msk.bf16.gmra.mrb[60].mxu0 %vm669_vm1, %v1963_v21  ;;  %v8764_v24 = vpop.xlane.xlu1 %3647  ;;  %v2841_v16 = vmul.f32 %v6456_v51, %v9633_v42  ;;  %v9634_v9 = vld [vmem:[#allocation103_spill] sm:$0xff]  ;;  %v9635_v21 = vld [vmem:[#allocation69_spill] sm:$0xff] }
 0x514   : > { %3719 = vadd.xlane.f32.xlu0 %v3718_v8  ;;  %6471 = vrcp.f32 %v8643_v33  ;;  %v9636_v51 = vld [vmem:[#allocation65_spill] sm:$0xff] }
 0x515   : > { %v6458_v63 = vpop.eup %6457  ;;  %v2872_v46 = vpack.c.bf16 %v2842_v27, %v2841_v16 }
 0x516   : > { %v8768_v40 = vpop.eup %6459  ;;  %v2746_v5 = vpop.xlane.xlu0 %2745  ;;  %v2840_v22 = vmul.f32 %v6458_v63, %v9632_v17 }
 0x517   : > { %v8775_v47 = vpop.eup %6461  ;;  %6473 = vrcp.f32 %v2746_v5  ;;  %v8777_v56 = vpop.xlane.xlu1 %3665  ;;  %v3721_v39 = vsel %vm669_vm1, %v8768_v40, 0.0 }
 0x518   : > { %v2871_v7 = vpack.c.bf16 %v2840_v22, %v2839_v53  ;;  %v6464_v10 = vpop.eup %6463  ;;  %6475 = vrcp.f32 %v8635_v3  ;;  %3722 = vadd.xlane.f32.xlu0 %v3721_v39  ;;  %v3727_v32 = vsel %vm669_vm1, %v8775_v47, 0.0  ;;  %v9638_v39 = vld [vmem:[#allocation35_spill] sm:$0xff] }
 0x519   : > { %v6466_v43 = vpop.eup %6465  ;;  %v2843_v3 = vmul.f32 %v6464_v10, %v9634_v9 }
 0x51a   : > { %5695 = vmatprep.mubr.msk.bf16.mxu0 %vm669_vm1, %v2871_v7  ;;  %v2740_v6 = vpop.xlane.xlu0 %2739  ;;  %v6468_v33 = vpop.eup %6467  ;;  %v2846_v63 = vmul.f32 %v6466_v43, %v9636_v51  ;;  %v9640_v43 = vld [vmem:[#allocation71_spill] sm:$0xff] }
 0x51b   : > { %6477 = vrcp.f32 %v2740_v6  ;;  %5696 = vmatmul.mubr.msk.bf16.vlgmr.msra.gmra.mrb[64].mxu0 %vm669_vm1, %v2872_v46  ;;  %v8784_v15 = vpop.xlane.xlu1 %3659  ;;  %v2845_v27 = vmul.f32 %v6468_v33, %v9637_v36  ;;  %v9639_v46 = vld [vmem:[#allocation73_spill] sm:$0xff]  ;;  %v9642_v36 = vld [vmem:[#allocation56_spill] sm:$0xff] }
 0x51c   : > { %3728 = vadd.xlane.f32.xlu0 %v3727_v32  ;;  %6479 = vrcp.f32 %v8664_v20 }
 0x51d   : > { %v6470_v13 = vpop.eup %6469  ;;  %v2874_v17 = vpack.c.bf16 %v2846_v63, %v2845_v27 }
 0x51e   : > { %v2758_v12 = vpop.xlane.xlu0 %2757  ;;  %v2844_v59 = vmul.f32 %v6470_v13, %v9635_v21  ;;  %v6472_v54 = vpop.eup %6471  ;;  %v9641_v13 = vld [vmem:[#allocation48_spill] sm:$0xff] }
 0x51f   : > { %6481 = vrcp.f32 %v2758_v12  ;;  %v8793_v5 = vpop.xlane.xlu1 %3677  ;;  %v2847_v10 = vmul.f32 %v6472_v54, %v9638_v39  ;;  %v9643_v54 = vld [vmem:[#allocation49_spill] sm:$0xff] }
 0x520   : > { %v2873_v8 = vpack.c.bf16 %v2844_v59, %v2843_v3  ;;  %6483 = vrcp.f32 %v8654_v26 }
 0x521   : > { %v6474_v22 = vpop.eup %6473 }
 0x522   : > { %5699 = vmatprep.mubr.msk.bf16.mxu0 %vm669_vm1, %v2873_v8  ;;  %v2752_v53 = vpop.xlane.xlu0 %2751  ;;  %v6476_v42 = vpop.eup %6475  ;;  %v2850_v33 = vmul.f32 %v6474_v22, %v9640_v43 }
 0x523   : > { %6485 = vrcp.f32 %v2752_v53  ;;  %5700 = vmatmul.mubr.msk.bf16.gmra.mrb[68].mxu0 %vm669_vm1, %v2874_v17  ;;  %v8798_v20 = vpop.xlane.xlu1 %3671  ;;  %v2849_v32 = vmul.f32 %v6476_v42, %v9641_v13  ;;  %v9644_v17 = vld [vmem:[#allocation74_spill] sm:$0xff] }
 0x525   : > { %v6478_v16 = vpop.eup %6477  ;;  %v2876_v21 = vpack.c.bf16 %v2850_v33, %v2849_v32  ;;  %v9647_v32 = vld [vmem:[#allocation52_spill] sm:$0xff] }
 0x526   : > { %v2761_v7 = vpop.xlane.xlu0 %2760  ;;  %v2848_v6 = vmul.f32 %v6478_v16, %v9639_v46  ;;  %v6480_v9 = vpop.eup %6479  ;;  %v9645_v16 = vld [vmem:[#allocation104_spill] sm:$0xff] }
 0x527   : > { %v3811_v12 = vpop.permute.xlu1 %3810  ;;  %v2851_v27 = vmul.f32 %v6480_v9, %v9642_v36 }
 0x528   : > { %v2875_v26 = vpack.c.bf16 %v2848_v6, %v2847_v10  ;;  %5761 = vmatprep.subr.bf16.mxu0 %v3811_v12 }
 0x529   : > { %v6482_v59 = vpop.eup %6481  ;;  %5762 = vmatpush3.bf16.msra.mxu0 %v3811_v12 }
 0x52a   : > { %5703 = vmatprep.mubr.msk.bf16.mxu0 %vm669_vm1, %v2875_v26  ;;  %v2770_v3 = vpop.xlane.xlu0 %2769  ;;  %v6484_v51 = vpop.eup %6483  ;;  %v2854_v22 = vmul.f32 %v6482_v59, %v9644_v17  ;;  %v9646_v26 = vld [vmem:[#allocation54_spill] sm:$0xff] }
 0x52b   : > { %6487 = vrcp.f32 %v2770_v3  ;;  %5704 = vmatmul.mubr.msk.bf16.gmra.mrb[72].mxu0 %vm669_vm1, %v2876_v21  ;;  %v2853_v39 = vmul.f32 %v6484_v51, %v9645_v16  ;;  %v9648_v21 = vld [vmem:[#allocation37_spill] sm:$0xff] }
 0x52c   : > { %6489 = vrcp.f32 %v2761_v7 }
 0x52d   : > { %v6486_v63 = vpop.eup %6485  ;;  %6491 = vrcp.f32 %v8678_v34  ;;  %v2878_v46 = vpack.c.bf16 %v2854_v22, %v2853_v39  ;;  %v9649_v22 = vld [vmem:[#allocation58_spill] sm:$0xff]  ;;  %v9650_v39 = vld [vmem:[#allocation55_spill] sm:$0xff] }
 0x52e   : > { %v2764_v8 = vpop.xlane.xlu0 %2763  ;;  %v2852_v53 = vmul.f32 %v6486_v63, %v9643_v54 }
 0x52f   : > { %6493 = vrcp.f32 %v2764_v8 }
 0x530   : > { %v2877_v42 = vpack.c.bf16 %v2852_v53, %v2851_v27 }
 0x532   : > { %5707 = vmatprep.mubr.msk.bf16.mxu0 %vm669_vm1, %v2877_v42  ;;  %v2779_v10 = vpop.xlane.xlu0 %2778 }
 0x533   : > { %5708 = vmatmul.mubr.msk.bf16.gmra.mrb[76].mxu0 %vm669_vm1, %v2878_v46 }
 0x535   : > { %v6488_v7 = vpop.eup %6487 }
 0x536   : > { %v6490_v6 = vpop.eup %6489  ;;  %v2773_v34 = vpop.xlane.xlu0 %2772  ;;  %v2858_v13 = vmul.f32 %v6488_v7, %v9646_v26 }
 0x537   : > { %v6492_v43 = vpop.eup %6491  ;;  %v2855_v12 = vmul.f32 %v6490_v6, %v9647_v32  ;;  %v9652_v6 = vld [vmem:[#allocation53_spill] sm:$0xff] }
 0x538   : > { %v2857_v59 = vmul.f32 %v6492_v43, %v9648_v21 }
 0x539   : > { %v6494_v33 = vpop.eup %6493 }
 0x53a   : > { %v2856_v9 = vmul.f32 %v6494_v33, %v8455_v37  ;;  %v2782_v3 = vpop.xlane.xlu0 %2781  ;;  %v2880_v63 = vpack.c.bf16 %v2858_v13, %v2857_v59 }
 0x53b   : > { %6495 = vrcp.f32 %v2782_v3 }
 0x53c   : > { %v2879_v51 = vpack.c.bf16 %v2856_v9, %v2855_v12  ;;  %6497 = vrcp.f32 %v2773_v34 }
 0x53d   : > { %6499 = vrcp.f32 %v2779_v10  ;;  %v9651_v10 = vld [vmem:[#allocation84_spill] sm:$0xff] }
 0x53e   : > { %5711 = vmatprep.mubr.msk.bf16.mxu0 %vm669_vm1, %v2879_v51  ;;  %v2776_v8 = vpop.xlane.xlu0 %2775  ;;  %v9653_v51 = vld [vmem:[#allocation79_spill] sm:$0xff] }
 0x53f   : > { %5712 = vmatmul.mubr.msk.bf16.gmra.mrb[80].mxu0 %vm669_vm1, %v2880_v63  ;;  %6501 = vrcp.f32 %v2776_v8  ;;  %v9654_v8 = vld [vmem:[#allocation38_spill] sm:$0xff] }
 0x542   : > { %v2785_v36 = vpop.xlane.xlu0 %2784 }
 0x545   : > { %v6496_v27 = vpop.eup %6495 }
 0x546   : > { %v2794_v54 = vpop.xlane.xlu0 %2793  ;;  %v6498_v53 = vpop.eup %6497  ;;  %v2862_v42 = vmul.f32 %v6496_v27, %v9649_v22 }
 0x547   : > { %v6500_v17 = vpop.eup %6499  ;;  %6503 = vrcp.f32 %v2794_v54  ;;  %v2859_v46 = vmul.f32 %v6498_v53, %v9650_v39  ;;  %v9657_v39 = vld [vmem:[#allocation62_spill] sm:$0xff] }
 0x548   : > { %6505 = vrcp.f32 %v2785_v36  ;;  %v2861_v34 = vmul.f32 %v6500_v17, %v9652_v6  ;;  %v9655_v17 = vld [vmem:[#allocation86_spill] sm:$0xff] }
 0x549   : > { %v6502_v37 = vpop.eup %6501  ;;  %6507 = vrcp.f32 %v8693_v28 }
 0x54a   : > { %v2788_v16 = vpop.xlane.xlu0 %2787  ;;  %v2860_v7 = vmul.f32 %v6502_v37, %v9651_v10  ;;  %v2882_v33 = vpack.c.bf16 %v2862_v42, %v2861_v34  ;;  %v9656_v42 = vld [vmem:[#allocation41_spill] sm:$0xff] }
 0x54b   : > { %6509 = vrcp.f32 %v2788_v16 }
 0x54c   : > { %v2881_v43 = vpack.c.bf16 %v2860_v7, %v2859_v46 }
 0x54e   : > { %5715 = vmatprep.mubr.msk.bf16.mxu0 %vm669_vm1, %v2881_v43  ;;  %v2806_v26 = vpop.xlane.xlu0 %2805 }
 0x54f   : > { %5716 = vmatmul.mubr.msk.bf16.gmra.mrb[84].mxu0 %vm669_vm1, %v2882_v33  ;;  %6511 = vrcp.f32 %v2806_v26 }
 0x550   : > { %6513 = vrcp.f32 %v8718_v60 }
 0x551   : > { %v6504_v13 = vpop.eup %6503  ;;  %6515 = vrcp.f32 %v8702_v61 }
 0x552   : > { %v2800_v28 = vpop.xlane.xlu0 %2799  ;;  %v6506_v32 = vpop.eup %6505  ;;  %v2866_v3 = vmul.f32 %v6504_v13, %v8518_v4  ;;  %v9658_v13 = vld [vmem:[#allocation67_spill] sm:$0xff] }
 0x553   : > { %6517 = vrcp.f32 %v2800_v28  ;;  %v6508_v12 = vpop.eup %6507  ;;  %v2863_v59 = vmul.f32 %v6506_v32, %v8500_v18  ;;  %v9659_v32 = vld [vmem:[#allocation42_spill] sm:$0xff] }
 0x554   : > { %v2865_v36 = vmul.f32 %v6508_v12, %v9654_v8  ;;  %v9660_v8 = vld [vmem:[#allocation45_spill] sm:$0xff] }
 0x555   : > { %v6510_v9 = vpop.eup %6509 }
 0x556   : > { %v3645_v21 = vpop.xlane.xlu0 %3644  ;;  %v2864_v63 = vmul.f32 %v6510_v9, %v9653_v51  ;;  %v2884_v60 = vpack.c.bf16 %v2866_v3, %v2865_v36 }
 0x557   : > { %6519 = vrcp.f32 %v3645_v21 }
 0x558   : > { %v2883_v27 = vpack.c.bf16 %v2864_v63, %v2863_v59  ;;  %6521 = vrcp.f32 %v8744_v55 }
 0x559   : > { %v6512_v61 = vpop.eup %6511  ;;  %6523 = vrcp.f32 %v8737_v23 }
 0x55a   : > { %5719 = vmatprep.mubr.msk.bf16.mxu0 %vm669_vm1, %v2883_v27  ;;  %v3639_v54 = vpop.xlane.xlu0 %3638  ;;  %v6514_v53 = vpop.eup %6513  ;;  %v2870_v37 = vmul.f32 %v6512_v61, %v9655_v17  ;;  %v9661_v27 = vld [vmem:[#allocation44_spill] sm:$0xff] }
 0x55b   : > { %6525 = vrcp.f32 %v3639_v54  ;;  %5720 = vmatmul.mubr.msk.bf16.gmra.mrb[88].mxu0 %vm669_vm1, %v2884_v60  ;;  %v6516_v4 = vpop.eup %6515  ;;  %v2867_v16 = vmul.f32 %v6514_v53, %v9656_v42  ;;  %v9663_v42 = vld [vmem:[#allocation46_spill] sm:$0xff] }
 0x55c   : > { %v2869_v46 = vmul.f32 %v6516_v4, %v9657_v39 }
 0x55d   : > { %v6518_v18 = vpop.eup %6517 }
 0x55e   : > { %v3657_v22 = vpop.xlane.xlu0 %3656  ;;  %v2868_v55 = vmul.f32 %v6518_v18, %v8541_v11  ;;  %v2886_v10 = vpack.c.bf16 %v2870_v37, %v2869_v46  ;;  %v9662_v37 = vld [vmem:[#allocation47_spill] sm:$0xff] }
 0x55f   : > { %6527 = vrcp.f32 %v3657_v22 }
 0x560   : > { %v2885_v23 = vpack.c.bf16 %v2868_v55, %v2867_v16  ;;  %6529 = vrcp.f32 %v8764_v24 }
 0x561   : > { %v6520_v7 = vpop.eup %6519  ;;  %6531 = vrcp.f32 %v8757_v50 }
 0x562   : > { %5723 = vmatprep.mubr.msk.bf16.mxu0 %vm669_vm1, %v2885_v23  ;;  %v3651_v6 = vpop.xlane.xlu0 %3650  ;;  %v6522_v34 = vpop.eup %6521  ;;  %v3765_v11 = vmul.f32 %v6520_v7, %v8561_v14 }
 0x563   : > { %6533 = vrcp.f32 %v3651_v6  ;;  %5724 = vmatmul.mubr.msk.bf16.gmra.mrb[92].mxu0 %vm669_vm1, %v2886_v10  ;;  %v6524_v43 = vpop.eup %6523  ;;  %v3762_v28 = vmul.f32 %v6522_v34, %v9658_v13  ;;  %v9664_v13 = vld [vmem:[#allocation51_spill] sm:$0xff] }
 0x564   : > { %v3764_v12 = vmul.f32 %v6524_v43, %v9659_v32  ;;  %v9665_v32 = vld [vmem:[#allocation50_spill] sm:$0xff] }
 0x565   : > { %v6526_v33 = vpop.eup %6525 }
 0x566   : > { %v3669_v26 = vpop.xlane.xlu0 %3668  ;;  %v3763_v24 = vmul.f32 %v6526_v33, %v8574_v57  ;;  %v3795_v9 = vpack.c.bf16 %v3765_v11, %v3764_v12 }
 0x567   : > { %6535 = vrcp.f32 %v3669_v26 }
 0x568   : > { %v3794_v50 = vpack.c.bf16 %v3763_v24, %v3762_v28  ;;  %6537 = vrcp.f32 %v8784_v15 }
 0x569   : > { %v6528_v3 = vpop.eup %6527  ;;  %6539 = vrcp.f32 %v8777_v56 }
 0x56a   : > { %5763 = vmatprep.mubr.msk.bf16.mxu0 %vm669_vm1, %v3794_v50  ;;  %v3663_v21 = vpop.xlane.xlu0 %3662  ;;  %v6530_v59 = vpop.eup %6529  ;;  %v3769_v57 = vmul.f32 %v6528_v3, %v8585_v19 }
 0x56b   : > { %6541 = vrcp.f32 %v3663_v21  ;;  %5764 = vmatmul.mubr.msk.bf16.vlgmr.msra.gmra.mrb[96].mxu0 %vm669_vm1, %v3795_v9  ;;  %v6532_v14 = vpop.eup %6531  ;;  %v3766_v36 = vmul.f32 %v6530_v59, %v9660_v8 }
 0x56c   : > { %v3768_v60 = vmul.f32 %v6532_v14, %v9661_v27 }
 0x56d   : > { %v6534_v51 = vpop.eup %6533 }
 0x56e   : > { %v3681_v63 = vpop.xlane.xlu0 %3680  ;;  %v3767_v15 = vmul.f32 %v6534_v51, %v8593_v41  ;;  %v3797_v61 = vpack.c.bf16 %v3769_v57, %v3768_v60 }
 0x56f   : > { %6543 = vrcp.f32 %v3681_v63 }
 0x570   : > { %v3796_v56 = vpack.c.bf16 %v3767_v15, %v3766_v36  ;;  %6545 = vrcp.f32 %v8798_v20 }
 0x571   : > { %v6536_v54 = vpop.eup %6535  ;;  %6547 = vrcp.f32 %v8793_v5 }
 0x572   : > { %5767 = vmatprep.mubr.msk.bf16.mxu0 %vm669_vm1, %v3796_v56  ;;  %v3675_v53 = vpop.xlane.xlu0 %3674  ;;  %v6538_v4 = vpop.eup %6537  ;;  %v3773_v41 = vmul.f32 %v6536_v54, %v8597_v2 }
 0x573   : > { %6549 = vrcp.f32 %v3675_v53  ;;  %5768 = vmatmul.mubr.msk.bf16.gmra.mrb[100].mxu0 %vm669_vm1, %v3797_v61  ;;  %v6540_v19 = vpop.eup %6539  ;;  %v3770_v22 = vmul.f32 %v6538_v4, %v9662_v37 }
 0x574   : > { %v3772_v16 = vmul.f32 %v6540_v19, %v9663_v42 }
 0x575   : > { %v6542_v18 = vpop.eup %6541 }
 0x576   : > { %v3690_v17 = vpop.xlane.xlu0 %3689  ;;  %v3771_v20 = vmul.f32 %v6542_v18, %v8625_v35  ;;  %v3799_v5 = vpack.c.bf16 %v3773_v41, %v3772_v16  ;;  %v9666_v16 = vld [vmem:[#allocation57_spill] sm:$0xff] }
 0x578   : > { %v3798_v55 = vpack.c.bf16 %v3771_v20, %v3770_v22 }
 0x579   : > { %v6544_v39 = vpop.eup %6543  ;;  %v5629_v46 = vpop.f32.mrb[32].mxu0 }
 0x57a   : > { %5771 = vmatprep.mubr.msk.bf16.mxu0 %vm669_vm1, %v3798_v55  ;;  %v3684_v23 = vpop.xlane.xlu0 %3683  ;;  %v6546_v10 = vpop.eup %6545  ;;  %v3777_v35 = vmul.f32 %v6544_v39, %v8633_v58 }
 0x57b   : > { %v2049_v7 = vpop.f32.mrb[33].mxu0  ;;  %5772 = vmatmul.mubr.msk.bf16.gmra.mrb[104].mxu0 %vm669_vm1, %v3799_v5  ;;  %v6548_v6 = vpop.eup %6547  ;;  %v3774_v28 = vmul.f32 %v6546_v10, %v9664_v13 }
 0x57c   : > { %v5630_v2 = vpop.f32.mrb[34].mxu0  ;;  %v3776_v12 = vmul.f32 %v6548_v6, %v9665_v32 }
 0x57d   : > { %v6550_v34 = vpop.eup %6549  ;;  %v5813_v43 = vpack.i.bf16 %v5630_v2, %v5629_v46  ;;  %v2052_v33 = vpop.f32.mrb[35].mxu0 }
 0x57e   : > { %v5818_v11 = vpack.i.bf16 %v2052_v33, %v2049_v7  ;;  %v3693_v26 = vpop.xlane.xlu0 %3692  ;;  %v3775_v24 = vmul.f32 %v6550_v34, %v8641_v48  ;;  %v3801_v9 = vpack.c.bf16 %v3777_v35, %v3776_v12  ;;  %v3696_v48 = vpop.xlane.xlu1 %3695 }
 0x57f   : > { %5814 = vrot.lane.b32.xlu0 %v5813_v43, %s6612_s14  ;;  %6551 = vrcp.f32 %v3693_v26 }
 0x580   : > { %5819 = vrot.lane.b32.xlu1 %v5818_v11, %s6612_s14  ;;  %v3800_v50 = vpack.c.bf16 %v3775_v24, %v3774_v28  ;;  %6553 = vrcp.f32 %v3684_v23 }
 0x581   : > { %6555 = vrcp.f32 %v3690_v17 }
 0x582   : > { %5775 = vmatprep.mubr.msk.bf16.mxu0 %vm669_vm1, %v3800_v50  ;;  %v3687_v58 = vpop.xlane.xlu0 %3686  ;;  %v3726_v34 = vpop.xlane.xlu1 %3725 }
 0x583   : > { %6557 = vrcp.f32 %v3687_v58  ;;  %5776 = vmatmul.mubr.msk.bf16.gmra.mrb[108].mxu0 %vm669_vm1, %v3801_v9 }
 0x586   : > { %v3702_v3 = vpop.xlane.xlu0 %3701 }
 0x589   : > { %v6552_v21 = vpop.eup %6551  ;;  %v5633_v59 = vpop.f32.mrb[36].mxu0 }
 0x58a   : > { %v3705_v14 = vpop.xlane.xlu0 %3704  ;;  %v6554_v51 = vpop.eup %6553  ;;  %v3781_v60 = vmul.f32 %v6552_v21, %v8662_v0 }
 0x58b   : > { %v2065_v57 = vpop.f32.mrb[37].mxu0  ;;  %v6556_v63 = vpop.eup %6555  ;;  %6559 = vrcp.f32 %v3705_v14  ;;  %v3778_v54 = vmul.f32 %v6554_v51, %v8658_v44 }
 0x58c   : > { %v5634_v8 = vpop.f32.mrb[38].mxu0  ;;  %6561 = vrcp.f32 %v3696_v48  ;;  %v3780_v4 = vmul.f32 %v6556_v63, %v8650_v45  ;;  %v9667_v63 = vld [vmem:[#allocation77_spill] sm:$0xff] }
 0x58d   : > { %v6558_v36 = vpop.eup %6557  ;;  %v5823_v15 = vpack.i.bf16 %v5634_v8, %v5633_v59  ;;  %v2068_v27 = vpop.f32.mrb[39].mxu0  ;;  %6563 = vrcp.f32 %v3702_v3 }
 0x58e   : > { %v5828_v56 = vpack.i.bf16 %v2068_v27, %v2065_v57  ;;  %v3699_v61 = vpop.xlane.xlu0 %3698  ;;  %v3779_v53 = vmul.f32 %v6558_v36, %v8676_v31  ;;  %v3803_v18 = vpack.c.bf16 %v3781_v60, %v3780_v4 }
 0x58f   : > { %6565 = vrcp.f32 %v3699_v61  ;;  %5824 = vrot.lane.b32.xlu1 %v5823_v15, %s6612_s14 }
 0x590   : > { %v3802_v19 = vpack.c.bf16 %v3779_v53, %v3778_v54 }
 0x592   : > { %5779 = vmatprep.mubr.msk.bf16.mxu0 %vm669_vm1, %v3802_v19  ;;  %v3714_v41 = vpop.xlane.xlu0 %3713 }
 0x593   : > { %5829 = vrot.lane.b32.xlu1 %v5828_v56, %s6612_s14  ;;  %5780 = vmatmul.mubr.msk.bf16.gmra.mrb[112].mxu0 %vm669_vm1, %v3803_v18 }
 0x595   : > { %v6560_v0 = vpop.eup %6559 }
 0x596   : > { %v3708_v17 = vpop.xlane.xlu0 %3707  ;;  %v6562_v37 = vpop.eup %6561  ;;  %v3785_v31 = vmul.f32 %v6560_v0, %v8691_v30 }
 0x597   : > { %v6564_v44 = vpop.eup %6563  ;;  %v3782_v45 = vmul.f32 %v6562_v37, %v9666_v16 }
 0x598   : > { %v3784_v39 = vmul.f32 %v6564_v44, %v8686_v25 }
 0x599   : > { %v6566_v22 = vpop.eup %6565  ;;  %v5637_v20 = vpop.f32.mrb[40].mxu0 }
 0x59a   : > { %v3717_v42 = vpop.xlane.xlu0 %3716  ;;  %v3783_v55 = vmul.f32 %v6566_v22, %v8697_v52  ;;  %v2081_v5 = vpop.f32.mrb[41].mxu0  ;;  %v3805_v6 = vpack.c.bf16 %v3785_v31, %v3784_v39 }
 0x59b   : > { %6567 = vrcp.f32 %v3717_v42  ;;  %v5638_v46 = vpop.f32.mrb[42].mxu0 }
 0x59c   : > { %v3804_v23 = vpack.c.bf16 %v3783_v55, %v3782_v45  ;;  %6569 = vrcp.f32 %v3708_v17  ;;  %v5833_v10 = vpack.i.bf16 %v5638_v46, %v5637_v20  ;;  %v2084_v7 = vpop.f32.mrb[43].mxu0 }
 0x59d   : > { %6571 = vrcp.f32 %v3714_v41  ;;  %v5838_v2 = vpack.i.bf16 %v2084_v7, %v2081_v5 }
 0x59e   : > { %5783 = vmatprep.mubr.msk.bf16.mxu0 %vm669_vm1, %v3804_v23  ;;  %v3711_v30 = vpop.xlane.xlu0 %3710  ;;  %5834 = vrot.lane.b32.xlu1 %v5833_v10, %s6612_s14 }
 0x59f   : > { %6573 = vrcp.f32 %v3711_v30  ;;  %5784 = vmatmul.mubr.msk.bf16.gmra.mrb[116].mxu0 %vm669_vm1, %v3805_v6  ;;  %5839 = vrot.lane.b32.xlu0 %v5838_v2, %s6612_s14 }
 0x5a2   : > { %v3720_v25 = vpop.xlane.xlu0 %3719 }
 0x5a3   : > { %6575 = vrcp.f32 %v3720_v25  ;;  %v9668_v25 = vld [vmem:[#allocation5_spill] sm:$0xff] }
 0x5a5   : > { %v6568_v52 = vpop.eup %6567 }
 0x5a6   : > { %v3723_v43 = vpop.xlane.xlu0 %3722  ;;  %v6570_v33 = vpop.eup %6569  ;;  %v3789_v26 = vmul.f32 %v6568_v52, %v8735_v1 }
 0x5a7   : > { %6577 = vrcp.f32 %v3723_v43  ;;  %v6572_v35 = vpop.eup %6571  ;;  %v3786_v28 = vmul.f32 %v6570_v33, %v8726_v62 }
 0x5a8   : > { %6579 = vrcp.f32 %v3726_v34  ;;  %v3788_v32 = vmul.f32 %v6572_v35, %v8713_v38  ;;  %v9669_v34 = vld [vmem:[#allocation3_spill] sm:$0xff] }
 0x5a9   : > { %v6574_v11 = vpop.eup %6573 }
 0x5aa   : > { %v3729_v13 = vpop.xlane.xlu0 %3728  ;;  %v3787_v24 = vmul.f32 %v6574_v11, %v8748_v49  ;;  %v3807_v50 = vpack.c.bf16 %v3789_v26, %v3788_v32 }
 0x5ab   : > { %6581 = vrcp.f32 %v3729_v13 }
 0x5ac   : > { %v3806_v12 = vpack.c.bf16 %v3787_v24, %v3786_v28 }
 0x5ad   : > { %v6576_v9 = vpop.eup %6575 }
 0x5ae   : > { %5787 = vmatprep.mubr.msk.bf16.mxu0 %vm669_vm1, %v3806_v12  ;;  %v3790_v62 = vmul.f32 %v6576_v9, %v8755_v29 }
 0x5af   : > { %v5641_v58 = vpop.f32.mrb[44].mxu0  ;;  %5788 = vmatmul.mubr.msk.bf16.gmra.mrb[120].mxu0 %vm669_vm1, %v3807_v50 }
 0x5b0   : > { %v2097_v3 = vpop.f32.mrb[45].mxu0 }
 0x5b1   : > { %v6578_v48 = vpop.eup %6577  ;;  %v5642_v21 = vpop.f32.mrb[46].mxu0 }
 0x5b2   : > { %v5843_v1 = vpack.i.bf16 %v5642_v21, %v5641_v58  ;;  %v2100_v59 = vpop.f32.mrb[47].mxu0  ;;  %v3791_v49 = vmul.f32 %v6578_v48, %v8768_v40  ;;  %v6580_v14 = vpop.eup %6579 }
 0x5b3   : > { %v5848_v51 = vpack.i.bf16 %v2100_v59, %v2097_v3  ;;  %v3792_v8 = vmul.f32 %v6580_v14, %v9667_v63 }
 0x5b4   : > { %5844 = vrot.lane.b32.xlu1 %v5843_v1, %s6612_s14  ;;  %v3808_v38 = vpack.c.bf16 %v3791_v49, %v3790_v62  ;;  %v9670_v1 = vld [vmem:[#allocation8_spill] sm:$0xff]  ;;  %v9671_v62 = vld [vmem:[#allocation6_spill] sm:$0xff] }
 0x5b5   : > { %v6582_v57 = vpop.eup %6581  ;;  %5849 = vrot.lane.b32.xlu0 %v5848_v51, %s6612_s14 }
 0x5b6   : > { %5791 = vmatprep.mubr.msk.bf16.mxu0 %vm669_vm1, %v3808_v38  ;;  %v3793_v36 = vmul.f32 %v6582_v57, %v8775_v47 }
 0x5b8   : > { %v3809_v15 = vpack.c.bf16 %v3793_v36, %v3792_v8  ;;  %v9672_v8 = vld [vmem:[#allocation9_spill] sm:$0xff] }
 0x5ba   : > { %5792 = vmatmul.mubr.msk.bf16.gmra.mrb[124].mxu0 %vm669_vm1, %v3809_v15  ;;  %v9673_v15 = vld [vmem:[#allocation7_spill] sm:$0xff] }
 0x5c6   : > { %v5645_v29 = vpop.f32.mrb[48].mxu0 }
 0x5c7   : > { %v2113_v27 = vpop.f32.mrb[49].mxu0 }
 0x5c8   : > { %v5646_v40 = vpop.f32.mrb[50].mxu0 }
 0x5c9   : > { %v5853_v60 = vpack.i.bf16 %v5646_v40, %v5645_v29  ;;  %v2116_v56 = vpop.f32.mrb[51].mxu0 }
 0x5ca   : > { %v5858_v61 = vpack.i.bf16 %v2116_v56, %v2113_v27 }
 0x5cb   : > { %5854 = vrot.lane.b32.xlu1 %v5853_v60, %s6612_s14 }
 0x5cc   : > { %5859 = vrot.lane.b32.xlu0 %v5858_v61, %s6612_s14 }
 0x5d6   : > { %v5649_v54 = vpop.f32.mrb[52].mxu0 }
 0x5d7   : > { %v2129_v53 = vpop.f32.mrb[53].mxu0 }
 0x5d8   : > { %v5650_v4 = vpop.f32.mrb[54].mxu0 }
 0x5d9   : > { %v5863_v19 = vpack.i.bf16 %v5650_v4, %v5649_v54  ;;  %v2132_v18 = vpop.f32.mrb[55].mxu0 }
 0x5da   : > { %v5868_v41 = vpack.i.bf16 %v2132_v18, %v2129_v53 }
 0x5db   : > { %5864 = vrot.lane.b32.xlu1 %v5863_v19, %s6612_s14 }
 0x5dc   : > { %5869 = vrot.lane.b32.xlu0 %v5868_v41, %s6612_s14 }
 0x5de   : > { %v5653_v47 = vpop.f32.mrb[56].mxu0 }
 0x5df   : > { %v2145_v0 = vpop.f32.mrb[57].mxu0 }
 0x5e0   : > { %v5654_v17 = vpop.f32.mrb[58].mxu0 }
 0x5e1   : > { %v5873_v37 = vpack.i.bf16 %v5654_v17, %v5653_v47  ;;  %v2148_v44 = vpop.f32.mrb[59].mxu0 }
 0x5e2   : > { %v5878_v22 = vpack.i.bf16 %v2148_v44, %v2145_v0 }
 0x5e3   : > { %5874 = vrot.lane.b32.xlu1 %v5873_v37, %s6612_s14  ;;  %v9674_v37 = vld [vmem:[#allocation12_spill] sm:$0xff] }
 0x5e4   : > { %5879 = vrot.lane.b32.xlu0 %v5878_v22, %s6612_s14  ;;  %v9675_v22 = vld [vmem:[#allocation10_spill] sm:$0xff] }
 0x5e6   : > { %v5657_v31 = vpop.f32.mrb[60].mxu0 }
 0x5e7   : > { %v2161_v20 = vpop.f32.mrb[61].mxu0 }
 0x5e8   : > { %v5658_v42 = vpop.f32.mrb[62].mxu0 }
 0x5e9   : > { %v5883_v16 = vpack.i.bf16 %v5658_v42, %v5657_v31  ;;  %v2164_v45 = vpop.f32.mrb[63].mxu0 }
 0x5ea   : > { %v5888_v55 = vpack.i.bf16 %v2164_v45, %v2161_v20 }
 0x5eb   : > { %5884 = vrot.lane.b32.xlu1 %v5883_v16, %s6612_s14  ;;  %v9676_v16 = vld [vmem:[#allocation13_spill] sm:$0xff] }
 0x5ec   : > { %5889 = vrot.lane.b32.xlu0 %v5888_v55, %s6612_s14  ;;  %v9677_v55 = vld [vmem:[#allocation11_spill] sm:$0xff] }
 0x5ee   : > { %v5697_v5 = vpop.f32.mrb[64].mxu0 }
 0x5ef   : > { %v2972_v39 = vpop.f32.mrb[65].mxu0 }
 0x5f0   : > { %v5698_v46 = vpop.f32.mrb[66].mxu0 }
 0x5f1   : > { %v5893_v23 = vpack.i.bf16 %v5698_v46, %v5697_v5  ;;  %v2975_v10 = vpop.f32.mrb[67].mxu0  ;;  %v8944_v61 = vpop.permute.xlu0 %5814 }
 0x5f2   : > { %v5898_v7 = vpack.i.bf16 %v2975_v10, %v2972_v39  ;;  %v5820_v6 = vpop.permute.xlu1 %5819 }
 0x5f3   : > { %v5822_v2 = vunpack.i.h.bf16 %v5820_v6  ;;  %v5821_v30 = vunpack.i.l.bf16 %v5820_v6  ;;  %5894 = vrot.lane.b32.xlu1 %v5893_v23, %s6613_s24 }
 0x5f4   : > { %5899 = vrot.lane.b32.xlu0 %v5898_v7, %s6613_s24 }
 0x5f5   : > { %v8916_v52 = vsel %vm424_vm0, %v9668_v25, %v5822_v2  ;;  %v8920_v43 = vsel %vm424_vm0, %v9669_v34, %v5821_v30 }
 0x5f6   : > { %v5701_v33 = vpop.f32.mrb[68].mxu0 }
 0x5f7   : > { %v2988_v35 = vpop.f32.mrb[69].mxu0 }
 0x5f8   : > { %v5702_v11 = vpop.f32.mrb[70].mxu0 }
 0x5f9   : > { %v5903_v26 = vpack.i.bf16 %v5702_v11, %v5701_v33  ;;  %v2991_v13 = vpop.f32.mrb[71].mxu0 }
 0x5fa   : > { %v5908_v28 = vpack.i.bf16 %v2991_v13, %v2988_v35 }
 0x5fb   : > { %5904 = vrot.lane.b32.xlu1 %v5903_v26, %s6613_s24  ;;  %v9678_v26 = vld [vmem:[#allocation16_spill] sm:$0xff] }
 0x5fc   : > { %5909 = vrot.lane.b32.xlu0 %v5908_v28, %s6613_s24  ;;  %v9679_v28 = vld [vmem:[#allocation14_spill] sm:$0xff] }
 0x5fe   : > { %v5705_v24 = vpop.f32.mrb[72].mxu0 }
 0x5ff   : > { %v3004_v32 = vpop.f32.mrb[73].mxu0 }
 0x600   : > { %v5706_v12 = vpop.f32.mrb[74].mxu0 }
 0x601   : > { %v5913_v50 = vpack.i.bf16 %v5706_v12, %v5705_v24  ;;  %v5825_v9 = vpop.permute.xlu1 %5824  ;;  %v3007_v58 = vpop.f32.mrb[75].mxu0 }
 0x602   : > { %v5827_v3 = vunpack.i.h.bf16 %v5825_v9  ;;  %v5826_v48 = vunpack.i.l.bf16 %v5825_v9  ;;  %v5918_v21 = vpack.i.bf16 %v3007_v58, %v3004_v32  ;;  %v9680_v32 = vld [vmem:[#allocation17_spill] sm:$0xff] }
 0x603   : > { %5914 = vrot.lane.b32.xlu1 %v5913_v50, %s6613_s24  ;;  %v9681_v50 = vld [vmem:[#allocation15_spill] sm:$0xff] }
 0x604   : > { %v8927_v59 = vsel %vm424_vm0, %v9670_v1, %v5827_v3  ;;  %v8931_v49 = vsel %vm424_vm0, %v9671_v62, %v5826_v48  ;;  %5919 = vrot.lane.b32.xlu0 %v5918_v21, %s6613_s24 }
 0x605   : > { %v5830_v14 = vpop.permute.xlu1 %5829 }
 0x606   : > { %v5832_v51 = vunpack.i.h.bf16 %v5830_v14  ;;  %v5831_v38 = vunpack.i.l.bf16 %v5830_v14  ;;  %v5709_v57 = vpop.f32.mrb[76].mxu0 }
 0x607   : > { %v3020_v63 = vpop.f32.mrb[77].mxu0 }
 0x608   : > { %v8936_v36 = vsel %vm424_vm0, %v9672_v8, %v5832_v51  ;;  %v8940_v29 = vsel %vm424_vm0, %v9673_v15, %v5831_v38  ;;  %v5710_v27 = vpop.f32.mrb[78].mxu0 }
 0x609   : > { %v5923_v40 = vpack.i.bf16 %v5710_v27, %v5709_v57  ;;  %v3023_v60 = vpop.f32.mrb[79].mxu0 }
 0x60a   : > { %v5928_v56 = vpack.i.bf16 %v3023_v60, %v3020_v63 }
 0x60b   : > { %5924 = vrot.lane.b32.xlu1 %v5923_v40, %s6613_s24 }
 0x60c   : > { %5929 = vrot.lane.b32.xlu0 %v5928_v56, %s6613_s24 }
 0x610   : > { %v5835_v54 = vpop.permute.xlu1 %5834 }
 0x611   : > { %v5837_v4 = vunpack.i.h.bf16 %v5835_v54  ;;  %v5836_v19 = vunpack.i.l.bf16 %v5835_v54  ;;  %v5840_v18 = vpop.permute.xlu0 %5839 }
 0x612   : > { %v5713_v53 = vpop.f32.mrb[80].mxu0  ;;  %v5842_v47 = vunpack.i.h.bf16 %v5840_v18  ;;  %v5841_v0 = vunpack.i.l.bf16 %v5840_v18 }
 0x613   : > { %v3036_v41 = vpop.f32.mrb[81].mxu0  ;;  %v8948_v44 = vsel %vm424_vm0, %v9674_v37, %v5837_v4  ;;  %v8952_v31 = vsel %vm424_vm0, %v9675_v22, %v5836_v19  ;;  %v9682_v19 = vld [vmem:[#allocation20_spill] sm:$0xff]  ;;  %v9685_v22 = vld [vmem:[#allocation19_spill] sm:$0xff] }
 0x614   : > { %v5714_v17 = vpop.f32.mrb[82].mxu0  ;;  %v8956_v45 = vsel %vm424_vm0, %v9676_v16, %v5842_v47  ;;  %v8960_v5 = vsel %vm424_vm0, %v9677_v55, %v5841_v0 }
 0x615   : > { %v5933_v20 = vpack.i.bf16 %v5714_v17, %v5713_v53  ;;  %v3039_v42 = vpop.f32.mrb[83].mxu0  ;;  %v9684_v17 = vld [vmem:[#allocation21_spill] sm:$0xff] }
 0x616   : > { %v5938_v39 = vpack.i.bf16 %v3039_v42, %v3036_v41  ;;  %v9683_v41 = vld [vmem:[#allocation18_spill] sm:$0xff] }
 0x617   : > { %5934 = vrot.lane.b32.xlu1 %v5933_v20, %s6613_s24 }
 0x618   : > { %5939 = vrot.lane.b32.xlu0 %v5938_v39, %s6613_s24 }
 0x622   : > { %v5717_v46 = vpop.f32.mrb[84].mxu0 }
 0x623   : > { %v3052_v23 = vpop.f32.mrb[85].mxu0 }
 0x624   : > { %v5718_v10 = vpop.f32.mrb[86].mxu0 }
 0x625   : > { %v5943_v7 = vpack.i.bf16 %v5718_v10, %v5717_v46  ;;  %v3055_v6 = vpop.f32.mrb[87].mxu0 }
 0x626   : > { %v5845_v2 = vpop.permute.xlu1 %5844  ;;  %v5948_v30 = vpack.i.bf16 %v3055_v6, %v3052_v23 }
 0x627   : > { %v5847_v25 = vunpack.i.h.bf16 %v5845_v2  ;;  %v5846_v34 = vunpack.i.l.bf16 %v5845_v2  ;;  %v5850_v33 = vpop.permute.xlu0 %5849  ;;  %5944 = vrot.lane.b32.xlu1 %v5943_v7, %s6613_s24 }
 0x628   : > { %v5852_v35 = vunpack.i.h.bf16 %v5850_v33  ;;  %v5851_v11 = vunpack.i.l.bf16 %v5850_v33  ;;  %5949 = vrot.lane.b32.xlu0 %v5948_v30, %s6613_s24 }
 0x629   : > { %v8968_v13 = vsel %vm424_vm0, %v9678_v26, %v5847_v25  ;;  %v8972_v24 = vsel %vm424_vm0, %v9679_v28, %v5846_v34  ;;  %v9686_v28 = vld [vmem:[#allocation24_spill] sm:$0xff] }
 0x62a   : > { %v8976_v12 = vsel %vm424_vm0, %v9680_v32, %v5852_v35  ;;  %v8980_v9 = vsel %vm424_vm0, %v9681_v50, %v5851_v11  ;;  %v9687_v50 = vld [vmem:[#allocation22_spill] sm:$0xff] }
 0x62e   : > { %v5721_v58 = vpop.f32.mrb[88].mxu0 }
 0x62f   : > { %v3068_v3 = vpop.f32.mrb[89].mxu0 }
 0x630   : > { %v5722_v48 = vpop.f32.mrb[90].mxu0 }
 0x631   : > { %v5953_v21 = vpack.i.bf16 %v5722_v48, %v5721_v58  ;;  %v3071_v1 = vpop.f32.mrb[91].mxu0  ;;  %v9688_v48 = vld [vmem:[#allocation25_spill] sm:$0xff] }
 0x632   : > { %v5958_v62 = vpack.i.bf16 %v3071_v1, %v3068_v3  ;;  %v9689_v1 = vld [vmem:[#allocation23_spill] sm:$0xff] }
 0x633   : > { %5954 = vrot.lane.b32.xlu1 %v5953_v21, %s6613_s24 }
 0x634   : > { %5959 = vrot.lane.b32.xlu0 %v5958_v62, %s6613_s24 }
 0x636   : > { %v5725_v14 = vpop.f32.mrb[92].mxu0 }
 0x637   : > { %v3084_v51 = vpop.f32.mrb[93].mxu0 }
 0x638   : > { %v5726_v38 = vpop.f32.mrb[94].mxu0 }
 0x639   : > { %v5963_v57 = vpack.i.bf16 %v5726_v38, %v5725_v14  ;;  %v3087_v63 = vpop.f32.mrb[95].mxu0 }
 0x63a   : > { %v5968_v8 = vpack.i.bf16 %v3087_v63, %v3084_v51 }
 0x63b   : > { %5964 = vrot.lane.b32.xlu1 %v5963_v57, %s6613_s24 }
 0x63c   : > { %5969 = vrot.lane.b32.xlu0 %v5968_v8, %s6613_s24 }
 0x63d   : > { %v5855_v15 = vpop.permute.xlu1 %5854 }
 0x63e   : > { %v5857_v27 = vunpack.i.h.bf16 %v5855_v15  ;;  %v5856_v40 = vunpack.i.l.bf16 %v5855_v15  ;;  %v5765_v60 = vpop.f32.mrb[96].mxu0  ;;  %v5860_v56 = vpop.permute.xlu0 %5859 }
 0x63f   : > { %v5862_v54 = vunpack.i.h.bf16 %v5860_v56  ;;  %v5861_v53 = vunpack.i.l.bf16 %v5860_v56  ;;  %v3895_v4 = vpop.f32.mrb[97].mxu0 }
 0x640   : > { %v8988_v18 = vsel %vm424_vm0, %v9682_v19, %v5857_v27  ;;  %v8992_v47 = vsel %vm424_vm0, %v9683_v41, %v5856_v40  ;;  %v5766_v0 = vpop.f32.mrb[98].mxu0 }
 0x641   : > { %v8996_v37 = vsel %vm424_vm0, %v9684_v17, %v5862_v54  ;;  %v9000_v20 = vsel %vm424_vm0, %v9685_v22, %v5861_v53  ;;  %v5973_v42 = vpack.i.bf16 %v5766_v0, %v5765_v60  ;;  %v3898_v16 = vpop.f32.mrb[99].mxu0  ;;  %v9690_v54 = vld [vmem:[#allocation28_spill] sm:$0xff]  ;;  %v9692_v0 = vld [vmem:[#allocation29_spill] sm:$0xff]  ;;  %v9693_v22 = vld [vmem:[#allocation27_spill] sm:$0xff] }
 0x642   : > { %v5978_v55 = vpack.i.bf16 %v3898_v16, %v3895_v4  ;;  %v9691_v4 = vld [vmem:[#allocation26_spill] sm:$0xff] }
 0x643   : > { %5974 = vrot.lane.b32.xlu1 %v5973_v42, %s6614_s6 }
 0x644   : > { %5979 = vrot.lane.b32.xlu0 %v5978_v55, %s6614_s6 }
 0x646   : > { %v5769_v39 = vpop.f32.mrb[100].mxu0 }
 0x647   : > { %v3911_v46 = vpop.f32.mrb[101].mxu0 }
 0x648   : > { %v5770_v23 = vpop.f32.mrb[102].mxu0 }
 0x649   : > { %v5983_v10 = vpack.i.bf16 %v5770_v23, %v5769_v39  ;;  %v3914_v7 = vpop.f32.mrb[103].mxu0 }
 0x64a   : > { %v5988_v6 = vpack.i.bf16 %v3914_v7, %v3911_v46 }
 0x64b   : > { %5984 = vrot.lane.b32.xlu1 %v5983_v10, %s6614_s6 }
 0x64c   : > { %5989 = vrot.lane.b32.xlu0 %v5988_v6, %s6614_s6 }
 0x64d   : > { %v5865_v2 = vpop.permute.xlu1 %5864 }
 0x64e   : > { %v5867_v30 = vunpack.i.h.bf16 %v5865_v2  ;;  %v5866_v25 = vunpack.i.l.bf16 %v5865_v2  ;;  %v5773_v34 = vpop.f32.mrb[104].mxu0  ;;  %v5870_v33 = vpop.permute.xlu0 %5869 }
 0x64f   : > { %v5872_v35 = vunpack.i.h.bf16 %v5870_v33  ;;  %v5871_v11 = vunpack.i.l.bf16 %v5870_v33  ;;  %v3927_v26 = vpop.f32.mrb[105].mxu0 }
 0x650   : > { %v9008_v32 = vsel %vm424_vm0, %v9686_v28, %v5867_v30  ;;  %v9012_v58 = vsel %vm424_vm0, %v9687_v50, %v5866_v25  ;;  %v5774_v3 = vpop.f32.mrb[106].mxu0  ;;  %v9694_v30 = vld [vmem:[#allocation32_spill] sm:$0xff] }
 0x651   : > { %v9016_v21 = vsel %vm424_vm0, %v9688_v48, %v5872_v35  ;;  %v9020_v62 = vsel %vm424_vm0, %v9689_v1, %v5871_v11  ;;  %v5993_v14 = vpack.i.bf16 %v5774_v3, %v5773_v34  ;;  %v3930_v51 = vpop.f32.mrb[107].mxu0  ;;  %v9695_v34 = vld [vmem:[#allocation30_spill] sm:$0xff]  ;;  %v9696_v35 = vld [vmem:[#allocation33_spill] sm:$0xff] }
 0x652   : > { %v5998_v38 = vpack.i.bf16 %v3930_v51, %v3927_v26  ;;  %v9697_v26 = vld [vmem:[#allocation31_spill] sm:$0xff] }
 0x653   : > { %5994 = vrot.lane.b32.xlu1 %v5993_v14, %s6614_s6 }
 0x654   : > { %5999 = vrot.lane.b32.xlu0 %v5998_v38, %s6614_s6 }
 0x655   : > { %v5875_v57 = vpop.permute.xlu1 %5874 }
 0x656   : > { %v5877_v63 = vunpack.i.h.bf16 %v5875_v57  ;;  %v5876_v8 = vunpack.i.l.bf16 %v5875_v57  ;;  %v5777_v15 = vpop.f32.mrb[108].mxu0  ;;  %v5880_v27 = vpop.permute.xlu0 %5879 }
 0x657   : > { %v5882_v40 = vunpack.i.h.bf16 %v5880_v27  ;;  %v5881_v60 = vunpack.i.l.bf16 %v5880_v27  ;;  %v3943_v56 = vpop.f32.mrb[109].mxu0 }
 0x658   : > { %v9026_v53 = vsel %vm424_vm0, %v9690_v54, %v5877_v63  ;;  %v9030_v19 = vsel %vm424_vm0, %v9691_v4, %v5876_v8  ;;  %v5778_v41 = vpop.f32.mrb[110].mxu0 }
 0x659   : > { %v9034_v17 = vsel %vm424_vm0, %v9692_v0, %v5882_v40  ;;  %v9038_v42 = vsel %vm424_vm0, %v9693_v22, %v5881_v60  ;;  %v6003_v16 = vpack.i.bf16 %v5778_v41, %v5777_v15  ;;  %v3946_v55 = vpop.f32.mrb[111].mxu0 }
 0x65a   : > { %v6008_v39 = vpack.i.bf16 %v3946_v55, %v3943_v56 }
 0x65b   : > { %6004 = vrot.lane.b32.xlu1 %v6003_v16, %s6614_s6 }
 0x65c   : > { %6009 = vrot.lane.b32.xlu0 %v6008_v39, %s6614_s6 }
 0x65d   : > { %v5885_v46 = vpop.permute.xlu1 %5884 }
 0x65e   : > { %v5887_v23 = vunpack.i.h.bf16 %v5885_v46  ;;  %v5886_v10 = vunpack.i.l.bf16 %v5885_v46  ;;  %v5890_v7 = vpop.permute.xlu0 %5889 }
 0x65f   : > { %v5892_v6 = vunpack.i.h.bf16 %v5890_v7  ;;  %v5891_v2 = vunpack.i.l.bf16 %v5890_v7 }
 0x660   : > { %v9044_v25 = vsel %vm424_vm0, %v9694_v30, %v5887_v23  ;;  %v9048_v33 = vsel %vm424_vm0, %v9695_v34, %v5886_v10 }
 0x661   : > { %v9052_v11 = vsel %vm424_vm0, %v9696_v35, %v5892_v6  ;;  %v9056_v28 = vsel %vm424_vm0, %v9697_v26, %v5891_v2 }
 0x665   : > { %v5895_v0 = vpop.permute.xlu1 %5894 }
 0x666   : > { %v5781_v50 = vpop.f32.mrb[112].mxu0  ;;  %v5900_v16 = vpop.permute.xlu0 %5899 }
 0x667   : > { %v3959_v3 = vpop.f32.mrb[113].mxu0 }
 0x668   : > { %v5782_v48 = vpop.f32.mrb[114].mxu0 }
 0x669   : > { %v6013_v1 = vpack.i.bf16 %v5782_v48, %v5781_v50  ;;  %v3962_v14 = vpop.f32.mrb[115].mxu0 }
 0x66a   : > { %v6018_v51 = vpack.i.bf16 %v3962_v14, %v3959_v3 }
 0x66b   : > { %6014 = vrot.lane.b32.xlu1 %v6013_v1, %s6614_s6 }
 0x66c   : > { %6019 = vrot.lane.b32.xlu0 %v6018_v51, %s6614_s6 }
 0x66d   : > { %v9064_v10 = vpop.permute.xlu1 %5904 }
 0x66e   : > { %v9066_v6 = vpop.permute.xlu0 %5909 }
 0x672   : > { %v5785_v38 = vpop.f32.mrb[116].mxu0 }
 0x673   : > { %v3975_v57 = vpop.f32.mrb[117].mxu0 }
 0x674   : > { %v5786_v63 = vpop.f32.mrb[118].mxu0 }
 0x675   : > { %v6023_v8 = vpack.i.bf16 %v5786_v63, %v5785_v38  ;;  %v3978_v15 = vpop.f32.mrb[119].mxu0  ;;  %v9070_v2 = vpop.permute.xlu1 %5914 }
 0x676   : > { %v6028_v27 = vpack.i.bf16 %v3978_v15, %v3975_v57  ;;  %v9072_v30 = vpop.permute.xlu0 %5919 }
 0x677   : > { %6024 = vrot.lane.b32.xlu1 %v6023_v8, %s6614_s6 }
 0x678   : > { %6029 = vrot.lane.b32.xlu0 %v6028_v27, %s6614_s6 }
 0x67d   : > { %v9074_v34 = vpop.permute.xlu1 %5924 }
 0x67e   : > { %v9076_v35 = vpop.permute.xlu0 %5929 }
 0x682   : > { %v5789_v40 = vpop.f32.mrb[120].mxu0 }
 0x683   : > { %v3991_v60 = vpop.f32.mrb[121].mxu0 }
 0x684   : > { %v5790_v56 = vpop.f32.mrb[122].mxu0 }
 0x685   : > { %v6033_v54 = vpack.i.bf16 %v5790_v56, %v5789_v40  ;;  %v3994_v4 = vpop.f32.mrb[123].mxu0 }
 0x686   : > { %v6038_v41 = vpack.i.bf16 %v3994_v4, %v3991_v60 }
 0x687   : > { %6034 = vrot.lane.b32.xlu1 %v6033_v54, %s6614_s6 }
 0x688   : > { %6039 = vrot.lane.b32.xlu0 %v6038_v41, %s6614_s6 }
 0x689   : > { %v9078_v26 = vpop.permute.xlu1 %5934 }
 0x68a   : > { %v9080_v50 = vpop.permute.xlu0 %5939 }
 0x68d   : > { %v5793_v22 = vpop.f32.mrb[124].mxu0 }
 0x68e   : > { %v4007_v55 = vpop.f32.mrb[125].mxu0 }
 0x68f   : > { %v5794_v39 = vpop.f32.mrb[126].mxu0 }
 0x690   : > { %v6048_v46 = vpack.i.bf16 %v5794_v39, %v5793_v22  ;;  %v4010_v23 = vpop.f32.mrb[127].mxu0  ;;  %v5816_v39 = vunpack.i.l.bf16 %v8944_v61 }
 0x691   : > { %v6043_v7 = vpack.i.bf16 %v4010_v23, %v4007_v55  ;;  %v5902_v23 = vunpack.i.h.bf16 %v5900_v16 }
 0x692   : > { %6049 = vrot.lane.b32.xlu1 %v6048_v46, %s6614_s6  ;;  %v5897_v46 = vunpack.i.h.bf16 %v5895_v0 }
 0x693   : > { %6044 = vrot.lane.b32.xlu0 %v6043_v7, %s6614_s6  ;;  %v5901_v7 = vunpack.i.l.bf16 %v5900_v16  ;;  %v4439_v16 = vsel %vm669_vm1, %v8916_v52, %v5902_v23  ;;  %v5906_v52 = vunpack.i.l.bf16 %v9064_v10  ;;  %v5911_v23 = vunpack.i.l.bf16 %v9066_v6 }
 0x699   : > { %v9082_v3 = vpop.permute.xlu1 %5944 }
 0x69a   : > { %v9084_v48 = vpop.permute.xlu0 %5949 }
 0x6a5   : > { %v5955_v1 = vpop.permute.xlu1 %5954 }
 0x6a6   : > { %v5957_v14 = vunpack.i.h.bf16 %v5955_v1  ;;  %v5956_v51 = vunpack.i.l.bf16 %v5955_v1  ;;  %v5960_v38 = vpop.permute.xlu0 %5959  ;;  %v9698_v1 = vld [vmem:[#allocation4_spill] sm:$0xff] }
 0x6a7   : > { %v5962_v57 = vunpack.i.h.bf16 %v5960_v38  ;;  %v5961_v63 = vunpack.i.l.bf16 %v5960_v38 }
 0x6a8   : > { %v9088_v8 = vsel %vm669_vm1, %v9026_v53, %v5957_v14  ;;  %v9092_v15 = vsel %vm669_vm1, %v9030_v19, %v5956_v51  ;;  %v9699_v51 = vld [vmem:[#allocation2_spill] sm:$0xff] }
 0x6a9   : > { %v9096_v27 = vsel %vm669_vm1, %v9038_v42, %v5961_v63  ;;  %v9100_v40 = vsel %vm669_vm1, %v9034_v17, %v5962_v57  ;;  %v5817_v42 = vunpack.i.h.bf16 %v8944_v61 }
 0x6ad   : > { %v5965_v60 = vpop.permute.xlu1 %5964 }
 0x6ae   : > { %v5967_v56 = vunpack.i.h.bf16 %v5965_v60  ;;  %v5966_v54 = vunpack.i.l.bf16 %v5965_v60  ;;  %v5970_v4 = vpop.permute.xlu0 %5969 }
 0x6af   : > { %v5972_v41 = vunpack.i.h.bf16 %v5970_v4  ;;  %v5971_v22 = vunpack.i.l.bf16 %v5970_v4 }
 0x6b0   : > { %v9104_v53 = vsel %vm669_vm1, %v9044_v25, %v5967_v56  ;;  %v9108_v19 = vsel %vm669_vm1, %v9048_v33, %v5966_v54  ;;  %v5896_v25 = vunpack.i.l.bf16 %v5895_v0  ;;  %v4409_v33 = vsel %vm424_vm0, %v9698_v1, %v5817_v42 }
 0x6b1   : > { %v9113_v17 = vsel %vm669_vm1, %v9056_v28, %v5971_v22  ;;  %v9117_v55 = vsel %vm669_vm1, %v9052_v11, %v5972_v41  ;;  %v4408_v28 = vsel %vm424_vm0, %v9699_v51, %v5816_v39  ;;  %v4441_v61 = vsel %vm669_vm1, %v4409_v33, %v5897_v46 }
 0x6b2   : > { %v4440_v63 = vsel %vm669_vm1, %v4408_v28, %v5896_v25  ;;  %v4438_v56 = vsel %vm669_vm1, %v8920_v43, %v5901_v7  ;;  %v5907_v1 = vunpack.i.h.bf16 %v9064_v10  ;;  %v5912_v43 = vunpack.i.h.bf16 %v9066_v6 }
 0x6b3   : > { %v4444_v10 = vsel %vm669_vm1, %v8931_v49, %v5906_v52 }
 0x6b4   : > { %v4445_v28 = vsel %vm669_vm1, %v8927_v59, %v5907_v1  ;;  %v4443_v6 = vsel %vm669_vm1, %v8936_v36, %v5912_v43  ;;  %v5916_v36 = vunpack.i.l.bf16 %v9070_v2 }
 0x6b5   : > { %v5975_v14 = vpop.permute.xlu1 %5974 }
 0x6b6   : > { %v5977_v38 = vunpack.i.h.bf16 %v5975_v14  ;;  %v5976_v57 = vunpack.i.l.bf16 %v5975_v14  ;;  %v5980_v11 = vpop.permute.xlu0 %5979 }
 0x6b7   : > { %v5982_v60 = vunpack.i.h.bf16 %v5980_v11  ;;  %v5981_v0 = vunpack.i.l.bf16 %v5980_v11  ;;  %v4442_v11 = vsel %vm669_vm1, %v8940_v29, %v5911_v23  ;;  %v5922_v29 = vunpack.i.h.bf16 %v9072_v30 }
 0x6b8   : > { %v4473_v54 = vsel %vm4470_vm2, %v4440_v63, %v5976_v57  ;;  %v4474_v4 = vsel %vm4470_vm2, %v4441_v61, %v5977_v38 }
 0x6b9   : > { %v5038_v41 = vpack.c.bf16 %v4473_v54, %v4473_v54  ;;  %v5039_v22 = vpack.c.bf16 %v4474_v4, %v4474_v4  ;;  %v4471_v42 = vsel %vm4470_vm2, %v4438_v56, %v5981_v0  ;;  %v4472_v39 = vsel %vm4470_vm2, %v4439_v16, %v5982_v60 }
 0x6ba   : > { %v5036_v46 = vpack.c.bf16 %v4471_v42, %v4471_v42  ;;  %v5037_v25 = vpack.c.bf16 %v4472_v39, %v4472_v39  ;;  %v5917_v54 = vunpack.i.h.bf16 %v9070_v2  ;;  %v5921_v4 = vunpack.i.l.bf16 %v9072_v30 }
 0x6bb   : > { %4634 = vst.msk [vmem:[%s9131_s9 + $0x8] sm:$0xf] %vm4631_vm3, %v5038_v41  ;;  %4635 = vst.msk [vmem:[%s9131_s9 + $0xc] sm:$0xf] %vm4631_vm3, %v5039_v22  ;;  %v4448_v2 = vsel %vm669_vm1, %v8952_v31, %v5916_v36  ;;  %v4447_v52 = vsel %vm669_vm1, %v8956_v45, %v5922_v29  ;;  %v5932_v45 = vunpack.i.h.bf16 %v9076_v35  ;;  %v5942_v29 = vunpack.i.h.bf16 %v9080_v50 }
 0x6bc   : > { %4632 = vst.msk [vmem:[%s9131_s9] sm:$0xf] %vm4631_vm3, %v5036_v46  ;;  %4633 = vst.msk [vmem:[%s9131_s9 + $0x4] sm:$0xf] %vm4631_vm3, %v5037_v25  ;;  %v4449_v46 = vsel %vm669_vm1, %v8948_v44, %v5917_v54  ;;  %v4446_v30 = vsel %vm669_vm1, %v8960_v5, %v5921_v4  ;;  %v5926_v5 = vunpack.i.l.bf16 %v9074_v34  ;;  %v5941_v4 = vunpack.i.l.bf16 %v9080_v50 }
 0x6bd   : > { %v5985_v7 = vpop.permute.xlu1 %5984  ;;  %v4455_v50 = vsel %vm669_vm1, %v8996_v37, %v5942_v29  ;;  %v5947_v37 = vunpack.i.h.bf16 %v9082_v3 }
 0x6be   : > { %v5987_v33 = vunpack.i.h.bf16 %v5985_v7  ;;  %v5986_v14 = vunpack.i.l.bf16 %v5985_v7  ;;  %v5990_v51 = vpop.permute.xlu0 %5989 }
 0x6bf   : > { %v5992_v38 = vunpack.i.h.bf16 %v5990_v51  ;;  %v5991_v57 = vunpack.i.l.bf16 %v5990_v51 }
 0x6c0   : > { %v4478_v63 = vsel %vm4470_vm2, %v4445_v28, %v5987_v33  ;;  %v4477_v61 = vsel %vm4470_vm2, %v4444_v10, %v5986_v14  ;;  %v5927_v28 = vunpack.i.h.bf16 %v9074_v34  ;;  %v5931_v10 = vunpack.i.l.bf16 %v9076_v35 }
 0x6c1   : > { %v5043_v59 = vpack.c.bf16 %v4478_v63, %v4478_v63  ;;  %v5042_v60 = vpack.c.bf16 %v4477_v61, %v4477_v61  ;;  %v4475_v0 = vsel %vm4470_vm2, %v4442_v11, %v5991_v57  ;;  %v4476_v49 = vsel %vm4470_vm2, %v4443_v6, %v5992_v38 }
 0x6c2   : > { %v5040_v16 = vpack.c.bf16 %v4475_v0, %v4475_v0  ;;  %v5041_v56 = vpack.c.bf16 %v4476_v49, %v4476_v49  ;;  %v4453_v34 = vsel %vm669_vm1, %v8968_v13, %v5927_v28  ;;  %v4452_v63 = vsel %vm669_vm1, %v8972_v24, %v5926_v5 }
 0x6c3   : > { %4639 = vst.msk [vmem:[%s9131_s9 + $0x1c] sm:$0xf] %vm4631_vm3, %v5043_v59  ;;  %4638 = vst.msk [vmem:[%s9131_s9 + $0x18] sm:$0xf] %vm4631_vm3, %v5042_v60  ;;  %v4450_v59 = vsel %vm669_vm1, %v8980_v9, %v5931_v10  ;;  %v4451_v60 = vsel %vm669_vm1, %v8976_v12, %v5932_v45  ;;  %v5937_v12 = vunpack.i.h.bf16 %v9078_v26  ;;  %v5936_v9 = vunpack.i.l.bf16 %v9078_v26 }
 0x6c4   : > { %4636 = vst.msk [vmem:[%s9131_s9 + $0x10] sm:$0xf] %vm4631_vm3, %v5040_v16  ;;  %4637 = vst.msk [vmem:[%s9131_s9 + $0x14] sm:$0xf] %vm4631_vm3, %v5041_v56  ;;  %v4461_v45 = vsel %vm669_vm1, %v9008_v32, %v5947_v37 }
 0x6c5   : > { %v5995_v41 = vpop.permute.xlu1 %5994 }
 0x6c6   : > { %v5997_v22 = vunpack.i.h.bf16 %v5995_v41  ;;  %v5996_v42 = vunpack.i.l.bf16 %v5995_v41  ;;  %v6000_v39 = vpop.permute.xlu0 %5999 }
 0x6c7   : > { %v6002_v25 = vunpack.i.h.bf16 %v6000_v39  ;;  %v6001_v1 = vunpack.i.l.bf16 %v6000_v39 }
 0x6c8   : > { %v4482_v43 = vsel %vm4470_vm2, %v4449_v46, %v5997_v22  ;;  %v4481_v23 = vsel %vm4470_vm2, %v4448_v2, %v5996_v42  ;;  %v4457_v46 = vsel %vm669_vm1, %v8988_v18, %v5937_v12  ;;  %v4456_v2 = vsel %vm669_vm1, %v8992_v47, %v5936_v9 }
 0x6c9   : > { %v5047_v44 = vpack.c.bf16 %v4482_v43, %v4482_v43  ;;  %v5046_v7 = vpack.c.bf16 %v4481_v23, %v4481_v23  ;;  %v4479_v33 = vsel %vm4470_vm2, %v4446_v30, %v6001_v1  ;;  %v4480_v31 = vsel %vm4470_vm2, %v4447_v52, %v6002_v25 }
 0x6ca   : > { %v5044_v14 = vpack.c.bf16 %v4479_v33, %v4479_v33  ;;  %v5045_v51 = vpack.c.bf16 %v4480_v31, %v4480_v31  ;;  %v4454_v1 = vsel %vm669_vm1, %v9000_v20, %v5941_v4  ;;  %v5946_v20 = vunpack.i.l.bf16 %v9082_v3 }
 0x6cb   : > { %4643 = vst.msk [vmem:[%s9131_s9 + $0x2c] sm:$0xf] %vm4631_vm3, %v5047_v44  ;;  %4642 = vst.msk [vmem:[%s9131_s9 + $0x28] sm:$0xf] %vm4631_vm3, %v5046_v7  ;;  %v5952_v33 = vunpack.i.h.bf16 %v9084_v48  ;;  %v5951_v31 = vunpack.i.l.bf16 %v9084_v48 }
 0x6cc   : > { %4640 = vst.msk [vmem:[%s9131_s9 + $0x20] sm:$0xf] %vm4631_vm3, %v5044_v14  ;;  %4641 = vst.msk [vmem:[%s9131_s9 + $0x24] sm:$0xf] %vm4631_vm3, %v5045_v51  ;;  %v4460_v10 = vsel %vm669_vm1, %v9012_v58, %v5946_v20 }
 0x6cd   : > { %v6005_v38 = vpop.permute.xlu1 %6004  ;;  %v4459_v48 = vsel %vm669_vm1, %v9016_v21, %v5952_v33 }
 0x6ce   : > { %v6007_v57 = vunpack.i.h.bf16 %v6005_v38  ;;  %v6006_v6 = vunpack.i.l.bf16 %v6005_v38  ;;  %v6010_v11 = vpop.permute.xlu0 %6009 }
 0x6cf   : > { %v6012_v61 = vunpack.i.h.bf16 %v6010_v11  ;;  %v6011_v35 = vunpack.i.l.bf16 %v6010_v11 }
 0x6d0   : > { %v4486_v0 = vsel %vm4470_vm2, %v4453_v34, %v6007_v57  ;;  %v4485_v49 = vsel %vm4470_vm2, %v4452_v63, %v6006_v6  ;;  %v4458_v57 = vsel %vm669_vm1, %v9020_v62, %v5951_v31 }
 0x6d1   : > { %v5051_v16 = vpack.c.bf16 %v4486_v0, %v4486_v0  ;;  %v5050_v56 = vpack.c.bf16 %v4485_v49, %v4485_v49  ;;  %v4483_v13 = vsel %vm4470_vm2, %v4450_v59, %v6011_v35  ;;  %v4484_v54 = vsel %vm4470_vm2, %v4451_v60, %v6012_v61 }
 0x6d2   : > { %v5048_v24 = vpack.c.bf16 %v4483_v13, %v4483_v13  ;;  %v5049_v36 = vpack.c.bf16 %v4484_v54, %v4484_v54 }
 0x6d3   : > { %4647 = vst.msk [vmem:[%s9131_s9 + $0x3c] sm:$0xf] %vm4631_vm3, %v5051_v16  ;;  %4646 = vst.msk [vmem:[%s9131_s9 + $0x38] sm:$0xf] %vm4631_vm3, %v5050_v56 }
 0x6d4   : > { %4644 = vst.msk [vmem:[%s9131_s9 + $0x30] sm:$0xf] %vm4631_vm3, %v5048_v24  ;;  %4645 = vst.msk [vmem:[%s9131_s9 + $0x34] sm:$0xf] %vm4631_vm3, %v5049_v36 }
 0x6dd   : > { %v6015_v41 = vpop.permute.xlu1 %6014 }
 0x6de   : > { %v6017_v22 = vunpack.i.h.bf16 %v6015_v41  ;;  %v6016_v42 = vunpack.i.l.bf16 %v6015_v41  ;;  %v6020_v39 = vpop.permute.xlu0 %6019 }
 0x6df   : > { %v6022_v25 = vunpack.i.h.bf16 %v6020_v39  ;;  %v6021_v26 = vunpack.i.l.bf16 %v6020_v39 }
 0x6e0   : > { %v4490_v30 = vsel %vm4470_vm2, %v4457_v46, %v6017_v22  ;;  %v4489_v52 = vsel %vm4470_vm2, %v4456_v2, %v6016_v42 }
 0x6e1   : > { %v5055_v43 = vpack.c.bf16 %v4490_v30, %v4490_v30  ;;  %v5054_v23 = vpack.c.bf16 %v4489_v52, %v4489_v52  ;;  %v4487_v18 = vsel %vm4470_vm2, %v4454_v1, %v6021_v26  ;;  %v4488_v44 = vsel %vm4470_vm2, %v4455_v50, %v6022_v25 }
 0x6e2   : > { %v5052_v47 = vpack.c.bf16 %v4487_v18, %v4487_v18  ;;  %v5053_v7 = vpack.c.bf16 %v4488_v44, %v4488_v44 }
 0x6e3   : > { %4651 = vst.msk [vmem:[%s9131_s9 + $0x4c] sm:$0xf] %vm4631_vm3, %v5055_v43  ;;  %4650 = vst.msk [vmem:[%s9131_s9 + $0x48] sm:$0xf] %vm4631_vm3, %v5054_v23 }
 0x6e4   : > { %4648 = vst.msk [vmem:[%s9131_s9 + $0x40] sm:$0xf] %vm4631_vm3, %v5052_v47  ;;  %4649 = vst.msk [vmem:[%s9131_s9 + $0x44] sm:$0xf] %vm4631_vm3, %v5053_v7 }
 0x6e9   : > { %v6025_v14 = vpop.permute.xlu1 %6024 }
 0x6ea   : > { %v6027_v51 = vunpack.i.h.bf16 %v6025_v14  ;;  %v6026_v28 = vunpack.i.l.bf16 %v6025_v14  ;;  %v6030_v5 = vpop.permute.xlu0 %6029 }
 0x6eb   : > { %v6032_v38 = vunpack.i.h.bf16 %v6030_v5  ;;  %v6031_v3 = vunpack.i.l.bf16 %v6030_v5 }
 0x6ec   : > { %v4494_v6 = vsel %vm4470_vm2, %v4461_v45, %v6027_v51  ;;  %v4493_v11 = vsel %vm4470_vm2, %v4460_v10, %v6026_v28 }
 0x6ed   : > { %v5059_v34 = vpack.c.bf16 %v4494_v6, %v4494_v6  ;;  %v5058_v63 = vpack.c.bf16 %v4493_v11, %v4493_v11  ;;  %v4491_v32 = vsel %vm4470_vm2, %v4458_v57, %v6031_v3  ;;  %v4492_v61 = vsel %vm4470_vm2, %v4459_v48, %v6032_v38 }
 0x6ee   : > { %v5056_v58 = vpack.c.bf16 %v4491_v32, %v4491_v32  ;;  %v5057_v35 = vpack.c.bf16 %v4492_v61, %v4492_v61 }
 0x6ef   : > { %4655 = vst.msk [vmem:[%s9131_s9 + $0x5c] sm:$0xf] %vm4631_vm3, %v5059_v34  ;;  %4654 = vst.msk [vmem:[%s9131_s9 + $0x58] sm:$0xf] %vm4631_vm3, %v5058_v63 }
 0x6f0   : > { %4652 = vst.msk [vmem:[%s9131_s9 + $0x50] sm:$0xf] %vm4631_vm3, %v5056_v58  ;;  %4653 = vst.msk [vmem:[%s9131_s9 + $0x54] sm:$0xf] %vm4631_vm3, %v5057_v35 }
 0x6f9   : > { %v6035_v21 = vpop.permute.xlu1 %6034 }
 0x6fa   : > { %v6037_v62 = vunpack.i.h.bf16 %v6035_v21  ;;  %v6036_v59 = vunpack.i.l.bf16 %v6035_v21  ;;  %v6040_v60 = vpop.permute.xlu0 %6039 }
 0x6fb   : > { %v6042_v0 = vunpack.i.h.bf16 %v6040_v60  ;;  %v6041_v49 = vunpack.i.l.bf16 %v6040_v60 }
 0x6fc   : > { %v4498_v16 = vsel %vm4470_vm2, %v9088_v8, %v6037_v62  ;;  %v4497_v56 = vsel %vm4470_vm2, %v9092_v15, %v6036_v59 }
 0x6fd   : > { %v5063_v13 = vpack.c.bf16 %v4498_v16, %v4498_v16  ;;  %v5062_v54 = vpack.c.bf16 %v4497_v56, %v4497_v56  ;;  %v4495_v24 = vsel %vm4470_vm2, %v9096_v27, %v6041_v49  ;;  %v4496_v36 = vsel %vm4470_vm2, %v9100_v40, %v6042_v0 }
 0x6fe   : > { %v5060_v12 = vpack.c.bf16 %v4495_v24, %v4495_v24  ;;  %v5061_v9 = vpack.c.bf16 %v4496_v36, %v4496_v36 }
 0x6ff   : > { %4659 = vst.msk [vmem:[%s9131_s9 + $0x6c] sm:$0xf] %vm4631_vm3, %v5063_v13  ;;  %4658 = vst.msk [vmem:[%s9131_s9 + $0x68] sm:$0xf] %vm4631_vm3, %v5062_v54 }
 0x700   : > { %4656 = vst.msk [vmem:[%s9131_s9 + $0x60] sm:$0xf] %vm4631_vm3, %v5060_v12  ;;  %4657 = vst.msk [vmem:[%s9131_s9 + $0x64] sm:$0xf] %vm4631_vm3, %v5061_v9 }
 0x704   : > { %v6050_v8 = vpop.permute.xlu1 %6049 }
 0x705   : > { %v6052_v15 = vunpack.i.h.bf16 %v6050_v8  ;;  %v6051_v27 = vunpack.i.l.bf16 %v6050_v8  ;;  %v6045_v29 = vpop.permute.xlu0 %6044 }
 0x706   : > { %v6047_v4 = vunpack.i.h.bf16 %v6045_v29  ;;  %v6046_v40 = vunpack.i.l.bf16 %v6045_v29 }
 0x707   : > { %v4502_v41 = vsel %vm4470_vm2, %v9104_v53, %v6052_v15  ;;  %v4501_v22 = vsel %vm4470_vm2, %v9108_v19, %v6051_v27 }
 0x708   : > { %v5067_v42 = vpack.c.bf16 %v4502_v41, %v4502_v41  ;;  %v5066_v39 = vpack.c.bf16 %v4501_v22, %v4501_v22  ;;  %v4499_v46 = vsel %vm4470_vm2, %v9113_v17, %v6046_v40  ;;  %v4500_v2 = vsel %vm4470_vm2, %v9117_v55, %v6047_v4 }
 0x709   : > { %v5064_v25 = vpack.c.bf16 %v4499_v46, %v4499_v46  ;;  %v5065_v26 = vpack.c.bf16 %v4500_v2, %v4500_v2 }
 0x70a   : > { %4663 = vst.msk [vmem:[%s9131_s9 + $0x7c] sm:$0xf] %vm4631_vm3, %v5067_v42  ;;  %4662 = vst.msk [vmem:[%s9131_s9 + $0x78] sm:$0xf] %vm4631_vm3, %v5066_v39 }
 0x70b   : > { %4660 = vst.msk [vmem:[%s9131_s9 + $0x70] sm:$0xf] %vm4631_vm3, %v5064_v25  ;;  %4661 = vst.msk [vmem:[%s9131_s9 + $0x74] sm:$0xf] %vm4631_vm3, %v5065_v26 }
 0x70c PF: > { %s14_s15 = sadd.s32 1, %s6607_s15  }
 0x70d   : > { %p11_p4 = scmp.ge.s32.totalorder %s14_s15, 4  }
 0x70f   :  { %13 = sbr.rel (!%p11_p4) target bundleno = 1 (0x1), region = 75 }

// kernel: basic_trans_decoder_block.7
= control target key start
LH: loop header
LB: loop body
LE: loop exit
PB: predicated region body
PF: predicated region fallthrough
CT: control target
= control target key end

     0   :  { %v2799_v1 = vmov 0   ;;  %vm841_vm0 = vcmask 261120   ;;  %s4124_s0 = inlined_call_operand.vmem [shape: bf16[512,288], index: 0, kind: input, shape index: {}]   ;;  %s4125_s1 = inlined_call_operand.vmem [shape: bf16[288,32], index: 1, kind: input, shape index: {}]   ;;  %s4126_s2 = inlined_call_operand.vmem [shape: f32[512,32], index: 2, kind: input, shape index: {}]   ;;  %s4127_s3 = inlined_call_operand.vmem [shape: f32[1,32], index: 3, kind: input, shape index: {}]   ;;  %s4128_s4 = inlined_call_operand.vmem [shape: f32[1,32], index: 4, kind: input, shape index: {}]   ;;  %s4129_s5 = inlined_call_operand.vmem [shape: bf16[32,32], index: 5, kind: input, shape index: {}]   ;;  %s4130_s6 = inlined_call_operand.hbm [shape: f32[512,32], index: 6, kind: output, shape index: {}]  }
   0x1   :  { %v2625_v0 = vld [vmem:[%s4125_s1] sm:$0xff]   ;;  %938 = vmatprep.subr.bf16.mxu0 %v2799_v1  ;;  %v2626_v2 = vld [vmem:[%s4125_s1 + $0x8] sm:$0xff]   ;;  %v2627_v3 = vld [vmem:[%s4125_s1 + $0x10] sm:$0xff]  }
   0x2   :  { %939 = vmatpush1.bf16.msra.mxu0 %v2625_v0  ;;  %v2628_v4 = vld [vmem:[%s4125_s1 + $0x18] sm:$0xff]   ;;  %v2629_v5 = vld [vmem:[%s4125_s1 + $0x20] sm:$0xff]   ;;  %v2642_v7 = vld [vmem:[%s4125_s1 + $0x88] sm:$0xff]  }
   0x3   :  { %940 = vmatprep.subr.bf16.mxu0 %v2799_v1  ;;  %v2640_v6 = vld [vmem:[%s4125_s1 + $0x80] sm:$0xff]   ;;  %v2630_v8 = vld [vmem:[%s4125_s1 + $0x28] sm:$0xff]   ;;  %v2631_v12 = vld [vmem:[%s4125_s1 + $0x30] sm:$0xff]  }
   0x4   :  { %2485 = vmatprep.subr.bf16.mxu1 %v2640_v6  ;;  %v2645_v9 = vld [vmem:[%s4124_s0 + $0x4] ss:$12 sps:$4 sm:$0xff]   ;;  %v2646_v10 = vld [vmem:[%s4124_s0 + $0x8] ss:$12 sps:$4 sm:$0xff]   ;;  %v2647_v11 = vld [vmem:[%s4124_s0 + $0x20] ss:$12 sps:$4 sm:$0xff]  }
   0x5   :  { %2486 = vmatpush3.bf16.msra.mxu1 %v2640_v6  ;;  %970 = vmatprep.mubr.bf16.mxu0 %v2645_v9  ;;  %v2654_v13 = vld [vmem:[%s4124_s0 + $0x38] ss:$12 sps:$4 sm:$0xff]   ;;  %v2655_v16 = vld [vmem:[%s4124_s0 + $0x50] ss:$12 sps:$4 sm:$0xff]   ;;  %v2662_v17 = vld [vmem:[%s4124_s0 + $0x68] ss:$12 sps:$4 sm:$0xff]  }
   0x6   :  { %941 = vmatpush1.bf16.msra.mxu0 %v2626_v2  ;;  %2487 = vmatprep.subr.bf16.mxu1 %v2642_v7  ;;  %v2632_v14 = vld [vmem:[%s4125_s1 + $0x38] sm:$0xff]   ;;  %v2633_v15 = vld [vmem:[%s4125_s1 + $0x40] sm:$0xff]   ;;  %v2634_v18 = vld [vmem:[%s4125_s1 + $0x48] sm:$0xff]  }
   0x7   :  { %942 = vmatprep.subr.bf16.mxu0 %v2799_v1  ;;  %2489 = vmatprep.mubr.msk.bf16.mxu1 %vm841_vm0, %v2646_v10  ;;  %v2635_v19 = vld [vmem:[%s4125_s1 + $0x50] sm:$0xff]   ;;  %v2663_v20 = vld [vmem:[%s4124_s0 + $0x80] ss:$12 sps:$4 sm:$0xff]   ;;  %v2670_v21 = vld [vmem:[%s4124_s0 + $0x98] ss:$12 sps:$4 sm:$0xff]  }
   0x8   :  { %v2636_v22 = vld [vmem:[%s4125_s1 + $0x58] sm:$0xff]   ;;  %v2637_v23 = vld [vmem:[%s4125_s1 + $0x60] sm:$0xff]   ;;  %v2678_v25 = vld [vmem:[%s4124_s0 + $0xc8] ss:$12 sps:$4 sm:$0xff]  }
   0x9   :  { %2488 = vmatpush3.bf16.msra.mxu1 %v2642_v7  ;;  %v2671_v24 = vld [vmem:[%s4124_s0 + $0xb0] ss:$12 sps:$4 sm:$0xff]   ;;  %v2638_v26 = vld [vmem:[%s4125_s1 + $0x68] sm:$0xff]   ;;  %v2686_v29 = vld [vmem:[%s4124_s0 + $0xf8] ss:$12 sps:$4 sm:$0xff]  }
   0xa   :  { %943 = vmatpush1.bf16.msra.mxu0 %v2627_v3  ;;  %v2639_v27 = vld [vmem:[%s4125_s1 + $0x70] sm:$0xff]   ;;  %v2679_v28 = vld [vmem:[%s4124_s0 + $0xe0] ss:$12 sps:$4 sm:$0xff]   ;;  %v2641_v30 = vld [vmem:[%s4125_s1 + $0x78] sm:$0xff]  }
   0xb   :  { %944 = vmatprep.subr.bf16.mxu0 %v2799_v1  ;;  %v2643_v31 = vld [vmem:[%s4124_s0] ss:$12 sps:$4 sm:$0xff]   ;;  %v2687_v32 = vld [vmem:[%s4124_s0 + $0x110] ss:$12 sps:$4 sm:$0xff]   ;;  %v2694_v34 = vld [vmem:[%s4124_s0 + $0x128] ss:$12 sps:$4 sm:$0xff]  }
   0xc   :  { %2490 = vmatmul.mubr.msk.bf16.vlgmr.msra.gmra.mrb[0].mxu1 %vm841_vm0, %v2647_v11  ;;  %v2648_v33 = vld [vmem:[%s4124_s0 + $0x1c] ss:$12 sps:$4 sm:$0xff]   ;;  %v2650_v35 = vld [vmem:[%s4124_s0 + $0x18] ss:$12 sps:$4 sm:$0xff]   ;;  %v2695_v36 = vld [vmem:[%s4124_s0 + $0x140] ss:$12 sps:$4 sm:$0xff]  }
   0xd   :  { %2493 = vmatprep.mubr.msk.bf16.mxu1 %vm841_vm0, %v2654_v13  ;;  %v2651_v37 = vld [vmem:[%s4124_s0 + $0x34] ss:$12 sps:$4 sm:$0xff]   ;;  %v2702_v38 = vld [vmem:[%s4124_s0 + $0x158] ss:$12 sps:$4 sm:$0xff]   ;;  %v2653_v39 = vld [vmem:[%s4124_s0 + $0x30] ss:$12 sps:$4 sm:$0xff]  }
   0xe   :  { %945 = vmatpush1.bf16.msra.mxu0 %v2628_v4  ;;  %v2703_v40 = vld [vmem:[%s4124_s0 + $0x170] ss:$12 sps:$4 sm:$0xff]   ;;  %v2656_v41 = vld [vmem:[%s4124_s0 + $0x4c] ss:$12 sps:$4 sm:$0xff]   ;;  %v2710_v42 = vld [vmem:[%s4124_s0 + $0x188] ss:$12 sps:$4 sm:$0xff]  }
   0xf   :  { %946 = vmatprep.subr.bf16.mxu0 %v2799_v1 }
  0x12   :  { %947 = vmatpush1.bf16.msra.mxu0 %v2629_v5 }
  0x13   :  { %948 = vmatprep.subr.bf16.mxu0 %v2799_v1 }
  0x14   :  { %2494 = vmatmul.mubr.msk.bf16.gmra.mrb[4].mxu1 %vm841_vm0, %v2655_v16 }
  0x15   :  { %2497 = vmatprep.mubr.msk.bf16.mxu1 %vm841_vm0, %v2662_v17 }
  0x16   :  { %949 = vmatpush1.bf16.msra.mxu0 %v2630_v8 }
  0x17   :  { %950 = vmatprep.subr.bf16.mxu0 %v2799_v1 }
  0x1a   :  { %951 = vmatpush1.bf16.msra.mxu0 %v2631_v12 }
  0x1b   :  { %952 = vmatprep.subr.bf16.mxu0 %v2799_v1 }
  0x1c   :  { %2498 = vmatmul.mubr.msk.bf16.gmra.mrb[8].mxu1 %vm841_vm0, %v2663_v20 }
  0x1d   :  { %2501 = vmatprep.mubr.msk.bf16.mxu1 %vm841_vm0, %v2670_v21 }
  0x1e   :  { %953 = vmatpush1.bf16.msra.mxu0 %v2632_v14 }
  0x1f   :  { %954 = vmatprep.subr.bf16.mxu0 %v2799_v1 }
  0x22   :  { %955 = vmatpush1.bf16.msra.mxu0 %v2633_v15 }
  0x23   :  { %956 = vmatprep.subr.bf16.mxu0 %v2799_v1 }
  0x24   :  { %2502 = vmatmul.mubr.msk.bf16.gmra.mrb[12].mxu1 %vm841_vm0, %v2671_v24 }
  0x25   :  { %2505 = vmatprep.mubr.msk.bf16.mxu1 %vm841_vm0, %v2678_v25 }
  0x26   :  { %957 = vmatpush1.bf16.msra.mxu0 %v2634_v18 }
  0x27   :  { %958 = vmatprep.subr.bf16.mxu0 %v2799_v1 }
  0x2a   :  { %959 = vmatpush1.bf16.msra.mxu0 %v2635_v19 }
  0x2b   :  { %960 = vmatprep.subr.bf16.mxu0 %v2799_v1 }
  0x2c   :  { %2506 = vmatmul.mubr.msk.bf16.gmra.mrb[16].mxu1 %vm841_vm0, %v2679_v28 }
  0x2d   :  { %2509 = vmatprep.mubr.msk.bf16.mxu1 %vm841_vm0, %v2686_v29 }
  0x2e   :  { %961 = vmatpush1.bf16.msra.mxu0 %v2636_v22 }
  0x2f   :  { %962 = vmatprep.subr.bf16.mxu0 %v2799_v1 }
  0x32   :  { %963 = vmatpush1.bf16.msra.mxu0 %v2637_v23 }
  0x33   :  { %964 = vmatprep.subr.bf16.mxu0 %v2799_v1 }
  0x34   :  { %2510 = vmatmul.mubr.msk.bf16.gmra.mrb[20].mxu1 %vm841_vm0, %v2687_v32 }
  0x35   :  { %2513 = vmatprep.mubr.msk.bf16.mxu1 %vm841_vm0, %v2694_v34 }
  0x36   :  { %965 = vmatpush1.bf16.msra.mxu0 %v2638_v26 }
  0x37   :  { %966 = vmatprep.subr.bf16.mxu0 %v2799_v1 }
  0x3a   :  { %967 = vmatpush1.bf16.msra.mxu0 %v2639_v27 }
  0x3b   :  { %968 = vmatprep.subr.bf16.mxu0 %v2799_v1 }
  0x3c   :  { %2514 = vmatmul.mubr.msk.bf16.gmra.mrb[24].mxu1 %vm841_vm0, %v2695_v36 }
  0x3d   :  { %2517 = vmatprep.mubr.msk.bf16.mxu1 %vm841_vm0, %v2702_v38 }
  0x3e   :  { %969 = vmatpush1.bf16.msra.mxu0 %v2641_v30 }
  0x41   :  { %971 = vmatmul.mubr.bf16.vlgmr.msra.gmra.mrb[0].mxu0 %v2643_v31 }
  0x42   :  { %978 = vmatprep.mubr.bf16.mxu0 %v2648_v33 }
  0x44   :  { %2518 = vmatmul.mubr.msk.bf16.gmra.mrb[28].mxu1 %vm841_vm0, %v2703_v40 }
  0x49   :  { %979 = vmatmul.mubr.bf16.gmra.mrb[4].mxu0 %v2650_v35 }
  0x4a   :  { %986 = vmatprep.mubr.bf16.mxu0 %v2651_v37 }
  0x51   :  { %987 = vmatmul.mubr.bf16.gmra.mrb[8].mxu0 %v2653_v39 }
  0x52   :  { %11 = vsyncpa [#allocation3], 0  ;;  %994 = vmatprep.mubr.bf16.mxu0 %v2656_v41  ;;  %2521 = vmatprep.mubr.msk.bf16.mxu1 %vm841_vm0, %v2710_v42  ;;  %v2658_v43 = vld [vmem:[%s4124_s0 + $0x48] ss:$12 sps:$4 sm:$0xff]   ;;  %v2711_v44 = vld [vmem:[%s4124_s0 + $0x1a0] ss:$12 sps:$4 sm:$0xff]  }
  0x53   :  { %v2659_v45 = vld [vmem:[%s4124_s0 + $0x64] ss:$12 sps:$4 sm:$0xff]   ;;  %2522 = vmatmul.mubr.msk.bf16.gmra.mrb[32].mxu1 %vm841_vm0, %v2711_v44  ;;  %v2661_v47 = vld [vmem:[%s4124_s0 + $0x60] ss:$12 sps:$4 sm:$0xff]   ;;  %v2664_v49 = vld [vmem:[%s4124_s0 + $0x7c] ss:$12 sps:$4 sm:$0xff]  }
  0x54   :  { %v2718_v46 = vld [vmem:[%s4124_s0 + $0x1b8] ss:$12 sps:$4 sm:$0xff]   ;;  %v2719_v48 = vld [vmem:[%s4124_s0 + $0x1d0] ss:$12 sps:$4 sm:$0xff]   ;;  %v2726_v50 = vld [vmem:[%s4124_s0 + $0x1e8] ss:$12 sps:$4 sm:$0xff]  }
  0x55   :  { %2525 = vmatprep.mubr.msk.bf16.mxu1 %vm841_vm0, %v2718_v46  ;;  %v2666_v51 = vld [vmem:[%s4124_s0 + $0x78] ss:$12 sps:$4 sm:$0xff]   ;;  %v2727_v52 = vld [vmem:[%s4124_s0 + $0x200] ss:$12 sps:$4 sm:$0xff]   ;;  %v2669_v54 = vld [vmem:[%s4124_s0 + $0x90] ss:$12 sps:$4 sm:$0xff]  }
  0x56   :  { %v2667_v53 = vld [vmem:[%s4124_s0 + $0x94] ss:$12 sps:$4 sm:$0xff]   ;;  %v2672_v55 = vld [vmem:[%s4124_s0 + $0xac] ss:$12 sps:$4 sm:$0xff]   ;;  %v2735_v57 = vld [vmem:[%s4124_s0 + $0x230] ss:$12 sps:$4 sm:$0xff]  }
  0x57   :  { %v2734_v56 = vld [vmem:[%s4124_s0 + $0x218] ss:$12 sps:$4 sm:$0xff]   ;;  %v2674_v58 = vld [vmem:[%s4124_s0 + $0xa8] ss:$12 sps:$4 sm:$0xff]   ;;  %v2677_v60 = vld [vmem:[%s4124_s0 + $0xc0] ss:$12 sps:$4 sm:$0xff]  }
  0x58   :  { %v2675_v59 = vld [vmem:[%s4124_s0 + $0xc4] ss:$12 sps:$4 sm:$0xff]   ;;  %v2680_v61 = vld [vmem:[%s4124_s0 + $0xdc] ss:$12 sps:$4 sm:$0xff]   ;;  %v2743_v63 = vld [vmem:[%s4124_s0 + $0x260] ss:$12 sps:$4 sm:$0xff]  }
  0x59   :  { %995 = vmatmul.mubr.bf16.gmra.mrb[12].mxu0 %v2658_v43  ;;  %v2742_v62 = vld [vmem:[%s4124_s0 + $0x248] ss:$12 sps:$4 sm:$0xff]   ;;  %v2682_v0 = vld [vmem:[%s4124_s0 + $0xd8] ss:$12 sps:$4 sm:$0xff]   ;;  %v2685_v2 = vld [vmem:[%s4124_s0 + $0xf0] ss:$12 sps:$4 sm:$0xff]  }
  0x5a   :  { %1002 = vmatprep.mubr.bf16.mxu0 %v2659_v45  ;;  %v2683_v1 = vld [vmem:[%s4124_s0 + $0xf4] ss:$12 sps:$4 sm:$0xff]   ;;  %v2688_v3 = vld [vmem:[%s4124_s0 + $0x10c] ss:$12 sps:$4 sm:$0xff]   ;;  %v2751_v5 = vld [vmem:[%s4124_s0 + $0x290] ss:$12 sps:$4 sm:$0xff]  }
  0x5b   :  { %2526 = vmatmul.mubr.msk.bf16.gmra.mrb[36].mxu1 %vm841_vm0, %v2719_v48  ;;  %v2750_v4 = vld [vmem:[%s4124_s0 + $0x278] ss:$12 sps:$4 sm:$0xff]   ;;  %v2690_v6 = vld [vmem:[%s4124_s0 + $0x108] ss:$12 sps:$4 sm:$0xff]   ;;  %v2756_v9 = vld [vmem:[%s4124_s0 + $0x2c0] ss:$12 sps:$4 sm:$0xff]  }
  0x5c   :  { %2529 = vmatprep.mubr.msk.bf16.mxu1 %vm841_vm0, %v2726_v50  ;;  %v2691_v7 = vld [vmem:[%s4124_s0 + $0x124] ss:$12 sps:$4 sm:$0xff]   ;;  %v2755_v8 = vld [vmem:[%s4124_s0 + $0x2a8] ss:$12 sps:$4 sm:$0xff]   ;;  %v2693_v10 = vld [vmem:[%s4124_s0 + $0x120] ss:$12 sps:$4 sm:$0xff]  }
  0x5d   :  { %v2696_v11 = vld [vmem:[%s4124_s0 + $0x13c] ss:$12 sps:$4 sm:$0xff]   ;;  %v2760_v12 = vld [vmem:[%s4124_s0 + $0x2d8] ss:$12 sps:$4 sm:$0xff]   ;;  %v2699_v17 = vld [vmem:[%s4124_s0 + $0x154] ss:$12 sps:$4 sm:$0xff]  }
  0x5e   :  { %v2761_v13 = vld [vmem:[%s4124_s0 + $0x2f0] ss:$12 sps:$4 sm:$0xff]   ;;  %v2762_v14 = vld [vmem:[%s4129_s5] sm:$0xff]   ;;  %v2763_v16 = vld [vmem:[%s4129_s5 + $0x8] sm:$0xff]  }
  0x5f   :  { %2553 = vmatprep.subr.bf16.mxu1 %v2762_v14  ;;  %v2698_v15 = vld [vmem:[%s4124_s0 + $0x138] ss:$12 sps:$4 sm:$0xff]   ;;  %v2701_v18 = vld [vmem:[%s4124_s0 + $0x150] ss:$12 sps:$4 sm:$0xff]   ;;  %v2706_v20 = vld [vmem:[%s4124_s0 + $0x168] ss:$12 sps:$4 sm:$0xff]  }
  0x60   :  { %2554 = vmatpush3.bf16.msra.mxu1 %v2762_v14  ;;  %v2704_v19 = vld [vmem:[%s4124_s0 + $0x16c] ss:$12 sps:$4 sm:$0xff]   ;;  %v2707_v21 = vld [vmem:[%s4124_s0 + $0x184] ss:$12 sps:$4 sm:$0xff]   ;;  %v2712_v23 = vld [vmem:[%s4124_s0 + $0x19c] ss:$12 sps:$4 sm:$0xff]  }
  0x61   :  { %1003 = vmatmul.mubr.bf16.gmra.mrb[16].mxu0 %v2661_v47  ;;  %2555 = vmatprep.subr.bf16.mxu1 %v2763_v16  ;;  %v2709_v22 = vld [vmem:[%s4124_s0 + $0x180] ss:$12 sps:$4 sm:$0xff]   ;;  %v2714_v24 = vld [vmem:[%s4124_s0 + $0x198] ss:$12 sps:$4 sm:$0xff]   ;;  %v2717_v26 = vld [vmem:[%s4124_s0 + $0x1b0] ss:$12 sps:$4 sm:$0xff]  }
  0x62   :  { %1010 = vmatprep.mubr.bf16.mxu0 %v2664_v49  ;;  %v2715_v25 = vld [vmem:[%s4124_s0 + $0x1b4] ss:$12 sps:$4 sm:$0xff]   ;;  %v2720_v27 = vld [vmem:[%s4124_s0 + $0x1cc] ss:$12 sps:$4 sm:$0xff]   ;;  %v2723_v29 = vld [vmem:[%s4124_s0 + $0x1e4] ss:$12 sps:$4 sm:$0xff]  }
  0x63   :  { %2530 = vmatmul.mubr.msk.bf16.gmra.mrb[40].mxu1 %vm841_vm0, %v2727_v52  ;;  %v2722_v28 = vld [vmem:[%s4124_s0 + $0x1c8] ss:$12 sps:$4 sm:$0xff]   ;;  %v2725_v30 = vld [vmem:[%s4124_s0 + $0x1e0] ss:$12 sps:$4 sm:$0xff]   ;;  %v2730_v32 = vld [vmem:[%s4124_s0 + $0x1f8] ss:$12 sps:$4 sm:$0xff]  }
  0x64   :  { %2533 = vmatprep.mubr.msk.bf16.mxu1 %vm841_vm0, %v2734_v56  ;;  %2556 = vmatpush3.bf16.msra.mxu1 %v2763_v16  ;;  %v2728_v31 = vld [vmem:[%s4124_s0 + $0x1fc] ss:$12 sps:$4 sm:$0xff]   ;;  %v2731_v33 = vld [vmem:[%s4124_s0 + $0x214] ss:$12 sps:$4 sm:$0xff]   ;;  %v2736_v37 = vld [vmem:[%s4124_s0 + $0x22c] ss:$12 sps:$4 sm:$0xff]  }
  0x65   :  { %v2733_v35 = vld [vmem:[%s4124_s0 + $0x210] ss:$12 sps:$4 sm:$0xff]   ;;  %v2738_v41 = vld [vmem:[%s4124_s0 + $0x228] ss:$12 sps:$4 sm:$0xff]   ;;  %v2741_v47 = vld [vmem:[%s4124_s0 + $0x240] ss:$12 sps:$4 sm:$0xff]  }
  0x66   :  { %v2739_v43 = vld [vmem:[%s4124_s0 + $0x244] ss:$12 sps:$4 sm:$0xff]   ;;  %v2744_v49 = vld [vmem:[%s4124_s0 + $0x25c] ss:$12 sps:$4 sm:$0xff]   ;;  %v3273_v16 = vld [vmem:[%s4128_s4] ss:$0 sm:$0xff] }
  0x69   :  { %1011 = vmatmul.mubr.bf16.gmra.mrb[20].mxu0 %v2666_v51 }
  0x6a   :  { %1018 = vmatprep.mubr.bf16.mxu0 %v2667_v53  ;;  %v2746_v53 = vld [vmem:[%s4124_s0 + $0x258] ss:$12 sps:$4 sm:$0xff]  }
  0x6b   :  { %2534 = vmatmul.mubr.msk.bf16.gmra.mrb[44].mxu1 %vm841_vm0, %v2735_v57 }
  0x6c   :  { %2537 = vmatprep.mubr.msk.bf16.mxu1 %vm841_vm0, %v2742_v62 }
  0x71   :  { %1019 = vmatmul.mubr.bf16.gmra.mrb[24].mxu0 %v2669_v54 }
  0x72   :  { %1026 = vmatprep.mubr.bf16.mxu0 %v2672_v55  ;;  %v2747_v55 = vld [vmem:[%s4124_s0 + $0x274] ss:$12 sps:$4 sm:$0xff]  }
  0x73   :  { %2538 = vmatmul.mubr.msk.bf16.gmra.mrb[48].mxu1 %vm841_vm0, %v2743_v63 }
  0x74   :  { %2541 = vmatprep.mubr.msk.bf16.mxu1 %vm841_vm0, %v2750_v4 }
  0x79   :  { %1027 = vmatmul.mubr.bf16.gmra.mrb[28].mxu0 %v2674_v58 }
  0x7a   :  { %1034 = vmatprep.mubr.bf16.mxu0 %v2675_v59  ;;  %v2749_v59 = vld [vmem:[%s4124_s0 + $0x270] ss:$12 sps:$4 sm:$0xff]  }
  0x7b   :  { %2542 = vmatmul.mubr.msk.bf16.gmra.mrb[52].mxu1 %vm841_vm0, %v2751_v5 }
  0x7c   :  { %2545 = vmatprep.mubr.msk.bf16.mxu1 %vm841_vm0, %v2755_v8 }
  0x81   :  { %1035 = vmatmul.mubr.bf16.gmra.mrb[32].mxu0 %v2677_v60 }
  0x82   :  { %1042 = vmatprep.mubr.bf16.mxu0 %v2680_v61  ;;  %v2752_v61 = vld [vmem:[%s4124_s0 + $0x28c] ss:$12 sps:$4 sm:$0xff]  }
  0x83   :  { %2546 = vmatmul.mubr.msk.bf16.gmra.mrb[56].mxu1 %vm841_vm0, %v2756_v9  ;;  %v3259_v9 = vld [vmem:[%s4127_s3] ss:$0 sm:$0xff] }
  0x84   :  { %2549 = vmatprep.mubr.msk.bf16.mxu1 %vm841_vm0, %v2760_v12 }
  0x89   :  { %1043 = vmatmul.mubr.bf16.gmra.mrb[36].mxu0 %v2682_v0  ;;  %v189_v0 = vld [vmem:[%s4126_s2] sm:$0xff] }
  0x8a   :  { %1050 = vmatprep.mubr.bf16.mxu0 %v2683_v1 }
  0x8b   :  { %2550 = vmatmul.mubr.msk.bf16.gmra.mrb[60].mxu1 %vm841_vm0, %v2761_v13 }
  0x91   :  { %1051 = vmatmul.mubr.bf16.gmra.mrb[40].mxu0 %v2685_v2  ;;  %v190_v2 = vld [vmem:[%s4126_s2 + $0x8] sm:$0xff] }
  0x92   :  { %1058 = vmatprep.mubr.bf16.mxu0 %v2688_v3 }
  0x99   :  { %1059 = vmatmul.mubr.bf16.gmra.mrb[44].mxu0 %v2690_v6  ;;  %v2754_v6 = vld [vmem:[%s4124_s0 + $0x288] ss:$12 sps:$4 sm:$0xff]  }
  0x9a   :  { %1066 = vmatprep.mubr.bf16.mxu0 %v2691_v7 }
  0xa1   :  { %1067 = vmatmul.mubr.bf16.gmra.mrb[48].mxu0 %v2693_v10  ;;  %v2757_v10 = vld [vmem:[%s4124_s0 + $0x2a4] ss:$12 sps:$4 sm:$0xff]  }
  0xa2   :  { %1074 = vmatprep.mubr.bf16.mxu0 %v2696_v11 }
  0xa9   :  { %1075 = vmatmul.mubr.bf16.gmra.mrb[52].mxu0 %v2698_v15 }
  0xaa   :  { %1082 = vmatprep.mubr.bf16.mxu0 %v2699_v17 }
  0xb1   :  { %1083 = vmatmul.mubr.bf16.gmra.mrb[56].mxu0 %v2701_v18 }
  0xb2   :  { %1090 = vmatprep.mubr.bf16.mxu0 %v2704_v19  ;;  %v191_v19 = vld [vmem:[%s4126_s2 + $0x10] sm:$0xff] }
  0xb9   :  { %1091 = vmatmul.mubr.bf16.gmra.mrb[60].mxu0 %v2706_v20 }
  0xba   :  { %1098 = vmatprep.mubr.bf16.mxu0 %v2707_v21 }
  0xc1   :  { %1099 = vmatmul.mubr.bf16.gmra.mrb[64].mxu0 %v2709_v22 }
  0xc2   :  { %1106 = vmatprep.mubr.bf16.mxu0 %v2712_v23  ;;  %v192_v23 = vld [vmem:[%s4126_s2 + $0x18] sm:$0xff] }
  0xc9   :  { %1107 = vmatmul.mubr.bf16.gmra.mrb[68].mxu0 %v2714_v24 }
  0xca   :  { %1114 = vmatprep.mubr.bf16.mxu0 %v2715_v25 }
  0xd1   :  { %1115 = vmatmul.mubr.bf16.gmra.mrb[72].mxu0 %v2717_v26 }
  0xd2   :  { %1122 = vmatprep.mubr.bf16.mxu0 %v2720_v27 }
  0xd9   :  { %1123 = vmatmul.mubr.bf16.gmra.mrb[76].mxu0 %v2722_v28  ;;  %v2759_v28 = vld [vmem:[%s4124_s0 + $0x2a0] ss:$12 sps:$4 sm:$0xff]  }
  0xda   :  { %1130 = vmatprep.mubr.bf16.mxu0 %v2723_v29 }
  0xdf   :  { %v3177_v34 = vpop.f32.mrb[0].mxu1 }
  0xe0   :  { %v1261_v36 = vpop.f32.mrb[1].mxu1 }
  0xe1   :  { %1131 = vmatmul.mubr.bf16.gmra.mrb[80].mxu0 %v2725_v30  ;;  %v3185_v38 = vpop.f32.mrb[2].mxu1 }
  0xe2   :  { %1138 = vmatprep.mubr.bf16.mxu0 %v2728_v31  ;;  %v1264_v39 = vpop.f32.mrb[3].mxu1  ;;  %v2764_v31 = vld [vmem:[%s4124_s0 + $0x2bc] ss:$12 sps:$4 sm:$0xff]  }
  0xe7   :  { %v3187_v40 = vpop.f32.mrb[4].mxu1 }
  0xe8   :  { %v3192_v42 = vpop.f32.mrb[5].mxu1 }
  0xe9   :  { %1139 = vmatmul.mubr.bf16.gmra.mrb[84].mxu0 %v2730_v32  ;;  %v3197_v44 = vpop.f32.mrb[6].mxu1 }
  0xea   :  { %1146 = vmatprep.mubr.bf16.mxu0 %v2731_v33  ;;  %v3199_v45 = vpop.f32.mrb[7].mxu1 }
  0xef   :  { %v3201_v46 = vpop.f32.mrb[8].mxu1 }
  0xf0   :  { %v3206_v48 = vpop.f32.mrb[9].mxu1 }
  0xf1   :  { %1147 = vmatmul.mubr.bf16.gmra.mrb[88].mxu0 %v2733_v35  ;;  %v3211_v50 = vpop.f32.mrb[10].mxu1 }
  0xf2   :  { %1154 = vmatprep.mubr.bf16.mxu0 %v2736_v37  ;;  %v3213_v51 = vpop.f32.mrb[11].mxu1 }
  0xf7   :  { %v3215_v52 = vpop.f32.mrb[12].mxu1 }
  0xf8   :  { %v3220_v54 = vpop.f32.mrb[13].mxu1 }
  0xf9   :  { %1155 = vmatmul.mubr.bf16.gmra.mrb[92].mxu0 %v2738_v41  ;;  %v3225_v56 = vpop.f32.mrb[14].mxu1 }
  0xfa   :  { %1162 = vmatprep.mubr.bf16.mxu0 %v2739_v43  ;;  %v3227_v57 = vpop.f32.mrb[15].mxu1 }
  0xff   :  { %v3229_v58 = vpop.f32.mrb[16].mxu1 }
 0x100   :  { %v3234_v60 = vpop.f32.mrb[17].mxu1 }
 0x101   :  { %1163 = vmatmul.mubr.bf16.gmra.mrb[96].mxu0 %v2741_v47  ;;  %v3239_v62 = vpop.f32.mrb[18].mxu1 }
 0x102   :  { %1170 = vmatprep.mubr.bf16.mxu0 %v2744_v49  ;;  %v3241_v63 = vpop.f32.mrb[19].mxu1 }
 0x107   :  { %v3249_v3 = vpop.f32.mrb[20].mxu1 }
 0x108   :  { %v3254_v7 = vpop.f32.mrb[21].mxu1 }
 0x109   :  { %1171 = vmatmul.mubr.bf16.gmra.mrb[100].mxu0 %v2746_v53  ;;  %v3264_v11 = vpop.f32.mrb[22].mxu1  ;;  %v193_v53 = vld [vmem:[%s4126_s2 + $0x20] sm:$0xff] }
 0x10a   :  { %1178 = vmatprep.mubr.bf16.mxu0 %v2747_v55  ;;  %v3268_v15 = vpop.f32.mrb[23].mxu1 }
 0x10f   :  { %v3288_v24 = vpop.f32.mrb[24].mxu1 }
 0x110   :  { %v3294_v29 = vpop.f32.mrb[25].mxu1 }
 0x111   :  { %1179 = vmatmul.mubr.bf16.gmra.mrb[104].mxu0 %v2749_v59  ;;  %v3299_v32 = vpop.f32.mrb[26].mxu1 }
 0x112   :  { %1186 = vmatprep.mubr.bf16.mxu0 %v2752_v61  ;;  %v3304_v41 = vpop.f32.mrb[27].mxu1  ;;  %v194_v61 = vld [vmem:[%s4126_s2 + $0x28] sm:$0xff] }
 0x114   :  { %v972_v1 = vpop.f32.mrb[0].mxu0 }
 0x115   :  { %v973_v4 = vadd.f32 %v972_v1, %v189_v0  ;;  %v974_v5 = vpop.f32.mrb[1].mxu0 }
 0x116   :  { %v975_v8 = vpop.f32.mrb[2].mxu0 }
 0x117   :  { %v976_v12 = vadd.f32 %v975_v8, %v190_v2  ;;  %v3266_v13 = vadd.f32 %v1261_v36, %v973_v4  ;;  %v977_v14 = vpop.f32.mrb[3].mxu0  ;;  %v2766_v4 = vld [vmem:[%s4124_s0 + $0x2b8] ss:$12 sps:$4 sm:$0xff]   ;;  %v2767_v8 = vld [vmem:[%s4124_s0 + $0x2d4] ss:$12 sps:$4 sm:$0xff]  }
 0x119   :  { %v1523_v17 = vmul.f32 %v3259_v9, %v3266_v13  ;;  %v3277_v18 = vadd.f32 %v1264_v39, %v976_v12  ;;  %1187 = vmatmul.mubr.bf16.gmra.mrb[108].mxu0 %v2754_v6 }
 0x11a   :  { %1194 = vmatprep.mubr.bf16.mxu0 %v2757_v10 }
 0x11b   :  { %v1594_v20 = vadd.f32 %v3273_v16, %v1523_v17  ;;  %v1524_v21 = vmul.f32 %v3259_v9, %v3277_v18 }
 0x11c   :  { %v980_v22 = vpop.f32.mrb[4].mxu0 }
 0x11d   :  { %v1595_v25 = vadd.f32 %v3273_v16, %v1524_v21  ;;  %v981_v26 = vadd.f32 %v980_v22, %v191_v19  ;;  %v982_v27 = vpop.f32.mrb[5].mxu0  ;;  %v1658_v33 = vmax.f32 %v1594_v20, 0.0 }
 0x11e   :  { %v983_v30 = vpop.f32.mrb[6].mxu0 }
 0x11f   :  { %v1659_v35 = vmax.f32 %v1595_v25, 0.0  ;;  %v3302_v36 = vadd.f32 %v3177_v34, %v981_v26  ;;  %v984_v37 = vadd.f32 %v983_v30, %v192_v23  ;;  %v985_v39 = vpop.f32.mrb[7].mxu0  ;;  %v195_v26 = vld [vmem:[%s4126_s2 + $0x30] sm:$0xff]  ;;  %v196_v30 = vld [vmem:[%s4126_s2 + $0x38] sm:$0xff] }
 0x121   :  { %v1722_v43 = vpack.c.bf16 %v1659_v35, %v1658_v33  ;;  %v1525_v47 = vmul.f32 %v3259_v9, %v3302_v36  ;;  %v3309_v49 = vadd.f32 %v3185_v38, %v984_v37  ;;  %1195 = vmatmul.mubr.bf16.gmra.mrb[112].mxu0 %v2759_v28  ;;  %v3321_v38 = vpop.f32.mrb[28].mxu1  ;;  %v2769_v37 = vld [vmem:[%s4124_s0 + $0x2d0] ss:$12 sps:$4 sm:$0xff]  }
 0x122   :  { %1202 = vmatprep.mubr.bf16.mxu0 %v2764_v31  ;;  %v3327_v5 = vpop.f32.mrb[29].mxu1 }
 0x123   :  { %v1596_v34 = vadd.f32 %v3273_v16, %v1525_v47  ;;  %v1526_v55 = vmul.f32 %v3259_v9, %v3309_v49  ;;  %2557 = vmatprep.mubr.msk.bf16.mxu1 %vm841_vm0, %v1722_v43  ;;  %v3332_v10 = vpop.f32.mrb[30].mxu1  ;;  %v2770_v47 = vld [vmem:[%s4124_s0 + $0x2ec] ss:$12 sps:$4 sm:$0xff]  }
 0x124   :  { %v988_v59 = vpop.f32.mrb[8].mxu0  ;;  %v3337_v21 = vpop.f32.mrb[31].mxu1 }
 0x125   :  { %v1597_v0 = vadd.f32 %v3273_v16, %v1526_v55  ;;  %v989_v1 = vadd.f32 %v988_v59, %v193_v53  ;;  %v990_v2 = vpop.f32.mrb[9].mxu0  ;;  %v1660_v12 = vmax.f32 %v1596_v34, 0.0 }
 0x126   :  { %v991_v6 = vpop.f32.mrb[10].mxu0 }
 0x127   :  { %v1661_v14 = vmax.f32 %v1597_v0, 0.0  ;;  %v992_v17 = vadd.f32 %v991_v6, %v194_v61  ;;  %v3335_v19 = vadd.f32 %v3192_v42, %v989_v1  ;;  %v993_v20 = vpop.f32.mrb[11].mxu0 }
 0x129   :  { %v1723_v22 = vpack.c.bf16 %v1661_v14, %v1660_v12  ;;  %v1527_v23 = vmul.f32 %v3259_v9, %v3335_v19  ;;  %v3342_v25 = vadd.f32 %v3199_v45, %v992_v17  ;;  %1203 = vmatmul.mubr.bf16.gmra.mrb[116].mxu0 %v2766_v4  ;;  %v3354_v45 = vpop.f32.mrb[32].mxu1  ;;  %v198_v17 = vld [vmem:[%s4126_s2 + $0x48] sm:$0xff] }
 0x12a   :  { %1210 = vmatprep.mubr.bf16.mxu0 %v2767_v8  ;;  %v3360_v39 = vpop.f32.mrb[33].mxu1  ;;  %v197_v8 = vld [vmem:[%s4126_s2 + $0x40] sm:$0xff] }
 0x12b   :  { %4153 = vst [vmem:[#allocation5_spill] sm:$0xff] %v3342_v25  ;;  %v1598_v27 = vadd.f32 %v3273_v16, %v1527_v23  ;;  %v1528_v42 = vmul.f32 %v3259_v9, %v3342_v25  ;;  %2558 = vmatmul.mubr.msk.bf16.vlgmr.msra.gmra.mrb[64].mxu1 %vm841_vm0, %v1723_v22  ;;  %v3365_v53 = vpop.f32.mrb[34].mxu1 }
 0x12c   :  { %v996_v28 = vpop.f32.mrb[12].mxu0  ;;  %v3370_v1 = vpop.f32.mrb[35].mxu1 }
 0x12d   :  { %v1599_v31 = vadd.f32 %v3273_v16, %v1528_v42  ;;  %v997_v33 = vadd.f32 %v996_v28, %v195_v26  ;;  %v998_v35 = vpop.f32.mrb[13].mxu0  ;;  %v1662_v34 = vmax.f32 %v1598_v27, 0.0  ;;  %v2772_v26 = vld [vmem:[%s4124_s0 + $0x2e8] ss:$12 sps:$4 sm:$0xff]  }
 0x12e   :  { %v999_v43 = vpop.f32.mrb[14].mxu0 }
 0x12f   :  { %v1663_v55 = vmax.f32 %v1599_v31, 0.0  ;;  %v3368_v59 = vadd.f32 %v3187_v40, %v997_v33  ;;  %v1000_v61 = vadd.f32 %v999_v43, %v196_v30  ;;  %v1001_v0 = vpop.f32.mrb[15].mxu0 }
 0x131   :  { %v1724_v2 = vpack.c.bf16 %v1663_v55, %v1662_v34  ;;  %v1529_v4 = vmul.f32 %v3259_v9, %v3368_v59  ;;  %v3375_v6 = vadd.f32 %v3197_v44, %v1000_v61  ;;  %1211 = vmatmul.mubr.bf16.gmra.mrb[120].mxu0 %v2769_v37  ;;  %v3387_v44 = vpop.f32.mrb[36].mxu1  ;;  %v199_v61 = vld [vmem:[%s4126_s2 + $0x50] sm:$0xff] }
 0x132   :  { %1218 = vmatprep.mubr.bf16.mxu0 %v2770_v47  ;;  %v3393_v27 = vpop.f32.mrb[37].mxu1 }
 0x133   :  { %v1600_v40 = vadd.f32 %v3273_v16, %v1529_v4  ;;  %v1530_v12 = vmul.f32 %v3259_v9, %v3375_v6  ;;  %2561 = vmatprep.mubr.msk.bf16.mxu1 %vm841_vm0, %v1724_v2  ;;  %v3395_v28 = vpop.f32.mrb[38].mxu1  ;;  %v200_v4 = vld [vmem:[%s4126_s2 + $0x58] sm:$0xff] }
 0x134   :  { %v1004_v14 = vpop.f32.mrb[16].mxu0  ;;  %v3400_v43 = vpop.f32.mrb[39].mxu1 }
 0x135   :  { %v1601_v20 = vadd.f32 %v3273_v16, %v1530_v12  ;;  %v1005_v22 = vadd.f32 %v1004_v14, %v197_v8  ;;  %v1006_v23 = vpop.f32.mrb[17].mxu0  ;;  %v1664_v30 = vmax.f32 %v1600_v40, 0.0 }
 0x136   :  { %v1007_v42 = vpop.f32.mrb[18].mxu0 }
 0x137   :  { %v1665_v31 = vmax.f32 %v1601_v20, 0.0  ;;  %v1008_v33 = vadd.f32 %v1007_v42, %v198_v17  ;;  %v3398_v35 = vadd.f32 %v3206_v48, %v1005_v22  ;;  %v1009_v37 = vpop.f32.mrb[19].mxu0 }
 0x139   :  { %4154 = vst [vmem:[#allocation6_spill] sm:$0xff] %v3398_v35  ;;  %v1531_v47 = vmul.f32 %v3259_v9, %v3398_v35  ;;  %v3405_v34 = vadd.f32 %v3213_v51, %v1008_v33  ;;  %1219 = vmatmul.mubr.bf16.gmra.mrb[124].mxu0 %v2772_v26  ;;  %v1725_v55 = vpack.c.bf16 %v1665_v31, %v1664_v30  ;;  %v3417_v51 = vpop.f32.mrb[40].mxu1 }
 0x13a   :  { %v3420_v14 = vpop.f32.mrb[41].mxu1 }
 0x13b   :  { %4155 = vst [vmem:[#allocation7_spill] sm:$0xff] %v3405_v34  ;;  %v1602_v0 = vadd.f32 %v3273_v16, %v1531_v47  ;;  %v1532_v48 = vmul.f32 %v3259_v9, %v3405_v34  ;;  %2562 = vmatmul.mubr.msk.bf16.gmra.mrb[68].mxu1 %vm841_vm0, %v1725_v55  ;;  %v3422_v20 = vpop.f32.mrb[42].mxu1  ;;  %v201_v55 = vld [vmem:[%s4126_s2 + $0x60] sm:$0xff] }
 0x13c   :  { %v1012_v2 = vpop.f32.mrb[20].mxu0  ;;  %v3427_v31 = vpop.f32.mrb[43].mxu1 }
 0x13d   :  { %v1603_v8 = vadd.f32 %v3273_v16, %v1532_v48  ;;  %v1013_v40 = vadd.f32 %v1012_v2, %v199_v61  ;;  %v1014_v12 = vpop.f32.mrb[21].mxu0  ;;  %v1666_v22 = vmax.f32 %v1602_v0, 0.0  ;;  %v202_v48 = vld [vmem:[%s4126_s2 + $0x68] sm:$0xff] }
 0x13e   :  { %v1015_v17 = vpop.f32.mrb[22].mxu0 }
 0x13f   :  { %v1667_v23 = vmax.f32 %v1603_v8, 0.0  ;;  %v3425_v26 = vadd.f32 %v3201_v46, %v1013_v40  ;;  %v1016_v42 = vadd.f32 %v1015_v17, %v200_v4  ;;  %v1017_v30 = vpop.f32.mrb[23].mxu0  ;;  %v3445_v8 = vpop.f32.mrb[44].mxu1 }
 0x140   :  { %v3447_v12 = vpop.f32.mrb[45].mxu1 }
 0x141   :  { %4156 = vst [vmem:[#allocation8_spill] sm:$0xff] %v3425_v26  ;;  %v1726_v33 = vpack.c.bf16 %v1667_v23, %v1666_v22  ;;  %v1533_v37 = vmul.f32 %v3259_v9, %v3425_v26  ;;  %v3432_v47 = vadd.f32 %v3211_v50, %v1016_v42 }
 0x143   :  { %4157 = vst [vmem:[#allocation9_spill] sm:$0xff] %v3432_v47  ;;  %v1604_v61 = vadd.f32 %v3273_v16, %v1533_v37  ;;  %v1534_v46 = vmul.f32 %v3259_v9, %v3432_v47  ;;  %2565 = vmatprep.mubr.msk.bf16.mxu1 %vm841_vm0, %v1726_v33  ;;  %v3452_v33 = vpop.f32.mrb[46].mxu1 }
 0x144   :  { %v1020_v0 = vpop.f32.mrb[24].mxu0  ;;  %v3454_v37 = vpop.f32.mrb[47].mxu1 }
 0x145   :  { %v1605_v2 = vadd.f32 %v3273_v16, %v1534_v46  ;;  %v1021_v50 = vadd.f32 %v1020_v0, %v201_v55  ;;  %v1022_v4 = vpop.f32.mrb[25].mxu0  ;;  %v1668_v17 = vmax.f32 %v1604_v61, 0.0  ;;  %v203_v61 = vld [vmem:[%s4126_s2 + $0x70] sm:$0xff] }
 0x146   :  { %v1023_v40 = vpop.f32.mrb[26].mxu0 }
 0x147   :  { %v1669_v22 = vmax.f32 %v1605_v2, 0.0  ;;  %v1024_v23 = vadd.f32 %v1023_v40, %v202_v48  ;;  %v3450_v42 = vadd.f32 %v3220_v54, %v1021_v50  ;;  %v1025_v30 = vpop.f32.mrb[27].mxu0  ;;  %v204_v50 = vld [vmem:[%s4126_s2 + $0x78] sm:$0xff] }
 0x149   :  { %4158 = vst [vmem:[#allocation10_spill] sm:$0xff] %v3450_v42  ;;  %v1535_v55 = vmul.f32 %v3259_v9, %v3450_v42  ;;  %v3459_v46 = vadd.f32 %v3227_v57, %v1024_v23  ;;  %v1727_v0 = vpack.c.bf16 %v1669_v22, %v1668_v17 }
 0x14b   :  { %4159 = vst [vmem:[#allocation11_spill] sm:$0xff] %v3459_v46  ;;  %v1606_v48 = vadd.f32 %v3273_v16, %v1535_v55  ;;  %v1536_v54 = vmul.f32 %v3259_v9, %v3459_v46  ;;  %2566 = vmatmul.mubr.msk.bf16.gmra.mrb[72].mxu1 %vm841_vm0, %v1727_v0 }
 0x14c   :  { %v1028_v2 = vpop.f32.mrb[28].mxu0 }
 0x14d   :  { %v1607_v57 = vadd.f32 %v3273_v16, %v1536_v54  ;;  %v1029_v4 = vadd.f32 %v1028_v2, %v203_v61  ;;  %v1030_v40 = vpop.f32.mrb[29].mxu0  ;;  %v1670_v22 = vmax.f32 %v1606_v48, 0.0  ;;  %v205_v61 = vld [vmem:[%s4126_s2 + $0x80] sm:$0xff] }
 0x14e   :  { %v1031_v17 = vpop.f32.mrb[30].mxu0 }
 0x14f   :  { %v1671_v23 = vmax.f32 %v1607_v57, 0.0  ;;  %v3473_v30 = vadd.f32 %v3215_v52, %v1029_v4  ;;  %v1032_v55 = vadd.f32 %v1031_v17, %v204_v50  ;;  %v1033_v42 = vpop.f32.mrb[31].mxu0  ;;  %v3491_v57 = vpop.f32.mrb[48].mxu1 }
 0x150   :  { %v206_v42 = vld [vmem:[%s4126_s2 + $0x88] sm:$0xff]  ;;  %v3493_v40 = vpop.f32.mrb[49].mxu1 }
 0x151   :  { %4160 = vst [vmem:[#allocation12_spill] sm:$0xff] %v3473_v30  ;;  %v1728_v46 = vpack.c.bf16 %v1671_v23, %v1670_v22  ;;  %v1537_v0 = vmul.f32 %v3259_v9, %v3473_v30  ;;  %v3478_v34 = vadd.f32 %v3225_v56, %v1032_v55 }
 0x153   :  { %4161 = vst [vmem:[#allocation13_spill] sm:$0xff] %v3478_v34  ;;  %v1608_v54 = vadd.f32 %v3273_v16, %v1537_v0  ;;  %v1538_v48 = vmul.f32 %v3259_v9, %v3478_v34  ;;  %2569 = vmatprep.mubr.msk.bf16.mxu1 %vm841_vm0, %v1728_v46  ;;  %v3498_v0 = vpop.f32.mrb[50].mxu1 }
 0x154   :  { %v1036_v52 = vpop.f32.mrb[32].mxu0  ;;  %v3500_v34 = vpop.f32.mrb[51].mxu1 }
 0x155   :  { %v1609_v2 = vadd.f32 %v3273_v16, %v1538_v48  ;;  %v1037_v56 = vadd.f32 %v1036_v52, %v205_v61  ;;  %v1038_v50 = vpop.f32.mrb[33].mxu0  ;;  %v1672_v17 = vmax.f32 %v1608_v54, 0.0  ;;  %v207_v54 = vld [vmem:[%s4126_s2 + $0x90] sm:$0xff] }
 0x156   :  { %v1039_v4 = vpop.f32.mrb[34].mxu0 }
 0x157   :  { %v1673_v22 = vmax.f32 %v1609_v2, 0.0  ;;  %v1040_v23 = vadd.f32 %v1039_v4, %v206_v42  ;;  %v3496_v55 = vadd.f32 %v3234_v60, %v1037_v56  ;;  %v1041_v46 = vpop.f32.mrb[35].mxu0  ;;  %v208_v56 = vld [vmem:[%s4126_s2 + $0x98] sm:$0xff] }
 0x159   :  { %4162 = vst [vmem:[#allocation14_spill] sm:$0xff] %v3496_v55  ;;  %v1539_v61 = vmul.f32 %v3259_v9, %v3496_v55  ;;  %v3505_v48 = vadd.f32 %v3241_v63, %v1040_v23  ;;  %v1729_v52 = vpack.c.bf16 %v1673_v22, %v1672_v17 }
 0x15b   :  { %4163 = vst [vmem:[#allocation15_spill] sm:$0xff] %v3505_v48  ;;  %v1610_v42 = vadd.f32 %v3273_v16, %v1539_v61  ;;  %v1540_v60 = vmul.f32 %v3259_v9, %v3505_v48  ;;  %2570 = vmatmul.mubr.msk.bf16.gmra.mrb[76].mxu1 %vm841_vm0, %v1729_v52 }
 0x15c   :  { %v1044_v2 = vpop.f32.mrb[36].mxu0 }
 0x15d   :  { %v1611_v63 = vadd.f32 %v3273_v16, %v1540_v60  ;;  %v1045_v50 = vadd.f32 %v1044_v2, %v207_v54  ;;  %v1046_v4 = vpop.f32.mrb[37].mxu0  ;;  %v1674_v22 = vmax.f32 %v1610_v42, 0.0  ;;  %v209_v54 = vld [vmem:[%s4126_s2 + $0xa0] sm:$0xff] }
 0x15e   :  { %v1047_v17 = vpop.f32.mrb[38].mxu0 }
 0x15f   :  { %v1675_v23 = vmax.f32 %v1611_v63, 0.0  ;;  %v3519_v46 = vadd.f32 %v3229_v58, %v1045_v50  ;;  %v1048_v61 = vadd.f32 %v1047_v17, %v208_v56  ;;  %v1049_v55 = vpop.f32.mrb[39].mxu0  ;;  %v3537_v63 = vpop.f32.mrb[52].mxu1 }
 0x160   :  { %v210_v55 = vld [vmem:[%s4126_s2 + $0xa8] sm:$0xff]  ;;  %v3539_v4 = vpop.f32.mrb[53].mxu1 }
 0x161   :  { %4164 = vst [vmem:[#allocation16_spill] sm:$0xff] %v3519_v46  ;;  %v1730_v48 = vpack.c.bf16 %v1675_v23, %v1674_v22  ;;  %v1541_v52 = vmul.f32 %v3259_v9, %v3519_v46  ;;  %v3524_v30 = vadd.f32 %v3239_v62, %v1048_v61 }
 0x163   :  { %4165 = vst [vmem:[#allocation17_spill] sm:$0xff] %v3524_v30  ;;  %v1612_v60 = vadd.f32 %v3273_v16, %v1541_v52  ;;  %v1542_v42 = vmul.f32 %v3259_v9, %v3524_v30  ;;  %2573 = vmatprep.mubr.msk.bf16.mxu1 %vm841_vm0, %v1730_v48  ;;  %v3544_v52 = vpop.f32.mrb[54].mxu1 }
 0x164   :  { %v1052_v58 = vpop.f32.mrb[40].mxu0  ;;  %v3546_v30 = vpop.f32.mrb[55].mxu1 }
 0x165   :  { %v1613_v2 = vadd.f32 %v3273_v16, %v1542_v42  ;;  %v1053_v62 = vadd.f32 %v1052_v58, %v209_v54  ;;  %v1054_v56 = vpop.f32.mrb[41].mxu0  ;;  %v1676_v17 = vmax.f32 %v1612_v60, 0.0  ;;  %v211_v60 = vld [vmem:[%s4126_s2 + $0xb0] sm:$0xff] }
 0x166   :  { %v1055_v50 = vpop.f32.mrb[42].mxu0 }
 0x167   :  { %v1677_v22 = vmax.f32 %v1613_v2, 0.0  ;;  %v1056_v23 = vadd.f32 %v1055_v50, %v210_v55  ;;  %v3542_v61 = vadd.f32 %v3254_v7, %v1053_v62  ;;  %v1057_v48 = vpop.f32.mrb[43].mxu0  ;;  %v212_v62 = vld [vmem:[%s4126_s2 + $0xb8] sm:$0xff] }
 0x169   :  { %4166 = vst [vmem:[#allocation18_spill] sm:$0xff] %v3542_v61  ;;  %v1543_v54 = vmul.f32 %v3259_v9, %v3542_v61  ;;  %v3551_v42 = vadd.f32 %v3268_v15, %v1056_v23  ;;  %v1731_v58 = vpack.c.bf16 %v1677_v22, %v1676_v17 }
 0x16b   :  { %4167 = vst [vmem:[#allocation19_spill] sm:$0xff] %v3551_v42  ;;  %v1614_v55 = vadd.f32 %v3273_v16, %v1543_v54  ;;  %v1544_v7 = vmul.f32 %v3259_v9, %v3551_v42  ;;  %2574 = vmatmul.mubr.msk.bf16.gmra.mrb[80].mxu1 %vm841_vm0, %v1731_v58 }
 0x16c   :  { %v1060_v2 = vpop.f32.mrb[44].mxu0 }
 0x16d   :  { %v1615_v15 = vadd.f32 %v3273_v16, %v1544_v7  ;;  %v1061_v56 = vadd.f32 %v1060_v2, %v211_v60  ;;  %v1062_v50 = vpop.f32.mrb[45].mxu0  ;;  %v1678_v22 = vmax.f32 %v1614_v55, 0.0  ;;  %v213_v60 = vld [vmem:[%s4126_s2 + $0xc0] sm:$0xff] }
 0x16e   :  { %v1063_v17 = vpop.f32.mrb[46].mxu0 }
 0x16f   :  { %v1679_v23 = vmax.f32 %v1615_v15, 0.0  ;;  %v3565_v48 = vadd.f32 %v3249_v3, %v1061_v56  ;;  %v1064_v54 = vadd.f32 %v1063_v17, %v212_v62  ;;  %v1065_v61 = vpop.f32.mrb[47].mxu0  ;;  %v3583_v15 = vpop.f32.mrb[56].mxu1 }
 0x170   :  { %v214_v61 = vld [vmem:[%s4126_s2 + $0xc8] sm:$0xff]  ;;  %v3585_v50 = vpop.f32.mrb[57].mxu1 }
 0x171   :  { %4168 = vst [vmem:[#allocation20_spill] sm:$0xff] %v3565_v48  ;;  %v1732_v42 = vpack.c.bf16 %v1679_v23, %v1678_v22  ;;  %v1545_v58 = vmul.f32 %v3259_v9, %v3565_v48  ;;  %v3570_v46 = vadd.f32 %v3264_v11, %v1064_v54 }
 0x173   :  { %4169 = vst [vmem:[#allocation21_spill] sm:$0xff] %v3570_v46  ;;  %v1616_v7 = vadd.f32 %v3273_v16, %v1545_v58  ;;  %v1546_v55 = vmul.f32 %v3259_v9, %v3570_v46  ;;  %2577 = vmatprep.mubr.msk.bf16.mxu1 %vm841_vm0, %v1732_v42  ;;  %v3590_v58 = vpop.f32.mrb[58].mxu1 }
 0x174   :  { %v1068_v3 = vpop.f32.mrb[48].mxu0  ;;  %v3592_v46 = vpop.f32.mrb[59].mxu1 }
 0x175   :  { %v1617_v2 = vadd.f32 %v3273_v16, %v1546_v55  ;;  %v1069_v11 = vadd.f32 %v1068_v3, %v213_v60  ;;  %v1070_v62 = vpop.f32.mrb[49].mxu0  ;;  %v1680_v17 = vmax.f32 %v1616_v7, 0.0  ;;  %v215_v7 = vld [vmem:[%s4126_s2 + $0xd0] sm:$0xff] }
 0x176   :  { %v1071_v56 = vpop.f32.mrb[50].mxu0 }
 0x177   :  { %v1681_v22 = vmax.f32 %v1617_v2, 0.0  ;;  %v1072_v23 = vadd.f32 %v1071_v56, %v214_v61  ;;  %v3588_v54 = vadd.f32 %v3294_v29, %v1069_v11  ;;  %v1073_v42 = vpop.f32.mrb[51].mxu0  ;;  %v3602_v61 = vpop.f32.mrb[60].mxu1 }
 0x178   :  { %v3608_v11 = vpop.f32.mrb[61].mxu1 }
 0x179   :  { %4170 = vst [vmem:[#allocation22_spill] sm:$0xff] %v3588_v54  ;;  %v1547_v60 = vmul.f32 %v3259_v9, %v3588_v54  ;;  %v3597_v55 = vadd.f32 %v3304_v41, %v1072_v23  ;;  %v1733_v3 = vpack.c.bf16 %v1681_v22, %v1680_v17  ;;  %v216_v41 = vld [vmem:[%s4126_s2 + $0xd8] sm:$0xff]  ;;  %v3613_v56 = vpop.f32.mrb[62].mxu1 }
 0x17a   :  { %v3616_v42 = vpop.f32.mrb[63].mxu1 }
 0x17b   :  { %4171 = vst [vmem:[#allocation23_spill] sm:$0xff] %v3597_v55  ;;  %v1618_v29 = vadd.f32 %v3273_v16, %v1547_v60  ;;  %v1548_v2 = vmul.f32 %v3259_v9, %v3597_v55  ;;  %2578 = vmatmul.mubr.msk.bf16.gmra.mrb[84].mxu1 %vm841_vm0, %v1733_v3 }
 0x17c   :  { %v1076_v62 = vpop.f32.mrb[52].mxu0 }
 0x17d   :  { %v1619_v17 = vadd.f32 %v3273_v16, %v1548_v2  ;;  %v1077_v22 = vadd.f32 %v1076_v62, %v215_v7  ;;  %v1078_v23 = vpop.f32.mrb[53].mxu0  ;;  %v1682_v54 = vmax.f32 %v1618_v29, 0.0  ;;  %v217_v7 = vld [vmem:[%s4126_s2 + $0xe0] sm:$0xff] }
 0x17e   :  { %v1079_v60 = vpop.f32.mrb[54].mxu0 }
 0x17f   :  { %v1683_v55 = vmax.f32 %v1619_v17, 0.0  ;;  %v3619_v3 = vadd.f32 %v3288_v24, %v1077_v22  ;;  %v1080_v48 = vadd.f32 %v1079_v60, %v216_v41  ;;  %v1081_v47 = vpop.f32.mrb[55].mxu0 }
 0x180   :  { %v218_v47 = vld [vmem:[%s4126_s2 + $0xe8] sm:$0xff] }
 0x181   :  { %v1734_v35 = vpack.c.bf16 %v1683_v55, %v1682_v54  ;;  %v1549_v26 = vmul.f32 %v3259_v9, %v3619_v3  ;;  %v3624_v25 = vadd.f32 %v3299_v32, %v1080_v48 }
 0x183   :  { %v1620_v2 = vadd.f32 %v3273_v16, %v1549_v26  ;;  %v1550_v29 = vmul.f32 %v3259_v9, %v3624_v25  ;;  %2581 = vmatprep.mubr.msk.bf16.mxu1 %vm841_vm0, %v1734_v35 }
 0x184   :  { %v1084_v24 = vpop.f32.mrb[56].mxu0 }
 0x185   :  { %v1621_v54 = vadd.f32 %v3273_v16, %v1550_v29  ;;  %v1085_v32 = vadd.f32 %v1084_v24, %v217_v7  ;;  %v1086_v48 = vpop.f32.mrb[57].mxu0  ;;  %v1684_v62 = vmax.f32 %v1620_v2, 0.0  ;;  %v219_v7 = vld [vmem:[%s4126_s2 + $0xf0] sm:$0xff]  ;;  %v220_v24 = vld [vmem:[%s4126_s2 + $0xf8] sm:$0xff] }
 0x186   :  { %v1087_v55 = vpop.f32.mrb[58].mxu0 }
 0x187   :  { %v1685_v41 = vmax.f32 %v1621_v54, 0.0  ;;  %v1088_v17 = vadd.f32 %v1087_v55, %v218_v47  ;;  %v3638_v26 = vadd.f32 %v3327_v5, %v1085_v32  ;;  %v1089_v22 = vpop.f32.mrb[59].mxu0 }
 0x189   :  { %v1551_v35 = vmul.f32 %v3259_v9, %v3638_v26  ;;  %v3643_v23 = vadd.f32 %v3337_v21, %v1088_v17  ;;  %v1735_v60 = vpack.c.bf16 %v1685_v41, %v1684_v62 }
 0x18b   :  { %v1622_v29 = vadd.f32 %v3273_v16, %v1551_v35  ;;  %v1552_v2 = vmul.f32 %v3259_v9, %v3643_v23  ;;  %2582 = vmatmul.mubr.msk.bf16.gmra.mrb[88].mxu1 %vm841_vm0, %v1735_v60 }
 0x18c   :  { %v1092_v5 = vpop.f32.mrb[60].mxu0 }
 0x18d   :  { %v1623_v21 = vadd.f32 %v3273_v16, %v1552_v2  ;;  %v1093_v47 = vadd.f32 %v1092_v5, %v219_v7  ;;  %v1094_v54 = vpop.f32.mrb[61].mxu0  ;;  %v1686_v48 = vmax.f32 %v1622_v29, 0.0  ;;  %v221_v7 = vld [vmem:[%s4126_s2 + $0x100] sm:$0xff]  ;;  %v222_v5 = vld [vmem:[%s4126_s2 + $0x108] sm:$0xff] }
 0x18e   :  { %v1095_v32 = vpop.f32.mrb[62].mxu0 }
 0x18f   :  { %v1687_v55 = vmax.f32 %v1623_v21, 0.0  ;;  %v3657_v62 = vadd.f32 %v3321_v38, %v1093_v47  ;;  %v1096_v41 = vadd.f32 %v1095_v32, %v220_v24  ;;  %v1097_v17 = vpop.f32.mrb[63].mxu0 }
 0x191   :  { %v1736_v22 = vpack.c.bf16 %v1687_v55, %v1686_v48  ;;  %v1553_v35 = vmul.f32 %v3259_v9, %v3657_v62  ;;  %v3662_v60 = vadd.f32 %v3332_v10, %v1096_v41 }
 0x193   :  { %v1624_v2 = vadd.f32 %v3273_v16, %v1553_v35  ;;  %v1554_v29 = vmul.f32 %v3259_v9, %v3662_v60  ;;  %2585 = vmatprep.mubr.msk.bf16.mxu1 %vm841_vm0, %v1736_v22 }
 0x194   :  { %v1100_v38 = vpop.f32.mrb[64].mxu0 }
 0x195   :  { %v1625_v24 = vadd.f32 %v3273_v16, %v1554_v29  ;;  %v1101_v10 = vadd.f32 %v1100_v38, %v221_v7  ;;  %v1102_v21 = vpop.f32.mrb[65].mxu0  ;;  %v1688_v54 = vmax.f32 %v1624_v2, 0.0  ;;  %v223_v7 = vld [vmem:[%s4126_s2 + $0x110] sm:$0xff]  ;;  %v224_v38 = vld [vmem:[%s4126_s2 + $0x118] sm:$0xff] }
 0x196   :  { %v1103_v47 = vpop.f32.mrb[66].mxu0 }
 0x197   :  { %v1689_v32 = vmax.f32 %v1625_v24, 0.0  ;;  %v1104_v48 = vadd.f32 %v1103_v47, %v222_v5  ;;  %v3676_v55 = vadd.f32 %v3360_v39, %v1101_v10  ;;  %v1105_v41 = vpop.f32.mrb[67].mxu0 }
 0x199   :  { %v1555_v17 = vmul.f32 %v3259_v9, %v3676_v55  ;;  %v3681_v22 = vadd.f32 %v3370_v1, %v1104_v48  ;;  %v1737_v35 = vpack.c.bf16 %v1689_v32, %v1688_v54 }
 0x19b   :  { %v1626_v29 = vadd.f32 %v3273_v16, %v1555_v17  ;;  %v1556_v2 = vmul.f32 %v3259_v9, %v3681_v22  ;;  %2586 = vmatmul.mubr.msk.bf16.gmra.mrb[92].mxu1 %vm841_vm0, %v1737_v35 }
 0x19c   :  { %v1108_v39 = vpop.f32.mrb[68].mxu0 }
 0x19d   :  { %v1627_v1 = vadd.f32 %v3273_v16, %v1556_v2  ;;  %v1109_v5 = vadd.f32 %v1108_v39, %v223_v7  ;;  %v1110_v24 = vpop.f32.mrb[69].mxu0  ;;  %v1690_v21 = vmax.f32 %v1626_v29, 0.0  ;;  %v225_v7 = vld [vmem:[%s4126_s2 + $0x120] sm:$0xff]  ;;  %v226_v39 = vld [vmem:[%s4126_s2 + $0x128] sm:$0xff] }
 0x19e   :  { %v1111_v10 = vpop.f32.mrb[70].mxu0 }
 0x19f   :  { %v1691_v47 = vmax.f32 %v1627_v1, 0.0  ;;  %v3695_v54 = vadd.f32 %v3354_v45, %v1109_v5  ;;  %v1112_v32 = vadd.f32 %v1111_v10, %v224_v38  ;;  %v1113_v48 = vpop.f32.mrb[71].mxu0 }
 0x1a1   :  { %v1738_v41 = vpack.c.bf16 %v1691_v47, %v1690_v21  ;;  %v1557_v17 = vmul.f32 %v3259_v9, %v3695_v54  ;;  %v3700_v35 = vadd.f32 %v3365_v53, %v1112_v32 }
 0x1a3   :  { %v1628_v2 = vadd.f32 %v3273_v16, %v1557_v17  ;;  %v1558_v29 = vmul.f32 %v3259_v9, %v3700_v35  ;;  %2589 = vmatprep.mubr.msk.bf16.mxu1 %vm841_vm0, %v1738_v41 }
 0x1a4   :  { %v1116_v45 = vpop.f32.mrb[72].mxu0 }
 0x1a5   :  { %v1629_v38 = vadd.f32 %v3273_v16, %v1558_v29  ;;  %v1117_v53 = vadd.f32 %v1116_v45, %v225_v7  ;;  %v1118_v1 = vpop.f32.mrb[73].mxu0  ;;  %v1692_v24 = vmax.f32 %v1628_v2, 0.0  ;;  %v227_v7 = vld [vmem:[%s4126_s2 + $0x130] sm:$0xff]  ;;  %v228_v45 = vld [vmem:[%s4126_s2 + $0x138] sm:$0xff] }
 0x1a6   :  { %v1119_v5 = vpop.f32.mrb[74].mxu0 }
 0x1a7   :  { %v1693_v10 = vmax.f32 %v1629_v38, 0.0  ;;  %v1120_v21 = vadd.f32 %v1119_v5, %v226_v39  ;;  %v3714_v47 = vadd.f32 %v3393_v27, %v1117_v53  ;;  %v1121_v32 = vpop.f32.mrb[75].mxu0 }
 0x1a9   :  { %v1559_v48 = vmul.f32 %v3259_v9, %v3714_v47  ;;  %v3719_v41 = vadd.f32 %v3400_v43, %v1120_v21  ;;  %v1739_v17 = vpack.c.bf16 %v1693_v10, %v1692_v24 }
 0x1ab   :  { %v1630_v29 = vadd.f32 %v3273_v16, %v1559_v48  ;;  %v1560_v2 = vmul.f32 %v3259_v9, %v3719_v41  ;;  %2590 = vmatmul.mubr.msk.bf16.gmra.mrb[96].mxu1 %vm841_vm0, %v1739_v17 }
 0x1ac   :  { %v1124_v27 = vpop.f32.mrb[76].mxu0 }
 0x1ad   :  { %v1631_v43 = vadd.f32 %v3273_v16, %v1560_v2  ;;  %v1125_v39 = vadd.f32 %v1124_v27, %v227_v7  ;;  %v1126_v38 = vpop.f32.mrb[77].mxu0  ;;  %v1694_v1 = vmax.f32 %v1630_v29, 0.0  ;;  %v229_v7 = vld [vmem:[%s4126_s2 + $0x140] sm:$0xff]  ;;  %v230_v27 = vld [vmem:[%s4126_s2 + $0x148] sm:$0xff] }
 0x1ae   :  { %v1127_v53 = vpop.f32.mrb[78].mxu0 }
 0x1af   :  { %v1695_v5 = vmax.f32 %v1631_v43, 0.0  ;;  %v3733_v24 = vadd.f32 %v3387_v44, %v1125_v39  ;;  %v1128_v10 = vadd.f32 %v1127_v53, %v228_v45  ;;  %v1129_v21 = vpop.f32.mrb[79].mxu0 }
 0x1b1   :  { %v1740_v32 = vpack.c.bf16 %v1695_v5, %v1694_v1  ;;  %v1561_v48 = vmul.f32 %v3259_v9, %v3733_v24  ;;  %v3738_v17 = vadd.f32 %v3395_v28, %v1128_v10 }
 0x1b3   :  { %v1632_v2 = vadd.f32 %v3273_v16, %v1561_v48  ;;  %v1562_v29 = vmul.f32 %v3259_v9, %v3738_v17  ;;  %2593 = vmatprep.mubr.msk.bf16.mxu1 %vm841_vm0, %v1740_v32 }
 0x1b4   :  { %v1132_v44 = vpop.f32.mrb[80].mxu0 }
 0x1b5   :  { %v1633_v45 = vadd.f32 %v3273_v16, %v1562_v29  ;;  %v1133_v28 = vadd.f32 %v1132_v44, %v229_v7  ;;  %v1134_v43 = vpop.f32.mrb[81].mxu0  ;;  %v1696_v38 = vmax.f32 %v1632_v2, 0.0  ;;  %v231_v7 = vld [vmem:[%s4126_s2 + $0x150] sm:$0xff]  ;;  %v232_v44 = vld [vmem:[%s4126_s2 + $0x158] sm:$0xff] }
 0x1b6   :  { %v1135_v39 = vpop.f32.mrb[82].mxu0 }
 0x1b7   :  { %v1697_v53 = vmax.f32 %v1633_v45, 0.0  ;;  %v1136_v1 = vadd.f32 %v1135_v39, %v230_v27  ;;  %v3752_v5 = vadd.f32 %v3420_v14, %v1133_v28  ;;  %v1137_v10 = vpop.f32.mrb[83].mxu0 }
 0x1b9   :  { %v1563_v21 = vmul.f32 %v3259_v9, %v3752_v5  ;;  %v3757_v32 = vadd.f32 %v3427_v31, %v1136_v1  ;;  %v1741_v48 = vpack.c.bf16 %v1697_v53, %v1696_v38 }
 0x1bb   :  { %v1634_v29 = vadd.f32 %v3273_v16, %v1563_v21  ;;  %v1564_v2 = vmul.f32 %v3259_v9, %v3757_v32  ;;  %2594 = vmatmul.mubr.msk.bf16.gmra.mrb[100].mxu1 %vm841_vm0, %v1741_v48 }
 0x1bc   :  { %v1140_v14 = vpop.f32.mrb[84].mxu0 }
 0x1bd   :  { %v1635_v31 = vadd.f32 %v3273_v16, %v1564_v2  ;;  %v1141_v27 = vadd.f32 %v1140_v14, %v231_v7  ;;  %v1142_v45 = vpop.f32.mrb[85].mxu0  ;;  %v1698_v43 = vmax.f32 %v1634_v29, 0.0  ;;  %v233_v7 = vld [vmem:[%s4126_s2 + $0x160] sm:$0xff]  ;;  %v234_v14 = vld [vmem:[%s4126_s2 + $0x168] sm:$0xff] }
 0x1be   :  { %v1143_v28 = vpop.f32.mrb[86].mxu0 }
 0x1bf   :  { %v1699_v39 = vmax.f32 %v1635_v31, 0.0  ;;  %v3771_v38 = vadd.f32 %v3417_v51, %v1141_v27  ;;  %v1144_v53 = vadd.f32 %v1143_v28, %v232_v44  ;;  %v1145_v1 = vpop.f32.mrb[87].mxu0 }
 0x1c1   :  { %v1742_v10 = vpack.c.bf16 %v1699_v39, %v1698_v43  ;;  %v1565_v21 = vmul.f32 %v3259_v9, %v3771_v38  ;;  %v3776_v48 = vadd.f32 %v3422_v20, %v1144_v53 }
 0x1c3   :  { %v1636_v2 = vadd.f32 %v3273_v16, %v1565_v21  ;;  %v1566_v29 = vmul.f32 %v3259_v9, %v3776_v48  ;;  %2597 = vmatprep.mubr.msk.bf16.mxu1 %vm841_vm0, %v1742_v10 }
 0x1c4   :  { %v1148_v51 = vpop.f32.mrb[88].mxu0 }
 0x1c5   :  { %v1637_v44 = vadd.f32 %v3273_v16, %v1566_v29  ;;  %v1149_v20 = vadd.f32 %v1148_v51, %v233_v7  ;;  %v1150_v31 = vpop.f32.mrb[89].mxu0  ;;  %v1700_v45 = vmax.f32 %v1636_v2, 0.0  ;;  %v235_v7 = vld [vmem:[%s4126_s2 + $0x170] sm:$0xff]  ;;  %v236_v51 = vld [vmem:[%s4126_s2 + $0x178] sm:$0xff] }
 0x1c6   :  { %v1151_v27 = vpop.f32.mrb[90].mxu0 }
 0x1c7   :  { %v1701_v28 = vmax.f32 %v1637_v44, 0.0  ;;  %v1152_v43 = vadd.f32 %v1151_v27, %v234_v14  ;;  %v3790_v39 = vadd.f32 %v3447_v12, %v1149_v20  ;;  %v1153_v53 = vpop.f32.mrb[91].mxu0 }
 0x1c9   :  { %v1567_v1 = vmul.f32 %v3259_v9, %v3790_v39  ;;  %v3795_v10 = vadd.f32 %v3454_v37, %v1152_v43  ;;  %v1743_v21 = vpack.c.bf16 %v1701_v28, %v1700_v45 }
 0x1cb   :  { %v1638_v29 = vadd.f32 %v3273_v16, %v1567_v1  ;;  %v1568_v2 = vmul.f32 %v3259_v9, %v3795_v10  ;;  %2598 = vmatmul.mubr.msk.bf16.gmra.mrb[104].mxu1 %vm841_vm0, %v1743_v21 }
 0x1cc   :  { %v1156_v12 = vpop.f32.mrb[92].mxu0 }
 0x1cd   :  { %v1639_v37 = vadd.f32 %v3273_v16, %v1568_v2  ;;  %v1157_v14 = vadd.f32 %v1156_v12, %v235_v7  ;;  %v1158_v44 = vpop.f32.mrb[93].mxu0  ;;  %v1702_v31 = vmax.f32 %v1638_v29, 0.0  ;;  %v237_v7 = vld [vmem:[%s4126_s2 + $0x180] sm:$0xff]  ;;  %v238_v12 = vld [vmem:[%s4126_s2 + $0x188] sm:$0xff] }
 0x1ce   :  { %v1159_v20 = vpop.f32.mrb[94].mxu0 }
 0x1cf   :  { %v1703_v27 = vmax.f32 %v1639_v37, 0.0  ;;  %v3809_v45 = vadd.f32 %v3445_v8, %v1157_v14  ;;  %v1160_v28 = vadd.f32 %v1159_v20, %v236_v51  ;;  %v1161_v43 = vpop.f32.mrb[95].mxu0 }
 0x1d1   :  { %v1744_v53 = vpack.c.bf16 %v1703_v27, %v1702_v31  ;;  %v1569_v1 = vmul.f32 %v3259_v9, %v3809_v45  ;;  %v3814_v21 = vadd.f32 %v3452_v33, %v1160_v28 }
 0x1d3   :  { %v1640_v2 = vadd.f32 %v3273_v16, %v1569_v1  ;;  %v1570_v29 = vmul.f32 %v3259_v9, %v3814_v21  ;;  %2601 = vmatprep.mubr.msk.bf16.mxu1 %vm841_vm0, %v1744_v53 }
 0x1d4   :  { %v1164_v8 = vpop.f32.mrb[96].mxu0 }
 0x1d5   :  { %v1641_v51 = vadd.f32 %v3273_v16, %v1570_v29  ;;  %v1165_v33 = vadd.f32 %v1164_v8, %v237_v7  ;;  %v1166_v37 = vpop.f32.mrb[97].mxu0  ;;  %v1704_v44 = vmax.f32 %v1640_v2, 0.0  ;;  %v239_v7 = vld [vmem:[%s4126_s2 + $0x190] sm:$0xff]  ;;  %v240_v8 = vld [vmem:[%s4126_s2 + $0x198] sm:$0xff] }
 0x1d6   :  { %v1167_v14 = vpop.f32.mrb[98].mxu0 }
 0x1d7   :  { %v1705_v20 = vmax.f32 %v1641_v51, 0.0  ;;  %v1168_v31 = vadd.f32 %v1167_v14, %v238_v12  ;;  %v3828_v27 = vadd.f32 %v3493_v40, %v1165_v33  ;;  %v1169_v28 = vpop.f32.mrb[99].mxu0 }
 0x1d8   :  { %v3852_v28 = vld [vmem:[%s4127_s3] ss:$0 sm:$0xff] }
 0x1d9   :  { %v1571_v43 = vmul.f32 %v3259_v9, %v3828_v27  ;;  %v3833_v53 = vadd.f32 %v3500_v34, %v1168_v31  ;;  %v1745_v1 = vpack.c.bf16 %v1705_v20, %v1704_v44 }
 0x1db   :  { %v1642_v29 = vadd.f32 %v3273_v16, %v1571_v43  ;;  %v1572_v2 = vmul.f32 %v3259_v9, %v3833_v53  ;;  %2602 = vmatmul.mubr.msk.bf16.gmra.mrb[108].mxu1 %vm841_vm0, %v1745_v1 }
 0x1dc   :  { %v1172_v40 = vpop.f32.mrb[100].mxu0 }
 0x1dd   :  { %v1643_v34 = vadd.f32 %v3273_v16, %v1572_v2  ;;  %v1173_v12 = vadd.f32 %v1172_v40, %v239_v7  ;;  %v1174_v51 = vpop.f32.mrb[101].mxu0  ;;  %v1706_v37 = vmax.f32 %v1642_v29, 0.0  ;;  %v241_v7 = vld [vmem:[%s4126_s2 + $0x1a0] sm:$0xff]  ;;  %v242_v40 = vld [vmem:[%s4126_s2 + $0x1a8] sm:$0xff] }
 0x1de   :  { %v1175_v33 = vpop.f32.mrb[102].mxu0 }
 0x1df   :  { %v1707_v14 = vmax.f32 %v1643_v34, 0.0  ;;  %v3847_v44 = vadd.f32 %v3491_v57, %v1173_v12  ;;  %v1176_v20 = vadd.f32 %v1175_v33, %v240_v8  ;;  %v1177_v31 = vpop.f32.mrb[103].mxu0 }
 0x1e1   :  { %v1746_v9 = vpack.c.bf16 %v1707_v14, %v1706_v37  ;;  %v1573_v43 = vmul.f32 %v3852_v28, %v3847_v44  ;;  %v3857_v1 = vadd.f32 %v3498_v0, %v1176_v20  ;;  %v3872_v0 = vld [vmem:[%s4128_s4] ss:$0 sm:$0xff] }
 0x1e3   :  { %v1644_v57 = vadd.f32 %v3273_v16, %v1573_v43  ;;  %v1574_v29 = vmul.f32 %v3852_v28, %v3857_v1  ;;  %2605 = vmatprep.mubr.msk.bf16.mxu1 %vm841_vm0, %v1746_v9 }
 0x1e4   :  { %v1180_v2 = vpop.f32.mrb[104].mxu0 }
 0x1e5   :  { %v1645_v8 = vadd.f32 %v3872_v0, %v1574_v29  ;;  %v1181_v34 = vadd.f32 %v1180_v2, %v241_v7  ;;  %v1182_v12 = vpop.f32.mrb[105].mxu0  ;;  %v1708_v51 = vmax.f32 %v1644_v57, 0.0  ;;  %v243_v7 = vld [vmem:[%s4126_s2 + $0x1b0] sm:$0xff]  ;;  %v244_v2 = vld [vmem:[%s4126_s2 + $0x1b8] sm:$0xff] }
 0x1e6   :  { %v1183_v16 = vpop.f32.mrb[106].mxu0 }
 0x1e7   :  { %v1709_v33 = vmax.f32 %v1645_v8, 0.0  ;;  %v1184_v37 = vadd.f32 %v1183_v16, %v242_v40  ;;  %v3876_v14 = vadd.f32 %v3539_v4, %v1181_v34  ;;  %v1185_v20 = vpop.f32.mrb[107].mxu0 }
 0x1e9   :  { %v1575_v31 = vmul.f32 %v3852_v28, %v3876_v14  ;;  %v3881_v9 = vadd.f32 %v3546_v30, %v1184_v37  ;;  %v1747_v43 = vpack.c.bf16 %v1709_v33, %v1708_v51 }
 0x1eb   :  { %4172 = vst [vmem:[#allocation24_spill] sm:$0xff] %v3881_v9  ;;  %v1646_v29 = vadd.f32 %v3872_v0, %v1575_v31  ;;  %v1576_v57 = vmul.f32 %v3852_v28, %v3881_v9  ;;  %2606 = vmatmul.mubr.msk.bf16.gmra.mrb[112].mxu1 %vm841_vm0, %v1747_v43 }
 0x1ec   :  { %v1188_v4 = vpop.f32.mrb[108].mxu0 }
 0x1ed   :  { %v1647_v30 = vadd.f32 %v3872_v0, %v1576_v57  ;;  %v1189_v40 = vadd.f32 %v1188_v4, %v243_v7  ;;  %v1190_v8 = vpop.f32.mrb[109].mxu0  ;;  %v1710_v12 = vmax.f32 %v1646_v29, 0.0  ;;  %v245_v7 = vld [vmem:[%s4126_s2 + $0x1c0] sm:$0xff]  ;;  %v246_v4 = vld [vmem:[%s4126_s2 + $0x1c8] sm:$0xff] }
 0x1ee   :  { %v1191_v34 = vpop.f32.mrb[110].mxu0 }
 0x1ef   :  { %v1711_v16 = vmax.f32 %v1647_v30, 0.0  ;;  %v3895_v51 = vadd.f32 %v3537_v63, %v1189_v40  ;;  %v1192_v33 = vadd.f32 %v1191_v34, %v244_v2  ;;  %v1193_v37 = vpop.f32.mrb[111].mxu0 }
 0x1f1   :  { %v1748_v20 = vpack.c.bf16 %v1711_v16, %v1710_v12  ;;  %v1577_v31 = vmul.f32 %v3852_v28, %v3895_v51  ;;  %v3900_v43 = vadd.f32 %v3544_v52, %v1192_v33 }
 0x1f3   :  { %v1648_v57 = vadd.f32 %v3872_v0, %v1577_v31  ;;  %v1578_v29 = vmul.f32 %v3852_v28, %v3900_v43  ;;  %2609 = vmatprep.mubr.msk.bf16.mxu1 %vm841_vm0, %v1748_v20 }
 0x1f4   :  { %v1196_v63 = vpop.f32.mrb[112].mxu0 }
 0x1f5   :  { %v1649_v2 = vadd.f32 %v3872_v0, %v1578_v29  ;;  %v1197_v52 = vadd.f32 %v1196_v63, %v245_v7  ;;  %v1198_v30 = vpop.f32.mrb[113].mxu0  ;;  %v1712_v8 = vmax.f32 %v1648_v57, 0.0  ;;  %v247_v7 = vld [vmem:[%s4126_s2 + $0x1d0] sm:$0xff]  ;;  %v248_v63 = vld [vmem:[%s4126_s2 + $0x1d8] sm:$0xff] }
 0x1f6   :  { %v1199_v40 = vpop.f32.mrb[114].mxu0 }
 0x1f7   :  { %v1713_v34 = vmax.f32 %v1649_v2, 0.0  ;;  %v1200_v12 = vadd.f32 %v1199_v40, %v246_v4  ;;  %v3914_v16 = vadd.f32 %v3585_v50, %v1197_v52  ;;  %v1201_v33 = vpop.f32.mrb[115].mxu0 }
 0x1f9   :  { %4173 = vst [vmem:[#allocation25_spill] sm:$0xff] %v3914_v16  ;;  %v1579_v37 = vmul.f32 %v3852_v28, %v3914_v16  ;;  %v3919_v20 = vadd.f32 %v3592_v46, %v1200_v12  ;;  %v1749_v31 = vpack.c.bf16 %v1713_v34, %v1712_v8 }
 0x1fb   :  { %4174 = vst [vmem:[#allocation26_spill] sm:$0xff] %v3919_v20  ;;  %v1650_v29 = vadd.f32 %v3872_v0, %v1579_v37  ;;  %v1580_v57 = vmul.f32 %v3852_v28, %v3919_v20  ;;  %2610 = vmatmul.mubr.msk.bf16.gmra.mrb[116].mxu1 %vm841_vm0, %v1749_v31 }
 0x1fc   :  { %v1204_v50 = vpop.f32.mrb[116].mxu0 }
 0x1fd   :  { %v1651_v46 = vadd.f32 %v3872_v0, %v1580_v57  ;;  %v1205_v4 = vadd.f32 %v1204_v50, %v247_v7  ;;  %v1206_v2 = vpop.f32.mrb[117].mxu0  ;;  %v1714_v52 = vmax.f32 %v1650_v29, 0.0 }
 0x1fe   :  { %v1207_v30 = vpop.f32.mrb[118].mxu0  ;;  %v2559_v40 = vpop.f32.mrb[64].mxu1 }
 0x1ff   :  { %v1715_v8 = vmax.f32 %v1651_v46, 0.0  ;;  %v3933_v34 = vadd.f32 %v3583_v15, %v1205_v4  ;;  %v1208_v12 = vadd.f32 %v1207_v30, %v248_v63  ;;  %v1909_v33 = vadd.f32 %v2559_v40, %v3302_v36  ;;  %v1209_v37 = vpop.f32.mrb[119].mxu0  ;;  %v1900_v31 = vpop.f32.mrb[65].mxu1 }
 0x200   :  { %v1901_v20 = vadd.f32 %v1900_v31, %v3266_v13  ;;  %v2560_v16 = vpop.f32.mrb[66].mxu1  ;;  %v249_v13 = vld [vmem:[%s4126_s2 + $0x1e0] sm:$0xff] }
 0x201   :  { %v1750_v9 = vpack.c.bf16 %v1715_v8, %v1714_v52  ;;  %v1581_v7 = vmul.f32 %v3852_v28, %v3933_v34  ;;  %v3940_v29 = vadd.f32 %v3590_v58, %v1208_v12  ;;  %2157 = vst.msk [vmem:[#allocation2 + $0x10] sm:$0xff] %vm841_vm0, %v1909_v33  ;;  %v1912_v15 = vadd.f32 %v2560_v16, %v3309_v49  ;;  %v1903_v57 = vpop.f32.mrb[67].mxu1  ;;  %v251_v33 = vld [vmem:[%s4126_s2 + $0x1f0] sm:$0xff] }
 0x202   :  { %2155 = vst.msk [vmem:[#allocation2] sm:$0xff] %vm841_vm0, %v1901_v20  ;;  %v1904_v36 = vadd.f32 %v1903_v57, %v3277_v18  ;;  %v250_v18 = vld [vmem:[%s4126_s2 + $0x1e8] sm:$0xff] }
 0x203   :  { %v1652_v50 = vadd.f32 %v3872_v0, %v1581_v7  ;;  %v1582_v63 = vmul.f32 %v3852_v28, %v3940_v29  ;;  %2158 = vst.msk [vmem:[#allocation2 + $0x18] sm:$0xff] %vm841_vm0, %v1912_v15  ;;  %2613 = vmatprep.mubr.msk.bf16.mxu1 %vm841_vm0, %v1750_v9  ;;  %v252_v7 = vld [vmem:[%s4126_s2 + $0x1f8] sm:$0xff]  ;;  %s2800_s2 = smov [#allocation2]  }
 0x204   :  { %2156 = vst.msk [vmem:[#allocation2 + $0x8] sm:$0xff] %vm841_vm0, %v1904_v36  ;;  %v1212_v49 = vpop.f32.mrb[120].mxu0  ;;  %s2224_s26 = sshll.u32 %s2800_s2, 4  ;;  %s2225_s26 = int_to_ptr.vmem [resolvable:$true] %s2224_s26 }
 0x205   :  { %v1653_v58 = vadd.f32 %v3872_v0, %v1582_v63  ;;  %v1213_v16 = vadd.f32 %v1212_v49, %v249_v13  ;;  %v1214_v20 = vpop.f32.mrb[121].mxu0  ;;  %v1716_v4 = vmax.f32 %v1652_v50, 0.0  ;;  %s2775_s27 = scalar_lea.vmem %s2225_s26, 8192  ;;  %p2780_p1 = scmp.lt.s32.totalorder %s2225_s26, %s2225_s26 }
 0x206   :  { %v1215_v46 = vpop.f32.mrb[122].mxu0  ;;  %p2776_p0 = scmp.ne.s32.totalorder %s2225_s26, %s2775_s27  ;;  %p2781_p2 = scmp.lt.s32.totalorder %s2775_s27, %s2775_s27 }
 0x207   :  { %v1717_v2 = vmax.f32 %v1653_v58, 0.0  ;;  %v3960_v52 = vadd.f32 %v3608_v11, %v1213_v16  ;;  %v1216_v30 = vadd.f32 %v1215_v46, %v250_v18  ;;  %v1217_v40 = vpop.f32.mrb[123].mxu0 }
 0x208   :  { %p2782_p3 = por %p2781_p2, %p2780_p1 }
 0x209   :  { %v1583_v9 = vmul.f32 %v3852_v28, %v3960_v52  ;;  %v3965_v8 = vadd.f32 %v3616_v42, %v1216_v30  ;;  %v1751_v12 = vpack.c.bf16 %v1717_v2, %v1716_v4 }
 0x20a   :  { %p2783_p4 = pnand %p2782_p3, %p2776_p0 }
 0x20b   :  { %v1654_v37 = vadd.f32 %v3872_v0, %v1583_v9  ;;  %v1584_v31 = vmul.f32 %v3852_v28, %v3965_v8  ;;  %2614 = vmatmul.mubr.msk.bf16.gmra.mrb[120].mxu1 %vm841_vm0, %v1751_v12 }
 0x20c   :  { %v1220_v11 = vpop.f32.mrb[124].mxu0 }
 0x20d   :  { %v1655_v42 = vadd.f32 %v3872_v0, %v1584_v31  ;;  %v1221_v15 = vadd.f32 %v1220_v11, %v251_v33  ;;  %v1222_v57 = vpop.f32.mrb[125].mxu0  ;;  %v1718_v36 = vmax.f32 %v1654_v37, 0.0 }
 0x20e   :  { %v1223_v13 = vpop.f32.mrb[126].mxu0  ;;  %v2563_v50 = vpop.f32.mrb[68].mxu1  ;;  %v4177_v57 = vld [vmem:[#allocation6_spill] sm:$0xff] }
 0x20f   :  { %v1719_v63 = vmax.f32 %v1655_v42, 0.0  ;;  %v3979_v49 = vadd.f32 %v3602_v61, %v1221_v15  ;;  %v1224_v18 = vadd.f32 %v1223_v13, %v252_v7  ;;  %v1925_v58 = vadd.f32 %v2563_v50, %v3368_v59  ;;  %v1225_v16 = vpop.f32.mrb[127].mxu0  ;;  %v1916_v20 = vpop.f32.mrb[69].mxu1  ;;  %v4175_v59 = vld [vmem:[#allocation5_spill] sm:$0xff]  ;;  %v4176_v7 = vld [vmem:[#allocation8_spill] sm:$0xff] }
 0x210   :  { %v1917_v46 = vadd.f32 %v1916_v20, %v3335_v19  ;;  %v2564_v4 = vpop.f32.mrb[70].mxu1  ;;  %v4178_v13 = vld [vmem:[#allocation9_spill] sm:$0xff]  ;;  %v4180_v16 = vld [vmem:[#allocation12_spill] sm:$0xff] }
 0x211   :  { %v1585_v2 = vmul.f32 %v3852_v28, %v3979_v49  ;;  %v3986_v30 = vadd.f32 %v3613_v56, %v1224_v18  ;;  %2161 = vst.msk [vmem:[#allocation2 + $0x30] sm:$0xff] %vm841_vm0, %v1925_v58  ;;  %v1928_v40 = vadd.f32 %v2564_v4, %v3375_v6  ;;  %v1919_v61 = vpop.f32.mrb[71].mxu1  ;;  %v1752_v9 = vpack.c.bf16 %v1719_v63, %v1718_v36  ;;  %v4181_v4 = vld [vmem:[#allocation10_spill] sm:$0xff] }
 0x212   :  { %2159 = vst.msk [vmem:[#allocation2 + $0x20] sm:$0xff] %vm841_vm0, %v1917_v46  ;;  %v1920_v12 = vadd.f32 %v1919_v61, %v4175_v59  ;;  %v4182_v61 = vld [vmem:[#allocation13_spill] sm:$0xff] }
 0x213   :  { %v1656_v33 = vadd.f32 %v3872_v0, %v1585_v2  ;;  %v1586_v19 = vmul.f32 %v3852_v28, %v3986_v30  ;;  %2162 = vst.msk [vmem:[#allocation2 + $0x38] sm:$0xff] %vm841_vm0, %v1928_v40  ;;  %2617 = vmatprep.mubr.msk.bf16.mxu1 %vm841_vm0, %v1752_v9 }
 0x214   :  { %2160 = vst.msk [vmem:[#allocation2 + $0x28] sm:$0xff] %vm841_vm0, %v1920_v12  ;;  %v4183_v12 = vld [vmem:[#allocation11_spill] sm:$0xff] }
 0x215   :  { %v1657_v56 = vadd.f32 %v3872_v0, %v1586_v19  ;;  %v1720_v6 = vmax.f32 %v1656_v33, 0.0  ;;  %v4179_v0 = vld [vmem:[#allocation7_spill] sm:$0xff] }
 0x217   :  { %v1721_v37 = vmax.f32 %v1657_v56, 0.0  ;;  %v4184_v56 = vld [vmem:[#allocation16_spill] sm:$0xff] }
 0x219   :  { %v1753_v31 = vpack.c.bf16 %v1721_v37, %v1720_v6 }
 0x21b   :  { %2618 = vmatmul.mubr.msk.bf16.gmra.mrb[124].mxu1 %vm841_vm0, %v1753_v31  ;;  %v4185_v31 = vld [vmem:[#allocation14_spill] sm:$0xff] }
 0x21e   :  { %v2567_v11 = vpop.f32.mrb[72].mxu1 }
 0x21f   :  { %v1941_v42 = vadd.f32 %v2567_v11, %v4176_v7  ;;  %v1932_v15 = vpop.f32.mrb[73].mxu1 }
 0x220   :  { %v1933_v36 = vadd.f32 %v1932_v15, %v4177_v57  ;;  %v2568_v28 = vpop.f32.mrb[74].mxu1 }
 0x221   :  { %2165 = vst.msk [vmem:[#allocation2 + $0x50] sm:$0xff] %vm841_vm0, %v1941_v42  ;;  %v1944_v50 = vadd.f32 %v2568_v28, %v4178_v13  ;;  %v1935_v63 = vpop.f32.mrb[75].mxu1  ;;  %v4186_v42 = vld [vmem:[#allocation17_spill] sm:$0xff] }
 0x222   :  { %2163 = vst.msk [vmem:[#allocation2 + $0x40] sm:$0xff] %vm841_vm0, %v1933_v36  ;;  %v1936_v18 = vadd.f32 %v1935_v63, %v4179_v0  ;;  %v4187_v36 = vld [vmem:[#allocation15_spill] sm:$0xff] }
 0x223   :  { %2166 = vst.msk [vmem:[#allocation2 + $0x58] sm:$0xff] %vm841_vm0, %v1944_v50  ;;  %v4188_v50 = vld [vmem:[#allocation20_spill] sm:$0xff] }
 0x224   :  { %2164 = vst.msk [vmem:[#allocation2 + $0x48] sm:$0xff] %vm841_vm0, %v1936_v18  ;;  %v4189_v18 = vld [vmem:[#allocation18_spill] sm:$0xff] }
 0x22e   :  { %v2571_v58 = vpop.f32.mrb[76].mxu1 }
 0x22f   :  { %v1957_v20 = vadd.f32 %v2571_v58, %v4180_v16  ;;  %v1948_v46 = vpop.f32.mrb[77].mxu1 }
 0x230   :  { %v1949_v2 = vadd.f32 %v1948_v46, %v4181_v4  ;;  %v2572_v40 = vpop.f32.mrb[78].mxu1 }
 0x231   :  { %2169 = vst.msk [vmem:[#allocation2 + $0x70] sm:$0xff] %vm841_vm0, %v1957_v20  ;;  %v1960_v9 = vadd.f32 %v2572_v40, %v4182_v61  ;;  %v1951_v59 = vpop.f32.mrb[79].mxu1  ;;  %v4190_v20 = vld [vmem:[#allocation21_spill] sm:$0xff] }
 0x232   :  { %2167 = vst.msk [vmem:[#allocation2 + $0x60] sm:$0xff] %vm841_vm0, %v1949_v2  ;;  %v1952_v33 = vadd.f32 %v1951_v59, %v4183_v12  ;;  %v4191_v2 = vld [vmem:[#allocation19_spill] sm:$0xff]  ;;  %v4192_v12 = vld [vmem:[#allocation22_spill] sm:$0xff] }
 0x233   :  { %2170 = vst.msk [vmem:[#allocation2 + $0x78] sm:$0xff] %vm841_vm0, %v1960_v9 }
 0x234   :  { %2168 = vst.msk [vmem:[#allocation2 + $0x68] sm:$0xff] %vm841_vm0, %v1952_v33 }
 0x23e   :  { %v2575_v19 = vpop.f32.mrb[80].mxu1 }
 0x23f   :  { %v1973_v6 = vadd.f32 %v2575_v19, %v4184_v56  ;;  %v1964_v37 = vpop.f32.mrb[81].mxu1 }
 0x240   :  { %v1965_v11 = vadd.f32 %v1964_v37, %v4185_v31  ;;  %v2576_v7 = vpop.f32.mrb[82].mxu1  ;;  %v4193_v37 = vld [vmem:[#allocation23_spill] sm:$0xff] }
 0x241   :  { %2173 = vst.msk [vmem:[#allocation2 + $0x90] sm:$0xff] %vm841_vm0, %v1973_v6  ;;  %v1976_v15 = vadd.f32 %v2576_v7, %v4186_v42  ;;  %v1967_v57 = vpop.f32.mrb[83].mxu1 }
 0x242   :  { %2171 = vst.msk [vmem:[#allocation2 + $0x80] sm:$0xff] %vm841_vm0, %v1965_v11  ;;  %v1968_v28 = vadd.f32 %v1967_v57, %v4187_v36 }
 0x243   :  { %2174 = vst.msk [vmem:[#allocation2 + $0x98] sm:$0xff] %vm841_vm0, %v1976_v15 }
 0x244   :  { %2172 = vst.msk [vmem:[#allocation2 + $0x88] sm:$0xff] %vm841_vm0, %v1968_v28 }
 0x24e   :  { %v2579_v13 = vpop.f32.mrb[84].mxu1 }
 0x24f   :  { %v1989_v63 = vadd.f32 %v2579_v13, %v4188_v50  ;;  %v1980_v0 = vpop.f32.mrb[85].mxu1 }
 0x250   :  { %v1981_v58 = vadd.f32 %v1980_v0, %v4189_v18  ;;  %v2580_v16 = vpop.f32.mrb[86].mxu1 }
 0x251   :  { %2177 = vst.msk [vmem:[#allocation2 + $0xb0] sm:$0xff] %vm841_vm0, %v1989_v63  ;;  %v1992_v46 = vadd.f32 %v2580_v16, %v4190_v20  ;;  %v1983_v4 = vpop.f32.mrb[87].mxu1 }
 0x252   :  { %2175 = vst.msk [vmem:[#allocation2 + $0xa0] sm:$0xff] %vm841_vm0, %v1981_v58  ;;  %v1984_v40 = vadd.f32 %v1983_v4, %v4191_v2 }
 0x253   :  { %2178 = vst.msk [vmem:[#allocation2 + $0xb8] sm:$0xff] %vm841_vm0, %v1992_v46 }
 0x254   :  { %2176 = vst.msk [vmem:[#allocation2 + $0xa8] sm:$0xff] %vm841_vm0, %v1984_v40 }
 0x25e   :  { %v2583_v61 = vpop.f32.mrb[88].mxu1 }
 0x25f   :  { %v2005_v9 = vadd.f32 %v2583_v61, %v3619_v3  ;;  %v1996_v59 = vpop.f32.mrb[89].mxu1 }
 0x260   :  { %v1997_v33 = vadd.f32 %v1996_v59, %v4192_v12  ;;  %v2584_v19 = vpop.f32.mrb[90].mxu1 }
 0x261   :  { %2181 = vst.msk [vmem:[#allocation2 + $0xd0] sm:$0xff] %vm841_vm0, %v2005_v9  ;;  %v2008_v56 = vadd.f32 %v2584_v19, %v3624_v25  ;;  %v1999_v6 = vpop.f32.mrb[91].mxu1 }
 0x262   :  { %2179 = vst.msk [vmem:[#allocation2 + $0xc0] sm:$0xff] %vm841_vm0, %v1997_v33  ;;  %v2000_v31 = vadd.f32 %v1999_v6, %v4193_v37 }
 0x263   :  { %2182 = vst.msk [vmem:[#allocation2 + $0xd8] sm:$0xff] %vm841_vm0, %v2008_v56 }
 0x264   :  { %2180 = vst.msk [vmem:[#allocation2 + $0xc8] sm:$0xff] %vm841_vm0, %v2000_v31 }
 0x26e   :  { %v2587_v11 = vpop.f32.mrb[92].mxu1 }
 0x26f   :  { %v2021_v3 = vadd.f32 %v2587_v11, %v3657_v62  ;;  %v2012_v7 = vpop.f32.mrb[93].mxu1 }
 0x270   :  { %v2013_v42 = vadd.f32 %v2012_v7, %v3638_v26  ;;  %v2588_v15 = vpop.f32.mrb[94].mxu1 }
 0x271   :  { %2185 = vst.msk [vmem:[#allocation2 + $0xf0] sm:$0xff] %vm841_vm0, %v2021_v3  ;;  %v2024_v25 = vadd.f32 %v2588_v15, %v3662_v60  ;;  %v2015_v57 = vpop.f32.mrb[95].mxu1  ;;  %v4194_v3 = vld [vmem:[#allocation24_spill] sm:$0xff]  ;;  %v4195_v15 = vld [vmem:[#allocation25_spill] sm:$0xff] }
 0x272   :  { %2183 = vst.msk [vmem:[#allocation2 + $0xe0] sm:$0xff] %vm841_vm0, %v2013_v42  ;;  %v2016_v36 = vadd.f32 %v2015_v57, %v3643_v23 }
 0x273   :  { %2186 = vst.msk [vmem:[#allocation2 + $0xf8] sm:$0xff] %vm841_vm0, %v2024_v25 }
 0x274   :  { %2184 = vst.msk [vmem:[#allocation2 + $0xe8] sm:$0xff] %vm841_vm0, %v2016_v36  ;;  %v4196_v36 = vld [vmem:[#allocation26_spill] sm:$0xff] }
 0x27e   :  { %v2591_v28 = vpop.f32.mrb[96].mxu1 }
 0x27f   :  { %v2037_v62 = vadd.f32 %v2591_v28, %v3695_v54  ;;  %v2028_v13 = vpop.f32.mrb[97].mxu1 }
 0x280   :  { %v2029_v26 = vadd.f32 %v2028_v13, %v3676_v55  ;;  %v2592_v50 = vpop.f32.mrb[98].mxu1 }
 0x281   :  { %2189 = vst.msk [vmem:[#allocation2 + $0x110] sm:$0xff] %vm841_vm0, %v2037_v62  ;;  %v2040_v60 = vadd.f32 %v2592_v50, %v3700_v35  ;;  %v2031_v63 = vpop.f32.mrb[99].mxu1 }
 0x282   :  { %2187 = vst.msk [vmem:[#allocation2 + $0x100] sm:$0xff] %vm841_vm0, %v2029_v26  ;;  %v2032_v23 = vadd.f32 %v2031_v63, %v3681_v22 }
 0x283   :  { %2190 = vst.msk [vmem:[#allocation2 + $0x118] sm:$0xff] %vm841_vm0, %v2040_v60 }
 0x284   :  { %2188 = vst.msk [vmem:[#allocation2 + $0x108] sm:$0xff] %vm841_vm0, %v2032_v23 }
 0x28e   :  { %v2595_v0 = vpop.f32.mrb[100].mxu1 }
 0x28f   :  { %v2053_v54 = vadd.f32 %v2595_v0, %v3733_v24  ;;  %v2044_v18 = vpop.f32.mrb[101].mxu1 }
 0x290   :  { %v2045_v55 = vadd.f32 %v2044_v18, %v3714_v47  ;;  %v2596_v58 = vpop.f32.mrb[102].mxu1 }
 0x291   :  { %2193 = vst.msk [vmem:[#allocation2 + $0x130] sm:$0xff] %vm841_vm0, %v2053_v54  ;;  %v2056_v35 = vadd.f32 %v2596_v58, %v3738_v17  ;;  %v2047_v16 = vpop.f32.mrb[103].mxu1 }
 0x292   :  { %2191 = vst.msk [vmem:[#allocation2 + $0x120] sm:$0xff] %vm841_vm0, %v2045_v55  ;;  %v2048_v22 = vadd.f32 %v2047_v16, %v3719_v41 }
 0x293   :  { %2194 = vst.msk [vmem:[#allocation2 + $0x138] sm:$0xff] %vm841_vm0, %v2056_v35 }
 0x294   :  { %2192 = vst.msk [vmem:[#allocation2 + $0x128] sm:$0xff] %vm841_vm0, %v2048_v22 }
 0x29e   :  { %v2599_v20 = vpop.f32.mrb[104].mxu1 }
 0x29f   :  { %v2069_v24 = vadd.f32 %v2599_v20, %v3771_v38  ;;  %v2060_v46 = vpop.f32.mrb[105].mxu1 }
 0x2a0   :  { %v2061_v47 = vadd.f32 %v2060_v46, %v3752_v5  ;;  %v2600_v4 = vpop.f32.mrb[106].mxu1 }
 0x2a1   :  { %2197 = vst.msk [vmem:[#allocation2 + $0x150] sm:$0xff] %vm841_vm0, %v2069_v24  ;;  %v2072_v17 = vadd.f32 %v2600_v4, %v3776_v48  ;;  %v2063_v2 = vpop.f32.mrb[107].mxu1 }
 0x2a2   :  { %2195 = vst.msk [vmem:[#allocation2 + $0x140] sm:$0xff] %vm841_vm0, %v2061_v47  ;;  %v2064_v41 = vadd.f32 %v2063_v2, %v3757_v32 }
 0x2a3   :  { %2198 = vst.msk [vmem:[#allocation2 + $0x158] sm:$0xff] %vm841_vm0, %v2072_v17 }
 0x2a4   :  { %2196 = vst.msk [vmem:[#allocation2 + $0x148] sm:$0xff] %vm841_vm0, %v2064_v41 }
 0x2ae   :  { %v2603_v40 = vpop.f32.mrb[108].mxu1 }
 0x2af   :  { %v2085_v38 = vadd.f32 %v2603_v40, %v3809_v45  ;;  %v2076_v61 = vpop.f32.mrb[109].mxu1 }
 0x2b0   :  { %v2077_v5 = vadd.f32 %v2076_v61, %v3790_v39  ;;  %v2604_v9 = vpop.f32.mrb[110].mxu1 }
 0x2b1   :  { %2201 = vst.msk [vmem:[#allocation2 + $0x170] sm:$0xff] %vm841_vm0, %v2085_v38  ;;  %v2088_v48 = vadd.f32 %v2604_v9, %v3814_v21  ;;  %v2079_v59 = vpop.f32.mrb[111].mxu1 }
 0x2b2   :  { %2199 = vst.msk [vmem:[#allocation2 + $0x160] sm:$0xff] %vm841_vm0, %v2077_v5  ;;  %v2080_v32 = vadd.f32 %v2079_v59, %v3795_v10 }
 0x2b3   :  { %2202 = vst.msk [vmem:[#allocation2 + $0x178] sm:$0xff] %vm841_vm0, %v2088_v48 }
 0x2b4   :  { %2200 = vst.msk [vmem:[#allocation2 + $0x168] sm:$0xff] %vm841_vm0, %v2080_v32 }
 0x2be   :  { %v2607_v12 = vpop.f32.mrb[112].mxu1 }
 0x2bf   :  { %v2101_v45 = vadd.f32 %v2607_v12, %v3847_v44  ;;  %v2092_v33 = vpop.f32.mrb[113].mxu1 }
 0x2c0   :  { %v2093_v39 = vadd.f32 %v2092_v33, %v3828_v27  ;;  %v2608_v19 = vpop.f32.mrb[114].mxu1 }
 0x2c1   :  { %2205 = vst.msk [vmem:[#allocation2 + $0x190] sm:$0xff] %vm841_vm0, %v2101_v45  ;;  %v2104_v21 = vadd.f32 %v2608_v19, %v3857_v1  ;;  %v2095_v56 = vpop.f32.mrb[115].mxu1 }
 0x2c2   :  { %2203 = vst.msk [vmem:[#allocation2 + $0x180] sm:$0xff] %vm841_vm0, %v2093_v39  ;;  %v2096_v10 = vadd.f32 %v2095_v56, %v3833_v53 }
 0x2c3   :  { %2206 = vst.msk [vmem:[#allocation2 + $0x198] sm:$0xff] %vm841_vm0, %v2104_v21 }
 0x2c4   :  { %2204 = vst.msk [vmem:[#allocation2 + $0x188] sm:$0xff] %vm841_vm0, %v2096_v10 }
 0x2ce   :  { %v2611_v6 = vpop.f32.mrb[116].mxu1 }
 0x2cf   :  { %v2117_v44 = vadd.f32 %v2611_v6, %v3895_v51  ;;  %v2108_v37 = vpop.f32.mrb[117].mxu1 }
 0x2d0   :  { %v2109_v27 = vadd.f32 %v2108_v37, %v3876_v14  ;;  %v2612_v31 = vpop.f32.mrb[118].mxu1 }
 0x2d1   :  { %2209 = vst.msk [vmem:[#allocation2 + $0x1b0] sm:$0xff] %vm841_vm0, %v2117_v44  ;;  %v2120_v1 = vadd.f32 %v2612_v31, %v3900_v43  ;;  %v2111_v11 = vpop.f32.mrb[119].mxu1 }
 0x2d2   :  { %2207 = vst.msk [vmem:[#allocation2 + $0x1a0] sm:$0xff] %vm841_vm0, %v2109_v27  ;;  %v2112_v53 = vadd.f32 %v2111_v11, %v4194_v3 }
 0x2d3   :  { %2210 = vst.msk [vmem:[#allocation2 + $0x1b8] sm:$0xff] %vm841_vm0, %v2120_v1 }
 0x2d4   :  { %2208 = vst.msk [vmem:[#allocation2 + $0x1a8] sm:$0xff] %vm841_vm0, %v2112_v53 }
 0x2de   :  { %v2615_v7 = vpop.f32.mrb[120].mxu1 }
 0x2df   :  { %v2133_v51 = vadd.f32 %v2615_v7, %v3933_v34  ;;  %v2124_v42 = vpop.f32.mrb[121].mxu1 }
 0x2e0   :  { %v2125_v14 = vadd.f32 %v2124_v42, %v4195_v15  ;;  %v2616_v25 = vpop.f32.mrb[122].mxu1 }
 0x2e1   :  { %2213 = vst.msk [vmem:[#allocation2 + $0x1d0] sm:$0xff] %vm841_vm0, %v2133_v51  ;;  %v2136_v43 = vadd.f32 %v2616_v25, %v3940_v29  ;;  %v2127_v57 = vpop.f32.mrb[123].mxu1 }
 0x2e2   :  { %2211 = vst.msk [vmem:[#allocation2 + $0x1c0] sm:$0xff] %vm841_vm0, %v2125_v14  ;;  %v2128_v28 = vadd.f32 %v2127_v57, %v4196_v36 }
 0x2e3   :  { %2214 = vst.msk [vmem:[#allocation2 + $0x1d8] sm:$0xff] %vm841_vm0, %v2136_v43 }
 0x2e4   :  { %2212 = vst.msk [vmem:[#allocation2 + $0x1c8] sm:$0xff] %vm841_vm0, %v2128_v28 }
 0x2ee   :  { %v2619_v62 = vpop.f32.mrb[124].mxu1 }
 0x2ef   :  { %v2149_v34 = vadd.f32 %v2619_v62, %v3979_v49  ;;  %v2140_v13 = vpop.f32.mrb[125].mxu1 }
 0x2f0   :  { %v2141_v26 = vadd.f32 %v2140_v13, %v3960_v52  ;;  %v2620_v50 = vpop.f32.mrb[126].mxu1 }
 0x2f1   :  { %2217 = vst.msk [vmem:[#allocation2 + $0x1f0] sm:$0xff] %vm841_vm0, %v2149_v34  ;;  %v2152_v29 = vadd.f32 %v2620_v50, %v3986_v30  ;;  %v2143_v60 = vpop.f32.mrb[127].mxu1 }
 0x2f2   :  { %2215 = vst.msk [vmem:[#allocation2 + $0x1e0] sm:$0xff] %vm841_vm0, %v2141_v26  ;;  %v2144_v63 = vadd.f32 %v2143_v60, %v3965_v8 }
 0x2f3   :  { %2218 = vst.msk [vmem:[#allocation2 + $0x1f8] sm:$0xff] %vm841_vm0, %v2152_v29 }
 0x2f4   :  { %2216 = vst.msk [vmem:[#allocation2 + $0x1e8] sm:$0xff] %vm841_vm0, %v2144_v63 }
 0x2f5   :  { %2786 = shalt.err (!%p2783_p4)
}
 0x2f6   :  { %s2787_s30 = scalar_lea.hbm %s4130_s6, 8192 }
 0x2f7   :  { %p2788_p5 = scmp.ne.s32.totalorder %s4130_s6, %s2787_s30  ;;  %p2791_p6 = scmp.lt.u32.totalorder %s2787_s30, %s4130_s6 }
 0x2f9   :  { %p2793_p7 = pnand %p2791_p6, %p2788_p5 }
 0x2fb   :  { %2796 = shalt.err (!%p2793_p7)
}
 0x2fc   :  { %s2801_s4 = smov 128   ;;  %s2802_s10 = smov 8  }
 0x2fd   :  { %2230 = dma.vmem_to_hbm [thread:$0]  %s2225_s26, 8192, %s4130_s6, [#allocation3], %s2801_s4, %s2801_s4, %s2802_s10  }
 0x2fe   :  { %2797 = dma.done.wait [#allocation3], 8192  }
 0x2ff   :  { %2798 = vsyncadd [#allocation3], 4294959104 }
 0x300   :  { %2234 = vsyncpa [#allocation3], 1 }

</bundles_post_ra>
